<compile_context>
chip_gen: v7x
topology: tpu7x:2x2x1
jax: 0.10.0
libtpu: 0.0.40
codegen_flags: <defaults>
</compile_context>

<pallas_src>
import functools

import jax
import jax.numpy as jnp
import numpy as np
from jax.experimental import pallas as pl
from jax.experimental.pallas import tpu as pltpu

# ----------------------------------------------------------------------------
# Model configuration
# ----------------------------------------------------------------------------
RNN_HIDDEN_DIMS = (32, 16, 8)      # (io, fast, slow)
IMAGE_FEAT_DIM = 24
DECODER_INPUT_DIM = 32
JOINT_DIM = 6
PB_DIMS = (4, 4, 4)                # (io_pb, fast_pb, slow_pb)
TAUS = (2.0, 5.0, 70.0)            # (rnn_io_tau, rnn_fast_tau, rnn_slow_tau)
IMG_SIZE = 16                      # NCHW input: (B, 3, 16, 16)
LANES = 128


# ----------------------------------------------------------------------------
# Pallas kernel: entire AEMTRNNPB forward in a single launch
# ----------------------------------------------------------------------------
def _aemtrnnpb_kernel(
    p1_ref, joint_ref, h_ref, u_ref,                  # activations / state
    s2_ref, sd1_ref, sd2_ref,                         # 0/1 gather matrices
    w1_ref, w2s_ref, wfcs_ref,                        # encoder weights
    wx_ref, wh_ref, wjd_ref, wfd_ref,                 # cell / head weights
    wdfc_ref, wd1s_ref, wd2s_ref,                     # decoder weights
    b1_ref, b128_ref, bdfc_ref, b384_ref,             # biases
    sj_ref, img_ref,                                  # packed outputs
    d1_ref,                                           # VMEM scratch
    *, batch,
):
    f32, bf16 = jnp.float32, jnp.bfloat16
    B = batch

    def mxdot(a, b):  # bf16 MXU matmul with f32 accumulation
        return jnp.dot(a.astype(bf16), b.astype(bf16),
                       preferred_element_type=f32)

    def tap_stack(y):
        # (rows, 9*128) f32 -> (9*rows, 128) bf16, row order (tap, input-row).
        # All pieces are 128-lane-aligned slices with >=16-row blocks, so this
        # is a plain tile-copy concatenation.
        yb = y.astype(bf16)
        return jnp.concatenate(
            [yb[:, d * LANES:(d + 1) * LANES] for d in range(9)], axis=0)

    # ---------------- image encoder ----------------
    # conv1 3x3/s2 (3->8) + ReLU; rows = (spatial 8x8, batch), lanes = 8
    y1 = jnp.maximum(mxdot(p1_ref[...], w1_ref[...]) + b1_ref[...], 0.0)

    # conv2 3x3/s2 (8->16) + ReLU as two fused matmuls (taps in the MXU K dim)
    st2 = tap_stack(mxdot(y1, w2s_ref[...]))                  # (9*64B, 128)
    y2 = jnp.maximum(mxdot(s2_ref[...], st2) + b128_ref[0:1, :], 0.0)  # (16B,128)

    # fc (16*4*4 -> 24) + Tanh; register-resident accumulation, contracting
    # only the 16 real channels per spatial position (compact weight).
    wfcs = wfcs_ref[...]
    accf = jnp.zeros((B, LANES), f32)
    for s in range(16):
        accf = accf + mxdot(y2[s * B:(s + 1) * B, 0:16],
                            wfcs[s * 16:(s + 1) * 16, :])
    feat = jnp.tanh(accf + b128_ref[1:2, :])                  # (B, 128)

    # ---------------- MTRNNPB cell (packed weights, hoisted pb bias) --------
    x_pack = jnp.concatenate([feat, joint_ref[...]], axis=-1)        # (B, 256)
    pb_bias = b384_ref[0:1, :]      # b + pb @ W_pb, precomputed host-side
    inv_tau = b384_ref[1:2, :]
    z = mxdot(x_pack, wx_ref[...]) + mxdot(h_ref[...], wh_ref[...]) + pb_bias
    u_new = (1.0 - inv_tau) * u_ref[...] + inv_tau * z        # (B, 384)
    h_new = jnp.tanh(u_new)

    # ---------------- joint decoder + fn_for_image_decoder ------------------
    nj = jnp.tanh(mxdot(h_new[:, 0:32], wjd_ref[...]) + b128_ref[2:3, :])
    dec_in = jnp.maximum(
        mxdot(jnp.concatenate([h_new[:, 0:LANES], nj], axis=-1), wfd_ref[...])
        + b128_ref[3:4, :], 0.0)                              # (B, 128)

    # ---------------- image decoder ----------------
    # fc (32 -> 16*4*4) + ReLU as ONE matmul; the 16 spatial groups come out
    # along lanes and are scattered into spatial-major rows via the scratch.
    D = jnp.maximum(mxdot(dec_in[:, 0:32], wdfc_ref[...]) + bdfc_ref[...], 0.0)
    for s in range(16):           # TODO(synk): becomes unmasked stores at B>=8
        d1_ref[s * B:(s + 1) * B, :] = D[:, s * LANES:(s + 1) * LANES]
    d1 = d1_ref[...]                                          # (16B, 128)

    # upsample2x + conv3x3 (16->8) + ReLU; output rows are batch-major (b, s)
    st3 = tap_stack(mxdot(d1[:, 0:16], wd1s_ref[...]))        # (9*16B, 128)
    d2 = jnp.maximum(mxdot(sd1_ref[...], st3) + b128_ref[4:5, :], 0.0)  # (64B,128)

    # upsample2x + conv3x3 (8->3) + Sigmoid; batch-independent gather matrix,
    # applied per batch on contiguous 64-row blocks.
    yt4 = mxdot(d2[:, 0:8], wd2s_ref[...])                    # (64B, 1152) f32
    yb4 = yt4.astype(bf16)
    sd2 = sd2_ref[...]
    bias2 = b128_ref[5:6, :]
    for b in range(B):
        st4 = jnp.concatenate(
            [yb4[b * 64:(b + 1) * 64, d * LANES:(d + 1) * LANES]
             for d in range(9)], axis=0)                      # (576, 128)
        ob = jax.nn.sigmoid(mxdot(sd2, st4) + bias2)          # (256, 128)
        img_ref[b * 256:(b + 1) * 256, :] = ob.astype(img_ref.dtype)

    # ---------------- packed, lane-dense state/joint output ----------------
    sj_ref[...] = jnp.concatenate([h_new, u_new, nj], axis=-1)       # (B, 896)


def _fused_forward(packed, p1, joint_pad, h_pack, u_pack, batch):
    B = batch
    inputs = [
        p1, joint_pad, h_pack, u_pack,
        packed["s2"], packed["sd1"], packed["sd2"],
        packed["w1"], packed["w2s"], packed["wfcs"],
        packed["wx"], packed["wh"], packed["wjd"], packed["wfd"],
        packed["wdfc"], packed["wd1s"], packed["wd2s"],
        packed["b1"], packed["b128"], packed["bdfc"], packed["b384"],
    ]
    out_shape = (
        jax.ShapeDtypeStruct((B, 7 * LANES), jnp.float32),            # h|u|joint
        jax.ShapeDtypeStruct((IMG_SIZE * IMG_SIZE * B, LANES), jnp.bfloat16),
    )
    # No grid / no BlockSpecs: single invocation, whole (small) arrays resident
    # in VMEM, single-buffered.
    return pl.pallas_call(
        functools.partial(_aemtrnnpb_kernel, batch=B),
        out_shape=out_shape,
        scratch_shapes=[pltpu.VMEM((16 * B, LANES), jnp.float32)],
        compiler_params=pltpu.CompilerParams(
            vmem_limit_bytes=32 * 1024 * 1024),
    )(*inputs)


# ----------------------------------------------------------------------------
# Constant 0/1 gather matrices (host-side numpy, taps stacked along columns)
# ----------------------------------------------------------------------------
def _sel_conv_fold(out_hw, in_hw, stride, pad, batch, out_batch_major):
    # S[row_out, d*(n_in*B) + s_in*B + b] = 1 ; input rows are spatial-major.
    oh, ow = out_hw
    ih, iw = in_hw
    n_out, n_in = oh * ow, ih * iw
    S = np.zeros((n_out * batch, 9 * n_in * batch), np.float32)
    for oi in range(oh):
        for oj in range(ow):
            so = oi * ow + oj
            for di in range(3):
                for dj in range(3):
                    d = di * 3 + dj
                    ii = oi * stride - pad + di
                    jj = oj * stride - pad + dj
                    if 0 <= ii < ih and 0 <= jj < iw:
                        si = ii * iw + jj
                        for b in range(batch):
                            row = b * n_out + so if out_batch_major \
                                else so * batch + b
                            S[row, d * n_in * batch + si * batch + b] = 1.0
    return S


def _sel_upconv_fold(out_hw, in_hw, pad, batch, out_batch_major):
    # 2x nearest-neighbour upsample folded into a 3x3/s1 gather.
    oh, ow = out_hw
    ih, iw = in_hw
    n_out, n_in = oh * ow, ih * iw
    S = np.zeros((n_out * batch, 9 * n_in * batch), np.float32)
    for oi in range(oh):
        for oj in range(ow):
            so = oi * ow + oj
            for di in range(3):
                for dj in range(3):
                    d = di * 3 + dj
                    pi, pj = oi - pad + di, oj - pad + dj
                    if 0 <= pi < oh and 0 <= pj < ow:
                        si = (pi // 2) * iw + (pj // 2)
                        for b in range(batch):
                            row = b * n_out + so if out_batch_major \
                                else so * batch + b
                            S[row, d * n_in * batch + si * batch + b] = 1.0
    return S


def _sel_upconv(out_hw, in_hw, pad):
    # Batch-independent version (applied per batch on contiguous row blocks).
    oh, ow = out_hw
    ih, iw = in_hw
    n_out, n_in = oh * ow, ih * iw
    S = np.zeros((n_out, 9 * n_in), np.float32)
    for oi in range(oh):
        for oj in range(ow):
            so = oi * ow + oj
            for di in range(3):
                for dj in range(3):
                    d = di * 3 + dj
                    pi, pj = oi - pad + di, oj - pad + dj
                    if 0 <= pi < oh and 0 <= pj < ow:
                        si = (pi // 2) * iw + (pj // 2)
                        S[so, d * n_in + si] = 1.0
    return S


# ----------------------------------------------------------------------------
# Deterministic synthetic parameters + TPU-friendly packing
# ----------------------------------------------------------------------------
def init_raw_params(key):
    Dio, Df, Ds = RNN_HIDDEN_DIMS
    Pio, Pf, Ps = PB_DIMS
    rnn_in = IMAGE_FEAT_DIM + JOINT_DIM
    keys = iter(jax.random.split(key, 32))

    def w(shape):
        s = 1.0 / np.sqrt(float(shape[-2]))
        return jax.random.uniform(next(keys), shape, jnp.float32, -1.0, 1.0) * s

    z = lambda n: jnp.zeros((n,), jnp.float32)
    return {
        # ImageEncoder: conv(3->8,s2) ReLU, conv(8->16,s2) ReLU, fc->feat Tanh
        "enc_w1": w((3 * 3 * 3, 8)), "enc_b1": z(8),
        "enc_w2": w((9, 8, 16)), "enc_b2": z(16),
        "enc_wfc": w((16 * 4 * 4, IMAGE_FEAT_DIM)), "enc_bfc": z(IMAGE_FEAT_DIM),
        # MTRNNPB cell
        "w_x_io": w((rnn_in, Dio)), "w_io_io": w((Dio, Dio)),
        "w_f_io": w((Df, Dio)), "w_pb_io": w((Pio, Dio)), "b_io": z(Dio),
        "w_io_f": w((Dio, Df)), "w_f_f": w((Df, Df)),
        "w_s_f": w((Ds, Df)), "w_pb_f": w((Pf, Df)), "b_f": z(Df),
        "w_f_s": w((Df, Ds)), "w_s_s": w((Ds, Ds)),
        "w_pb_s": w((Ps, Ds)), "b_s": z(Ds),
        "pb_io": w((1, Pio)), "pb_f": w((1, Pf)), "pb_s": w((1, Ps)),
        # joint_decoder: Linear + Tanh
        "w_jd": w((Dio, JOINT_DIM)), "b_jd": z(JOINT_DIM),
        # fn_for_image_decoder: Linear(concat(h_io, joint)) + ReLU
        "w_fd": w((Dio + JOINT_DIM, DECODER_INPUT_DIM)),
        "b_fd": z(DECODER_INPUT_DIM),
        # ImageDecoder: fc->16x4x4 ReLU; up2+conv(16->8) ReLU; up2+conv(8->3) Sigmoid
        "dec_wfc": w((DECODER_INPUT_DIM, 16 * 4 * 4)), "dec_bfc": z(16 * 4 * 4),
        "dec_w1": w((9, 16, 8)), "dec_b1": z(8),
        "dec_w2": w((9, 8, 3)), "dec_b2": z(3),
    }


def pack_params(raw, batch):
    r = {k: np.asarray(v, np.float32) for k, v in raw.items()}
    Dio, Df, Ds = RNN_HIDDEN_DIMS
    B = batch

    def pad2(a, rows, cols):
        out = np.zeros((rows, cols), np.float32)
        out[:a.shape[0], :a.shape[1]] = a
        return out

    def padrow(v):
        out = np.zeros((1, LANES), np.float32)
        out[0, :v.shape[0]] = v
        return out

    def tap_weight_stack(w_dco, cin):
        # W_stack[c, d*128 + o] = W[d, c, o]; only real in-channel rows kept.
        out = np.zeros((cin, 9 * LANES), np.float32)
        for d in range(9):
            blk = w_dco[d]
            out[:blk.shape[0], d * LANES:d * LANES + blk.shape[1]] = blk
        return out

    # encoder
    w1 = r["enc_w1"]                                   # (27, 8)
    w2s = tap_weight_stack(r["enc_w2"], 8)             # (8, 1152)
    wfcs = pad2(r["enc_wfc"], 256, LANES)              # (256, 128), 24 real cols

    # MTRNNPB cell: packed block weights + hoisted parametric-bias terms
    wx = np.zeros((2 * LANES, 3 * LANES), np.float32)
    wx[0:IMAGE_FEAT_DIM, 0:Dio] = r["w_x_io"][0:IMAGE_FEAT_DIM]
    wx[LANES:LANES + JOINT_DIM, 0:Dio] = r["w_x_io"][IMAGE_FEAT_DIM:]

    wh = np.zeros((3 * LANES, 3 * LANES), np.float32)
    wh[0:Dio, 0:Dio] = r["w_io_io"]
    wh[LANES:LANES + Df, 0:Dio] = r["w_f_io"]
    wh[0:Dio, LANES:LANES + Df] = r["w_io_f"]
    wh[LANES:LANES + Df, LANES:LANES + Df] = r["w_f_f"]
    wh[2 * LANES:2 * LANES + Ds, LANES:LANES + Df] = r["w_s_f"]
    wh[LANES:LANES + Df, 2 * LANES:2 * LANES + Ds] = r["w_f_s"]
    wh[2 * LANES:2 * LANES + Ds, 2 * LANES:2 * LANES + Ds] = r["w_s_s"]

    pb_bias = np.zeros((1, 3 * LANES), np.float32)
    pb_bias[0, 0:Dio] = r["b_io"] + (r["pb_io"] @ r["w_pb_io"])[0]
    pb_bias[0, LANES:LANES + Df] = r["b_f"] + (r["pb_f"] @ r["w_pb_f"])[0]
    pb_bias[0, 2 * LANES:2 * LANES + Ds] = r["b_s"] + (r["pb_s"] @ r["w_pb_s"])[0]
    inv_tau = np.zeros((1, 3 * LANES), np.float32)
    inv_tau[0, 0:LANES] = 1.0 / TAUS[0]
    inv_tau[0, LANES:2 * LANES] = 1.0 / TAUS[1]
    inv_tau[0, 2 * LANES:] = 1.0 / TAUS[2]
    b384 = np.concatenate([pb_bias, inv_tau], 0)

    # heads
    wjd = pad2(r["w_jd"], Dio, LANES)                  # (32, 128)
    wfd = np.zeros((2 * LANES, LANES), np.float32)
    wfd[0:Dio, 0:DECODER_INPUT_DIM] = r["w_fd"][0:Dio]
    wfd[LANES:LANES + JOINT_DIM, 0:DECODER_INPUT_DIM] = r["w_fd"][Dio:]

    # decoder fc: one matmul, 16 spatial groups stacked along lanes
    wdfc = np.zeros((DECODER_INPUT_DIM, 16 * LANES), np.float32)
    bdfc = np.zeros((1, 16 * LANES), np.float32)
    for s in range(16):
        wdfc[:, s * LANES:s * LANES + 16] = r["dec_wfc"][:, s * 16:(s + 1) * 16]
        bdfc[0, s * LANES:s * LANES + 16] = r["dec_bfc"][s * 16:(s + 1) * 16]

    wd1s = tap_weight_stack(r["dec_w1"], 16)           # (16, 1152)
    wd2s = tap_weight_stack(r["dec_w2"], 8)            # (8, 1152)

    # bias rows (lane-padded): [enc_b2, enc_bfc, b_jd, b_fd, dec_b1, dec_b2]
    b128 = np.concatenate(
        [padrow(r["enc_b2"]), padrow(r["enc_bfc"]), padrow(r["b_jd"]),
         padrow(r["b_fd"]), padrow(r["dec_b1"]), padrow(r["dec_b2"])], 0)
    b1 = r["enc_b1"].reshape(1, 8)

    # constant 0/1 gather matrices (taps along columns, upsample folded in)
    s2 = _sel_conv_fold((4, 4), (8, 8), 2, 1, B, out_batch_major=False)
    sd1 = _sel_upconv_fold((8, 8), (4, 4), 1, B, out_batch_major=True)
    sd2 = _sel_upconv((16, 16), (8, 8), 1)             # batch-independent

    bf = lambda a: jnp.asarray(a, jnp.bfloat16)
    f32 = lambda a: jnp.asarray(a, jnp.float32)
    return {
        "w1": bf(w1), "w2s": bf(w2s), "wfcs": bf(wfcs),
        "wx": bf(wx), "wh": bf(wh), "wjd": bf(wjd), "wfd": bf(wfd),
        "wdfc": bf(wdfc), "wd1s": bf(wd1s), "wd2s": bf(wd2s),
        "s2": bf(s2), "sd1": bf(sd1), "sd2": bf(sd2),
        "b1": f32(b1), "b128": f32(b128), "bdfc": f32(bdfc), "b384": f32(b384),
    }


# ----------------------------------------------------------------------------
# Forward pass (matches AEMTRNNPB.forward semantics)
# ----------------------------------------------------------------------------
def _pack_state(rnn_state, batch):
    if rnn_state is None:
        zeros = jnp.zeros((batch, 3 * LANES), jnp.float32)
        return zeros, zeros
    h_io, h_f, h_s, u_io, u_f, u_s = rnn_state
    pad = lambda a: jnp.pad(a.astype(jnp.float32),
                            ((0, 0), (0, LANES - a.shape[1])))
    h = jnp.concatenate([pad(h_io), pad(h_f), pad(h_s)], -1)
    u = jnp.concatenate([pad(u_io), pad(u_f), pad(u_s)], -1)
    return h, u


def aemtrnnpb_forward(packed, image_nchw, joint, rnn_state=None):
    B = image_nchw.shape[0]
    Dio, Df, Ds = RNN_HIDDEN_DIMS

    # conv1 patches (wrapper-side patch extraction of the raw input only),
    # spatial-major rows, compact 27-lane patches.
    x = jnp.transpose(image_nchw, (0, 2, 3, 1)).astype(jnp.float32)   # NHWC
    xp = jnp.pad(x, ((0, 0), (1, 1), (1, 1), (0, 0)))
    cols = [xp[:, di:di + 16:2, dj:dj + 16:2, :]
            for di in range(3) for dj in range(3)]
    patches = jnp.concatenate(cols, axis=-1)                          # (B,8,8,27)
    p1 = jnp.transpose(patches, (1, 2, 0, 3)).reshape(64 * B, 27)
    p1 = p1.astype(jnp.bfloat16)

    joint_pad = jnp.pad(joint.astype(jnp.float32),
                        ((0, 0), (0, LANES - JOINT_DIM)))
    h_pack, u_pack = _pack_state(rnn_state, B)

    sj, img = _fused_forward(packed, p1, joint_pad, h_pack, u_pack, B)

    # unpack lane-dense slabs
    h_io = sj[:, 0:Dio]
    h_f = sj[:, LANES:LANES + Df]
    h_s = sj[:, 2 * LANES:2 * LANES + Ds]
    u_io = sj[:, 3 * LANES:3 * LANES + Dio]
    u_f = sj[:, 4 * LANES:4 * LANES + Df]
    u_s = sj[:, 5 * LANES:5 * LANES + Ds]
    next_joint = sj[:, 6 * LANES:6 * LANES + JOINT_DIM]

    # image rows are batch-major: row = b*256 + h*16 + w, lanes = channels
    pred_next_image = jnp.transpose(
        img.reshape(B, IMG_SIZE, IMG_SIZE, LANES)[..., :3],
        (0, 3, 1, 2)).astype(jnp.float32)

    return pred_next_image, next_joint, (h_io, h_f, h_s, u_io, u_f, u_s)


# ----------------------------------------------------------------------------
# Main
# ----------------------------------------------------------------------------
if __name__ == "__main__":
    key = jax.random.PRNGKey(0)
    kp, ki, kj = jax.random.split(key, 3)

    B = 2
    raw = init_raw_params(kp)
    packed = pack_params(raw, B)

    image = jax.random.uniform(ki, (B, 3, IMG_SIZE, IMG_SIZE), jnp.float32)
    joint = jax.random.uniform(kj, (B, JOINT_DIM), jnp.float32, -1.0, 1.0)

    fwd = jax.jit(aemtrnnpb_forward)
    pred_image, next_joint, rnn_states = fwd(packed, image, joint)
    jax.block_until_ready((pred_image, next_joint, rnn_states))

    assert pred_image.shape == (B, 3, IMG_SIZE, IMG_SIZE)
    assert next_joint.shape == (B, JOINT_DIM)
    assert rnn_states[0].shape == (B, RNN_HIDDEN_DIMS[0])
    assert rnn_states[3].shape == (B, RNN_HIDDEN_DIMS[0])
    print("KERNEL_OK")
</pallas_src>

<mosaic_0001>
module attributes {stable_mosaic.version = 11 : i64} {
  func.func @_aemtrnnpb_kernel(%arg0: memref<128x27xbf16, #tpu.memory_space<vmem>>, %arg1: memref<2x128xf32, #tpu.memory_space<vmem>>, %arg2: memref<2x384xf32, #tpu.memory_space<vmem>>, %arg3: memref<2x384xf32, #tpu.memory_space<vmem>>, %arg4: memref<32x1152xbf16, #tpu.memory_space<vmem>>, %arg5: memref<128x288xbf16, #tpu.memory_space<vmem>>, %arg6: memref<256x576xbf16, #tpu.memory_space<vmem>>, %arg7: memref<27x8xbf16, #tpu.memory_space<vmem>>, %arg8: memref<8x1152xbf16, #tpu.memory_space<vmem>>, %arg9: memref<256x128xbf16, #tpu.memory_space<vmem>>, %arg10: memref<256x384xbf16, #tpu.memory_space<vmem>>, %arg11: memref<384x384xbf16, #tpu.memory_space<vmem>>, %arg12: memref<32x128xbf16, #tpu.memory_space<vmem>>, %arg13: memref<256x128xbf16, #tpu.memory_space<vmem>>, %arg14: memref<32x2048xbf16, #tpu.memory_space<vmem>>, %arg15: memref<16x1152xbf16, #tpu.memory_space<vmem>>, %arg16: memref<8x1152xbf16, #tpu.memory_space<vmem>>, %arg17: memref<1x8xf32, #tpu.memory_space<vmem>>, %arg18: memref<6x128xf32, #tpu.memory_space<vmem>>, %arg19: memref<1x2048xf32, #tpu.memory_space<vmem>>, %arg20: memref<2x384xf32, #tpu.memory_space<vmem>>, %arg21: memref<2x896xf32, #tpu.memory_space<vmem>>, %arg22: memref<512x128xbf16, #tpu.memory_space<vmem>>, %arg23: memref<32x128xf32, #tpu.memory_space<vmem>>) attributes {dimension_semantics = [], scalar_prefetch = 0 : i64, scratch_operands = 1 : i64, tpu.core_type = #tpu.core_type<tc>} {
    %c0 = arith.constant 0 : index
    %c0_0 = arith.constant 0 : index
    %0 = vector.load %arg0[%c0, %c0_0] : memref<128x27xbf16, #tpu.memory_space<vmem>>, vector<128x27xbf16>
    %c0_1 = arith.constant 0 : index
    %c0_2 = arith.constant 0 : index
    %1 = vector.load %arg7[%c0_1, %c0_2] : memref<27x8xbf16, #tpu.memory_space<vmem>>, vector<27x8xbf16>
    %cst = arith.constant dense<0.000000e+00> : vector<128x8xf32>
    %2 = tpu.matmul %0, %1, %cst {dimension_numbers = #tpu.dot_dimension_numbers<[1], [0], [0], [1], [0, 0, 1, 1], [], []>} : vector<128x27xbf16>, vector<27x8xbf16>, vector<128x8xf32> -> vector<128x8xf32>
    %c0_3 = arith.constant 0 : index
    %c0_4 = arith.constant 0 : index
    %3 = vector.load %arg17[%c0_3, %c0_4] : memref<1x8xf32, #tpu.memory_space<vmem>>, vector<1x8xf32>
    %4 = vector.broadcast %3 : vector<1x8xf32> to vector<128x8xf32>
    %5 = arith.addf %2, %4 : vector<128x8xf32>
    %cst_5 = arith.constant 0.000000e+00 : f32
    %6 = vector.broadcast %cst_5 : f32 to vector<128x8xf32>
    %7 = arith.maximumf %5, %6 : vector<128x8xf32>
    %c0_6 = arith.constant 0 : index
    %c0_7 = arith.constant 0 : index
    %8 = vector.load %arg8[%c0_6, %c0_7] : memref<8x1152xbf16, #tpu.memory_space<vmem>>, vector<8x1152xbf16>
    %9 = arith.truncf %7 : vector<128x8xf32> to vector<128x8xbf16>
    %cst_8 = arith.constant dense<0.000000e+00> : vector<128x1152xf32>
    %10 = tpu.matmul %9, %8, %cst_8 {dimension_numbers = #tpu.dot_dimension_numbers<[1], [0], [0], [1], [0, 0, 1, 1], [], []>} : vector<128x8xbf16>, vector<8x1152xbf16>, vector<128x1152xf32> -> vector<128x1152xf32>
    %11 = arith.truncf %10 : vector<128x1152xf32> to vector<128x1152xbf16>
    %12 = vector.extract_strided_slice %11 {offsets = [0, 0], sizes = [128, 128], strides = [1, 1]} : vector<128x1152xbf16> to vector<128x128xbf16>
    %13 = vector.extract_strided_slice %11 {offsets = [0, 128], sizes = [128, 128], strides = [1, 1]} : vector<128x1152xbf16> to vector<128x128xbf16>
    %14 = vector.extract_strided_slice %11 {offsets = [0, 256], sizes = [128, 128], strides = [1, 1]} : vector<128x1152xbf16> to vector<128x128xbf16>
    %15 = vector.extract_strided_slice %11 {offsets = [0, 384], sizes = [128, 128], strides = [1, 1]} : vector<128x1152xbf16> to vector<128x128xbf16>
    %16 = vector.extract_strided_slice %11 {offsets = [0, 512], sizes = [128, 128], strides = [1, 1]} : vector<128x1152xbf16> to vector<128x128xbf16>
    %17 = vector.extract_strided_slice %11 {offsets = [0, 640], sizes = [128, 128], strides = [1, 1]} : vector<128x1152xbf16> to vector<128x128xbf16>
    %18 = vector.extract_strided_slice %11 {offsets = [0, 768], sizes = [128, 128], strides = [1, 1]} : vector<128x1152xbf16> to vector<128x128xbf16>
    %19 = vector.extract_strided_slice %11 {offsets = [0, 896], sizes = [128, 128], strides = [1, 1]} : vector<128x1152xbf16> to vector<128x128xbf16>
    %20 = vector.extract_strided_slice %11 {offsets = [0, 1024], sizes = [128, 128], strides = [1, 1]} : vector<128x1152xbf16> to vector<128x128xbf16>
    %21 = tpu.concatenate %12, %13, %14, %15, %16, %17, %18, %19, %20 in 0 : vector<128x128xbf16>, vector<128x128xbf16>, vector<128x128xbf16>, vector<128x128xbf16>, vector<128x128xbf16>, vector<128x128xbf16>, vector<128x128xbf16>, vector<128x128xbf16>, vector<128x128xbf16> -> vector<1152x128xbf16>
    %c0_9 = arith.constant 0 : index
    %c0_10 = arith.constant 0 : index
    %22 = vector.load %arg4[%c0_9, %c0_10] : memref<32x1152xbf16, #tpu.memory_space<vmem>>, vector<32x1152xbf16>
    %cst_11 = arith.constant dense<0.000000e+00> : vector<32x128xf32>
    %23 = tpu.matmul %22, %21, %cst_11 {dimension_numbers = #tpu.dot_dimension_numbers<[1], [0], [0], [1], [0, 0, 1, 1], [], []>} : vector<32x1152xbf16>, vector<1152x128xbf16>, vector<32x128xf32> -> vector<32x128xf32>
    %c0_12 = arith.constant 0 : index
    %c0_13 = arith.constant 0 : index
    %24 = vector.load %arg18[%c0_12, %c0_13] : memref<6x128xf32, #tpu.memory_space<vmem>>, vector<1x128xf32>
    %25 = vector.broadcast %24 : vector<1x128xf32> to vector<32x128xf32>
    %26 = arith.addf %23, %25 : vector<32x128xf32>
    %cst_14 = arith.constant 0.000000e+00 : f32
    %27 = vector.broadcast %cst_14 : f32 to vector<32x128xf32>
    %28 = arith.maximumf %26, %27 : vector<32x128xf32>
    %c0_15 = arith.constant 0 : index
    %c0_16 = arith.constant 0 : index
    %29 = vector.load %arg9[%c0_15, %c0_16] : memref<256x128xbf16, #tpu.memory_space<vmem>>, vector<256x128xbf16>
    %cst_17 = arith.constant 0.000000e+00 : f32
    %30 = vector.broadcast %cst_17 : f32 to vector<2x128xf32>
    %31 = vector.extract_strided_slice %28 {offsets = [0, 0], sizes = [2, 16], strides = [1, 1]} : vector<32x128xf32> to vector<2x16xf32>
    %32 = vector.extract_strided_slice %29 {offsets = [0, 0], sizes = [16, 128], strides = [1, 1]} : vector<256x128xbf16> to vector<16x128xbf16>
    %33 = arith.truncf %31 : vector<2x16xf32> to vector<2x16xbf16>
    %cst_18 = arith.constant dense<0.000000e+00> : vector<2x128xf32>
    %34 = tpu.matmul %33, %32, %cst_18 {dimension_numbers = #tpu.dot_dimension_numbers<[1], [0], [0], [1], [0, 0, 1, 1], [], []>} : vector<2x16xbf16>, vector<16x128xbf16>, vector<2x128xf32> -> vector<2x128xf32>
    %35 = arith.addf %30, %34 : vector<2x128xf32>
    %36 = vector.extract_strided_slice %28 {offsets = [2, 0], sizes = [2, 16], strides = [1, 1]} : vector<32x128xf32> to vector<2x16xf32>
    %37 = vector.extract_strided_slice %29 {offsets = [16, 0], sizes = [16, 128], strides = [1, 1]} : vector<256x128xbf16> to vector<16x128xbf16>
    %38 = arith.truncf %36 : vector<2x16xf32> to vector<2x16xbf16>
    %cst_19 = arith.constant dense<0.000000e+00> : vector<2x128xf32>
    %39 = tpu.matmul %38, %37, %cst_19 {dimension_numbers = #tpu.dot_dimension_numbers<[1], [0], [0], [1], [0, 0, 1, 1], [], []>} : vector<2x16xbf16>, vector<16x128xbf16>, vector<2x128xf32> -> vector<2x128xf32>
    %40 = arith.addf %35, %39 : vector<2x128xf32>
    %41 = vector.extract_strided_slice %28 {offsets = [4, 0], sizes = [2, 16], strides = [1, 1]} : vector<32x128xf32> to vector<2x16xf32>
    %42 = vector.extract_strided_slice %29 {offsets = [32, 0], sizes = [16, 128], strides = [1, 1]} : vector<256x128xbf16> to vector<16x128xbf16>
    %43 = arith.truncf %41 : vector<2x16xf32> to vector<2x16xbf16>
    %cst_20 = arith.constant dense<0.000000e+00> : vector<2x128xf32>
    %44 = tpu.matmul %43, %42, %cst_20 {dimension_numbers = #tpu.dot_dimension_numbers<[1], [0], [0], [1], [0, 0, 1, 1], [], []>} : vector<2x16xbf16>, vector<16x128xbf16>, vector<2x128xf32> -> vector<2x128xf32>
    %45 = arith.addf %40, %44 : vector<2x128xf32>
    %46 = vector.extract_strided_slice %28 {offsets = [6, 0], sizes = [2, 16], strides = [1, 1]} : vector<32x128xf32> to vector<2x16xf32>
    %47 = vector.extract_strided_slice %29 {offsets = [48, 0], sizes = [16, 128], strides = [1, 1]} : vector<256x128xbf16> to vector<16x128xbf16>
    %48 = arith.truncf %46 : vector<2x16xf32> to vector<2x16xbf16>
    %cst_21 = arith.constant dense<0.000000e+00> : vector<2x128xf32>
    %49 = tpu.matmul %48, %47, %cst_21 {dimension_numbers = #tpu.dot_dimension_numbers<[1], [0], [0], [1], [0, 0, 1, 1], [], []>} : vector<2x16xbf16>, vector<16x128xbf16>, vector<2x128xf32> -> vector<2x128xf32>
    %50 = arith.addf %45, %49 : vector<2x128xf32>
    %51 = vector.extract_strided_slice %28 {offsets = [8, 0], sizes = [2, 16], strides = [1, 1]} : vector<32x128xf32> to vector<2x16xf32>
    %52 = vector.extract_strided_slice %29 {offsets = [64, 0], sizes = [16, 128], strides = [1, 1]} : vector<256x128xbf16> to vector<16x128xbf16>
    %53 = arith.truncf %51 : vector<2x16xf32> to vector<2x16xbf16>
    %cst_22 = arith.constant dense<0.000000e+00> : vector<2x128xf32>
    %54 = tpu.matmul %53, %52, %cst_22 {dimension_numbers = #tpu.dot_dimension_numbers<[1], [0], [0], [1], [0, 0, 1, 1], [], []>} : vector<2x16xbf16>, vector<16x128xbf16>, vector<2x128xf32> -> vector<2x128xf32>
    %55 = arith.addf %50, %54 : vector<2x128xf32>
    %56 = vector.extract_strided_slice %28 {offsets = [10, 0], sizes = [2, 16], strides = [1, 1]} : vector<32x128xf32> to vector<2x16xf32>
    %57 = vector.extract_strided_slice %29 {offsets = [80, 0], sizes = [16, 128], strides = [1, 1]} : vector<256x128xbf16> to vector<16x128xbf16>
    %58 = arith.truncf %56 : vector<2x16xf32> to vector<2x16xbf16>
    %cst_23 = arith.constant dense<0.000000e+00> : vector<2x128xf32>
    %59 = tpu.matmul %58, %57, %cst_23 {dimension_numbers = #tpu.dot_dimension_numbers<[1], [0], [0], [1], [0, 0, 1, 1], [], []>} : vector<2x16xbf16>, vector<16x128xbf16>, vector<2x128xf32> -> vector<2x128xf32>
    %60 = arith.addf %55, %59 : vector<2x128xf32>
    %61 = vector.extract_strided_slice %28 {offsets = [12, 0], sizes = [2, 16], strides = [1, 1]} : vector<32x128xf32> to vector<2x16xf32>
    %62 = vector.extract_strided_slice %29 {offsets = [96, 0], sizes = [16, 128], strides = [1, 1]} : vector<256x128xbf16> to vector<16x128xbf16>
    %63 = arith.truncf %61 : vector<2x16xf32> to vector<2x16xbf16>
    %cst_24 = arith.constant dense<0.000000e+00> : vector<2x128xf32>
    %64 = tpu.matmul %63, %62, %cst_24 {dimension_numbers = #tpu.dot_dimension_numbers<[1], [0], [0], [1], [0, 0, 1, 1], [], []>} : vector<2x16xbf16>, vector<16x128xbf16>, vector<2x128xf32> -> vector<2x128xf32>
    %65 = arith.addf %60, %64 : vector<2x128xf32>
    %66 = vector.extract_strided_slice %28 {offsets = [14, 0], sizes = [2, 16], strides = [1, 1]} : vector<32x128xf32> to vector<2x16xf32>
    %67 = vector.extract_strided_slice %29 {offsets = [112, 0], sizes = [16, 128], strides = [1, 1]} : vector<256x128xbf16> to vector<16x128xbf16>
    %68 = arith.truncf %66 : vector<2x16xf32> to vector<2x16xbf16>
    %cst_25 = arith.constant dense<0.000000e+00> : vector<2x128xf32>
    %69 = tpu.matmul %68, %67, %cst_25 {dimension_numbers = #tpu.dot_dimension_numbers<[1], [0], [0], [1], [0, 0, 1, 1], [], []>} : vector<2x16xbf16>, vector<16x128xbf16>, vector<2x128xf32> -> vector<2x128xf32>
    %70 = arith.addf %65, %69 : vector<2x128xf32>
    %71 = vector.extract_strided_slice %28 {offsets = [16, 0], sizes = [2, 16], strides = [1, 1]} : vector<32x128xf32> to vector<2x16xf32>
    %72 = vector.extract_strided_slice %29 {offsets = [128, 0], sizes = [16, 128], strides = [1, 1]} : vector<256x128xbf16> to vector<16x128xbf16>
    %73 = arith.truncf %71 : vector<2x16xf32> to vector<2x16xbf16>
    %cst_26 = arith.constant dense<0.000000e+00> : vector<2x128xf32>
    %74 = tpu.matmul %73, %72, %cst_26 {dimension_numbers = #tpu.dot_dimension_numbers<[1], [0], [0], [1], [0, 0, 1, 1], [], []>} : vector<2x16xbf16>, vector<16x128xbf16>, vector<2x128xf32> -> vector<2x128xf32>
    %75 = arith.addf %70, %74 : vector<2x128xf32>
    %76 = vector.extract_strided_slice %28 {offsets = [18, 0], sizes = [2, 16], strides = [1, 1]} : vector<32x128xf32> to vector<2x16xf32>
    %77 = vector.extract_strided_slice %29 {offsets = [144, 0], sizes = [16, 128], strides = [1, 1]} : vector<256x128xbf16> to vector<16x128xbf16>
    %78 = arith.truncf %76 : vector<2x16xf32> to vector<2x16xbf16>
    %cst_27 = arith.constant dense<0.000000e+00> : vector<2x128xf32>
    %79 = tpu.matmul %78, %77, %cst_27 {dimension_numbers = #tpu.dot_dimension_numbers<[1], [0], [0], [1], [0, 0, 1, 1], [], []>} : vector<2x16xbf16>, vector<16x128xbf16>, vector<2x128xf32> -> vector<2x128xf32>
    %80 = arith.addf %75, %79 : vector<2x128xf32>
    %81 = vector.extract_strided_slice %28 {offsets = [20, 0], sizes = [2, 16], strides = [1, 1]} : vector<32x128xf32> to vector<2x16xf32>
    %82 = vector.extract_strided_slice %29 {offsets = [160, 0], sizes = [16, 128], strides = [1, 1]} : vector<256x128xbf16> to vector<16x128xbf16>
    %83 = arith.truncf %81 : vector<2x16xf32> to vector<2x16xbf16>
    %cst_28 = arith.constant dense<0.000000e+00> : vector<2x128xf32>
    %84 = tpu.matmul %83, %82, %cst_28 {dimension_numbers = #tpu.dot_dimension_numbers<[1], [0], [0], [1], [0, 0, 1, 1], [], []>} : vector<2x16xbf16>, vector<16x128xbf16>, vector<2x128xf32> -> vector<2x128xf32>
    %85 = arith.addf %80, %84 : vector<2x128xf32>
    %86 = vector.extract_strided_slice %28 {offsets = [22, 0], sizes = [2, 16], strides = [1, 1]} : vector<32x128xf32> to vector<2x16xf32>
    %87 = vector.extract_strided_slice %29 {offsets = [176, 0], sizes = [16, 128], strides = [1, 1]} : vector<256x128xbf16> to vector<16x128xbf16>
    %88 = arith.truncf %86 : vector<2x16xf32> to vector<2x16xbf16>
    %cst_29 = arith.constant dense<0.000000e+00> : vector<2x128xf32>
    %89 = tpu.matmul %88, %87, %cst_29 {dimension_numbers = #tpu.dot_dimension_numbers<[1], [0], [0], [1], [0, 0, 1, 1], [], []>} : vector<2x16xbf16>, vector<16x128xbf16>, vector<2x128xf32> -> vector<2x128xf32>
    %90 = arith.addf %85, %89 : vector<2x128xf32>
    %91 = vector.extract_strided_slice %28 {offsets = [24, 0], sizes = [2, 16], strides = [1, 1]} : vector<32x128xf32> to vector<2x16xf32>
    %92 = vector.extract_strided_slice %29 {offsets = [192, 0], sizes = [16, 128], strides = [1, 1]} : vector<256x128xbf16> to vector<16x128xbf16>
    %93 = arith.truncf %91 : vector<2x16xf32> to vector<2x16xbf16>
    %cst_30 = arith.constant dense<0.000000e+00> : vector<2x128xf32>
    %94 = tpu.matmul %93, %92, %cst_30 {dimension_numbers = #tpu.dot_dimension_numbers<[1], [0], [0], [1], [0, 0, 1, 1], [], []>} : vector<2x16xbf16>, vector<16x128xbf16>, vector<2x128xf32> -> vector<2x128xf32>
    %95 = arith.addf %90, %94 : vector<2x128xf32>
    %96 = vector.extract_strided_slice %28 {offsets = [26, 0], sizes = [2, 16], strides = [1, 1]} : vector<32x128xf32> to vector<2x16xf32>
    %97 = vector.extract_strided_slice %29 {offsets = [208, 0], sizes = [16, 128], strides = [1, 1]} : vector<256x128xbf16> to vector<16x128xbf16>
    %98 = arith.truncf %96 : vector<2x16xf32> to vector<2x16xbf16>
    %cst_31 = arith.constant dense<0.000000e+00> : vector<2x128xf32>
    %99 = tpu.matmul %98, %97, %cst_31 {dimension_numbers = #tpu.dot_dimension_numbers<[1], [0], [0], [1], [0, 0, 1, 1], [], []>} : vector<2x16xbf16>, vector<16x128xbf16>, vector<2x128xf32> -> vector<2x128xf32>
    %100 = arith.addf %95, %99 : vector<2x128xf32>
    %101 = vector.extract_strided_slice %28 {offsets = [28, 0], sizes = [2, 16], strides = [1, 1]} : vector<32x128xf32> to vector<2x16xf32>
    %102 = vector.extract_strided_slice %29 {offsets = [224, 0], sizes = [16, 128], strides = [1, 1]} : vector<256x128xbf16> to vector<16x128xbf16>
    %103 = arith.truncf %101 : vector<2x16xf32> to vector<2x16xbf16>
    %cst_32 = arith.constant dense<0.000000e+00> : vector<2x128xf32>
    %104 = tpu.matmul %103, %102, %cst_32 {dimension_numbers = #tpu.dot_dimension_numbers<[1], [0], [0], [1], [0, 0, 1, 1], [], []>} : vector<2x16xbf16>, vector<16x128xbf16>, vector<2x128xf32> -> vector<2x128xf32>
    %105 = arith.addf %100, %104 : vector<2x128xf32>
    %106 = vector.extract_strided_slice %28 {offsets = [30, 0], sizes = [2, 16], strides = [1, 1]} : vector<32x128xf32> to vector<2x16xf32>
    %107 = vector.extract_strided_slice %29 {offsets = [240, 0], sizes = [16, 128], strides = [1, 1]} : vector<256x128xbf16> to vector<16x128xbf16>
    %108 = arith.truncf %106 : vector<2x16xf32> to vector<2x16xbf16>
    %cst_33 = arith.constant dense<0.000000e+00> : vector<2x128xf32>
    %109 = tpu.matmul %108, %107, %cst_33 {dimension_numbers = #tpu.dot_dimension_numbers<[1], [0], [0], [1], [0, 0, 1, 1], [], []>} : vector<2x16xbf16>, vector<16x128xbf16>, vector<2x128xf32> -> vector<2x128xf32>
    %110 = arith.addf %105, %109 : vector<2x128xf32>
    %c1 = arith.constant 1 : index
    %c0_34 = arith.constant 0 : index
    %111 = vector.load %arg18[%c1, %c0_34] : memref<6x128xf32, #tpu.memory_space<vmem>>, vector<1x128xf32>
    %112 = vector.broadcast %111 : vector<1x128xf32> to vector<2x128xf32>
    %113 = arith.addf %110, %112 : vector<2x128xf32>
    %114 = math.tanh %113 : vector<2x128xf32>
    %c0_35 = arith.constant 0 : index
    %c0_36 = arith.constant 0 : index
    %115 = vector.load %arg1[%c0_35, %c0_36] : memref<2x128xf32, #tpu.memory_space<vmem>>, vector<2x128xf32>
    %116 = tpu.concatenate %114, %115 in 1 : vector<2x128xf32>, vector<2x128xf32> -> vector<2x256xf32>
    %c0_37 = arith.constant 0 : index
    %c0_38 = arith.constant 0 : index
    %117 = vector.load %arg20[%c0_37, %c0_38] : memref<2x384xf32, #tpu.memory_space<vmem>>, vector<1x384xf32>
    %c1_39 = arith.constant 1 : index
    %c0_40 = arith.constant 0 : index
    %118 = vector.load %arg20[%c1_39, %c0_40] : memref<2x384xf32, #tpu.memory_space<vmem>>, vector<1x384xf32>
    %c0_41 = arith.constant 0 : index
    %c0_42 = arith.constant 0 : index
    %119 = vector.load %arg10[%c0_41, %c0_42] : memref<256x384xbf16, #tpu.memory_space<vmem>>, vector<256x384xbf16>
    %120 = arith.truncf %116 : vector<2x256xf32> to vector<2x256xbf16>
    %cst_43 = arith.constant dense<0.000000e+00> : vector<2x384xf32>
    %121 = tpu.matmul %120, %119, %cst_43 {dimension_numbers = #tpu.dot_dimension_numbers<[1], [0], [0], [1], [0, 0, 1, 1], [], []>} : vector<2x256xbf16>, vector<256x384xbf16>, vector<2x384xf32> -> vector<2x384xf32>
    %c0_44 = arith.constant 0 : index
    %c0_45 = arith.constant 0 : index
    %122 = vector.load %arg2[%c0_44, %c0_45] : memref<2x384xf32, #tpu.memory_space<vmem>>, vector<2x384xf32>
    %c0_46 = arith.constant 0 : index
    %c0_47 = arith.constant 0 : index
    %123 = vector.load %arg11[%c0_46, %c0_47] : memref<384x384xbf16, #tpu.memory_space<vmem>>, vector<384x384xbf16>
    %124 = arith.truncf %122 : vector<2x384xf32> to vector<2x384xbf16>
    %cst_48 = arith.constant dense<0.000000e+00> : vector<2x384xf32>
    %125 = tpu.matmul %124, %123, %cst_48 {dimension_numbers = #tpu.dot_dimension_numbers<[1], [0], [0], [1], [0, 0, 1, 1], [], []>} : vector<2x384xbf16>, vector<384x384xbf16>, vector<2x384xf32> -> vector<2x384xf32>
    %126 = arith.addf %121, %125 : vector<2x384xf32>
    %127 = vector.broadcast %117 : vector<1x384xf32> to vector<2x384xf32>
    %128 = arith.addf %126, %127 : vector<2x384xf32>
    %cst_49 = arith.constant 1.000000e+00 : f32
    %129 = vector.broadcast %cst_49 : f32 to vector<1x384xf32>
    %130 = arith.subf %129, %118 : vector<1x384xf32>
    %c0_50 = arith.constant 0 : index
    %c0_51 = arith.constant 0 : index
    %131 = vector.load %arg3[%c0_50, %c0_51] : memref<2x384xf32, #tpu.memory_space<vmem>>, vector<2x384xf32>
    %132 = vector.broadcast %130 : vector<1x384xf32> to vector<2x384xf32>
    %133 = arith.mulf %132, %131 : vector<2x384xf32>
    %134 = vector.broadcast %118 : vector<1x384xf32> to vector<2x384xf32>
    %135 = arith.mulf %134, %128 : vector<2x384xf32>
    %136 = arith.addf %133, %135 : vector<2x384xf32>
    %137 = math.tanh %136 : vector<2x384xf32>
    %138 = vector.extract_strided_slice %137 {offsets = [0, 0], sizes = [2, 32], strides = [1, 1]} : vector<2x384xf32> to vector<2x32xf32>
    %c0_52 = arith.constant 0 : index
    %c0_53 = arith.constant 0 : index
    %139 = vector.load %arg12[%c0_52, %c0_53] : memref<32x128xbf16, #tpu.memory_space<vmem>>, vector<32x128xbf16>
    %140 = arith.truncf %138 : vector<2x32xf32> to vector<2x32xbf16>
    %cst_54 = arith.constant dense<0.000000e+00> : vector<2x128xf32>
    %141 = tpu.matmul %140, %139, %cst_54 {dimension_numbers = #tpu.dot_dimension_numbers<[1], [0], [0], [1], [0, 0, 1, 1], [], []>} : vector<2x32xbf16>, vector<32x128xbf16>, vector<2x128xf32> -> vector<2x128xf32>
    %c2 = arith.constant 2 : index
    %c0_55 = arith.constant 0 : index
    %142 = vector.load %arg18[%c2, %c0_55] : memref<6x128xf32, #tpu.memory_space<vmem>>, vector<1x128xf32>
    %143 = vector.broadcast %142 : vector<1x128xf32> to vector<2x128xf32>
    %144 = arith.addf %141, %143 : vector<2x128xf32>
    %145 = math.tanh %144 : vector<2x128xf32>
    %146 = vector.extract_strided_slice %137 {offsets = [0, 0], sizes = [2, 128], strides = [1, 1]} : vector<2x384xf32> to vector<2x128xf32>
    %147 = tpu.concatenate %146, %145 in 1 : vector<2x128xf32>, vector<2x128xf32> -> vector<2x256xf32>
    %c0_56 = arith.constant 0 : index
    %c0_57 = arith.constant 0 : index
    %148 = vector.load %arg13[%c0_56, %c0_57] : memref<256x128xbf16, #tpu.memory_space<vmem>>, vector<256x128xbf16>
    %149 = arith.truncf %147 : vector<2x256xf32> to vector<2x256xbf16>
    %cst_58 = arith.constant dense<0.000000e+00> : vector<2x128xf32>
    %150 = tpu.matmul %149, %148, %cst_58 {dimension_numbers = #tpu.dot_dimension_numbers<[1], [0], [0], [1], [0, 0, 1, 1], [], []>} : vector<2x256xbf16>, vector<256x128xbf16>, vector<2x128xf32> -> vector<2x128xf32>
    %c3 = arith.constant 3 : index
    %c0_59 = arith.constant 0 : index
    %151 = vector.load %arg18[%c3, %c0_59] : memref<6x128xf32, #tpu.memory_space<vmem>>, vector<1x128xf32>
    %152 = vector.broadcast %151 : vector<1x128xf32> to vector<2x128xf32>
    %153 = arith.addf %150, %152 : vector<2x128xf32>
    %cst_60 = arith.constant 0.000000e+00 : f32
    %154 = vector.broadcast %cst_60 : f32 to vector<2x128xf32>
    %155 = arith.maximumf %153, %154 : vector<2x128xf32>
    %156 = vector.extract_strided_slice %155 {offsets = [0, 0], sizes = [2, 32], strides = [1, 1]} : vector<2x128xf32> to vector<2x32xf32>
    %c0_61 = arith.constant 0 : index
    %c0_62 = arith.constant 0 : index
    %157 = vector.load %arg14[%c0_61, %c0_62] : memref<32x2048xbf16, #tpu.memory_space<vmem>>, vector<32x2048xbf16>
    %158 = arith.truncf %156 : vector<2x32xf32> to vector<2x32xbf16>
    %cst_63 = arith.constant dense<0.000000e+00> : vector<2x2048xf32>
    %159 = tpu.matmul %158, %157, %cst_63 {dimension_numbers = #tpu.dot_dimension_numbers<[1], [0], [0], [1], [0, 0, 1, 1], [], []>} : vector<2x32xbf16>, vector<32x2048xbf16>, vector<2x2048xf32> -> vector<2x2048xf32>
    %c0_64 = arith.constant 0 : index
    %c0_65 = arith.constant 0 : index
    %160 = vector.load %arg19[%c0_64, %c0_65] : memref<1x2048xf32, #tpu.memory_space<vmem>>, vector<1x2048xf32>
    %161 = vector.broadcast %160 : vector<1x2048xf32> to vector<2x2048xf32>
    %162 = arith.addf %159, %161 : vector<2x2048xf32>
    %cst_66 = arith.constant 0.000000e+00 : f32
    %163 = vector.broadcast %cst_66 : f32 to vector<2x2048xf32>
    %164 = arith.maximumf %162, %163 : vector<2x2048xf32>
    %165 = vector.extract_strided_slice %164 {offsets = [0, 0], sizes = [2, 128], strides = [1, 1]} : vector<2x2048xf32> to vector<2x128xf32>
    %c0_67 = arith.constant 0 : index
    %c0_68 = arith.constant 0 : index
    %166 = vector.load %arg23[%c0_67, %c0_68] : memref<32x128xf32, #tpu.memory_space<vmem>>, vector<2x128xf32>
    tpu.vector_store %arg23[%c0_67, %c0_68], %165 {strides = array<i32>} : memref<32x128xf32, #tpu.memory_space<vmem>>, vector<2x128xf32>,
    %167 = vector.extract_strided_slice %164 {offsets = [0, 128], sizes = [2, 128], strides = [1, 1]} : vector<2x2048xf32> to vector<2x128xf32>
    %c2_69 = arith.constant 2 : index
    %c0_70 = arith.constant 0 : index
    %168 = vector.load %arg23[%c2_69, %c0_70] : memref<32x128xf32, #tpu.memory_space<vmem>>, vector<2x128xf32>
    tpu.vector_store %arg23[%c2_69, %c0_70], %167 {strides = array<i32>} : memref<32x128xf32, #tpu.memory_space<vmem>>, vector<2x128xf32>,
    %169 = vector.extract_strided_slice %164 {offsets = [0, 256], sizes = [2, 128], strides = [1, 1]} : vector<2x2048xf32> to vector<2x128xf32>
    %c4 = arith.constant 4 : index
    %c0_71 = arith.constant 0 : index
    %170 = vector.load %arg23[%c4, %c0_71] : memref<32x128xf32, #tpu.memory_space<vmem>>, vector<2x128xf32>
    tpu.vector_store %arg23[%c4, %c0_71], %169 {strides = array<i32>} : memref<32x128xf32, #tpu.memory_space<vmem>>, vector<2x128xf32>,
    %171 = vector.extract_strided_slice %164 {offsets = [0, 384], sizes = [2, 128], strides = [1, 1]} : vector<2x2048xf32> to vector<2x128xf32>
    %c6 = arith.constant 6 : index
    %c0_72 = arith.constant 0 : index
    %172 = vector.load %arg23[%c6, %c0_72] : memref<32x128xf32, #tpu.memory_space<vmem>>, vector<2x128xf32>
    tpu.vector_store %arg23[%c6, %c0_72], %171 {strides = array<i32>} : memref<32x128xf32, #tpu.memory_space<vmem>>, vector<2x128xf32>,
    %173 = vector.extract_strided_slice %164 {offsets = [0, 512], sizes = [2, 128], strides = [1, 1]} : vector<2x2048xf32> to vector<2x128xf32>
    %c8 = arith.constant 8 : index
    %c0_73 = arith.constant 0 : index
    %174 = vector.load %arg23[%c8, %c0_73] : memref<32x128xf32, #tpu.memory_space<vmem>>, vector<2x128xf32>
    tpu.vector_store %arg23[%c8, %c0_73], %173 {strides = array<i32>} : memref<32x128xf32, #tpu.memory_space<vmem>>, vector<2x128xf32>,
    %175 = vector.extract_strided_slice %164 {offsets = [0, 640], sizes = [2, 128], strides = [1, 1]} : vector<2x2048xf32> to vector<2x128xf32>
    %c10 = arith.constant 10 : index
    %c0_74 = arith.constant 0 : index
    %176 = vector.load %arg23[%c10, %c0_74] : memref<32x128xf32, #tpu.memory_space<vmem>>, vector<2x128xf32>
    tpu.vector_store %arg23[%c10, %c0_74], %175 {strides = array<i32>} : memref<32x128xf32, #tpu.memory_space<vmem>>, vector<2x128xf32>,
    %177 = vector.extract_strided_slice %164 {offsets = [0, 768], sizes = [2, 128], strides = [1, 1]} : vector<2x2048xf32> to vector<2x128xf32>
    %c12 = arith.constant 12 : index
    %c0_75 = arith.constant 0 : index
    %178 = vector.load %arg23[%c12, %c0_75] : memref<32x128xf32, #tpu.memory_space<vmem>>, vector<2x128xf32>
    tpu.vector_store %arg23[%c12, %c0_75], %177 {strides = array<i32>} : memref<32x128xf32, #tpu.memory_space<vmem>>, vector<2x128xf32>,
    %179 = vector.extract_strided_slice %164 {offsets = [0, 896], sizes = [2, 128], strides = [1, 1]} : vector<2x2048xf32> to vector<2x128xf32>
    %c14 = arith.constant 14 : index
    %c0_76 = arith.constant 0 : index
    %180 = vector.load %arg23[%c14, %c0_76] : memref<32x128xf32, #tpu.memory_space<vmem>>, vector<2x128xf32>
    tpu.vector_store %arg23[%c14, %c0_76], %179 {strides = array<i32>} : memref<32x128xf32, #tpu.memory_space<vmem>>, vector<2x128xf32>,
    %181 = vector.extract_strided_slice %164 {offsets = [0, 1024], sizes = [2, 128], strides = [1, 1]} : vector<2x2048xf32> to vector<2x128xf32>
    %c16 = arith.constant 16 : index
    %c0_77 = arith.constant 0 : index
    %182 = vector.load %arg23[%c16, %c0_77] : memref<32x128xf32, #tpu.memory_space<vmem>>, vector<2x128xf32>
    tpu.vector_store %arg23[%c16, %c0_77], %181 {strides = array<i32>} : memref<32x128xf32, #tpu.memory_space<vmem>>, vector<2x128xf32>,
    %183 = vector.extract_strided_slice %164 {offsets = [0, 1152], sizes = [2, 128], strides = [1, 1]} : vector<2x2048xf32> to vector<2x128xf32>
    %c18 = arith.constant 18 : index
    %c0_78 = arith.constant 0 : index
    %184 = vector.load %arg23[%c18, %c0_78] : memref<32x128xf32, #tpu.memory_space<vmem>>, vector<2x128xf32>
    tpu.vector_store %arg23[%c18, %c0_78], %183 {strides = array<i32>} : memref<32x128xf32, #tpu.memory_space<vmem>>, vector<2x128xf32>,
    %185 = vector.extract_strided_slice %164 {offsets = [0, 1280], sizes = [2, 128], strides = [1, 1]} : vector<2x2048xf32> to vector<2x128xf32>
    %c20 = arith.constant 20 : index
    %c0_79 = arith.constant 0 : index
    %186 = vector.load %arg23[%c20, %c0_79] : memref<32x128xf32, #tpu.memory_space<vmem>>, vector<2x128xf32>
    tpu.vector_store %arg23[%c20, %c0_79], %185 {strides = array<i32>} : memref<32x128xf32, #tpu.memory_space<vmem>>, vector<2x128xf32>,
    %187 = vector.extract_strided_slice %164 {offsets = [0, 1408], sizes = [2, 128], strides = [1, 1]} : vector<2x2048xf32> to vector<2x128xf32>
    %c22 = arith.constant 22 : index
    %c0_80 = arith.constant 0 : index
    %188 = vector.load %arg23[%c22, %c0_80] : memref<32x128xf32, #tpu.memory_space<vmem>>, vector<2x128xf32>
    tpu.vector_store %arg23[%c22, %c0_80], %187 {strides = array<i32>} : memref<32x128xf32, #tpu.memory_space<vmem>>, vector<2x128xf32>,
    %189 = vector.extract_strided_slice %164 {offsets = [0, 1536], sizes = [2, 128], strides = [1, 1]} : vector<2x2048xf32> to vector<2x128xf32>
    %c24 = arith.constant 24 : index
    %c0_81 = arith.constant 0 : index
    %190 = vector.load %arg23[%c24, %c0_81] : memref<32x128xf32, #tpu.memory_space<vmem>>, vector<2x128xf32>
    tpu.vector_store %arg23[%c24, %c0_81], %189 {strides = array<i32>} : memref<32x128xf32, #tpu.memory_space<vmem>>, vector<2x128xf32>,
    %191 = vector.extract_strided_slice %164 {offsets = [0, 1664], sizes = [2, 128], strides = [1, 1]} : vector<2x2048xf32> to vector<2x128xf32>
    %c26 = arith.constant 26 : index
    %c0_82 = arith.constant 0 : index
    %192 = vector.load %arg23[%c26, %c0_82] : memref<32x128xf32, #tpu.memory_space<vmem>>, vector<2x128xf32>
    tpu.vector_store %arg23[%c26, %c0_82], %191 {strides = array<i32>} : memref<32x128xf32, #tpu.memory_space<vmem>>, vector<2x128xf32>,
    %193 = vector.extract_strided_slice %164 {offsets = [0, 1792], sizes = [2, 128], strides = [1, 1]} : vector<2x2048xf32> to vector<2x128xf32>
    %c28 = arith.constant 28 : index
    %c0_83 = arith.constant 0 : index
    %194 = vector.load %arg23[%c28, %c0_83] : memref<32x128xf32, #tpu.memory_space<vmem>>, vector<2x128xf32>
    tpu.vector_store %arg23[%c28, %c0_83], %193 {strides = array<i32>} : memref<32x128xf32, #tpu.memory_space<vmem>>, vector<2x128xf32>,
    %195 = vector.extract_strided_slice %164 {offsets = [0, 1920], sizes = [2, 128], strides = [1, 1]} : vector<2x2048xf32> to vector<2x128xf32>
    %c30 = arith.constant 30 : index
    %c0_84 = arith.constant 0 : index
    %196 = vector.load %arg23[%c30, %c0_84] : memref<32x128xf32, #tpu.memory_space<vmem>>, vector<2x128xf32>
    tpu.vector_store %arg23[%c30, %c0_84], %195 {strides = array<i32>} : memref<32x128xf32, #tpu.memory_space<vmem>>, vector<2x128xf32>,
    %c0_85 = arith.constant 0 : index
    %c0_86 = arith.constant 0 : index
    %197 = vector.load %arg23[%c0_85, %c0_86] : memref<32x128xf32, #tpu.memory_space<vmem>>, vector<32x128xf32>
    %198 = vector.extract_strided_slice %197 {offsets = [0, 0], sizes = [32, 16], strides = [1, 1]} : vector<32x128xf32> to vector<32x16xf32>
    %c0_87 = arith.constant 0 : index
    %c0_88 = arith.constant 0 : index
    %199 = vector.load %arg15[%c0_87, %c0_88] : memref<16x1152xbf16, #tpu.memory_space<vmem>>, vector<16x1152xbf16>
    %200 = arith.truncf %198 : vector<32x16xf32> to vector<32x16xbf16>
    %cst_89 = arith.constant dense<0.000000e+00> : vector<32x1152xf32>
    %201 = tpu.matmul %200, %199, %cst_89 {dimension_numbers = #tpu.dot_dimension_numbers<[1], [0], [0], [1], [0, 0, 1, 1], [], []>} : vector<32x16xbf16>, vector<16x1152xbf16>, vector<32x1152xf32> -> vector<32x1152xf32>
    %202 = arith.truncf %201 : vector<32x1152xf32> to vector<32x1152xbf16>
    %203 = vector.extract_strided_slice %202 {offsets = [0, 0], sizes = [32, 128], strides = [1, 1]} : vector<32x1152xbf16> to vector<32x128xbf16>
    %204 = vector.extract_strided_slice %202 {offsets = [0, 128], sizes = [32, 128], strides = [1, 1]} : vector<32x1152xbf16> to vector<32x128xbf16>
    %205 = vector.extract_strided_slice %202 {offsets = [0, 256], sizes = [32, 128], strides = [1, 1]} : vector<32x1152xbf16> to vector<32x128xbf16>
    %206 = vector.extract_strided_slice %202 {offsets = [0, 384], sizes = [32, 128], strides = [1, 1]} : vector<32x1152xbf16> to vector<32x128xbf16>
    %207 = vector.extract_strided_slice %202 {offsets = [0, 512], sizes = [32, 128], strides = [1, 1]} : vector<32x1152xbf16> to vector<32x128xbf16>
    %208 = vector.extract_strided_slice %202 {offsets = [0, 640], sizes = [32, 128], strides = [1, 1]} : vector<32x1152xbf16> to vector<32x128xbf16>
    %209 = vector.extract_strided_slice %202 {offsets = [0, 768], sizes = [32, 128], strides = [1, 1]} : vector<32x1152xbf16> to vector<32x128xbf16>
    %210 = vector.extract_strided_slice %202 {offsets = [0, 896], sizes = [32, 128], strides = [1, 1]} : vector<32x1152xbf16> to vector<32x128xbf16>
    %211 = vector.extract_strided_slice %202 {offsets = [0, 1024], sizes = [32, 128], strides = [1, 1]} : vector<32x1152xbf16> to vector<32x128xbf16>
    %212 = tpu.concatenate %203, %204, %205, %206, %207, %208, %209, %210, %211 in 0 : vector<32x128xbf16>, vector<32x128xbf16>, vector<32x128xbf16>, vector<32x128xbf16>, vector<32x128xbf16>, vector<32x128xbf16>, vector<32x128xbf16>, vector<32x128xbf16>, vector<32x128xbf16> -> vector<288x128xbf16>
    %c0_90 = arith.constant 0 : index
    %c0_91 = arith.constant 0 : index
    %213 = vector.load %arg5[%c0_90, %c0_91] : memref<128x288xbf16, #tpu.memory_space<vmem>>, vector<128x288xbf16>
    %cst_92 = arith.constant dense<0.000000e+00> : vector<128x128xf32>
    %214 = tpu.matmul %213, %212, %cst_92 {dimension_numbers = #tpu.dot_dimension_numbers<[1], [0], [0], [1], [0, 0, 1, 1], [], []>} : vector<128x288xbf16>, vector<288x128xbf16>, vector<128x128xf32> -> vector<128x128xf32>
    %c4_93 = arith.constant 4 : index
    %c0_94 = arith.constant 0 : index
    %215 = vector.load %arg18[%c4_93, %c0_94] : memref<6x128xf32, #tpu.memory_space<vmem>>, vector<1x128xf32>
    %216 = vector.broadcast %215 : vector<1x128xf32> to vector<128x128xf32>
    %217 = arith.addf %214, %216 : vector<128x128xf32>
    %cst_95 = arith.constant 0.000000e+00 : f32
    %218 = vector.broadcast %cst_95 : f32 to vector<128x128xf32>
    %219 = arith.maximumf %217, %218 : vector<128x128xf32>
    %220 = vector.extract_strided_slice %219 {offsets = [0, 0], sizes = [128, 8], strides = [1, 1]} : vector<128x128xf32> to vector<128x8xf32>
    %c0_96 = arith.constant 0 : index
    %c0_97 = arith.constant 0 : index
    %221 = vector.load %arg16[%c0_96, %c0_97] : memref<8x1152xbf16, #tpu.memory_space<vmem>>, vector<8x1152xbf16>
    %222 = arith.truncf %220 : vector<128x8xf32> to vector<128x8xbf16>
    %cst_98 = arith.constant dense<0.000000e+00> : vector<128x1152xf32>
    %223 = tpu.matmul %222, %221, %cst_98 {dimension_numbers = #tpu.dot_dimension_numbers<[1], [0], [0], [1], [0, 0, 1, 1], [], []>} : vector<128x8xbf16>, vector<8x1152xbf16>, vector<128x1152xf32> -> vector<128x1152xf32>
    %224 = arith.truncf %223 : vector<128x1152xf32> to vector<128x1152xbf16>
    %c0_99 = arith.constant 0 : index
    %c0_100 = arith.constant 0 : index
    %225 = vector.load %arg6[%c0_99, %c0_100] : memref<256x576xbf16, #tpu.memory_space<vmem>>, vector<256x576xbf16>
    %c5 = arith.constant 5 : index
    %c0_101 = arith.constant 0 : index
    %226 = vector.load %arg18[%c5, %c0_101] : memref<6x128xf32, #tpu.memory_space<vmem>>, vector<1x128xf32>
    %227 = vector.extract_strided_slice %224 {offsets = [0, 0], sizes = [64, 128], strides = [1, 1]} : vector<128x1152xbf16> to vector<64x128xbf16>
    %228 = vector.extract_strided_slice %224 {offsets = [0, 128], sizes = [64, 128], strides = [1, 1]} : vector<128x1152xbf16> to vector<64x128xbf16>
    %229 = vector.extract_strided_slice %224 {offsets = [0, 256], sizes = [64, 128], strides = [1, 1]} : vector<128x1152xbf16> to vector<64x128xbf16>
    %230 = vector.extract_strided_slice %224 {offsets = [0, 384], sizes = [64, 128], strides = [1, 1]} : vector<128x1152xbf16> to vector<64x128xbf16>
    %231 = vector.extract_strided_slice %224 {offsets = [0, 512], sizes = [64, 128], strides = [1, 1]} : vector<128x1152xbf16> to vector<64x128xbf16>
    %232 = vector.extract_strided_slice %224 {offsets = [0, 640], sizes = [64, 128], strides = [1, 1]} : vector<128x1152xbf16> to vector<64x128xbf16>
    %233 = vector.extract_strided_slice %224 {offsets = [0, 768], sizes = [64, 128], strides = [1, 1]} : vector<128x1152xbf16> to vector<64x128xbf16>
    %234 = vector.extract_strided_slice %224 {offsets = [0, 896], sizes = [64, 128], strides = [1, 1]} : vector<128x1152xbf16> to vector<64x128xbf16>
    %235 = vector.extract_strided_slice %224 {offsets = [0, 1024], sizes = [64, 128], strides = [1, 1]} : vector<128x1152xbf16> to vector<64x128xbf16>
    %236 = tpu.concatenate %227, %228, %229, %230, %231, %232, %233, %234, %235 in 0 : vector<64x128xbf16>, vector<64x128xbf16>, vector<64x128xbf16>, vector<64x128xbf16>, vector<64x128xbf16>, vector<64x128xbf16>, vector<64x128xbf16>, vector<64x128xbf16>, vector<64x128xbf16> -> vector<576x128xbf16>
    %cst_102 = arith.constant dense<0.000000e+00> : vector<256x128xf32>
    %237 = tpu.matmul %225, %236, %cst_102 {dimension_numbers = #tpu.dot_dimension_numbers<[1], [0], [0], [1], [0, 0, 1, 1], [], []>} : vector<256x576xbf16>, vector<576x128xbf16>, vector<256x128xf32> -> vector<256x128xf32>
    %238 = vector.broadcast %226 : vector<1x128xf32> to vector<256x128xf32>
    %239 = arith.addf %237, %238 : vector<256x128xf32>
    %240 = arith.negf %239 : vector<256x128xf32>
    %241 = math.exp %240 : vector<256x128xf32>
    %cst_103 = arith.constant 1.000000e+00 : f32
    %242 = vector.broadcast %cst_103 : f32 to vector<256x128xf32>
    %243 = arith.addf %242, %241 : vector<256x128xf32>
    %244 = arith.divf %242, %243 : vector<256x128xf32>
    %245 = arith.truncf %244 : vector<256x128xf32> to vector<256x128xbf16>
    %c0_104 = arith.constant 0 : index
    %c0_105 = arith.constant 0 : index
    %246 = vector.load %arg22[%c0_104, %c0_105] : memref<512x128xbf16, #tpu.memory_space<vmem>>, vector<256x128xbf16>
    tpu.vector_store %arg22[%c0_104, %c0_105], %245 {strides = array<i32>} : memref<512x128xbf16, #tpu.memory_space<vmem>>, vector<256x128xbf16>,
    %247 = vector.extract_strided_slice %224 {offsets = [64, 0], sizes = [64, 128], strides = [1, 1]} : vector<128x1152xbf16> to vector<64x128xbf16>
    %248 = vector.extract_strided_slice %224 {offsets = [64, 128], sizes = [64, 128], strides = [1, 1]} : vector<128x1152xbf16> to vector<64x128xbf16>
    %249 = vector.extract_strided_slice %224 {offsets = [64, 256], sizes = [64, 128], strides = [1, 1]} : vector<128x1152xbf16> to vector<64x128xbf16>
    %250 = vector.extract_strided_slice %224 {offsets = [64, 384], sizes = [64, 128], strides = [1, 1]} : vector<128x1152xbf16> to vector<64x128xbf16>
    %251 = vector.extract_strided_slice %224 {offsets = [64, 512], sizes = [64, 128], strides = [1, 1]} : vector<128x1152xbf16> to vector<64x128xbf16>
    %252 = vector.extract_strided_slice %224 {offsets = [64, 640], sizes = [64, 128], strides = [1, 1]} : vector<128x1152xbf16> to vector<64x128xbf16>
    %253 = vector.extract_strided_slice %224 {offsets = [64, 768], sizes = [64, 128], strides = [1, 1]} : vector<128x1152xbf16> to vector<64x128xbf16>
    %254 = vector.extract_strided_slice %224 {offsets = [64, 896], sizes = [64, 128], strides = [1, 1]} : vector<128x1152xbf16> to vector<64x128xbf16>
    %255 = vector.extract_strided_slice %224 {offsets = [64, 1024], sizes = [64, 128], strides = [1, 1]} : vector<128x1152xbf16> to vector<64x128xbf16>
    %256 = tpu.concatenate %247, %248, %249, %250, %251, %252, %253, %254, %255 in 0 : vector<64x128xbf16>, vector<64x128xbf16>, vector<64x128xbf16>, vector<64x128xbf16>, vector<64x128xbf16>, vector<64x128xbf16>, vector<64x128xbf16>, vector<64x128xbf16>, vector<64x128xbf16> -> vector<576x128xbf16>
    %cst_106 = arith.constant dense<0.000000e+00> : vector<256x128xf32>
    %257 = tpu.matmul %225, %256, %cst_106 {dimension_numbers = #tpu.dot_dimension_numbers<[1], [0], [0], [1], [0, 0, 1, 1], [], []>} : vector<256x576xbf16>, vector<576x128xbf16>, vector<256x128xf32> -> vector<256x128xf32>
    %258 = vector.broadcast %226 : vector<1x128xf32> to vector<256x128xf32>
    %259 = arith.addf %257, %258 : vector<256x128xf32>
    %260 = arith.negf %259 : vector<256x128xf32>
    %261 = math.exp %260 : vector<256x128xf32>
    %cst_107 = arith.constant 1.000000e+00 : f32
    %262 = vector.broadcast %cst_107 : f32 to vector<256x128xf32>
    %263 = arith.addf %262, %261 : vector<256x128xf32>
    %264 = arith.divf %262, %263 : vector<256x128xf32>
    %265 = arith.truncf %264 : vector<256x128xf32> to vector<256x128xbf16>
    %c256 = arith.constant 256 : index
    %c0_108 = arith.constant 0 : index
    %266 = vector.load %arg22[%c256, %c0_108] : memref<512x128xbf16, #tpu.memory_space<vmem>>, vector<256x128xbf16>
    tpu.vector_store %arg22[%c256, %c0_108], %265 {strides = array<i32>} : memref<512x128xbf16, #tpu.memory_space<vmem>>, vector<256x128xbf16>,
    %267 = tpu.concatenate %137, %136, %145 in 1 : vector<2x384xf32>, vector<2x384xf32>, vector<2x128xf32> -> vector<2x896xf32>
    %c0_109 = arith.constant 0 : index
    %c0_110 = arith.constant 0 : index
    %268 = vector.load %arg21[%c0_109, %c0_110] : memref<2x896xf32, #tpu.memory_space<vmem>>, vector<2x896xf32>
    tpu.vector_store %arg21[%c0_109, %c0_110], %267 {strides = array<i32>} : memref<2x896xf32, #tpu.memory_space<vmem>>, vector<2x896xf32>,
    return
  }
}

</mosaic_0001>

<bundles_post_ra>
// kernel: aemtrnnpb_forward.1
= control target key start
LH: loop header
LB: loop body
LE: loop exit
PB: predicated region body
PF: predicated region fallthrough
CT: control target
= control target key end

     0   :  { %vm174_vm0 = vcmask 1044480   ;;  %vm175_vm1 = vcmask 1045504   ;;  %vm149_vm2 = vcmask 220160   ;;  %v10705_v1 = vmov 65535   ;;  %s13563_s7 = inlined_call_operand.vmem [shape: bf16[27,8], index: 7, kind: input, shape index: {}]   ;;  %s13564_s0 = inlined_call_operand.vmem [shape: bf16[128,27], index: 0, kind: input, shape index: {}]   ;;  %s13565_s8 = inlined_call_operand.vmem [shape: bf16[8,1152], index: 8, kind: input, shape index: {}]   ;;  %s13566_s17 = inlined_call_operand.vmem [shape: f32[1,8], index: 17, kind: input, shape index: {}]   ;;  %s13567_s4 = inlined_call_operand.vmem [shape: bf16[32,1152], index: 4, kind: input, shape index: {}]   ;;  %s13568_s9 = inlined_call_operand.vmem [shape: bf16[256,128], index: 9, kind: input, shape index: {}]   ;;  %s13569_s18 = inlined_call_operand.vmem [shape: f32[6,128], index: 18, kind: input, shape index: {}]   ;;  %s13570_s11 = inlined_call_operand.vmem [shape: bf16[384,384], index: 11, kind: input, shape index: {}]   ;;  %s13571_s2 = inlined_call_operand.vmem [shape: f32[2,384], index: 2, kind: input, shape index: {}, may-alias: {2,3}]   ;;  %s13572_s10 = inlined_call_operand.vmem [shape: bf16[256,384], index: 10, kind: input, shape index: {}]   ;;  %s13573_s1 = inlined_call_operand.vmem [shape: f32[2,128], index: 1, kind: input, shape index: {}]   ;;  %s13574_s12 = inlined_call_operand.vmem [shape: bf16[32,128], index: 12, kind: input, shape index: {}]   ;;  %s13575_s13 = inlined_call_operand.vmem [shape: bf16[256,128], index: 13, kind: input, shape index: {}]   ;;  %s13576_s20 = inlined_call_operand.vmem [shape: f32[2,384], index: 20, kind: input, shape index: {}]   ;;  %s13577_s3 = inlined_call_operand.vmem [shape: f32[2,384], index: 3, kind: input, shape index: {}, may-alias: {2,3}]   ;;  %s13578_s21 = inlined_call_operand.vmem [shape: f32[2,896], index: 21, kind: output, shape index: {0}]   ;;  %s13579_s14 = inlined_call_operand.vmem [shape: bf16[32,2048], index: 14, kind: input, shape index: {}]   ;;  %s13580_s15 = inlined_call_operand.vmem [shape: bf16[16,1152], index: 15, kind: input, shape index: {}]   ;;  %s13581_s19 = inlined_call_operand.vmem [shape: f32[1,2048], index: 19, kind: input, shape index: {}]   ;;  %s13582_s5 = inlined_call_operand.vmem [shape: bf16[128,288], index: 5, kind: input, shape index: {}]   ;;  %s13583_s16 = inlined_call_operand.vmem [shape: bf16[8,1152], index: 16, kind: input, shape index: {}]   ;;  %s13584_s6 = inlined_call_operand.vmem [shape: bf16[256,576], index: 6, kind: input, shape index: {}]   ;;  %s13585_s22 = inlined_call_operand.vmem [shape: bf16[512,128], index: 22, kind: output, shape index: {1}]  }
   0x1   :  { %13620 = sst [smem:[#allocation31_spill]] %s13563_s7  ;;  %v176_v2 = vsel %vm174_vm0, 4294967295, %v10705_v1  ;;  %vm355_vm3 = vcmask 1043456   ;;  %v10706_v22 = vmov 0   ;;  %vm330_vm4 = vcmask 64512  }
   0x2   :  { %13621 = sst [smem:[#allocation32_spill]] %s13564_s0  ;;  %s13627_s29 = sld [smem:[#allocation31_spill]]  ;;  %v177_v4 = vsel %vm175_vm1, %v176_v2, 0  ;;  %415 = vmatprep.mubr.bf16.mxu1 %v10706_v22  ;;  %vm10708_vm5 = vmmov 0   ;;  %vm1411_vm6 = vcmask 130048   ;;  %vm3408_vm7 = vcmask 261120  }
   0x3   :  { %13622 = sst [smem:[#allocation33_spill]] %s13565_s8  ;;  %s13628_s0 = sld [smem:[#allocation32_spill]]  ;;  %vm6215_vm8 = vcmask 523264  }
   0x4   :  { %13623 = sst [smem:[#allocation34_spill]] %s13566_s17 }
   0x5   :  { %13624 = sst [smem:[#allocation35_spill]] %s13567_s4  ;;  %s13630_s30 = sld [smem:[#allocation34_spill]] }
   0x6   :  { %13625 = sst [smem:[#allocation36_spill]] %s13568_s9  ;;  %s13631_s24 = sld [smem:[#allocation35_spill]] }
   0x7   :  { %13626 = sst [smem:[#allocation37_spill]] %s13569_s18  ;;  %s13629_s18 = sld [smem:[#allocation33_spill]] }
   0x8   :  { %v10031_v0 = vld [vmem:[%s13627_s29] sm:$0xff]   ;;  %v10032_v3 = vld [vmem:[%s13627_s29 + $0x8] sm:$0x3f]   ;;  %s13632_s29 = sld [smem:[#allocation36_spill]]  ;;  %s13633_s23 = sld [smem:[#allocation37_spill]] }
   0x9   :  { %9718 = vmatprep.subr.bf16.mxu0 %v10031_v0  ;;  %v10033_v5 = vld [vmem:[%s13628_s0] sm:$0xff]   ;;  %v179_v6 = vand.u32 %v10032_v3, %v177_v4  ;;  %v10034_v7 = vld [vmem:[%s13628_s0 + $0x8] sm:$0xff]   ;;  %v10035_v8 = vld [vmem:[%s13628_s0 + $0x10] sm:$0xff]  }
   0xa   :  { %9719 = vmatpush3.bf16.msra.mxu0 %v10031_v0  ;;  %9722 = vmatprep.mubr.msk.bf16.mxu0 %vm149_vm2, %v10033_v5  ;;  %v10036_v9 = vld [vmem:[%s13628_s0 + $0x18] sm:$0xff]   ;;  %v10037_v10 = vld [vmem:[%s13628_s0 + $0x20] sm:$0xff]   ;;  %v10038_v11 = vld [vmem:[%s13628_s0 + $0x28] sm:$0xff]  }
   0xb   :  { %9720 = vmatprep.subr.bf16.mxu0 %v179_v6  ;;  %v10039_v12 = vld [vmem:[%s13628_s0 + $0x30] sm:$0xff]   ;;  %v10040_v13 = vld [vmem:[%s13628_s0 + $0x38] sm:$0xff]   ;;  %v10886_v27 = vld [vmem:[%s13630_s30] ss:$0 sm:$0xff] }
   0xd   :  { %v294_v14 = vld [vmem:[%s13629_s18] sm:$0xff]  ;;  %v295_v15 = vld [vmem:[%s13629_s18 + $0x8] sm:$0xff]  ;;  %v296_v23 = vld [vmem:[%s13629_s18 + $0x10] sm:$0xff] }
   0xe   :  { %9721 = vmatpush3.bf16.msra.mxu0 %v179_v6  ;;  %v8006_v16 = vcombine.high %v294_v14, %v294_v14  ;;  %v8008_v17 = vcombine.high %v295_v15, %v295_v15  ;;  %v8005_v18 = vcombine.low %v294_v14, %v294_v14  ;;  %v8007_v19 = vcombine.low %v295_v15, %v295_v15  ;;  %v297_v25 = vld [vmem:[%s13629_s18 + $0x18] sm:$0xff]  ;;  %v10902_v49 = vld [vmem:[%s13629_s18 + $0x20] ss:$0 sps:$4 sm:$0xff]  }
   0xf   :  { %v8010_v24 = vcombine.high %v296_v23, %v296_v23  ;;  %v8012_v26 = vcombine.high %v297_v25, %v297_v25  ;;  %v8009_v38 = vcombine.low %v296_v23, %v296_v23  ;;  %v8011_v39 = vcombine.low %v297_v25, %v297_v25 }
  0x10   :  { %8014 = vmatprep.subr.msk.bf16.mxu1 %vm355_vm3, %v8006_v16  ;;  %8023 = vmatprep.subr.msk.bf16.mxu0 %vm355_vm3, %v8008_v17  ;;  %v357_v20 = vsel %vm355_vm3, %v8005_v18, 0  ;;  %v363_v21 = vsel %vm355_vm3, %v8007_v19, 0 }
  0x11   :  { %9723 = vmatmul.mubr.msk.bf16.vlgmr.msra.gmra.mrb[0].mxu0 %vm149_vm2, %v10034_v7  ;;  %384 = vmatpush1.bf16.msra.mxu1 %v357_v20  ;;  %v369_v47 = vsel %vm355_vm3, %v8009_v38, 0  ;;  %v375_v48 = vsel %vm355_vm3, %v8011_v39, 0 }
  0x12   :  { %9726 = vmatprep.mubr.msk.bf16.mxu0 %vm149_vm2, %v10035_v8  ;;  %497 = vmatpush1.bf16.msra.mxu0 %v363_v21 }
  0x13   :  { %8032 = vmatprep.subr.msk.bf16.mxu1 %vm355_vm3, %v8010_v24  ;;  %8041 = vmatprep.subr.msk.bf16.mxu0 %vm355_vm3, %v8012_v26  ;;  %v381_v26 = vsel %vm355_vm3, %v10902_v49, 0 }
  0x19   :  { %9727 = vmatmul.mubr.msk.bf16.gmra.mrb[4].mxu0 %vm149_vm2, %v10036_v9 }
  0x1a   :  { %9730 = vmatprep.mubr.msk.bf16.mxu0 %vm149_vm2, %v10037_v10 }
  0x21   :  { %9731 = vmatmul.mubr.msk.bf16.gmra.mrb[8].mxu0 %vm149_vm2, %v10038_v11 }
  0x22   :  { %9734 = vmatprep.mubr.msk.bf16.mxu0 %vm149_vm2, %v10039_v12 }
  0x29   :  { %9735 = vmatmul.mubr.msk.bf16.gmra.mrb[12].mxu0 %vm149_vm2, %v10040_v13 }
  0x2a   :  { %528 = vmatprep.mubr.bf16.mxu0 %v10706_v22 }
  0xe4   :  { %v9724_v28 = vpop.f32.mrb[0].mxu0 }
  0xe5   :  { %v224_v29 = vadd.f32 %v9724_v28, %v10886_v27  ;;  %v215_v30 = vpop.f32.mrb[1].mxu0  ;;  %v10055_v28 = vld [vmem:[%s13631_s24 + $0xc] ss:$36 sps:$4 sm:$0xff]  }
  0xe6   :  { %v216_v31 = vadd.f32 %v10886_v27, %v215_v30  ;;  %v9725_v32 = vpop.f32.mrb[2].mxu0 }
  0xe7   :  { %v227_v33 = vadd.f32 %v9725_v32, %v10886_v27  ;;  %v218_v34 = vpop.f32.mrb[3].mxu0  ;;  %v280_v36 = vmax.f32 %v224_v29, 0.0 }
  0xe8   :  { %v219_v35 = vadd.f32 %v10886_v27, %v218_v34  ;;  %v278_v40 = vmax.f32 %v216_v31, 0.0 }
  0xe9   :  { %v281_v37 = vmax.f32 %v227_v33, 0.0 }
  0xea   :  { %v279_v41 = vmax.f32 %v219_v35, 0.0 }
  0xeb   :  { %v10892_v42 = vpack.c.bf16 %v281_v37, %v280_v36 }
  0xec   :  { %v10894_v43 = vpack.c.bf16 %v279_v41, %v278_v40  ;;  %v9728_v44 = vpop.f32.mrb[4].mxu0 }
  0xed   :  { %v240_v45 = vadd.f32 %v9728_v44, %v10886_v27  ;;  %v231_v46 = vpop.f32.mrb[5].mxu0 }
  0xee   :  { %8015 = vmatmul.mubr.msk.bf16.vlgmr.msra.gmra.mrb[0].mxu1 %vm330_vm4, %v10894_v43  ;;  %8024 = vmatmul.mubr.msk.bf16.vlgmr.msra.gmra.mrb[16].mxu0 %vm330_vm4, %v10894_v43  ;;  %v232_v50 = vadd.f32 %v10886_v27, %v231_v46  ;;  %v9729_v51 = vpop.f32.mrb[6].mxu0 }
  0xef   :  { %v284_v52 = vmax.f32 %v240_v45, 0.0  ;;  %v243_v53 = vadd.f32 %v9729_v51, %v10886_v27  ;;  %v234_v54 = vpop.f32.mrb[7].mxu0  ;;  %425 = vmatprep.mubr.bf16.mxu1 %v10706_v22  ;;  %538 = vmatprep.mubr.bf16.mxu0 %v10706_v22 }
  0xf0   :  { %v282_v55 = vmax.f32 %v232_v50, 0.0  ;;  %v235_v56 = vadd.f32 %v10886_v27, %v234_v54  ;;  %610 = vmatpush1.bf16.msra.mxu1 %v369_v47  ;;  %723 = vmatpush1.bf16.msra.mxu0 %v375_v48 }
  0xf1   :  { %v285_v57 = vmax.f32 %v243_v53, 0.0  ;;  %10024 = vmatprep.subr.msk.bf16.mxu1 %vm355_vm3, %v10902_v49 }
  0xf2   :  { %v283_v58 = vmax.f32 %v235_v56, 0.0 }
  0xf3   :  { %v10915_v59 = vpack.c.bf16 %v285_v57, %v284_v52 }
  0xf4   :  { %v10917_v60 = vpack.c.bf16 %v283_v58, %v282_v55  ;;  %v9732_v61 = vpop.f32.mrb[8].mxu0 }
  0xf5   :  { %v256_v62 = vadd.f32 %v9732_v61, %v10886_v27  ;;  %v247_v63 = vpop.f32.mrb[9].mxu0 }
  0xf6   :  { %8016 = vmatmul.mubr.msk.bf16.gmra.mrb[4].mxu1 %vm330_vm4, %v10892_v42  ;;  %8025 = vmatmul.mubr.msk.bf16.gmra.mrb[20].mxu0 %vm330_vm4, %v10892_v42  ;;  %v248_v0 = vadd.f32 %v10886_v27, %v247_v63  ;;  %v9733_v1 = vpop.f32.mrb[10].mxu0 }
  0xf7   :  { %435 = vmatprep.mubr.bf16.mxu1 %v10706_v22  ;;  %548 = vmatprep.mubr.bf16.mxu0 %v10706_v22  ;;  %v288_v2 = vmax.f32 %v256_v62, 0.0  ;;  %v259_v3 = vadd.f32 %v9733_v1, %v10886_v27  ;;  %v250_v4 = vpop.f32.mrb[11].mxu0 }
  0xf8   :  { %v286_v5 = vmax.f32 %v248_v0, 0.0  ;;  %v251_v6 = vadd.f32 %v10886_v27, %v250_v4 }
  0xf9   :  { %v289_v7 = vmax.f32 %v259_v3, 0.0 }
  0xfa   :  { %v287_v8 = vmax.f32 %v251_v6, 0.0 }
  0xfb   :  { %v10929_v9 = vpack.c.bf16 %v289_v7, %v288_v2 }
  0xfc   :  { %v10931_v10 = vpack.c.bf16 %v287_v8, %v286_v5  ;;  %v9736_v11 = vpop.f32.mrb[12].mxu0 }
  0xfd   :  { %v272_v12 = vadd.f32 %v9736_v11, %v10886_v27  ;;  %v263_v13 = vpop.f32.mrb[13].mxu0 }
  0xfe   :  { %8017 = vmatmul.mubr.msk.bf16.gmra.mrb[8].mxu1 %vm330_vm4, %v10917_v60  ;;  %8026 = vmatmul.mubr.msk.bf16.gmra.mrb[24].mxu0 %vm330_vm4, %v10917_v60  ;;  %v264_v14 = vadd.f32 %v10886_v27, %v263_v13  ;;  %v9737_v15 = vpop.f32.mrb[14].mxu0 }
  0xff   :  { %445 = vmatprep.mubr.bf16.mxu1 %v10706_v22  ;;  %558 = vmatprep.mubr.bf16.mxu0 %v10706_v22  ;;  %v292_v16 = vmax.f32 %v272_v12, 0.0  ;;  %v275_v17 = vadd.f32 %v9737_v15, %v10886_v27  ;;  %v266_v18 = vpop.f32.mrb[15].mxu0 }
 0x100   :  { %v290_v19 = vmax.f32 %v264_v14, 0.0  ;;  %v267_v20 = vadd.f32 %v10886_v27, %v266_v18  ;;  %v10052_v27 = vld [vmem:[%s13631_s24 + $0x4] ss:$36 sps:$4 sm:$0xff]  }
 0x101   :  { %v293_v21 = vmax.f32 %v275_v17, 0.0 }
 0x102   :  { %v291_v23 = vmax.f32 %v267_v20, 0.0 }
 0x103   :  { %v306_v24 = vpack.c.bf16 %v293_v21, %v292_v16 }
 0x104   :  { %v305_v25 = vpack.c.bf16 %v291_v23, %v290_v19 }
 0x106   :  { %8018 = vmatmul.mubr.msk.bf16.gmra.mrb[12].mxu1 %vm330_vm4, %v10915_v59  ;;  %8027 = vmatmul.mubr.msk.bf16.gmra.mrb[28].mxu0 %vm330_vm4, %v10915_v59 }
 0x107   :  { %455 = vmatprep.mubr.bf16.mxu1 %v10706_v22  ;;  %568 = vmatprep.mubr.bf16.mxu0 %v10706_v22 }
 0x10e   :  { %8019 = vmatmul.mubr.msk.bf16.gmra.mrb[16].mxu1 %vm330_vm4, %v10931_v10  ;;  %8028 = vmatmul.mubr.msk.bf16.gmra.mrb[32].mxu0 %vm330_vm4, %v10931_v10 }
 0x10f   :  { %465 = vmatprep.mubr.bf16.mxu1 %v10706_v22  ;;  %578 = vmatprep.mubr.bf16.mxu0 %v10706_v22 }
 0x116   :  { %8020 = vmatmul.mubr.msk.bf16.gmra.mrb[20].mxu1 %vm330_vm4, %v10929_v9  ;;  %8029 = vmatmul.mubr.msk.bf16.gmra.mrb[36].mxu0 %vm330_vm4, %v10929_v9 }
 0x117   :  { %475 = vmatprep.mubr.bf16.mxu1 %v10706_v22  ;;  %588 = vmatprep.mubr.bf16.mxu0 %v10706_v22 }
 0x11e   :  { %8021 = vmatmul.mubr.msk.bf16.gmra.mrb[24].mxu1 %vm330_vm4, %v305_v25  ;;  %8030 = vmatmul.mubr.msk.bf16.gmra.mrb[40].mxu0 %vm330_vm4, %v305_v25 }
 0x11f   :  { %485 = vmatprep.mubr.bf16.mxu1 %v10706_v22  ;;  %598 = vmatprep.mubr.bf16.mxu0 %v10706_v22 }
 0x126   :  { %8022 = vmatmul.mubr.msk.bf16.gmra.mrb[28].mxu1 %vm330_vm4, %v306_v24  ;;  %8031 = vmatmul.mubr.msk.bf16.gmra.mrb[44].mxu0 %vm330_vm4, %v306_v24 }
 0x127   :  { %641 = vmatprep.mubr.bf16.mxu1 %v10706_v22  ;;  %754 = vmatprep.mubr.bf16.mxu0 %v10706_v22 }
 0x12e   :  { %8033 = vmatmul.mubr.msk.bf16.vlgmr.msra.gmra.mrb[32].mxu1 %vm330_vm4, %v10894_v43  ;;  %8042 = vmatmul.mubr.msk.bf16.vlgmr.msra.gmra.mrb[48].mxu0 %vm330_vm4, %v10894_v43 }
 0x12f   :  { %651 = vmatprep.mubr.bf16.mxu1 %v10706_v22  ;;  %764 = vmatprep.mubr.bf16.mxu0 %v10706_v22 }
 0x130   :  { %9739 = vmatpush3.bf16.msra.mxu1 %v381_v26 }
 0x136   :  { %8034 = vmatmul.mubr.msk.bf16.gmra.mrb[36].mxu1 %vm330_vm4, %v10892_v42  ;;  %8043 = vmatmul.mubr.msk.bf16.gmra.mrb[52].mxu0 %vm330_vm4, %v10892_v42 }
 0x137   :  { %661 = vmatprep.mubr.bf16.mxu1 %v10706_v22  ;;  %774 = vmatprep.mubr.bf16.mxu0 %v10706_v22 }
 0x13e   :  { %8035 = vmatmul.mubr.msk.bf16.gmra.mrb[40].mxu1 %vm330_vm4, %v10917_v60  ;;  %8044 = vmatmul.mubr.msk.bf16.gmra.mrb[56].mxu0 %vm330_vm4, %v10917_v60 }
 0x13f   :  { %671 = vmatprep.mubr.bf16.mxu1 %v10706_v22  ;;  %784 = vmatprep.mubr.bf16.mxu0 %v10706_v22 }
 0x146   :  { %8036 = vmatmul.mubr.msk.bf16.gmra.mrb[44].mxu1 %vm330_vm4, %v10915_v59  ;;  %8045 = vmatmul.mubr.msk.bf16.gmra.mrb[60].mxu0 %vm330_vm4, %v10915_v59 }
 0x147   :  { %681 = vmatprep.mubr.bf16.mxu1 %v10706_v22  ;;  %794 = vmatprep.mubr.bf16.mxu0 %v10706_v22 }
 0x14e   :  { %8037 = vmatmul.mubr.msk.bf16.gmra.mrb[48].mxu1 %vm330_vm4, %v10931_v10  ;;  %8046 = vmatmul.mubr.msk.bf16.gmra.mrb[64].mxu0 %vm330_vm4, %v10931_v10 }
 0x14f   :  { %691 = vmatprep.mubr.bf16.mxu1 %v10706_v22  ;;  %804 = vmatprep.mubr.bf16.mxu0 %v10706_v22 }
 0x156   :  { %8038 = vmatmul.mubr.msk.bf16.gmra.mrb[52].mxu1 %vm330_vm4, %v10929_v9  ;;  %8047 = vmatmul.mubr.msk.bf16.gmra.mrb[68].mxu0 %vm330_vm4, %v10929_v9 }
 0x157   :  { %701 = vmatprep.mubr.bf16.mxu1 %v10706_v22  ;;  %814 = vmatprep.mubr.bf16.mxu0 %v10706_v22 }
 0x15e   :  { %8039 = vmatmul.mubr.msk.bf16.gmra.mrb[56].mxu1 %vm330_vm4, %v305_v25  ;;  %8048 = vmatmul.mubr.msk.bf16.gmra.mrb[72].mxu0 %vm330_vm4, %v305_v25 }
 0x15f   :  { %711 = vmatprep.mubr.bf16.mxu1 %v10706_v22  ;;  %824 = vmatprep.mubr.bf16.mxu0 %v10706_v22 }
 0x166   :  { %8040 = vmatmul.mubr.msk.bf16.gmra.mrb[60].mxu1 %vm330_vm4, %v306_v24  ;;  %8049 = vmatmul.mubr.msk.bf16.gmra.mrb[76].mxu0 %vm330_vm4, %v306_v24 }
 0x167   :  { %9740 = vmatprep.mubr.msk.bf16.mxu1 %vm330_vm4, %v10894_v43  ;;  %1202 = vmatprep.mubr.bf16.mxu0 %v10055_v28 }
 0x16e   :  { %9741 = vmatmul.mubr.msk.bf16.vlgmr.msra.gmra.mrb[64].mxu1 %vm330_vm4, %v10892_v42 }
 0x16f   :  { %9744 = vmatprep.mubr.msk.bf16.mxu1 %vm330_vm4, %v10917_v60 }
 0x176   :  { %9745 = vmatmul.mubr.msk.bf16.gmra.mrb[68].mxu1 %vm330_vm4, %v10915_v59 }
 0x177   :  { %9748 = vmatprep.mubr.msk.bf16.mxu1 %vm330_vm4, %v10931_v10 }
 0x17e   :  { %9749 = vmatmul.mubr.msk.bf16.gmra.mrb[72].mxu1 %vm330_vm4, %v10929_v9 }
 0x17f   :  { %9752 = vmatprep.mubr.msk.bf16.mxu1 %vm330_vm4, %v305_v25 }
 0x186   :  { %9753 = vmatmul.mubr.msk.bf16.gmra.mrb[76].mxu1 %vm330_vm4, %v306_v24 }
 0x187   :  { %1153 = vmatprep.mubr.bf16.mxu1 %v10052_v27 }
 0x1c1   :  { %v417_v29 = vpop.f32.mrb[0].mxu1  ;;  %v530_v30 = vpop.f32.mrb[16].mxu0 }
 0x1c2   :  { %v419_v31 = vpop.f32.mrb[1].mxu1  ;;  %v532_v32 = vpop.f32.mrb[17].mxu0 }
 0x1c3   :  { %v421_v33 = vpop.f32.mrb[2].mxu1  ;;  %v534_v34 = vpop.f32.mrb[18].mxu0 }
 0x1c4   :  { %v932_v35 = vpack.c.bf16 %v421_v33, %v417_v29  ;;  %v934_v36 = vpack.c.bf16 %v534_v34, %v530_v30  ;;  %v423_v37 = vpop.f32.mrb[3].mxu1  ;;  %v536_v38 = vpop.f32.mrb[19].mxu0 }
 0x1c5   :  { %v933_v39 = vpack.c.bf16 %v423_v37, %v419_v31  ;;  %v935_v40 = vpack.c.bf16 %v536_v38, %v532_v32 }
 0x1c7   :  { %8912 = vmatprep.subr.bf16.mxu1 %v933_v39  ;;  %8940 = vmatprep.subr.bf16.mxu0 %v935_v40 }
 0x1c8   :  { %8913 = vmatpush3.bf16.msra.mxu1 %v932_v35  ;;  %8941 = vmatpush3.bf16.msra.mxu0 %v934_v36 }
 0x1c9   :  { %v427_v41 = vpop.f32.mrb[4].mxu1  ;;  %v540_v42 = vpop.f32.mrb[20].mxu0 }
 0x1ca   :  { %v429_v43 = vpop.f32.mrb[5].mxu1  ;;  %v542_v44 = vpop.f32.mrb[21].mxu0 }
 0x1cb   :  { %v431_v45 = vpop.f32.mrb[6].mxu1  ;;  %v544_v46 = vpop.f32.mrb[22].mxu0 }
 0x1cc   :  { %v941_v47 = vpack.c.bf16 %v431_v45, %v427_v41  ;;  %v943_v48 = vpack.c.bf16 %v544_v46, %v540_v42  ;;  %v433_v49 = vpop.f32.mrb[7].mxu1  ;;  %v546_v50 = vpop.f32.mrb[23].mxu0 }
 0x1cd   :  { %v942_v51 = vpack.c.bf16 %v433_v49, %v429_v43  ;;  %v944_v52 = vpack.c.bf16 %v546_v50, %v542_v44 }
 0x1cf   :  { %8914 = vmatprep.subr.bf16.mxu1 %v942_v51  ;;  %8942 = vmatprep.subr.bf16.mxu0 %v944_v52 }
 0x1d0   :  { %8915 = vmatpush3.bf16.msra.mxu1 %v941_v47  ;;  %8943 = vmatpush3.bf16.msra.mxu0 %v943_v48 }
 0x1d1   :  { %v437_v53 = vpop.f32.mrb[8].mxu1  ;;  %v550_v54 = vpop.f32.mrb[24].mxu0 }
 0x1d2   :  { %v439_v55 = vpop.f32.mrb[9].mxu1  ;;  %v552_v56 = vpop.f32.mrb[25].mxu0 }
 0x1d3   :  { %v441_v57 = vpop.f32.mrb[10].mxu1  ;;  %v554_v58 = vpop.f32.mrb[26].mxu0 }
 0x1d4   :  { %v950_v59 = vpack.c.bf16 %v441_v57, %v437_v53  ;;  %v952_v60 = vpack.c.bf16 %v554_v58, %v550_v54  ;;  %v443_v61 = vpop.f32.mrb[11].mxu1  ;;  %v556_v62 = vpop.f32.mrb[27].mxu0 }
 0x1d5   :  { %v951_v63 = vpack.c.bf16 %v443_v61, %v439_v55  ;;  %v953_v0 = vpack.c.bf16 %v556_v62, %v552_v56  ;;  %v10050_v62 = vld [vmem:[%s13631_s24] ss:$36 sps:$4 sm:$0xff]  }
 0x1d7   :  { %8916 = vmatprep.subr.bf16.mxu1 %v951_v63  ;;  %8944 = vmatprep.subr.bf16.mxu0 %v953_v0  ;;  %v10053_v63 = vld [vmem:[%s13631_s24 + $0x8] ss:$36 sps:$4 sm:$0xff]  }
 0x1d8   :  { %8917 = vmatpush3.bf16.msra.mxu1 %v950_v59  ;;  %8945 = vmatpush3.bf16.msra.mxu0 %v952_v60  ;;  %v10056_v0 = vld [vmem:[%s13631_s24 + $0x4c] ss:$36 sps:$4 sm:$0xff]  }
 0x1d9   :  { %v447_v1 = vpop.f32.mrb[12].mxu1  ;;  %v560_v2 = vpop.f32.mrb[28].mxu0 }
 0x1da   :  { %v449_v3 = vpop.f32.mrb[13].mxu1  ;;  %v562_v4 = vpop.f32.mrb[29].mxu0 }
 0x1db   :  { %v451_v5 = vpop.f32.mrb[14].mxu1  ;;  %v564_v6 = vpop.f32.mrb[30].mxu0 }
 0x1dc   :  { %v959_v7 = vpack.c.bf16 %v451_v5, %v447_v1  ;;  %v961_v8 = vpack.c.bf16 %v564_v6, %v560_v2  ;;  %v453_v9 = vpop.f32.mrb[15].mxu1  ;;  %v566_v10 = vpop.f32.mrb[31].mxu0  ;;  %v10059_v1 = vld [vmem:[%s13631_s24 + $0x54] ss:$36 sps:$4 sm:$0xff]  }
 0x1dd   :  { %v960_v11 = vpack.c.bf16 %v453_v9, %v449_v3  ;;  %v962_v12 = vpack.c.bf16 %v566_v10, %v562_v4 }
 0x1df   :  { %8918 = vmatprep.subr.bf16.mxu1 %v960_v11  ;;  %8946 = vmatprep.subr.bf16.mxu0 %v962_v12 }
 0x1e0   :  { %8919 = vmatpush3.bf16.msra.mxu1 %v959_v7  ;;  %8947 = vmatpush3.bf16.msra.mxu0 %v961_v8 }
 0x1e1   :  { %v457_v13 = vpop.f32.mrb[16].mxu1  ;;  %v570_v14 = vpop.f32.mrb[32].mxu0 }
 0x1e2   :  { %v459_v15 = vpop.f32.mrb[17].mxu1  ;;  %v572_v16 = vpop.f32.mrb[33].mxu0 }
 0x1e3   :  { %v461_v17 = vpop.f32.mrb[18].mxu1  ;;  %v574_v18 = vpop.f32.mrb[34].mxu0 }
 0x1e4   :  { %v968_v19 = vpack.c.bf16 %v461_v17, %v457_v13  ;;  %v970_v20 = vpack.c.bf16 %v574_v18, %v570_v14  ;;  %v463_v21 = vpop.f32.mrb[19].mxu1  ;;  %v576_v23 = vpop.f32.mrb[35].mxu0  ;;  %v10058_v14 = vld [vmem:[%s13631_s24 + $0x48] ss:$36 sps:$4 sm:$0xff]   ;;  %v10067_v17 = vld [vmem:[%s13631_s24 + $0x1c] ss:$36 sps:$4 sm:$0xff]  }
 0x1e5   :  { %v969_v24 = vpack.c.bf16 %v463_v21, %v459_v15  ;;  %v971_v25 = vpack.c.bf16 %v576_v23, %v572_v16  ;;  %v10061_v15 = vld [vmem:[%s13631_s24 + $0x50] ss:$36 sps:$4 sm:$0xff]  }
 0x1e6   :  { %v10064_v16 = vld [vmem:[%s13631_s24 + $0x14] ss:$36 sps:$4 sm:$0xff]  }
 0x1e7   :  { %8920 = vmatprep.subr.bf16.mxu1 %v969_v24  ;;  %8948 = vmatprep.subr.bf16.mxu0 %v971_v25 }
 0x1e8   :  { %8921 = vmatpush3.bf16.msra.mxu1 %v968_v19  ;;  %8949 = vmatpush3.bf16.msra.mxu0 %v970_v20 }
 0x1e9   :  { %v467_v26 = vpop.f32.mrb[20].mxu1  ;;  %v580_v27 = vpop.f32.mrb[36].mxu0 }
 0x1ea   :  { %v469_v28 = vpop.f32.mrb[21].mxu1  ;;  %v582_v29 = vpop.f32.mrb[37].mxu0 }
 0x1eb   :  { %v471_v30 = vpop.f32.mrb[22].mxu1  ;;  %v584_v31 = vpop.f32.mrb[38].mxu0 }
 0x1ec   :  { %v977_v32 = vpack.c.bf16 %v471_v30, %v467_v26  ;;  %v979_v33 = vpack.c.bf16 %v584_v31, %v580_v27  ;;  %v473_v34 = vpop.f32.mrb[23].mxu1  ;;  %v586_v35 = vpop.f32.mrb[39].mxu0 }
 0x1ed   :  { %v978_v36 = vpack.c.bf16 %v473_v34, %v469_v28  ;;  %v980_v37 = vpack.c.bf16 %v586_v35, %v582_v29 }
 0x1ef   :  { %8922 = vmatprep.subr.bf16.mxu1 %v978_v36  ;;  %8950 = vmatprep.subr.bf16.mxu0 %v980_v37 }
 0x1f0   :  { %8923 = vmatpush3.bf16.msra.mxu1 %v977_v32  ;;  %8951 = vmatpush3.bf16.msra.mxu0 %v979_v33 }
 0x1f1   :  { %v477_v38 = vpop.f32.mrb[24].mxu1  ;;  %v590_v39 = vpop.f32.mrb[40].mxu0 }
 0x1f2   :  { %v479_v40 = vpop.f32.mrb[25].mxu1  ;;  %v592_v41 = vpop.f32.mrb[41].mxu0 }
 0x1f3   :  { %v481_v42 = vpop.f32.mrb[26].mxu1  ;;  %v594_v43 = vpop.f32.mrb[42].mxu0 }
 0x1f4   :  { %v986_v44 = vpack.c.bf16 %v481_v42, %v477_v38  ;;  %v988_v45 = vpack.c.bf16 %v594_v43, %v590_v39  ;;  %v483_v46 = vpop.f32.mrb[27].mxu1  ;;  %v596_v47 = vpop.f32.mrb[43].mxu0 }
 0x1f5   :  { %v987_v48 = vpack.c.bf16 %v483_v46, %v479_v40  ;;  %v989_v49 = vpack.c.bf16 %v596_v47, %v592_v41 }
 0x1f7   :  { %8924 = vmatprep.subr.bf16.mxu1 %v987_v48  ;;  %8952 = vmatprep.subr.bf16.mxu0 %v989_v49 }
 0x1f8   :  { %8925 = vmatpush3.bf16.msra.mxu1 %v986_v44  ;;  %8953 = vmatpush3.bf16.msra.mxu0 %v988_v45 }
 0x1f9   :  { %v487_v50 = vpop.f32.mrb[28].mxu1  ;;  %v600_v51 = vpop.f32.mrb[44].mxu0 }
 0x1fa   :  { %v489_v52 = vpop.f32.mrb[29].mxu1  ;;  %v602_v53 = vpop.f32.mrb[45].mxu0 }
 0x1fb   :  { %v491_v54 = vpop.f32.mrb[30].mxu1  ;;  %v604_v55 = vpop.f32.mrb[46].mxu0 }
 0x1fc   :  { %v995_v56 = vpack.c.bf16 %v491_v54, %v487_v50  ;;  %v997_v57 = vpack.c.bf16 %v604_v55, %v600_v51  ;;  %v493_v58 = vpop.f32.mrb[31].mxu1  ;;  %v606_v59 = vpop.f32.mrb[47].mxu0 }
 0x1fd   :  { %v996_v60 = vpack.c.bf16 %v493_v58, %v489_v52  ;;  %v998_v61 = vpack.c.bf16 %v606_v59, %v602_v53 }
 0x1ff   :  { %8926 = vmatprep.subr.bf16.mxu1 %v996_v60  ;;  %8954 = vmatprep.subr.bf16.mxu0 %v998_v61 }
 0x200   :  { %8927 = vmatpush3.bf16.msra.mxu1 %v995_v56  ;;  %8955 = vmatpush3.bf16.msra.mxu0 %v997_v57 }
 0x201   :  { %v643_v2 = vpop.f32.mrb[32].mxu1  ;;  %v756_v3 = vpop.f32.mrb[48].mxu0 }
 0x202   :  { %v645_v4 = vpop.f32.mrb[33].mxu1  ;;  %v758_v5 = vpop.f32.mrb[49].mxu0 }
 0x203   :  { %v647_v6 = vpop.f32.mrb[34].mxu1  ;;  %v760_v7 = vpop.f32.mrb[50].mxu0  ;;  %1154 = vmatmul.mubr.bf16.vlgmr.msra.gmra.mrb[80].mxu1 %v10050_v62  ;;  %1203 = vmatmul.mubr.bf16.vlgmr.msra.gmra.mrb[80].mxu0 %v10053_v63 }
 0x204   :  { %v936_v8 = vpack.c.bf16 %v647_v6, %v643_v2  ;;  %v938_v9 = vpack.c.bf16 %v760_v7, %v756_v3  ;;  %v649_v10 = vpop.f32.mrb[35].mxu1  ;;  %v762_v11 = vpop.f32.mrb[51].mxu0  ;;  %1161 = vmatprep.mubr.bf16.mxu1 %v10056_v0  ;;  %1210 = vmatprep.mubr.bf16.mxu0 %v10059_v1 }
 0x205   :  { %v937_v12 = vpack.c.bf16 %v649_v10, %v645_v4  ;;  %v939_v13 = vpack.c.bf16 %v762_v11, %v758_v5 }
 0x207   :  { %8968 = vmatprep.subr.bf16.mxu1 %v937_v12  ;;  %8996 = vmatprep.subr.bf16.mxu0 %v939_v13 }
 0x208   :  { %8969 = vmatpush3.bf16.msra.mxu1 %v936_v8  ;;  %8997 = vmatpush3.bf16.msra.mxu0 %v938_v9 }
 0x209   :  { %v653_v18 = vpop.f32.mrb[36].mxu1  ;;  %v766_v19 = vpop.f32.mrb[52].mxu0 }
 0x20a   :  { %v655_v20 = vpop.f32.mrb[37].mxu1  ;;  %v768_v21 = vpop.f32.mrb[53].mxu0 }
 0x20b   :  { %v657_v23 = vpop.f32.mrb[38].mxu1  ;;  %v770_v24 = vpop.f32.mrb[54].mxu0  ;;  %1162 = vmatmul.mubr.bf16.gmra.mrb[84].mxu1 %v10058_v14  ;;  %1211 = vmatmul.mubr.bf16.gmra.mrb[84].mxu0 %v10061_v15 }
 0x20c   :  { %v945_v25 = vpack.c.bf16 %v657_v23, %v653_v18  ;;  %v947_v26 = vpack.c.bf16 %v770_v24, %v766_v19  ;;  %v659_v27 = vpop.f32.mrb[39].mxu1  ;;  %v772_v28 = vpop.f32.mrb[55].mxu0  ;;  %1251 = vmatprep.mubr.bf16.mxu1 %v10064_v16  ;;  %1300 = vmatprep.mubr.bf16.mxu0 %v10067_v17 }
 0x20d   :  { %v946_v29 = vpack.c.bf16 %v659_v27, %v655_v20  ;;  %v948_v30 = vpack.c.bf16 %v772_v28, %v768_v21 }
 0x20f   :  { %8970 = vmatprep.subr.bf16.mxu1 %v946_v29  ;;  %8998 = vmatprep.subr.bf16.mxu0 %v948_v30 }
 0x210   :  { %8971 = vmatpush3.bf16.msra.mxu1 %v945_v25  ;;  %8999 = vmatpush3.bf16.msra.mxu0 %v947_v26 }
 0x211   :  { %v663_v31 = vpop.f32.mrb[40].mxu1  ;;  %v776_v32 = vpop.f32.mrb[56].mxu0 }
 0x212   :  { %v665_v33 = vpop.f32.mrb[41].mxu1  ;;  %v778_v34 = vpop.f32.mrb[57].mxu0 }
 0x213   :  { %v667_v35 = vpop.f32.mrb[42].mxu1  ;;  %v780_v36 = vpop.f32.mrb[58].mxu0 }
 0x214   :  { %v954_v37 = vpack.c.bf16 %v667_v35, %v663_v31  ;;  %v956_v38 = vpack.c.bf16 %v780_v36, %v776_v32  ;;  %v669_v39 = vpop.f32.mrb[43].mxu1  ;;  %v782_v40 = vpop.f32.mrb[59].mxu0 }
 0x215   :  { %v955_v41 = vpack.c.bf16 %v669_v39, %v665_v33  ;;  %v957_v42 = vpack.c.bf16 %v782_v40, %v778_v34  ;;  %v10062_v40 = vld [vmem:[%s13631_s24 + $0x10] ss:$36 sps:$4 sm:$0xff]  }
 0x217   :  { %8972 = vmatprep.subr.bf16.mxu1 %v955_v41  ;;  %9000 = vmatprep.subr.bf16.mxu0 %v957_v42  ;;  %v10065_v41 = vld [vmem:[%s13631_s24 + $0x18] ss:$36 sps:$4 sm:$0xff]  }
 0x218   :  { %8973 = vmatpush3.bf16.msra.mxu1 %v954_v37  ;;  %9001 = vmatpush3.bf16.msra.mxu0 %v956_v38  ;;  %v10068_v42 = vld [vmem:[%s13631_s24 + $0x5c] ss:$36 sps:$4 sm:$0xff]  }
 0x219   :  { %v673_v43 = vpop.f32.mrb[44].mxu1  ;;  %v786_v44 = vpop.f32.mrb[60].mxu0 }
 0x21a   :  { %v675_v45 = vpop.f32.mrb[45].mxu1  ;;  %v788_v46 = vpop.f32.mrb[61].mxu0 }
 0x21b   :  { %v677_v47 = vpop.f32.mrb[46].mxu1  ;;  %v790_v48 = vpop.f32.mrb[62].mxu0 }
 0x21c   :  { %v963_v49 = vpack.c.bf16 %v677_v47, %v673_v43  ;;  %v965_v50 = vpack.c.bf16 %v790_v48, %v786_v44  ;;  %v679_v51 = vpop.f32.mrb[47].mxu1  ;;  %v792_v52 = vpop.f32.mrb[63].mxu0  ;;  %v10071_v43 = vld [vmem:[%s13631_s24 + $0x64] ss:$36 sps:$4 sm:$0xff]  }
 0x21d   :  { %v964_v53 = vpack.c.bf16 %v679_v51, %v675_v45  ;;  %v966_v54 = vpack.c.bf16 %v792_v52, %v788_v46  ;;  %v10073_v51 = vld [vmem:[%s13631_s24 + $0x60] ss:$36 sps:$4 sm:$0xff]  }
 0x21e   :  { %v10074_v52 = vld [vmem:[%s13631_s24 + $0x20] ss:$36 sps:$4 sm:$0xff]  }
 0x21f   :  { %8974 = vmatprep.subr.bf16.mxu1 %v964_v53  ;;  %9002 = vmatprep.subr.bf16.mxu0 %v966_v54 }
 0x220   :  { %8975 = vmatpush3.bf16.msra.mxu1 %v963_v49  ;;  %9003 = vmatpush3.bf16.msra.mxu0 %v965_v50  ;;  %v10070_v50 = vld [vmem:[%s13631_s24 + $0x58] ss:$36 sps:$4 sm:$0xff]  }
 0x221   :  { %v683_v55 = vpop.f32.mrb[48].mxu1  ;;  %v796_v56 = vpop.f32.mrb[64].mxu0 }
 0x222   :  { %v685_v57 = vpop.f32.mrb[49].mxu1  ;;  %v798_v58 = vpop.f32.mrb[65].mxu0 }
 0x223   :  { %v687_v59 = vpop.f32.mrb[50].mxu1  ;;  %v800_v60 = vpop.f32.mrb[66].mxu0 }
 0x224   :  { %v972_v61 = vpack.c.bf16 %v687_v59, %v683_v55  ;;  %v974_v62 = vpack.c.bf16 %v800_v60, %v796_v56  ;;  %v689_v63 = vpop.f32.mrb[51].mxu1  ;;  %v802_v0 = vpop.f32.mrb[67].mxu0 }
 0x225   :  { %v973_v1 = vpack.c.bf16 %v689_v63, %v685_v57  ;;  %v975_v2 = vpack.c.bf16 %v802_v0, %v798_v58 }
 0x227   :  { %8976 = vmatprep.subr.bf16.mxu1 %v973_v1  ;;  %9004 = vmatprep.subr.bf16.mxu0 %v975_v2 }
 0x228   :  { %8977 = vmatpush3.bf16.msra.mxu1 %v972_v61  ;;  %9005 = vmatpush3.bf16.msra.mxu0 %v974_v62 }
 0x229   :  { %v693_v3 = vpop.f32.mrb[52].mxu1  ;;  %v806_v4 = vpop.f32.mrb[68].mxu0 }
 0x22a   :  { %v695_v5 = vpop.f32.mrb[53].mxu1  ;;  %v808_v6 = vpop.f32.mrb[69].mxu0 }
 0x22b   :  { %v697_v7 = vpop.f32.mrb[54].mxu1  ;;  %v810_v8 = vpop.f32.mrb[70].mxu0 }
 0x22c   :  { %v981_v9 = vpack.c.bf16 %v697_v7, %v693_v3  ;;  %v983_v10 = vpack.c.bf16 %v810_v8, %v806_v4  ;;  %v699_v11 = vpop.f32.mrb[55].mxu1  ;;  %v812_v12 = vpop.f32.mrb[71].mxu0  ;;  %v10075_v7 = vld [vmem:[%s13631_s24 + $0x68] ss:$36 sps:$4 sm:$0xff]   ;;  %v10076_v8 = vld [vmem:[%s13632_s29] sm:$0xff]  }
 0x22d   :  { %v982_v13 = vpack.c.bf16 %v699_v11, %v695_v5  ;;  %v984_v14 = vpack.c.bf16 %v812_v12, %v808_v6 }
 0x22f   :  { %8978 = vmatprep.subr.bf16.mxu1 %v982_v13  ;;  %9006 = vmatprep.subr.bf16.mxu0 %v984_v14  ;;  %v8058_v13 = vld [vmem:[%s13633_s23] ss:$0 sm:$0xff] }
 0x230   :  { %8979 = vmatpush3.bf16.msra.mxu1 %v981_v9  ;;  %9007 = vmatpush3.bf16.msra.mxu0 %v983_v10  ;;  %v10707_v9 = vmov 0.0   ;;  %v10077_v10 = vld [vmem:[%s13632_s29 + $0x8] sm:$0xff]  }
 0x231   :  { %v703_v15 = vpop.f32.mrb[56].mxu1  ;;  %v816_v16 = vpop.f32.mrb[72].mxu0 }
 0x232   :  { %v705_v17 = vpop.f32.mrb[57].mxu1  ;;  %v818_v18 = vpop.f32.mrb[73].mxu0 }
 0x233   :  { %v707_v19 = vpop.f32.mrb[58].mxu1  ;;  %v820_v20 = vpop.f32.mrb[74].mxu0 }
 0x234   :  { %v990_v21 = vpack.c.bf16 %v707_v19, %v703_v15  ;;  %v992_v23 = vpack.c.bf16 %v820_v20, %v816_v16  ;;  %v709_v24 = vpop.f32.mrb[59].mxu1  ;;  %v822_v25 = vpop.f32.mrb[75].mxu0 }
 0x235   :  { %v991_v26 = vpack.c.bf16 %v709_v24, %v705_v17  ;;  %v993_v27 = vpack.c.bf16 %v822_v25, %v818_v18 }
 0x237   :  { %8980 = vmatprep.subr.bf16.mxu1 %v991_v26  ;;  %9008 = vmatprep.subr.bf16.mxu0 %v993_v27 }
 0x238   :  { %8981 = vmatpush3.bf16.msra.mxu1 %v990_v21  ;;  %9009 = vmatpush3.bf16.msra.mxu0 %v992_v23 }
 0x239   :  { %v713_v28 = vpop.f32.mrb[60].mxu1  ;;  %v826_v29 = vpop.f32.mrb[76].mxu0 }
 0x23a   :  { %v715_v30 = vpop.f32.mrb[61].mxu1  ;;  %v828_v31 = vpop.f32.mrb[77].mxu0 }
 0x23b   :  { %v717_v32 = vpop.f32.mrb[62].mxu1  ;;  %v830_v33 = vpop.f32.mrb[78].mxu0 }
 0x23c   :  { %v999_v34 = vpack.c.bf16 %v717_v32, %v713_v28  ;;  %v1001_v35 = vpack.c.bf16 %v830_v33, %v826_v29  ;;  %v719_v36 = vpop.f32.mrb[63].mxu1  ;;  %v832_v37 = vpop.f32.mrb[79].mxu0 }
 0x23d   :  { %v1000_v38 = vpack.c.bf16 %v719_v36, %v715_v30  ;;  %v1002_v39 = vpack.c.bf16 %v832_v37, %v828_v31 }
 0x23f   :  { %8982 = vmatprep.subr.bf16.mxu1 %v1000_v38  ;;  %9010 = vmatprep.subr.bf16.mxu0 %v1002_v39 }
 0x240   :  { %8983 = vmatpush3.bf16.msra.mxu1 %v999_v34  ;;  %9011 = vmatpush3.bf16.msra.mxu0 %v1001_v35 }
 0x241   :  { %v9742_v44 = vpop.f32.mrb[64].mxu1  ;;  %9782 = vmatprep.subr.bf16.mxu0 %v10707_v9 }
 0x242   :  { %v869_v45 = vpop.f32.mrb[65].mxu1 }
 0x243   :  { %v9743_v46 = vpop.f32.mrb[66].mxu1  ;;  %1252 = vmatmul.mubr.bf16.vlgmr.msra.gmra.mrb[88].mxu1 %v10062_v40  ;;  %1301 = vmatmul.mubr.bf16.vlgmr.msra.gmra.mrb[88].mxu0 %v10065_v41 }
 0x244   :  { %v949_v47 = vpack.c.bf16 %v9743_v46, %v9742_v44  ;;  %v872_v48 = vpop.f32.mrb[67].mxu1  ;;  %1259 = vmatprep.mubr.bf16.mxu1 %v10068_v42  ;;  %1308 = vmatprep.mubr.bf16.mxu0 %v10071_v43 }
 0x245   :  { %v940_v49 = vpack.c.bf16 %v872_v48, %v869_v45  ;;  %9783 = vmatpush3.bf16.msra.mxu0 %v10076_v8 }
 0x246   :  { %9788 = vmatprep.subr.bf16.mxu0 %v10707_v9 }
 0x247   :  { %9756 = vmatprep.subr.bf16.mxu1 %v940_v49 }
 0x248   :  { %9757 = vmatpush3.bf16.msra.mxu1 %v940_v49 }
 0x249   :  { %v9746_v53 = vpop.f32.mrb[68].mxu1  ;;  %9758 = vmatprep.subr.bf16.mxu1 %v949_v47 }
 0x24a   :  { %v885_v54 = vpop.f32.mrb[69].mxu1 }
 0x24b   :  { %v9747_v55 = vpop.f32.mrb[70].mxu1  ;;  %1260 = vmatmul.mubr.bf16.gmra.mrb[92].mxu1 %v10070_v50  ;;  %1309 = vmatmul.mubr.bf16.gmra.mrb[92].mxu0 %v10073_v51 }
 0x24c   :  { %v967_v56 = vpack.c.bf16 %v9747_v55, %v9746_v53  ;;  %v888_v57 = vpop.f32.mrb[71].mxu1  ;;  %9759 = vmatpush3.bf16.msra.mxu1 %v949_v47  ;;  %9772 = vmatprep.mubr.bf16.mxu1 %v10074_v52 }
 0x24d   :  { %v958_v58 = vpack.c.bf16 %v888_v57, %v885_v54  ;;  %9784 = vmatprep.mubr.msk.bf16.mxu0 %vm10708_vm5, %v10707_v9 }
 0x24f   :  { %9760 = vmatprep.subr.bf16.mxu1 %v958_v58 }
 0x250   :  { %9761 = vmatpush3.bf16.msra.mxu1 %v958_v58 }
 0x251   :  { %v9750_v59 = vpop.f32.mrb[72].mxu1  ;;  %9762 = vmatprep.subr.bf16.mxu1 %v967_v56 }
 0x252   :  { %v901_v60 = vpop.f32.mrb[73].mxu1 }
 0x253   :  { %v9751_v61 = vpop.f32.mrb[74].mxu1 }
 0x254   :  { %v985_v62 = vpack.c.bf16 %v9751_v61, %v9750_v59  ;;  %v904_v63 = vpop.f32.mrb[75].mxu1  ;;  %9763 = vmatpush3.bf16.msra.mxu1 %v967_v56 }
 0x255   :  { %v976_v0 = vpack.c.bf16 %v904_v63, %v901_v60 }
 0x257   :  { %9764 = vmatprep.subr.bf16.mxu1 %v976_v0 }
 0x258   :  { %9765 = vmatpush3.bf16.msra.mxu1 %v976_v0 }
 0x259   :  { %v9754_v1 = vpop.f32.mrb[76].mxu1  ;;  %9766 = vmatprep.subr.bf16.mxu1 %v985_v62 }
 0x25a   :  { %v917_v2 = vpop.f32.mrb[77].mxu1 }
 0x25b   :  { %v9755_v3 = vpop.f32.mrb[78].mxu1 }
 0x25c   :  { %v1003_v4 = vpack.c.bf16 %v9755_v3, %v9754_v1  ;;  %v920_v5 = vpop.f32.mrb[79].mxu1  ;;  %9767 = vmatpush3.bf16.msra.mxu1 %v985_v62 }
 0x25d   :  { %v994_v6 = vpack.c.bf16 %v920_v5, %v917_v2 }
 0x25f   :  { %9768 = vmatprep.subr.bf16.mxu1 %v994_v6 }
 0x260   :  { %9769 = vmatpush3.bf16.msra.mxu1 %v994_v6 }
 0x261   :  { %9770 = vmatprep.subr.bf16.mxu1 %v1003_v4 }
 0x264   :  { %9771 = vmatpush3.bf16.msra.mxu1 %v1003_v4 }
 0x265   :  { %9776 = vmatprep.subr.bf16.mxu1 %v10707_v9 }
 0x267   :  { %9773 = vmatmul.mubr.bf16.vlgmr.msra.gmra.mrb[96].mxu1 %v10075_v7 }
 0x268   :  { %9777 = vmatpush3.bf16.msra.mxu1 %v10077_v10  ;;  %9778 = vmatprep.mubr.msk.bf16.mxu1 %vm10708_vm5, %v10707_v9 }
 0x269   :  { %9794 = vmatprep.subr.bf16.mxu1 %v10707_v9 }
 0x2d6   :  { %v8928_v11 = vpop.f32.mrb[80].mxu1  ;;  %v8956_v12 = vpop.f32.mrb[80].mxu0 }
 0x2d7   :  { %v8929_v14 = vpop.f32.mrb[81].mxu1  ;;  %v8957_v15 = vpop.f32.mrb[81].mxu0 }
 0x2d8   :  { %v8930_v16 = vadd.f32 %v8929_v14, %v8928_v11  ;;  %v8931_v17 = vpop.f32.mrb[82].mxu1  ;;  %v8958_v18 = vadd.f32 %v8957_v15, %v8956_v12  ;;  %v8959_v19 = vpop.f32.mrb[82].mxu0 }
 0x2d9   :  { %v8932_v20 = vpop.f32.mrb[83].mxu1  ;;  %v8960_v21 = vpop.f32.mrb[83].mxu0 }
 0x2da   :  { %v1156_v23 = vadd.f32 %v8930_v16, %v8058_v13  ;;  %v8933_v24 = vadd.f32 %v8932_v20, %v8931_v17  ;;  %v8961_v25 = vadd.f32 %v8960_v21, %v8959_v19 }
 0x2dc   :  { %v1159_v26 = vadd.f32 %v8933_v24, %v8058_v13  ;;  %v1205_v27 = vadd.f32 %v8958_v18, %v1156_v23  ;;  %v10078_v24 = vld [vmem:[%s13632_s29 + $0x10] sm:$0xff]  }
 0x2de   :  { %v1208_v28 = vadd.f32 %v8961_v25, %v1159_v26  ;;  %v8934_v29 = vpop.f32.mrb[84].mxu1  ;;  %v8962_v30 = vpop.f32.mrb[84].mxu0  ;;  %v10079_v26 = vld [vmem:[%s13632_s29 + $0x18] sm:$0xff]  }
 0x2df   :  { %v8935_v31 = vpop.f32.mrb[85].mxu1  ;;  %v8963_v32 = vpop.f32.mrb[85].mxu0 }
 0x2e0   :  { %v8936_v33 = vadd.f32 %v8935_v31, %v8934_v29  ;;  %v8937_v34 = vpop.f32.mrb[86].mxu1  ;;  %v8964_v35 = vadd.f32 %v8963_v32, %v8962_v30  ;;  %v8965_v36 = vpop.f32.mrb[86].mxu0  ;;  %v10081_v30 = vld [vmem:[%s13632_s29 + $0x28] sm:$0xff]  }
 0x2e1   :  { %v8938_v37 = vpop.f32.mrb[87].mxu1  ;;  %v8966_v38 = vpop.f32.mrb[87].mxu0 }
 0x2e2   :  { %v1164_v39 = vadd.f32 %v8936_v33, %v8058_v13  ;;  %v8939_v40 = vadd.f32 %v8938_v37, %v8937_v34  ;;  %v8967_v41 = vadd.f32 %v8966_v38, %v8965_v36  ;;  %v10082_v34 = vld [vmem:[%s13632_s29 + $0x30] sm:$0xff]   ;;  %v10084_v37 = vld [vmem:[%s13632_s29 + $0x40] sm:$0xff]  }
 0x2e4   :  { %v1167_v42 = vadd.f32 %v8939_v40, %v8058_v13  ;;  %v1213_v43 = vadd.f32 %v8964_v35, %v1164_v39  ;;  %v10083_v35 = vld [vmem:[%s13632_s29 + $0x38] sm:$0xff]   ;;  %v10085_v39 = vld [vmem:[%s13632_s29 + $0x48] sm:$0xff]  }
 0x2e6   :  { %v1216_v44 = vadd.f32 %v8967_v41, %v1167_v42 }
 0x316   :  { %v8984_v45 = vpop.f32.mrb[88].mxu1  ;;  %v9012_v46 = vpop.f32.mrb[88].mxu0 }
 0x317   :  { %v8985_v47 = vpop.f32.mrb[89].mxu1  ;;  %v9013_v48 = vpop.f32.mrb[89].mxu0 }
 0x318   :  { %v8986_v49 = vadd.f32 %v8985_v47, %v8984_v45  ;;  %v8987_v50 = vpop.f32.mrb[90].mxu1  ;;  %v9014_v51 = vadd.f32 %v9013_v48, %v9012_v46  ;;  %v9015_v52 = vpop.f32.mrb[90].mxu0  ;;  %v10709_v46 = vmov 1983009808   ;;  %v2400_v48 = vlaneseq }
 0x319   :  { %v8988_v53 = vpop.f32.mrb[91].mxu1  ;;  %v9016_v54 = vpop.f32.mrb[91].mxu0  ;;  %v2398_v47 = vunpack.c.l.s4 %v10709_v46  ;;  %v10125_v46 = vld [vmem:[%s13570_s11 + $0xd8] ss:$12 sps:$4 sm:$0xff]  }
 0x31a   :  { %v1254_v55 = vadd.f32 %v8986_v49, %v1205_v27  ;;  %v8989_v56 = vadd.f32 %v8988_v53, %v8987_v50  ;;  %v9017_v57 = vadd.f32 %v9016_v54, %v9015_v52  ;;  %v10088_v49 = vld [vmem:[%s13632_s29 + $0x60] sm:$0xff]   ;;  %v10089_v53 = vld [vmem:[%s13632_s29 + $0x68] sm:$0xff]  }
 0x31b   :  { %v2399_v50 = vunpack.c.0.s8 %v2398_v47  ;;  %v10133_v47 = vld [vmem:[%s13570_s11 + $0xf4] ss:$12 sps:$4 sm:$0xff]  }
 0x31c   :  { %v1257_v58 = vadd.f32 %v8989_v56, %v1208_v28  ;;  %v1303_v59 = vadd.f32 %v9014_v51, %v1254_v55  ;;  %v10080_v28 = vld [vmem:[%s13632_s29 + $0x20] sm:$0xff]   ;;  %v11173_v51 = vshrl.u32 %v2400_v48, 7 }
 0x31d   :  { %v10168_v48 = vld [vmem:[%s13570_s11 + $0x20] ss:$12 sps:$4 sm:$0xff]  }
 0x31e   :  { %v8990_v60 = vpop.f32.mrb[92].mxu1  ;;  %v9018_v61 = vpop.f32.mrb[92].mxu0  ;;  %v1306_v62 = vadd.f32 %v9017_v57, %v1257_v58  ;;  %v11183_v56 = vsub.s32 %v2399_v50, %v11173_v51  ;;  %v11190_v57 = vld [vmem:[%s13571_s2] sm:$0x3f] }
 0x31f   :  { %v8991_v63 = vpop.f32.mrb[93].mxu1  ;;  %v9019_v0 = vpop.f32.mrb[93].mxu0  ;;  %v10170_v50 = vld [vmem:[%s13570_s11 + $0xf8] ss:$12 sps:$4 sm:$0xff]  }
 0x320   :  { %v8992_v1 = vadd.f32 %v8991_v63, %v8990_v60  ;;  %v8993_v2 = vpop.f32.mrb[94].mxu1  ;;  %v9020_v3 = vadd.f32 %v9019_v0, %v9018_v61  ;;  %v9021_v4 = vpop.f32.mrb[94].mxu0  ;;  %v11200_v60 = vrot.slane %v11190_v57, %v11183_v56  ;;  %v10094_v61 = vld [vmem:[%s13570_s11 + $0x4] ss:$12 sps:$4 sm:$0xff]  }
 0x321   :  { %v8994_v5 = vpop.f32.mrb[95].mxu1  ;;  %v9022_v6 = vpop.f32.mrb[95].mxu0  ;;  %v10118_v0 = vld [vmem:[%s13570_s11 + $0x184] ss:$12 sps:$4 sm:$0xff]  }
 0x322   :  { %v1262_v7 = vadd.f32 %v8992_v1, %v1213_v43  ;;  %v8995_v8 = vadd.f32 %v8994_v5, %v8993_v2  ;;  %v9023_v10 = vadd.f32 %v9022_v6, %v9021_v4  ;;  %v10086_v43 = vld [vmem:[%s13632_s29 + $0x50] sm:$0xff]   ;;  %v2411_v1 = vcombine.high %v11200_v60, %v11200_v60  ;;  %v10092_v2 = vld [vmem:[%s13570_s11] ss:$12 sps:$4 sm:$0xff]   ;;  %v10097_v5 = vld [vmem:[%s13570_s11 + $0x1c] ss:$12 sps:$4 sm:$0xff]  }
 0x323   :  { %v10116_v6 = vld [vmem:[%s13570_s11 + $0x180] ss:$12 sps:$4 sm:$0xff]  }
 0x324   :  { %v1265_v11 = vadd.f32 %v8995_v8, %v1216_v44  ;;  %v1311_v12 = vadd.f32 %v9020_v3, %v1262_v7  ;;  %v10087_v44 = vld [vmem:[%s13632_s29 + $0x58] sm:$0xff]   ;;  %v11222_v3 = vpack.c.bf16 %v2411_v1, %v2411_v1 }
 0x325   :  { %v10124_v8 = vld [vmem:[%s13570_s11 + $0x19c] ss:$12 sps:$4 sm:$0xff]   ;;  %v10149_v1 = vld [vmem:[%s13570_s11 + $0x138] ss:$12 sps:$4 sm:$0xff]  }
 0x326   :  { %v1314_v13 = vadd.f32 %v9023_v10, %v1265_v11  ;;  %v10095_v10 = vld [vmem:[%s13570_s11 + $0x18] ss:$12 sps:$4 sm:$0xff]   ;;  %v10100_v11 = vld [vmem:[%s13570_s11 + $0x34] ss:$12 sps:$4 sm:$0xff]  }
 0x33a   :  { %v9774_v14 = vpop.f32.mrb[96].mxu1 }
 0x33b   :  { %v1360_v15 = vadd.f32 %v9774_v14, %v1311_v12  ;;  %v1351_v16 = vpop.f32.mrb[97].mxu1  ;;  %v10122_v12 = vld [vmem:[%s13570_s11 + $0x198] ss:$12 sps:$4 sm:$0xff]   ;;  %v10098_v14 = vld [vmem:[%s13570_s11 + $0x30] ss:$12 sps:$4 sm:$0xff]  }
 0x33c   :  { %v1352_v17 = vadd.f32 %v1351_v16, %v1303_v59  ;;  %v9775_v18 = vpop.f32.mrb[98].mxu1  ;;  %v10090_v59 = vld [vmem:[%s13632_s29 + $0x70] sm:$0xff]  }
 0x33d   :  { %v11098_v19 = vadd.f32 %v9775_v18, %v1314_v13  ;;  %v1354_v20 = vpop.f32.mrb[99].mxu1  ;;  %v1368_v40 = vmax.f32 %v1360_v15, 0.0  ;;  %v10130_v13 = vld [vmem:[%s13570_s11 + $0x1b4] ss:$12 sps:$4 sm:$0xff]   ;;  %v10103_v15 = vld [vmem:[%s13570_s11 + $0x4c] ss:$12 sps:$4 sm:$0xff]  }
 0x33e   :  { %v1366_v21 = vmax.f32 %v1352_v17, 0.0  ;;  %v1355_v23 = vadd.f32 %v1354_v20, %v1306_v62  ;;  %v10091_v62 = vld [vmem:[%s13632_s29 + $0x78] sm:$0xff]   ;;  %v10101_v18 = vld [vmem:[%s13570_s11 + $0x48] ss:$12 sps:$4 sm:$0xff]  }
 0x33f   :  { %v1811_v42 = vpack.c.bf16 %v1368_v40, %v1368_v40  ;;  %v1369_v54 = vmax.f32 %v11098_v19, 0.0  ;;  %v10128_v16 = vld [vmem:[%s13570_s11 + $0x1b0] ss:$12 sps:$4 sm:$0xff]   ;;  %v10136_v17 = vld [vmem:[%s13570_s11 + $0x1cc] ss:$12 sps:$4 sm:$0xff]  }
 0x340   :  { %v1402_v25 = vpack.c.bf16 %v1366_v21, %v1366_v21  ;;  %v1367_v31 = vmax.f32 %v1355_v23, 0.0  ;;  %v10106_v19 = vld [vmem:[%s13570_s11 + $0x64] ss:$12 sps:$4 sm:$0xff]   ;;  %v10134_v20 = vld [vmem:[%s13570_s11 + $0x1c8] ss:$12 sps:$4 sm:$0xff]  }
 0x341   :  { %v1863_v45 = vrot.slane %v1811_v42, 1  ;;  %v1914_v52 = vrot.slane %v1811_v42, 2  ;;  %v1965_v55 = vrot.slane %v1811_v42, 3  ;;  %v2016_v58 = vpack.c.bf16 %v1369_v54, %v1369_v54  ;;  %v10142_v21 = vld [vmem:[%s13570_s11 + $0x1e4] ss:$12 sps:$4 sm:$0xff]  }
 0x342   :  { %9785 = vmatmul.mubr.msk.bf16.vlgmr.msra.gmra.mrb[96].mxu0 %vm1411_vm6, %v1402_v25  ;;  %v1404_v27 = vrot.slane %v1402_v25, 1  ;;  %v1504_v29 = vrot.slane %v1402_v25, 2  ;;  %v1555_v32 = vrot.slane %v1402_v25, 3  ;;  %v1606_v33 = vpack.c.bf16 %v1367_v31, %v1367_v31  ;;  %v10104_v23 = vld [vmem:[%s13570_s11 + $0x60] ss:$12 sps:$4 sm:$0xff]  }
 0x343   :  { %9789 = vmatpush3.bf16.msra.mxu0 %v10078_v24  ;;  %9790 = vmatprep.mubr.msk.bf16.mxu0 %vm10708_vm5, %v10707_v9  ;;  %v2068_v63 = vrot.slane %v2016_v58, 1  ;;  %v2119_v4 = vrot.slane %v2016_v58, 2  ;;  %v2170_v7 = vrot.slane %v2016_v58, 3  ;;  %v10109_v24 = vld [vmem:[%s13570_s11 + $0x7c] ss:$12 sps:$4 sm:$0xff]  }
 0x344   :  { %9779 = vmatmul.mubr.msk.bf16.vlgmr.msra.gmra.mrb[100].mxu1 %vm1411_vm6, %v1404_v27  ;;  %9800 = vmatprep.subr.bf16.mxu0 %v10707_v9  ;;  %v1658_v36 = vrot.slane %v1606_v33, 1  ;;  %v1709_v38 = vrot.slane %v1606_v33, 2  ;;  %v1760_v41 = vrot.slane %v1606_v33, 3  ;;  %v10140_v25 = vld [vmem:[%s13570_s11 + $0x1e0] ss:$12 sps:$4 sm:$0xff]  }
 0x345   :  { %9795 = vmatpush3.bf16.msra.mxu1 %v10079_v26  ;;  %9796 = vmatprep.mubr.msk.bf16.mxu1 %vm10708_vm5, %v10707_v9  ;;  %v10148_v26 = vld [vmem:[%s13570_s11 + $0x1fc] ss:$12 sps:$4 sm:$0xff]   ;;  %v10107_v27 = vld [vmem:[%s13570_s11 + $0x78] ss:$12 sps:$4 sm:$0xff]  }
 0x346   :  { %9806 = vmatprep.subr.bf16.mxu1 %v10707_v9  ;;  %v10110_v31 = vld [vmem:[%s13570_s11 + $0x90] ss:$12 sps:$4 sm:$0xff]   ;;  %v10165_v40 = vld [vmem:[%s13570_s11 + $0xc8] ss:$12 sps:$4 sm:$0xff]  }
 0x347   :  { %v10173_v54 = vld [vmem:[%s13570_s11 + $0x110] ss:$12 sps:$4 sm:$0xff]  }
 0x34a   :  { %9791 = vmatmul.mubr.msk.bf16.vlgmr.msra.gmra.mrb[100].mxu0 %vm1411_vm6, %v1504_v29  ;;  %v10146_v29 = vld [vmem:[%s13570_s11 + $0x1f8] ss:$12 sps:$4 sm:$0xff]  }
 0x34b   :  { %9801 = vmatpush3.bf16.msra.mxu0 %v10080_v28  ;;  %9802 = vmatprep.mubr.msk.bf16.mxu0 %vm10708_vm5, %v10707_v9  ;;  %v10112_v28 = vld [vmem:[%s13570_s11 + $0x94] ss:$12 sps:$4 sm:$0xff]  }
 0x34c   :  { %9797 = vmatmul.mubr.msk.bf16.vlgmr.msra.gmra.mrb[104].mxu1 %vm1411_vm6, %v1555_v32  ;;  %9812 = vmatprep.subr.bf16.mxu0 %v10707_v9  ;;  %v10115_v32 = vld [vmem:[%s13570_s11 + $0xac] ss:$12 sps:$4 sm:$0xff]  }
 0x34d   :  { %9807 = vmatpush3.bf16.msra.mxu1 %v10081_v30  ;;  %9808 = vmatprep.mubr.msk.bf16.mxu1 %vm10708_vm5, %v10707_v9  ;;  %v10154_v30 = vld [vmem:[%s13570_s11 + $0x214] ss:$12 sps:$4 sm:$0xff]  }
 0x34e   :  { %9818 = vmatprep.subr.bf16.mxu1 %v10707_v9 }
 0x352   :  { %9803 = vmatmul.mubr.msk.bf16.vlgmr.msra.gmra.mrb[104].mxu0 %vm1411_vm6, %v1606_v33  ;;  %v2396_v33 = vcombine.high %v11190_v57, %v11190_v57  ;;  %v10145_v57 = vld [vmem:[%s13570_s11 + $0x124] ss:$12 sps:$4 sm:$0xff]  }
 0x353   :  { %9813 = vmatpush3.bf16.msra.mxu0 %v10082_v34  ;;  %9814 = vmatprep.mubr.msk.bf16.mxu0 %vm10708_vm5, %v10707_v9  ;;  %v10152_v34 = vld [vmem:[%s13570_s11 + $0x210] ss:$12 sps:$4 sm:$0xff]  }
 0x354   :  { %9809 = vmatmul.mubr.msk.bf16.vlgmr.msra.gmra.mrb[108].mxu1 %vm1411_vm6, %v1658_v36  ;;  %9824 = vmatprep.subr.bf16.mxu0 %v10707_v9  ;;  %v10113_v36 = vld [vmem:[%s13570_s11 + $0xa8] ss:$12 sps:$4 sm:$0xff]  }
 0x355   :  { %9819 = vmatpush3.bf16.msra.mxu1 %v10083_v35  ;;  %9820 = vmatprep.mubr.msk.bf16.mxu1 %vm10708_vm5, %v10707_v9  ;;  %v10160_v35 = vld [vmem:[%s13570_s11 + $0x22c] ss:$12 sps:$4 sm:$0xff]  }
 0x356   :  { %9830 = vmatprep.subr.bf16.mxu1 %v10707_v9 }
 0x35a   :  { %9815 = vmatmul.mubr.msk.bf16.vlgmr.msra.gmra.mrb[108].mxu0 %vm1411_vm6, %v1709_v38  ;;  %v2410_v38 = vrot.slane %v2396_v33, %v11183_v56  ;;  %v10207_v33 = vld [vmem:[%s13572_s10 + $0x90] ss:$12 sps:$4 sm:$0xff]  }
 0x35b   :  { %9825 = vmatpush3.bf16.msra.mxu0 %v10084_v37  ;;  %9826 = vmatprep.mubr.msk.bf16.mxu0 %vm10708_vm5, %v10707_v9  ;;  %v10121_v37 = vld [vmem:[%s13570_s11 + $0xc4] ss:$12 sps:$4 sm:$0xff]  }
 0x35c   :  { %9821 = vmatmul.mubr.msk.bf16.vlgmr.msra.gmra.mrb[112].mxu1 %vm1411_vm6, %v1760_v41  ;;  %9836 = vmatprep.subr.bf16.mxu0 %v10707_v9  ;;  %v10119_v41 = vld [vmem:[%s13570_s11 + $0xc0] ss:$12 sps:$4 sm:$0xff]  }
 0x35d   :  { %9831 = vmatpush3.bf16.msra.mxu1 %v10085_v39  ;;  %9832 = vmatprep.mubr.msk.bf16.mxu1 %vm10708_vm5, %v10707_v9  ;;  %v10158_v39 = vld [vmem:[%s13570_s11 + $0x228] ss:$12 sps:$4 sm:$0xff]  }
 0x35e   :  { %9842 = vmatprep.subr.bf16.mxu1 %v10707_v9 }
 0x362   :  { %9827 = vmatmul.mubr.msk.bf16.vlgmr.msra.gmra.mrb[112].mxu0 %vm1411_vm6, %v1811_v42  ;;  %v10127_v42 = vld [vmem:[%s13570_s11 + $0xdc] ss:$12 sps:$4 sm:$0xff]  }
 0x363   :  { %9837 = vmatpush3.bf16.msra.mxu0 %v10086_v43  ;;  %9838 = vmatprep.mubr.msk.bf16.mxu0 %vm10708_vm5, %v10707_v9  ;;  %v11330_v43 = vpack.c.bf16 %v2410_v38, %v2410_v38  ;;  %v10215_v38 = vld [vmem:[%s13572_s10 + $0xc4] ss:$12 sps:$4 sm:$0xff]  }
 0x364   :  { %9833 = vmatmul.mubr.msk.bf16.vlgmr.msra.gmra.mrb[116].mxu1 %vm1411_vm6, %v1863_v45  ;;  %9848 = vmatprep.subr.bf16.mxu0 %v10707_v9  ;;  %v10167_v45 = vld [vmem:[%s13570_s11 + $0xe0] ss:$12 sps:$4 sm:$0xff]  }
 0x365   :  { %9843 = vmatpush3.bf16.msra.mxu1 %v10087_v44  ;;  %9844 = vmatprep.mubr.msk.bf16.mxu1 %vm10708_vm5, %v10707_v9  ;;  %v10166_v44 = vld [vmem:[%s13570_s11 + $0x8] ss:$12 sps:$4 sm:$0xff]  }
 0x366   :  { %9854 = vmatprep.subr.bf16.mxu1 %v10707_v9 }
 0x36a   :  { %9839 = vmatmul.mubr.msk.bf16.vlgmr.msra.gmra.mrb[116].mxu0 %vm1411_vm6, %v1914_v52  ;;  %v10139_v52 = vld [vmem:[%s13570_s11 + $0x10c] ss:$12 sps:$4 sm:$0xff]  }
 0x36b   :  { %9849 = vmatpush3.bf16.msra.mxu0 %v10088_v49  ;;  %9850 = vmatprep.mubr.msk.bf16.mxu0 %vm10708_vm5, %v10707_v9  ;;  %v10131_v49 = vld [vmem:[%s13570_s11 + $0xf0] ss:$12 sps:$4 sm:$0xff]  }
 0x36c   :  { %9845 = vmatmul.mubr.msk.bf16.vlgmr.msra.gmra.mrb[120].mxu1 %vm1411_vm6, %v1965_v55  ;;  %9860 = vmatprep.subr.bf16.mxu0 %v10707_v9  ;;  %v10137_v55 = vld [vmem:[%s13570_s11 + $0x108] ss:$12 sps:$4 sm:$0xff]  }
 0x36d   :  { %9855 = vmatpush3.bf16.msra.mxu1 %v10089_v53  ;;  %9856 = vmatprep.mubr.msk.bf16.mxu1 %vm10708_vm5, %v10707_v9  ;;  %v10171_v53 = vld [vmem:[%s13570_s11 + $0x38] ss:$12 sps:$4 sm:$0xff]  }
 0x36e   :  { %9866 = vmatprep.subr.bf16.mxu1 %v10707_v9 }
 0x372   :  { %9851 = vmatmul.mubr.msk.bf16.vlgmr.msra.gmra.mrb[120].mxu0 %vm1411_vm6, %v2016_v58  ;;  %v10174_v58 = vld [vmem:[%s13570_s11 + $0x50] ss:$12 sps:$4 sm:$0xff]  }
 0x373   :  { %9861 = vmatpush3.bf16.msra.mxu0 %v10090_v59  ;;  %9862 = vmatprep.mubr.msk.bf16.mxu0 %vm10708_vm5, %v10707_v9  ;;  %v10176_v59 = vld [vmem:[%s13570_s11 + $0x128] ss:$12 sps:$4 sm:$0xff]  }
 0x374   :  { %9857 = vmatmul.mubr.msk.bf16.vlgmr.msra.gmra.mrb[124].mxu1 %vm1411_vm6, %v2068_v63  ;;  %2802 = vmatprep.subr.bf16.mxu0 %v10094_v61  ;;  %v10143_v61 = vld [vmem:[%s13570_s11 + $0x120] ss:$12 sps:$4 sm:$0xff]   ;;  %v10177_v63 = vld [vmem:[%s13570_s11 + $0x68] ss:$12 sps:$4 sm:$0xff]  }
 0x375   :  { %9867 = vmatpush3.bf16.msra.mxu1 %v10091_v62  ;;  %9868 = vmatprep.mubr.msk.bf16.mxu1 %vm10708_vm5, %v10707_v9  ;;  %v10151_v62 = vld [vmem:[%s13570_s11 + $0x13c] ss:$12 sps:$4 sm:$0xff]  }
 0x376   :  { %2843 = vmatprep.subr.bf16.mxu1 %v10118_v0  ;;  %v10179_v0 = vld [vmem:[%s13570_s11 + $0x140] ss:$12 sps:$4 sm:$0xff]  }
 0x37a   :  { %9863 = vmatmul.mubr.msk.bf16.vlgmr.msra.gmra.mrb[124].mxu0 %vm1411_vm6, %v2119_v4  ;;  %v10182_v4 = vld [vmem:[%s13570_s11 + $0x158] ss:$12 sps:$4 sm:$0xff]  }
 0x37b   :  { %2803 = vmatpush1.bf16.msra.mxu0 %v10092_v2  ;;  %2834 = vmatprep.mubr.bf16.mxu0 %v11222_v3  ;;  %v10157_v2 = vld [vmem:[%s13570_s11 + $0x154] ss:$12 sps:$4 sm:$0xff]  }
 0x37c   :  { %9869 = vmatmul.mubr.msk.bf16.vlgmr.msra.gmra.mrb[128].mxu1 %vm1411_vm6, %v2170_v7  ;;  %2804 = vmatprep.subr.bf16.mxu0 %v10097_v5  ;;  %v10155_v5 = vld [vmem:[%s13570_s11 + $0x150] ss:$12 sps:$4 sm:$0xff]   ;;  %v10183_v7 = vld [vmem:[%s13570_s11 + $0x98] ss:$12 sps:$4 sm:$0xff]  }
 0x37d   :  { %2844 = vmatpush1.bf16.msra.mxu1 %v10116_v6  ;;  %2875 = vmatprep.mubr.bf16.mxu1 %v10706_v22  ;;  %v10163_v6 = vld [vmem:[%s13570_s11 + $0x16c] ss:$12 sps:$4 sm:$0xff]  }
 0x37e   :  { %2845 = vmatprep.subr.bf16.mxu1 %v10124_v8  ;;  %v10185_v8 = vld [vmem:[%s13570_s11 + $0x170] ss:$12 sps:$4 sm:$0xff]  }
 0x37f   :  { %2805 = vmatpush1.bf16.msra.mxu0 %v10095_v10  ;;  %v10161_v10 = vld [vmem:[%s13570_s11 + $0x168] ss:$12 sps:$4 sm:$0xff]  }
 0x380   :  { %2806 = vmatprep.subr.bf16.mxu0 %v10100_v11  ;;  %v10186_v11 = vld [vmem:[%s13570_s11 + $0xb0] ss:$12 sps:$4 sm:$0xff]  }
 0x381   :  { %2846 = vmatpush1.bf16.msra.mxu1 %v10122_v12  ;;  %v10191_v12 = vld [vmem:[%s13572_s10 + $0x4] ss:$12 sps:$4 sm:$0xff]  }
 0x382   :  { %2847 = vmatprep.subr.bf16.mxu1 %v10130_v13  ;;  %v2415_v13 = vpack.c.bf16 %v11200_v60, %v11200_v60  ;;  %v10172_v60 = vld [vmem:[%s13570_s11 + $0x1a0] ss:$12 sps:$4 sm:$0xff]  }
 0x383   :  { %2807 = vmatpush1.bf16.msra.mxu0 %v10098_v14  ;;  %v10169_v14 = vld [vmem:[%s13570_s11 + $0x188] ss:$12 sps:$4 sm:$0xff]  }
 0x384   :  { %2808 = vmatprep.subr.bf16.mxu0 %v10103_v15  ;;  %v10189_v15 = vld [vmem:[%s13572_s10] ss:$12 sps:$4 sm:$0xff]  }
 0x385   :  { %2848 = vmatpush1.bf16.msra.mxu1 %v10128_v16  ;;  %v10194_v16 = vld [vmem:[%s13572_s10 + $0x1c] ss:$12 sps:$4 sm:$0xff]  }
 0x386   :  { %2849 = vmatprep.subr.bf16.mxu1 %v10136_v17  ;;  %v10192_v17 = vld [vmem:[%s13572_s10 + $0x18] ss:$12 sps:$4 sm:$0xff]  }
 0x387   :  { %2809 = vmatpush1.bf16.msra.mxu0 %v10101_v18  ;;  %v10197_v18 = vld [vmem:[%s13572_s10 + $0x34] ss:$12 sps:$4 sm:$0xff]  }
 0x388   :  { %2810 = vmatprep.subr.bf16.mxu0 %v10106_v19  ;;  %v10175_v19 = vld [vmem:[%s13570_s11 + $0x1b8] ss:$12 sps:$4 sm:$0xff]  }
 0x389   :  { %2850 = vmatpush1.bf16.msra.mxu1 %v10134_v20  ;;  %v10195_v20 = vld [vmem:[%s13572_s10 + $0x30] ss:$12 sps:$4 sm:$0xff]  }
 0x38a   :  { %2851 = vmatprep.subr.bf16.mxu1 %v10142_v21  ;;  %v10200_v21 = vld [vmem:[%s13572_s10 + $0x4c] ss:$12 sps:$4 sm:$0xff]  }
 0x38b   :  { %2811 = vmatpush1.bf16.msra.mxu0 %v10104_v23  ;;  %v10178_v23 = vld [vmem:[%s13570_s11 + $0x1d0] ss:$12 sps:$4 sm:$0xff]  }
 0x38c   :  { %2812 = vmatprep.subr.bf16.mxu0 %v10109_v24  ;;  %v10198_v24 = vld [vmem:[%s13572_s10 + $0x48] ss:$12 sps:$4 sm:$0xff]  }
 0x38d   :  { %2852 = vmatpush1.bf16.msra.mxu1 %v10140_v25  ;;  %v10203_v25 = vld [vmem:[%s13572_s10 + $0x64] ss:$12 sps:$4 sm:$0xff]  }
 0x38e   :  { %2853 = vmatprep.subr.bf16.mxu1 %v10148_v26  ;;  %v10181_v26 = vld [vmem:[%s13570_s11 + $0x1e8] ss:$12 sps:$4 sm:$0xff]  }
 0x38f   :  { %2813 = vmatpush1.bf16.msra.mxu0 %v10107_v27  ;;  %v10201_v27 = vld [vmem:[%s13572_s10 + $0x60] ss:$12 sps:$4 sm:$0xff]  }
 0x390   :  { %2814 = vmatprep.subr.bf16.mxu0 %v10112_v28  ;;  %v10206_v28 = vld [vmem:[%s13572_s10 + $0x7c] ss:$12 sps:$4 sm:$0xff]  }
 0x391   :  { %2854 = vmatpush1.bf16.msra.mxu1 %v10146_v29  ;;  %v10184_v29 = vld [vmem:[%s13570_s11 + $0x200] ss:$12 sps:$4 sm:$0xff]  }
 0x392   :  { %2855 = vmatprep.subr.bf16.mxu1 %v10154_v30  ;;  %v10204_v30 = vld [vmem:[%s13572_s10 + $0x78] ss:$12 sps:$4 sm:$0xff]  }
 0x393   :  { %2815 = vmatpush1.bf16.msra.mxu0 %v10110_v31  ;;  %v10209_v31 = vld [vmem:[%s13572_s10 + $0x94] ss:$12 sps:$4 sm:$0xff]  }
 0x394   :  { %2816 = vmatprep.subr.bf16.mxu0 %v10115_v32  ;;  %v10187_v32 = vld [vmem:[%s13570_s11 + $0x218] ss:$12 sps:$4 sm:$0xff]  }
 0x395   :  { %2856 = vmatpush1.bf16.msra.mxu1 %v10152_v34  ;;  %v10212_v34 = vld [vmem:[%s13572_s10 + $0xac] ss:$12 sps:$4 sm:$0xff]  }
 0x396   :  { %2857 = vmatprep.subr.bf16.mxu1 %v10160_v35  ;;  %v10188_v35 = vld [vmem:[%s13570_s11 + $0x230] ss:$12 sps:$4 sm:$0xff]  }
 0x397   :  { %2817 = vmatpush1.bf16.msra.mxu0 %v10113_v36  ;;  %v10216_v36 = vld [vmem:[%s13572_s10 + $0xc8] ss:$12 sps:$4 sm:$0xff]  }
 0x398   :  { %2818 = vmatprep.subr.bf16.mxu0 %v10121_v37  ;;  %v10210_v37 = vld [vmem:[%s13572_s10 + $0xa8] ss:$12 sps:$4 sm:$0xff]  }
 0x399   :  { %2858 = vmatpush1.bf16.msra.mxu1 %v10158_v39  ;;  %v10217_v39 = vld [vmem:[%s13572_s10 + $0x8] ss:$12 sps:$4 sm:$0xff]  }
 0x39a   :  { %9066 = vmatprep.subr.bf16.mxu1 %v10165_v40  ;;  %v2228_v40 = vld [vmem:[%s13573_s1] sm:$0x3] }
 0x39b   :  { %2819 = vmatpush1.bf16.msra.mxu0 %v10119_v41  ;;  %v10221_v41 = vld [vmem:[%s13572_s10 + $0xe0] ss:$12 sps:$4 sm:$0xff]  }
 0x39c   :  { %2820 = vmatprep.subr.bf16.mxu0 %v10127_v42  ;;  %2876 = vmatmul.mubr.bf16.vlgmr.msra.gmra.mrb[132].mxu1 %v11330_v43  ;;  %v2297_v42 = vpack.c.bf16 %v2228_v40, %v2228_v40 }
 0x39d   :  { %9067 = vmatpush3.bf16.msra.mxu1 %v10166_v44  ;;  %2916 = vmatprep.mubr.bf16.mxu1 %v11222_v3  ;;  %v10180_v3 = vld [vmem:[%s13570_s11 + $0x80] ss:$12 sps:$4 sm:$0xff]  }
 0x39e   :  { %9068 = vmatprep.subr.bf16.mxu1 %v10167_v45  ;;  %v10213_v44 = vld [vmem:[%s13572_s10 + $0xc0] ss:$12 sps:$4 sm:$0xff]   ;;  %v10220_v45 = vld [vmem:[%s13572_s10 + $0xdc] ss:$12 sps:$4 sm:$0xff]  }
 0x39f   :  { %2821 = vmatpush1.bf16.msra.mxu0 %v10125_v46  ;;  %v10222_v46 = vld [vmem:[%s13572_s10 + $0x20] ss:$12 sps:$4 sm:$0xff]  }
 0x3a0   :  { %2822 = vmatprep.subr.bf16.mxu0 %v10133_v47  ;;  %v10226_v47 = vld [vmem:[%s13572_s10 + $0xf8] ss:$12 sps:$4 sm:$0xff]  }
 0x3a1   :  { %9069 = vmatpush3.bf16.msra.mxu1 %v10168_v48  ;;  %v10225_v48 = vld [vmem:[%s13572_s10 + $0xf4] ss:$12 sps:$4 sm:$0xff]  }
 0x3a2   :  { %9070 = vmatprep.subr.bf16.mxu1 %v10170_v50  ;;  %v10231_v50 = vld [vmem:[%s13572_s10 + $0x110] ss:$12 sps:$4 sm:$0xff]  }
 0x3a3   :  { %2823 = vmatpush1.bf16.msra.mxu0 %v10131_v49  ;;  %v10227_v49 = vld [vmem:[%s13572_s10 + $0x38] ss:$12 sps:$4 sm:$0xff]  }
 0x3a4   :  { %2824 = vmatprep.subr.bf16.mxu0 %v10139_v52  ;;  %v10223_v52 = vld [vmem:[%s13572_s10 + $0xf0] ss:$12 sps:$4 sm:$0xff]  }
 0x3a5   :  { %9071 = vmatpush3.bf16.msra.mxu1 %v10171_v53  ;;  %v10230_v53 = vld [vmem:[%s13572_s10 + $0x10c] ss:$12 sps:$4 sm:$0xff]  }
 0x3a6   :  { %9072 = vmatprep.subr.bf16.mxu1 %v10173_v54  ;;  %v10232_v54 = vld [vmem:[%s13572_s10 + $0x50] ss:$12 sps:$4 sm:$0xff]  }
 0x3a7   :  { %2825 = vmatpush1.bf16.msra.mxu0 %v10137_v55  ;;  %v10236_v55 = vld [vmem:[%s13572_s10 + $0x128] ss:$12 sps:$4 sm:$0xff]  }
 0x3a8   :  { %2826 = vmatprep.subr.bf16.mxu0 %v10145_v57  ;;  %v10228_v57 = vld [vmem:[%s13572_s10 + $0x108] ss:$12 sps:$4 sm:$0xff]  }
 0x3a9   :  { %9073 = vmatpush3.bf16.msra.mxu1 %v10174_v58  ;;  %v10235_v58 = vld [vmem:[%s13572_s10 + $0x124] ss:$12 sps:$4 sm:$0xff]  }
 0x3aa   :  { %9074 = vmatprep.subr.bf16.mxu1 %v10176_v59  ;;  %v10237_v59 = vld [vmem:[%s13572_s10 + $0x68] ss:$12 sps:$4 sm:$0xff]  }
 0x3ab   :  { %2827 = vmatpush1.bf16.msra.mxu0 %v10143_v61  ;;  %v10241_v61 = vld [vmem:[%s13572_s10 + $0x140] ss:$12 sps:$4 sm:$0xff]  }
 0x3ac   :  { %2828 = vmatprep.subr.bf16.mxu0 %v10151_v62  ;;  %v10233_v62 = vld [vmem:[%s13572_s10 + $0x120] ss:$12 sps:$4 sm:$0xff]  }
 0x3ad   :  { %9075 = vmatpush3.bf16.msra.mxu1 %v10177_v63  ;;  %v10240_v63 = vld [vmem:[%s13572_s10 + $0x13c] ss:$12 sps:$4 sm:$0xff]  }
 0x3ae   :  { %9076 = vmatprep.subr.bf16.mxu1 %v10179_v0  ;;  %v10242_v0 = vld [vmem:[%s13572_s10 + $0x80] ss:$12 sps:$4 sm:$0xff]  }
 0x3af   :  { %2829 = vmatpush1.bf16.msra.mxu0 %v10149_v1  ;;  %v10246_v1 = vld [vmem:[%s13572_s10 + $0x158] ss:$12 sps:$4 sm:$0xff]  }
 0x3b0   :  { %2830 = vmatprep.subr.bf16.mxu0 %v10157_v2  ;;  %v10238_v2 = vld [vmem:[%s13572_s10 + $0x138] ss:$12 sps:$4 sm:$0xff]  }
 0x3b1   :  { %9077 = vmatpush3.bf16.msra.mxu1 %v10180_v3  ;;  %v10245_v3 = vld [vmem:[%s13572_s10 + $0x154] ss:$12 sps:$4 sm:$0xff]  }
 0x3b2   :  { %9078 = vmatprep.subr.bf16.mxu1 %v10182_v4  ;;  %v10247_v4 = vld [vmem:[%s13572_s10 + $0x98] ss:$12 sps:$4 sm:$0xff]  }
 0x3b3   :  { %2831 = vmatpush1.bf16.msra.mxu0 %v10155_v5  ;;  %v10251_v5 = vld [vmem:[%s13572_s10 + $0x170] ss:$12 sps:$4 sm:$0xff]  }
 0x3b4   :  { %2832 = vmatprep.subr.bf16.mxu0 %v10163_v6  ;;  %v10243_v6 = vld [vmem:[%s13572_s10 + $0x150] ss:$12 sps:$4 sm:$0xff]  }
 0x3b5   :  { %9079 = vmatpush3.bf16.msra.mxu1 %v10183_v7  ;;  %v10250_v7 = vld [vmem:[%s13572_s10 + $0x16c] ss:$12 sps:$4 sm:$0xff]  }
 0x3b6   :  { %9080 = vmatprep.subr.bf16.mxu1 %v10185_v8  ;;  %v10252_v8 = vld [vmem:[%s13572_s10 + $0xb0] ss:$12 sps:$4 sm:$0xff]  }
 0x3b7   :  { %2833 = vmatpush1.bf16.msra.mxu0 %v10161_v10  ;;  %v10248_v10 = vld [vmem:[%s13572_s10 + $0x168] ss:$12 sps:$4 sm:$0xff]  }
 0x3b8   :  { %9872 = vmatprep.subr.bf16.mxu0 %v10707_v9 }
 0x3b9   :  { %9081 = vmatpush3.bf16.msra.mxu1 %v10186_v11 }
 0x3ba   :  { %2835 = vmatmul.mubr.bf16.vlgmr.msra.gmra.mrb[128].mxu0 %v2415_v13  ;;  %3220 = vmatprep.subr.bf16.mxu1 %v10191_v12 }
 0x3bb   :  { %9873 = vmatpush3.bf16.msra.mxu0 %v10169_v14  ;;  %9888 = vmatprep.mubr.msk.bf16.mxu0 %vm10708_vm5, %v10707_v9 }
 0x3bc   :  { %9874 = vmatprep.subr.bf16.mxu0 %v10707_v9  ;;  %2917 = vmatmul.mubr.bf16.vlgmr.msra.gmra.mrb[136].mxu1 %v2415_v13 }
 0x3bd   :  { %3221 = vmatpush1.bf16.msra.mxu1 %v10189_v15  ;;  %3252 = vmatprep.mubr.bf16.mxu1 %v2297_v42 }
 0x3be   :  { %3222 = vmatprep.subr.bf16.mxu1 %v10194_v16 }
 0x3bf   :  { %9875 = vmatpush3.bf16.msra.mxu0 %v10172_v60 }
 0x3c0   :  { %9876 = vmatprep.subr.bf16.mxu0 %v10707_v9 }
 0x3c1   :  { %3223 = vmatpush1.bf16.msra.mxu1 %v10192_v17 }
 0x3c2   :  { %3224 = vmatprep.subr.bf16.mxu1 %v10197_v18 }
 0x3c3   :  { %9877 = vmatpush3.bf16.msra.mxu0 %v10175_v19 }
 0x3c4   :  { %9878 = vmatprep.subr.bf16.mxu0 %v10707_v9 }
 0x3c5   :  { %3225 = vmatpush1.bf16.msra.mxu1 %v10195_v20 }
 0x3c6   :  { %3226 = vmatprep.subr.bf16.mxu1 %v10200_v21 }
 0x3c7   :  { %9879 = vmatpush3.bf16.msra.mxu0 %v10178_v23 }
 0x3c8   :  { %9880 = vmatprep.subr.bf16.mxu0 %v10707_v9 }
 0x3c9   :  { %3227 = vmatpush1.bf16.msra.mxu1 %v10198_v24 }
 0x3ca   :  { %3228 = vmatprep.subr.bf16.mxu1 %v10203_v25 }
 0x3cb   :  { %9881 = vmatpush3.bf16.msra.mxu0 %v10181_v26 }
 0x3cc   :  { %9882 = vmatprep.subr.bf16.mxu0 %v10707_v9 }
 0x3cd   :  { %3229 = vmatpush1.bf16.msra.mxu1 %v10201_v27 }
 0x3ce   :  { %3230 = vmatprep.subr.bf16.mxu1 %v10206_v28 }
 0x3cf   :  { %9883 = vmatpush3.bf16.msra.mxu0 %v10184_v29 }
 0x3d0   :  { %9884 = vmatprep.subr.bf16.mxu0 %v10707_v9 }
 0x3d1   :  { %3231 = vmatpush1.bf16.msra.mxu1 %v10204_v30 }
 0x3d2   :  { %3232 = vmatprep.subr.bf16.mxu1 %v10209_v31 }
 0x3d3   :  { %9885 = vmatpush3.bf16.msra.mxu0 %v10187_v32 }
 0x3d4   :  { %9886 = vmatprep.subr.bf16.mxu0 %v10707_v9 }
 0x3d5   :  { %3233 = vmatpush1.bf16.msra.mxu1 %v10207_v33 }
 0x3d6   :  { %3234 = vmatprep.subr.bf16.mxu1 %v10212_v34 }
 0x3d7   :  { %9887 = vmatpush3.bf16.msra.mxu0 %v10188_v35 }
 0x3d8   :  { %9097 = vmatprep.subr.bf16.mxu0 %v10216_v36 }
 0x3d9   :  { %3235 = vmatpush1.bf16.msra.mxu1 %v10210_v37 }
 0x3da   :  { %9889 = vmatmul.mubr.bf16.vlgmr.msra.gmra.mrb[132].mxu0 %v11330_v43  ;;  %3236 = vmatprep.subr.bf16.mxu1 %v10215_v38  ;;  %v10218_v43 = vld [vmem:[%s13572_s10 + $0xd8] ss:$12 sps:$4 sm:$0xff]  }
 0x3db   :  { %9098 = vmatpush3.bf16.msra.mxu0 %v10217_v39  ;;  %3293 = vmatprep.mubr.bf16.mxu0 %v2297_v42 }
 0x3dc   :  { %9099 = vmatprep.subr.bf16.mxu0 %v10221_v41 }
 0x3dd   :  { %3237 = vmatpush1.bf16.msra.mxu1 %v10213_v44 }
 0x3de   :  { %3238 = vmatprep.subr.bf16.mxu1 %v10220_v45 }
 0x3df   :  { %9100 = vmatpush3.bf16.msra.mxu0 %v10222_v46 }
 0x3e0   :  { %9101 = vmatprep.subr.bf16.mxu0 %v10226_v47 }
 0x3e1   :  { %3239 = vmatpush1.bf16.msra.mxu1 %v10218_v43 }
 0x3e2   :  { %3240 = vmatprep.subr.bf16.mxu1 %v10225_v48 }
 0x3e3   :  { %9102 = vmatpush3.bf16.msra.mxu0 %v10227_v49 }
 0x3e4   :  { %9103 = vmatprep.subr.bf16.mxu0 %v10231_v50 }
 0x3e5   :  { %3241 = vmatpush1.bf16.msra.mxu1 %v10223_v52 }
 0x3e6   :  { %3242 = vmatprep.subr.bf16.mxu1 %v10230_v53 }
 0x3e7   :  { %9104 = vmatpush3.bf16.msra.mxu0 %v10232_v54 }
 0x3e8   :  { %9105 = vmatprep.subr.bf16.mxu0 %v10236_v55 }
 0x3e9   :  { %3243 = vmatpush1.bf16.msra.mxu1 %v10228_v57 }
 0x3ea   :  { %3244 = vmatprep.subr.bf16.mxu1 %v10235_v58 }
 0x3eb   :  { %9106 = vmatpush3.bf16.msra.mxu0 %v10237_v59 }
 0x3ec   :  { %9107 = vmatprep.subr.bf16.mxu0 %v10241_v61 }
 0x3ed   :  { %3245 = vmatpush1.bf16.msra.mxu1 %v10233_v62 }
 0x3ee   :  { %3246 = vmatprep.subr.bf16.mxu1 %v10240_v63 }
 0x3ef   :  { %9108 = vmatpush3.bf16.msra.mxu0 %v10242_v0 }
 0x3f0   :  { %9109 = vmatprep.subr.bf16.mxu0 %v10246_v1 }
 0x3f1   :  { %3247 = vmatpush1.bf16.msra.mxu1 %v10238_v2 }
 0x3f2   :  { %3248 = vmatprep.subr.bf16.mxu1 %v10245_v3 }
 0x3f3   :  { %9110 = vmatpush3.bf16.msra.mxu0 %v10247_v4 }
 0x3f4   :  { %9111 = vmatprep.subr.bf16.mxu0 %v10251_v5 }
 0x3f5   :  { %3249 = vmatpush1.bf16.msra.mxu1 %v10243_v6 }
 0x3f6   :  { %3250 = vmatprep.subr.bf16.mxu1 %v10250_v7 }
 0x3f7   :  { %9112 = vmatpush3.bf16.msra.mxu0 %v10252_v8 }
 0x3f8   :  { %9892 = vmatprep.subr.bf16.mxu0 %v10707_v9 }
 0x3f9   :  { %3251 = vmatpush1.bf16.msra.mxu1 %v10248_v10 }
 0x415   :  { %v1498_v11 = vpop.f32.mrb[96].mxu0 }
 0x416   :  { %v9786_v12 = vpop.f32.mrb[97].mxu0 }
 0x417   :  { %v1449_v13 = vpop.f32.mrb[100].mxu1  ;;  %v1501_v14 = vpop.f32.mrb[98].mxu0 }
 0x418   :  { %v1499_v15 = vadd.f32 %v1498_v11, %v1449_v13  ;;  %v9780_v16 = vpop.f32.mrb[101].mxu1  ;;  %v9787_v60 = vpop.f32.mrb[99].mxu0 }
 0x419   :  { %v1452_v17 = vpop.f32.mrb[102].mxu1 }
 0x41a   :  { %v9781_v18 = vpop.f32.mrb[103].mxu1 }
 0x41d   :  { %v1548_v19 = vpop.f32.mrb[100].mxu0 }
 0x41e   :  { %v1554_v20 = vadd.f32 %v1548_v19, %v1499_v15  ;;  %v9792_v21 = vpop.f32.mrb[101].mxu0 }
 0x41f   :  { %v1551_v23 = vpop.f32.mrb[102].mxu0  ;;  %v1599_v24 = vpop.f32.mrb[104].mxu1 }
 0x420   :  { %v1605_v25 = vadd.f32 %v1599_v24, %v1554_v20  ;;  %v9793_v26 = vpop.f32.mrb[103].mxu0  ;;  %v9798_v27 = vpop.f32.mrb[105].mxu1 }
 0x421   :  { %v1602_v28 = vpop.f32.mrb[106].mxu1 }
 0x422   :  { %v9799_v29 = vpop.f32.mrb[107].mxu1 }
 0x425   :  { %v1650_v30 = vpop.f32.mrb[104].mxu0 }
 0x426   :  { %v1656_v31 = vadd.f32 %v1650_v30, %v1605_v25  ;;  %v9804_v32 = vpop.f32.mrb[105].mxu0  ;;  %v8109_v25 = vld [vmem:[%s13633_s23 + $0x1] ss:$0 sm:$0xff] }
 0x427   :  { %v1653_v33 = vpop.f32.mrb[106].mxu0  ;;  %v1702_v34 = vpop.f32.mrb[108].mxu1 }
 0x428   :  { %v1708_v35 = vadd.f32 %v1702_v34, %v1656_v31  ;;  %v9805_v36 = vpop.f32.mrb[107].mxu0  ;;  %v9810_v37 = vpop.f32.mrb[109].mxu1 }
 0x429   :  { %v1705_v38 = vpop.f32.mrb[110].mxu1 }
 0x42a   :  { %v9811_v39 = vpop.f32.mrb[111].mxu1 }
 0x42d   :  { %v1753_v40 = vpop.f32.mrb[108].mxu0 }
 0x42e   :  { %v1759_v41 = vadd.f32 %v1753_v40, %v1708_v35  ;;  %v9816_v42 = vpop.f32.mrb[109].mxu0 }
 0x42f   :  { %v1756_v44 = vpop.f32.mrb[110].mxu0  ;;  %v1804_v45 = vpop.f32.mrb[112].mxu1 }
 0x430   :  { %v1810_v46 = vadd.f32 %v1804_v45, %v1759_v41  ;;  %v9817_v47 = vpop.f32.mrb[111].mxu0  ;;  %v9822_v43 = vpop.f32.mrb[113].mxu1 }
 0x431   :  { %v1807_v48 = vpop.f32.mrb[114].mxu1 }
 0x432   :  { %v9823_v49 = vpop.f32.mrb[115].mxu1 }
 0x435   :  { %v1855_v50 = vpop.f32.mrb[112].mxu0 }
 0x436   :  { %v1861_v52 = vadd.f32 %v1855_v50, %v1810_v46  ;;  %v9828_v53 = vpop.f32.mrb[113].mxu0 }
 0x437   :  { %v1858_v54 = vpop.f32.mrb[114].mxu0  ;;  %v1907_v55 = vpop.f32.mrb[116].mxu1 }
 0x438   :  { %v1913_v57 = vadd.f32 %v1907_v55, %v1861_v52  ;;  %v9829_v58 = vpop.f32.mrb[115].mxu0  ;;  %v9834_v59 = vpop.f32.mrb[117].mxu1  ;;  %v10254_v55 = vld [vmem:[%s13574_s12] sm:$0xff]  }
 0x439   :  { %v1910_v61 = vpop.f32.mrb[118].mxu1  ;;  %v10256_v58 = vld [vmem:[%s13575_s13 + $0x40] sm:$0xff]  }
 0x43a   :  { %v9835_v62 = vpop.f32.mrb[119].mxu1  ;;  %v10257_v59 = vld [vmem:[%s13575_s13] sm:$0xff]   ;;  %9122 = vmatprep.subr.bf16.mxu1 %v10256_v58  ;;  %v10258_v61 = vld [vmem:[%s13575_s13 + $0x48] sm:$0xff]  }
 0x43b   :  { %v10260_v62 = vld [vmem:[%s13575_s13 + $0x50] sm:$0xff]  }
 0x43d   :  { %v1958_v63 = vpop.f32.mrb[116].mxu0 }
 0x43e   :  { %v1964_v0 = vadd.f32 %v1958_v63, %v1913_v57  ;;  %v9840_v1 = vpop.f32.mrb[117].mxu0  ;;  %v10255_v57 = vld [vmem:[%s13574_s12 + $0x8] sm:$0xff]   ;;  %v10261_v63 = vld [vmem:[%s13575_s13 + $0x10] sm:$0xff]  }
 0x43f   :  { %v1961_v2 = vpop.f32.mrb[118].mxu0  ;;  %v2009_v3 = vpop.f32.mrb[120].mxu1  ;;  %v10263_v1 = vld [vmem:[%s13575_s13 + $0x18] sm:$0xff]  }
 0x440   :  { %v2015_v4 = vadd.f32 %v2009_v3, %v1964_v0  ;;  %v9841_v5 = vpop.f32.mrb[119].mxu0  ;;  %v9846_v6 = vpop.f32.mrb[121].mxu1  ;;  %v10262_v0 = vld [vmem:[%s13575_s13 + $0x58] sm:$0xff]   ;;  %v8110_v2 = vld [vmem:[%s13576_s20 + $0x1] ss:$2 sm:$0x7] }
 0x441   :  { %v2012_v7 = vpop.f32.mrb[122].mxu1  ;;  %v3321_v3 = vld [vmem:[%s13577_s3] sm:$0x3f]  ;;  %v3320_v5 = vsub.f32 1.0, %v8110_v2 }
 0x442   :  { %v9847_v8 = vpop.f32.mrb[123].mxu1  ;;  %v2229_v6 = vld [vmem:[%s13576_s20] ss:$2 sm:$0x7]  ;;  %v3346_v7 = vrot.slane %v3321_v3, %v11183_v56 }
 0x443   :  { %v11655_v8 = vsub.s32 1, %v11173_v51 }
 0x445   :  { %v2060_v10 = vpop.f32.mrb[120].mxu0 }
 0x446   :  { %v2066_v11 = vadd.f32 %v2060_v10, %v2015_v4  ;;  %v9852_v12 = vpop.f32.mrb[121].mxu0  ;;  %v11648_v4 = vsub.s32 0, %v11173_v51  ;;  %v11658_v10 = vsub.s32 2, %v11173_v51 }
 0x447   :  { %v2063_v13 = vpop.f32.mrb[122].mxu0  ;;  %v2112_v14 = vpop.f32.mrb[124].mxu1 }
 0x448   :  { %v2118_v15 = vadd.f32 %v2112_v14, %v2066_v11  ;;  %v9853_v16 = vpop.f32.mrb[123].mxu0  ;;  %v9858_v60 = vpop.f32.mrb[125].mxu1  ;;  %v3339_v11 = vcombine.high %v3321_v3, %v3321_v3  ;;  %v3305_v12 = vrot.slane %v2229_v6, %v11648_v4  ;;  %v3326_v13 = vrot.slane %v3320_v5, %v11648_v4  ;;  %v8231_v3 = vld [vmem:[%s13633_s23 + $0x2] ss:$0 sm:$0xff] }
 0x449   :  { %v2115_v17 = vpop.f32.mrb[126].mxu1  ;;  %v3309_v16 = vrot.slane %v2229_v6, %v11655_v8  ;;  %v3330_v60 = vrot.slane %v3320_v5, %v11655_v8 }
 0x44a   :  { %v9859_v18 = vpop.f32.mrb[127].mxu1  ;;  %v3354_v17 = vcombine.high %v3346_v7, %v3346_v7 }
 0x44d   :  { %v2163_v19 = vpop.f32.mrb[124].mxu0 }
 0x44e   :  { %v2169_v20 = vadd.f32 %v2163_v19, %v2118_v15  ;;  %v9864_v21 = vpop.f32.mrb[125].mxu0  ;;  %v3365_v19 = vrot.slane %v8110_v2, %v11648_v4 }
 0x44f   :  { %v2166_v23 = vpop.f32.mrb[126].mxu0  ;;  %v2214_v24 = vpop.f32.mrb[128].mxu1  ;;  %v3369_v21 = vrot.slane %v8110_v2, %v11655_v8 }
 0x450   :  { %v2220_v26 = vadd.f32 %v2214_v24, %v2169_v20  ;;  %v9865_v27 = vpop.f32.mrb[127].mxu0  ;;  %v9870_v28 = vpop.f32.mrb[129].mxu1  ;;  %v3313_v24 = vrot.slane %v2229_v6, %v11658_v10 }
 0x451   :  { %v2217_v29 = vpop.f32.mrb[130].mxu1  ;;  %v3334_v27 = vrot.slane %v3320_v5, %v11658_v10  ;;  %v3353_v28 = vrot.slane %v3339_v11, %v11183_v56 }
 0x452   :  { %v2226_v30 = vadd.f32 %v8109_v25, %v2220_v26  ;;  %v9871_v31 = vpop.f32.mrb[131].mxu1 }
 0x454   :  { %10438 = vtanh.f32 %v2226_v30 }
 0x45e   :  { %v10439_v32 = vpop.eup %10438 }
 0x45f   :  { %v2296_v33 = vpack.c.bf16 %v10439_v32, %v10439_v32  ;;  %v3358_v32 = vmul.f32 %v3346_v7, %v3326_v13 }
 0x461   :  { %3253 = vmatmul.mubr.bf16.vlgmr.msra.gmra.mrb[140].mxu1 %v2296_v33  ;;  %3294 = vmatmul.mubr.bf16.vlgmr.msra.gmra.mrb[136].mxu0 %v2296_v33 }
 0x462   :  { %9896 = vmatprep.mubr.msk.bf16.mxu0 %vm10708_vm5, %v10707_v9  ;;  %9893 = vmatpush3.bf16.msra.mxu0 %v10254_v55 }
 0x463   :  { %9894 = vmatprep.subr.bf16.mxu0 %v10707_v9  ;;  %9123 = vmatpush3.bf16.msra.mxu1 %v10257_v59  ;;  %v10259_v9 = vld [vmem:[%s13575_s13 + $0x8] sm:$0xff]   ;;  %v10264_v59 = vld [vmem:[%s13575_s13 + $0x60] sm:$0xff]  }
 0x464   :  { %9124 = vmatprep.subr.bf16.mxu1 %v10258_v61  ;;  %v10265_v61 = vld [vmem:[%s13575_s13 + $0x20] sm:$0xff]  }
 0x466   :  { %9895 = vmatpush3.bf16.msra.mxu0 %v10255_v57 }
 0x467   :  { %9125 = vmatpush3.bf16.msra.mxu1 %v10259_v9  ;;  %v10266_v9 = vld [vmem:[%s13575_s13 + $0x68] sm:$0xff]  }
 0x468   :  { %9126 = vmatprep.subr.bf16.mxu1 %v10260_v62  ;;  %v10267_v62 = vld [vmem:[%s13575_s13 + $0x28] sm:$0xff]  }
 0x46b   :  { %9127 = vmatpush3.bf16.msra.mxu1 %v10261_v63  ;;  %v10268_v63 = vld [vmem:[%s13575_s13 + $0x70] sm:$0xff]  }
 0x46c   :  { %9128 = vmatprep.subr.bf16.mxu1 %v10262_v0  ;;  %v10269_v0 = vld [vmem:[%s13575_s13 + $0x30] sm:$0xff]  }
 0x46f   :  { %v2877_v34 = vpop.f32.mrb[132].mxu1  ;;  %9129 = vmatpush3.bf16.msra.mxu1 %v10263_v1  ;;  %v10270_v1 = vld [vmem:[%s13575_s13 + $0x78] sm:$0xff]  }
 0x470   :  { %v2879_v35 = vpop.f32.mrb[133].mxu1  ;;  %9130 = vmatprep.subr.bf16.mxu1 %v10264_v59  ;;  %v3638_v59 = vld [vmem:[%s13579_s14 + $0x50] sm:$0xff] }
 0x471   :  { %v2881_v36 = vpop.f32.mrb[134].mxu1 }
 0x472   :  { %v2882_v37 = vpop.f32.mrb[135].mxu1  ;;  %v3359_v36 = vmul.f32 %v3354_v17, %v3330_v60  ;;  %v3628_v17 = vld [vmem:[%s13579_s14] sm:$0xff] }
 0x473   :  { %9131 = vmatpush3.bf16.msra.mxu1 %v10265_v61 }
 0x474   :  { %9132 = vmatprep.subr.bf16.mxu1 %v10266_v9 }
 0x477   :  { %9133 = vmatpush3.bf16.msra.mxu1 %v10267_v62 }
 0x478   :  { %9134 = vmatprep.subr.bf16.mxu1 %v10268_v63  ;;  %v3646_v63 = vld [vmem:[%s13579_s14 + $0x90] sm:$0xff] }
 0x47b   :  { %9135 = vmatpush3.bf16.msra.mxu1 %v10269_v0  ;;  %v3654_v0 = vld [vmem:[%s13579_s14 + $0xd0] sm:$0xff] }
 0x47c   :  { %9136 = vmatprep.subr.bf16.mxu1 %v10270_v1 }
 0x48d   :  { %v2836_v38 = vpop.f32.mrb[128].mxu0 }
 0x48e   :  { %v2878_v39 = vadd.f32 %v2877_v34, %v2836_v38  ;;  %v2838_v40 = vpop.f32.mrb[129].mxu0  ;;  %v3373_v38 = vrot.slane %v8110_v2, %v11658_v10  ;;  %v10271_v2 = vld [vmem:[%s13575_s13 + $0x38] sm:$0xff]  }
 0x48f   :  { %v2880_v41 = vadd.f32 %v2879_v35, %v2838_v40  ;;  %v9082_v42 = vpop.f32.mrb[136].mxu1  ;;  %v2840_v44 = vpop.f32.mrb[130].mxu0  ;;  %9137 = vmatpush3.bf16.msra.mxu1 %v10271_v2  ;;  %v8273_v2 = vcombine.high %v3646_v63, %v3654_v0 }
 0x490   :  { %v9083_v45 = vpop.f32.mrb[137].mxu1  ;;  %v2841_v46 = vpop.f32.mrb[131].mxu0 }
 0x491   :  { %v9084_v47 = vadd.f32 %v9083_v45, %v9082_v42  ;;  %v9085_v43 = vpop.f32.mrb[138].mxu1  ;;  %v3360_v42 = vmul.f32 %v3353_v28, %v3334_v27  ;;  %v3648_v27 = vld [vmem:[%s13579_s14 + $0xa0] sm:$0xff] }
 0x492   :  { %v9086_v48 = vpop.f32.mrb[139].mxu1 }
 0x4ad   :  { %v2958_v49 = vpop.f32.mrb[132].mxu0 }
 0x4ae   :  { %v11608_v50 = vadd.f32 %v9084_v47, %v2958_v49  ;;  %v9890_v52 = vpop.f32.mrb[133].mxu0 }
 0x4af   :  { %v2961_v53 = vpop.f32.mrb[134].mxu0 }
 0x4b0   :  { %v9891_v54 = vpop.f32.mrb[135].mxu0 }
 0x534   :  { %v3254_v14 = vpop.f32.mrb[140].mxu1  ;;  %v9113_v15 = vpop.f32.mrb[136].mxu0 }
 0x535   :  { %v3255_v18 = vadd.f32 %v3254_v14, %v2878_v39  ;;  %v3256_v20 = vpop.f32.mrb[141].mxu1  ;;  %v9114_v23 = vpop.f32.mrb[137].mxu0 }
 0x536   :  { %v3257_v25 = vadd.f32 %v3256_v20, %v2880_v41  ;;  %v9115_v26 = vadd.f32 %v9114_v23, %v9113_v15  ;;  %v3258_v29 = vpop.f32.mrb[142].mxu1  ;;  %v9116_v30 = vpop.f32.mrb[138].mxu0  ;;  %v3640_v20 = vld [vmem:[%s13579_s14 + $0x60] sm:$0xff] }
 0x537   :  { %v3317_v31 = vadd.f32 %v3305_v12, %v3255_v18  ;;  %v3259_v33 = vpop.f32.mrb[143].mxu1  ;;  %v9117_v34 = vpop.f32.mrb[139].mxu0  ;;  %v3636_v18 = vld [vmem:[%s13579_s14 + $0x40] sm:$0xff] }
 0x538   :  { %v3318_v35 = vadd.f32 %v3309_v16, %v3257_v25  ;;  %v3296_v37 = vadd.f32 %v9115_v26, %v11608_v50  ;;  %v3644_v25 = vld [vmem:[%s13579_s14 + $0x80] sm:$0xff]  ;;  %v3629_v33 = vld [vmem:[%s13579_s14 + $0x8] sm:$0xff] }
 0x539   :  { %v3377_v39 = vmul.f32 %v3365_v19, %v3317_v31  ;;  %v8253_v19 = vcombine.high %v3628_v17, %v3636_v18  ;;  %v3652_v26 = vld [vmem:[%s13579_s14 + $0xc0] sm:$0xff]  ;;  %v3637_v34 = vld [vmem:[%s13579_s14 + $0x48] sm:$0xff] }
 0x53a   :  { %v3378_v40 = vmul.f32 %v3369_v21, %v3318_v35  ;;  %v3319_v41 = vadd.f32 %v3313_v24, %v3296_v37  ;;  %v8252_v21 = vcombine.low %v3628_v17, %v3636_v18  ;;  %v8269_v28 = vcombine.high %v3644_v25, %v3652_v26  ;;  %v3656_v29 = vld [vmem:[%s13579_s14 + $0xe0] sm:$0xff]  ;;  %v3634_v35 = vld [vmem:[%s13579_s14 + $0x30] sm:$0xff]  ;;  %v3649_v18 = vld [vmem:[%s13579_s14 + $0xa8] sm:$0xff] }
 0x53b   :  { %v3380_v44 = vadd.f32 %v3377_v39, %v3358_v32  ;;  %3908 = vmatprep.subr.bf16.mxu0 %v8253_v19  ;;  %v8268_v30 = vcombine.low %v3644_v25, %v3652_v26  ;;  %v8276_v31 = vcombine.low %v3648_v27, %v3656_v29  ;;  %v8277_v32 = vcombine.high %v3648_v27, %v3656_v29  ;;  %v3642_v37 = vld [vmem:[%s13579_s14 + $0x70] sm:$0xff]  ;;  %v3651_v26 = vld [vmem:[%s13579_s14 + $0xb8] sm:$0xff] }
 0x53c   :  { %v3381_v45 = vadd.f32 %v3378_v40, %v3359_v36  ;;  %v3379_v46 = vmul.f32 %v3373_v38, %v3319_v41  ;;  %v8255_v36 = vcombine.high %v3629_v33, %v3637_v34  ;;  %v8254_v38 = vcombine.low %v3629_v33, %v3637_v34  ;;  %v3659_v27 = vld [vmem:[%s13579_s14 + $0xf8] sm:$0xff]  ;;  %v10275_v33 = vld [vmem:[%s13580_s15 + $0x8] ss:$36 sps:$4 sm:$0xff]  }
 0x53d   :  { %10440 = vtanh.f32 %v3380_v44  ;;  %v8264_v39 = vcombine.low %v3634_v35, %v3642_v37  ;;  %v8265_v40 = vcombine.high %v3634_v35, %v3642_v37  ;;  %v8283_v29 = vcombine.high %v3651_v26, %v3659_v27  ;;  %v10277_v34 = vld [vmem:[%s13580_s15 + $0xc] ss:$36 sps:$4 sm:$0xff]   ;;  %v10280_v35 = vld [vmem:[%s13580_s15 + $0x14] ss:$36 sps:$4 sm:$0xff]   ;;  %v11857_v37 = vld [vmem:[%s13581_s19] sm:$0xff] }
 0x53e   :  { %10442 = vtanh.f32 %v3381_v45  ;;  %v3382_v47 = vadd.f32 %v3379_v46, %v3360_v42  ;;  %v8235_v42 = vld [vmem:[%s13633_s23 + $0x3] ss:$0 sm:$0xff] }
 0x540   :  { %10444 = vtanh.f32 %v3382_v47  ;;  %v7958_v43 = vcombine.low %v3381_v45, %v3382_v47 }
 0x542   :  { %v7965_v14 = vrot.slane %v7958_v43, %v11183_v56 }
 0x547   :  { %v10441_v48 = vpop.eup %10440 }
 0x548   :  { %v10443_v49 = vpop.eup %10442  ;;  %v3390_v52 = vpack.c.bf16 %v10441_v48, %v10441_v48 }
 0x549   :  { %v7941_v53 = vcombine.low %v10441_v48, %v10443_v49  ;;  %v3645_v48 = vld [vmem:[%s13579_s14 + $0x88] sm:$0xff] }
 0x54a   :  { %v10445_v50 = vpop.eup %10444  ;;  %9897 = vmatmul.mubr.msk.bf16.vlgmr.msra.gmra.mrb[140].mxu0 %vm3408_vm7, %v3390_v52  ;;  %v3653_v49 = vld [vmem:[%s13579_s14 + $0xc8] sm:$0xff] }
 0x54b   :  { %v7942_v54 = vcombine.low %v10445_v50, %v3380_v44  ;;  %3940 = vmatprep.mubr.bf16.mxu0 %v10706_v22  ;;  %v7949_v55 = vrot.slane %v7941_v53, %v11183_v56  ;;  %3909 = vmatpush1.bf16.msra.mxu0 %v8252_v21  ;;  %v3658_v53 = vld [vmem:[%s13579_s14 + $0xf0] sm:$0xff]  ;;  %v8270_v61 = vcombine.low %v3645_v48, %v3653_v49  ;;  %v3635_v21 = vld [vmem:[%s13579_s14 + $0x38] sm:$0xff] }
 0x54c   :  { %3910 = vmatprep.subr.bf16.mxu0 %v8269_v28 }
 0x54d   :  { %v7956_v57 = vrot.slane %v7942_v54, %v11183_v56 }
 0x54f   :  { %v7957_v58 = vcombine.low %v7949_v55, %v7956_v57  ;;  %3911 = vmatpush1.bf16.msra.mxu0 %v8268_v30  ;;  %v8271_v55 = vcombine.high %v3645_v48, %v3653_v49  ;;  %v8282_v30 = vcombine.low %v3651_v26, %v3659_v27  ;;  %v3683_v49 = vsub.s32 4, %v11173_v51 }
 0x550   :  { %3949 = vmatprep.subr.bf16.mxu0 %v8255_v36  ;;  %v10283_v36 = vld [vmem:[%s13580_s15 + $0x1c] ss:$36 sps:$4 sm:$0xff]   ;;  %v3691_v26 = vsub.s32 6, %v11173_v51 }
 0x551   :  { %7976 = vst [vmem:[%s13578_s21] sm:$0xff] %v7957_v58  ;;  %v3630_v58 = vld [vmem:[%s13579_s14 + $0x10] sm:$0xff] }
 0x552   :  { %v8257_v62 = vcombine.high %v3630_v58, %v3638_v59  ;;  %v8256_v1 = vcombine.low %v3630_v58, %v3638_v59 }
 0x61d   :  { %v3446_v5 = vpop.f32.mrb[140].mxu0 }
 0x61e   :  { %v3447_v6 = vadd.f32 %v8231_v3, %v3446_v5  ;;  %v9898_v7 = vpop.f32.mrb[141].mxu0  ;;  %v3631_v3 = vld [vmem:[%s13579_s14 + $0x18] sm:$0xff] }
 0x61f   :  { %v3449_v11 = vpop.f32.mrb[142].mxu0  ;;  %v3639_v5 = vld [vmem:[%s13579_s14 + $0x58] sm:$0xff] }
 0x620   :  { %10446 = vtanh.f32 %v3447_v6  ;;  %v9899_v12 = vpop.f32.mrb[143].mxu0  ;;  %v8272_v6 = vcombine.low %v3646_v63, %v3654_v0  ;;  %v8259_v7 = vcombine.high %v3631_v3, %v3639_v5  ;;  %v3647_v11 = vld [vmem:[%s13579_s14 + $0x98] sm:$0xff] }
 0x621   :  { %v3655_v12 = vld [vmem:[%s13579_s14 + $0xd8] sm:$0xff] }
 0x62a   :  { %v10447_v13 = vpop.eup %10446 }
 0x62b   :  { %v7972_v15 = vrot.slane %v10447_v13, %v11183_v56  ;;  %v3485_v16 = vpack.c.bf16 %v10447_v13, %v10447_v13  ;;  %v3632_v56 = vld [vmem:[%s13579_s14 + $0x20] sm:$0xff]  ;;  %v8258_v13 = vcombine.low %v3631_v3, %v3639_v5 }
 0x62c   :  { %v8260_v23 = vcombine.low %v3632_v56, %v3640_v20  ;;  %v8261_v24 = vcombine.high %v3632_v56, %v3640_v20  ;;  %v3657_v56 = vld [vmem:[%s13579_s14 + $0xe8] sm:$0xff] }
 0x62d   :  { %v7973_v60 = vcombine.low %v7965_v14, %v7972_v15  ;;  %3619 = vmatprep.mubr.bf16.mxu1 %v3485_v16  ;;  %v8275_v14 = vcombine.high %v3647_v11, %v3655_v12  ;;  %v3633_v15 = vld [vmem:[%s13579_s14 + $0x28] sm:$0xff]  ;;  %v8279_v20 = vcombine.high %v3649_v18, %v3657_v56 }
 0x62e   :  { %3620 = vmatmul.mubr.bf16.vlgmr.msra.gmra.mrb[144].mxu1 %v3390_v52  ;;  %4072 = vmatprep.subr.bf16.mxu1 %v8261_v24  ;;  %v3650_v52 = vld [vmem:[%s13579_s14 + $0xb0] sm:$0xff]  ;;  %v3641_v16 = vld [vmem:[%s13579_s14 + $0x68] sm:$0xff]  ;;  %v8278_v24 = vcombine.low %v3649_v18, %v3657_v56 }
 0x62f   :  { %7977 = vst [vmem:[%s13578_s21 + $0x8] sm:$0x3f] %v7973_v60  ;;  %4104 = vmatprep.mubr.bf16.mxu1 %v10706_v22  ;;  %4073 = vmatpush1.bf16.msra.mxu1 %v8260_v23  ;;  %v8281_v57 = vcombine.high %v3650_v52, %v3658_v53  ;;  %v8280_v9 = vcombine.low %v3650_v52, %v3658_v53  ;;  %v3643_v23 = vld [vmem:[%s13579_s14 + $0x78] sm:$0xff] }
 0x630   :  { %4074 = vmatprep.subr.bf16.mxu1 %v8277_v32  ;;  %v8274_v60 = vcombine.low %v3647_v11, %v3655_v12  ;;  %v8263_v17 = vcombine.high %v3633_v15, %v3641_v16  ;;  %v8262_v19 = vcombine.low %v3633_v15, %v3641_v16  ;;  %v8267_v25 = vcombine.high %v3635_v21, %v3643_v23  ;;  %v10272_v32 = vld [vmem:[%s13580_s15] ss:$36 sps:$4 sm:$0xff]  }
 0x631   :  { %v8266_v28 = vcombine.low %v3635_v21, %v3643_v23 }
 0x633   :  { %4075 = vmatpush1.bf16.msra.mxu1 %v8276_v31  ;;  %v10274_v31 = vld [vmem:[%s13580_s15 + $0x4] ss:$36 sps:$4 sm:$0xff]  }
 0x634   :  { %4154 = vmatprep.subr.bf16.mxu1 %v8265_v40 }
 0x701   :  { %v9138_v41 = vpop.f32.mrb[144].mxu1 }
 0x702   :  { %v9139_v44 = vpop.f32.mrb[145].mxu1 }
 0x703   :  { %v9140_v45 = vadd.f32 %v9139_v44, %v9138_v41  ;;  %v9141_v46 = vpop.f32.mrb[146].mxu1  ;;  %v3672_v41 = vrot.slane %v11857_v37, %v11655_v8 }
 0x704   :  { %v9142_v47 = vpop.f32.mrb[147].mxu1 }
 0x705   :  { %v3622_v43 = vadd.f32 %v9140_v45, %v8235_v42 }
 0x707   :  { %v3627_v50 = vmax.f32 %v3622_v43, 0.0 }
 0x709   :  { %v11762_v54 = vpack.c.bf16 %v3627_v50, %v3627_v50 }
 0x70b   :  { %8284 = vmatmul.mubr.msk.bf16.vlgmr.msra.gmra.mrb[144].mxu0 %vm3408_vm7, %v11762_v54  ;;  %8288 = vmatmul.mubr.msk.bf16.vlgmr.msra.gmra.mrb[148].mxu1 %vm3408_vm7, %v11762_v54 }
 0x70c   :  { %3950 = vmatpush1.bf16.msra.mxu0 %v8254_v38  ;;  %4155 = vmatpush1.bf16.msra.mxu1 %v8264_v39  ;;  %v11862_v38 = vld [vmem:[%s13581_s19 + $0x8] sm:$0xff]  ;;  %v3668_v39 = vrot.slane %v11857_v37, %v11648_v4 }
 0x70d   :  { %3951 = vmatprep.subr.bf16.mxu0 %v8271_v55  ;;  %4156 = vmatprep.subr.bf16.mxu1 %v8281_v57  ;;  %v3700_v40 = vrot.slane %v11862_v38, %v11648_v4  ;;  %v3704_v42 = vrot.slane %v11862_v38, %v11655_v8  ;;  %v3679_v4 = vsub.s32 3, %v11173_v51  ;;  %v3687_v55 = vsub.s32 5, %v11173_v51 }
 0x70e   :  { %3981 = vmatprep.mubr.bf16.mxu0 %v10706_v22  ;;  %4186 = vmatprep.mubr.bf16.mxu1 %v10706_v22  ;;  %v3716_v63 = vrot.slane %v11862_v38, %v3683_v49 }
 0x70f   :  { %v3680_v0 = vrot.slane %v11857_v37, %v3679_v4  ;;  %v3688_v21 = vrot.slane %v11857_v37, %v3687_v55 }
 0x710   :  { %3952 = vmatpush1.bf16.msra.mxu0 %v8270_v61  ;;  %4157 = vmatpush1.bf16.msra.mxu1 %v8280_v9 }
 0x711   :  { %3990 = vmatprep.subr.bf16.mxu0 %v8257_v62  ;;  %4336 = vmatprep.subr.bf16.mxu1 %v10274_v31  ;;  %v3676_v62 = vrot.slane %v11857_v37, %v11658_v10 }
 0x713   :  { %8285 = vmatmul.mubr.msk.bf16.vlgmr.msra.gmra.mrb[148].mxu0 %vm3408_vm7, %v11762_v54  ;;  %8290 = vmatmul.mubr.msk.bf16.vlgmr.msra.gmra.mrb[152].mxu1 %vm3408_vm7, %v11762_v54 }
 0x714   :  { %3991 = vmatpush1.bf16.msra.mxu0 %v8256_v1  ;;  %4022 = vmatprep.mubr.bf16.mxu0 %v10706_v22  ;;  %v3720_v1 = vrot.slane %v11862_v38, %v3687_v55  ;;  %v3724_v55 = vrot.slane %v11862_v38, %v3691_v26 }
 0x715   :  { %3992 = vmatprep.subr.bf16.mxu0 %v8273_v2  ;;  %4368 = vmatprep.mubr.bf16.mxu1 %v10706_v22 }
 0x716   :  { %4337 = vmatpush1.bf16.msra.mxu1 %v10272_v32 }
 0x717   :  { %4442 = vmatprep.subr.bf16.mxu1 %v10280_v35 }
 0x718   :  { %3993 = vmatpush1.bf16.msra.mxu0 %v8272_v6 }
 0x719   :  { %4031 = vmatprep.subr.bf16.mxu0 %v8259_v7 }
 0x71b   :  { %8286 = vmatmul.mubr.msk.bf16.vlgmr.msra.gmra.mrb[152].mxu0 %vm3408_vm7, %v11762_v54 }
 0x71c   :  { %4032 = vmatpush1.bf16.msra.mxu0 %v8258_v13  ;;  %4063 = vmatprep.mubr.bf16.mxu0 %v10706_v22 }
 0x71d   :  { %4033 = vmatprep.subr.bf16.mxu0 %v8275_v14 }
 0x720   :  { %4034 = vmatpush1.bf16.msra.mxu0 %v8274_v60 }
 0x721   :  { %4113 = vmatprep.subr.bf16.mxu0 %v8263_v17 }
 0x723   :  { %8287 = vmatmul.mubr.msk.bf16.vlgmr.msra.gmra.mrb[156].mxu0 %vm3408_vm7, %v11762_v54 }
 0x724   :  { %4114 = vmatpush1.bf16.msra.mxu0 %v8262_v19  ;;  %4145 = vmatprep.mubr.bf16.mxu0 %v10706_v22 }
 0x725   :  { %4115 = vmatprep.subr.bf16.mxu0 %v8279_v20  ;;  %v3684_v20 = vrot.slane %v11857_v37, %v3683_v49 }
 0x728   :  { %4116 = vmatpush1.bf16.msra.mxu0 %v8278_v24 }
 0x729   :  { %4195 = vmatprep.subr.bf16.mxu0 %v8267_v25 }
 0x72b   :  { %8289 = vmatmul.mubr.msk.bf16.vlgmr.msra.gmra.mrb[160].mxu0 %vm3408_vm7, %v11762_v54 }
 0x72c   :  { %4196 = vmatpush1.bf16.msra.mxu0 %v8266_v28  ;;  %4227 = vmatprep.mubr.bf16.mxu0 %v10706_v22 }
 0x72d   :  { %4197 = vmatprep.subr.bf16.mxu0 %v8283_v29  ;;  %v3695_v29 = vsub.s32 7, %v11173_v51  ;;  %v10278_v51 = vld [vmem:[%s13580_s15 + $0x10] ss:$36 sps:$4 sm:$0xff]  }
 0x730   :  { %4198 = vmatpush1.bf16.msra.mxu0 %v8282_v30 }
 0x731   :  { %4389 = vmatprep.subr.bf16.mxu0 %v10277_v34  ;;  %v3696_v34 = vrot.slane %v11857_v37, %v3695_v29 }
 0x733   :  { %8291 = vmatmul.mubr.msk.bf16.vlgmr.msra.gmra.mrb[164].mxu0 %vm3408_vm7, %v11762_v54 }
 0x734   :  { %4421 = vmatprep.mubr.bf16.mxu0 %v10706_v22  ;;  %4390 = vmatpush1.bf16.msra.mxu0 %v10275_v33  ;;  %v3692_v33 = vrot.slane %v11857_v37, %v3691_v26 }
 0x735   :  { %4495 = vmatprep.subr.bf16.mxu0 %v10283_v36 }
 0x7de   :  { %v3942_v44 = vpop.f32.mrb[144].mxu0  ;;  %v4106_v45 = vpop.f32.mrb[148].mxu1 }
 0x7df   :  { %v3943_v46 = vadd.f32 %v3942_v44, %v3668_v39  ;;  %v4107_v47 = vadd.f32 %v4106_v45, %v3700_v40  ;;  %v3944_v43 = vpop.f32.mrb[145].mxu0  ;;  %v4108_v48 = vpop.f32.mrb[149].mxu1 }
 0x7e0   :  { %v3945_v52 = vadd.f32 %v3944_v43, %v3672_v41  ;;  %v4109_v53 = vadd.f32 %v4108_v48, %v3704_v42  ;;  %v3946_v50 = vpop.f32.mrb[146].mxu0  ;;  %v4110_v54 = vpop.f32.mrb[150].mxu1 }
 0x7e1   :  { %v4236_v57 = vmax.f32 %v3943_v46, 0.0  ;;  %v4244_v58 = vmax.f32 %v4107_v47, 0.0  ;;  %v3947_v59 = vpop.f32.mrb[147].mxu0  ;;  %v4111_v8 = vpop.f32.mrb[151].mxu1  ;;  %v3708_v46 = vrot.slane %v11862_v38, %v11658_v10  ;;  %v3712_v47 = vrot.slane %v11862_v38, %v3679_v4  ;;  %v10281_v4 = vld [vmem:[%s13580_s15 + $0x18] ss:$36 sps:$4 sm:$0xff]  }
 0x7e2   :  { %v4237_v61 = vmax.f32 %v3945_v52, 0.0  ;;  %v4245_v9 = vmax.f32 %v4109_v53, 0.0  ;;  %v3728_v59 = vrot.slane %v11862_v38, %v3695_v29  ;;  %v10284_v8 = vld [vmem:[%s13580_s15 + $0x20] ss:$36 sps:$4 sm:$0xff]  }
 0x7e3   :  { %4252 = vst [vmem:[#allocation2] sm:$0x3] %v4236_v57  ;;  %4260 = vst [vmem:[#allocation2 + $0x10] sm:$0x3] %v4244_v58 }
 0x7e4   :  { %4253 = vst [vmem:[#allocation2 + $0x2] sm:$0x3] %v4237_v61  ;;  %4261 = vst [vmem:[#allocation2 + $0x12] sm:$0x3] %v4245_v9 }
 0x7e6   :  { %v3983_v2 = vpop.f32.mrb[148].mxu0  ;;  %v4188_v3 = vpop.f32.mrb[152].mxu1 }
 0x7e7   :  { %v3984_v5 = vadd.f32 %v3983_v2, %v3676_v62  ;;  %v4189_v6 = vadd.f32 %v4188_v3, %v3716_v63  ;;  %v3985_v7 = vpop.f32.mrb[149].mxu0  ;;  %v4190_v11 = vpop.f32.mrb[153].mxu1 }
 0x7e8   :  { %v3986_v12 = vadd.f32 %v3985_v7, %v3680_v0  ;;  %v4191_v13 = vadd.f32 %v4190_v11, %v3720_v1  ;;  %v3987_v14 = vpop.f32.mrb[150].mxu0  ;;  %v4192_v15 = vpop.f32.mrb[154].mxu1  ;;  %v10287_v7 = vld [vmem:[%s13582_s5 + $0x4] ss:$12 sps:$4 sm:$0xff]   ;;  %v10288_v11 = vld [vmem:[%s13582_s5 + $0x8] ss:$12 sps:$4 sm:$0xff]  }
 0x7e9   :  { %v4238_v16 = vmax.f32 %v3984_v5, 0.0  ;;  %v4248_v60 = vmax.f32 %v4189_v6, 0.0  ;;  %v3988_v17 = vpop.f32.mrb[151].mxu0  ;;  %v4193_v18 = vpop.f32.mrb[155].mxu1 }
 0x7ea   :  { %v4239_v56 = vmax.f32 %v3986_v12, 0.0  ;;  %v4249_v19 = vmax.f32 %v4191_v13, 0.0 }
 0x7eb   :  { %4254 = vst [vmem:[#allocation2 + $0x4] sm:$0x3] %v4238_v16  ;;  %4264 = vst [vmem:[#allocation2 + $0x18] sm:$0x3] %v4248_v60 }
 0x7ec   :  { %4255 = vst [vmem:[#allocation2 + $0x6] sm:$0x3] %v4239_v56  ;;  %4265 = vst [vmem:[#allocation2 + $0x1a] sm:$0x3] %v4249_v19 }
 0x7ee   :  { %v4024_v23 = vpop.f32.mrb[152].mxu0 }
 0x7ef   :  { %v4025_v24 = vadd.f32 %v4024_v23, %v3684_v20  ;;  %v4026_v25 = vpop.f32.mrb[153].mxu0 }
 0x7f0   :  { %v4027_v27 = vadd.f32 %v4026_v25, %v3688_v21  ;;  %v4028_v28 = vpop.f32.mrb[154].mxu0 }
 0x7f1   :  { %v4240_v30 = vmax.f32 %v4025_v24, 0.0  ;;  %v4029_v31 = vpop.f32.mrb[155].mxu0 }
 0x7f2   :  { %v4241_v32 = vmax.f32 %v4027_v27, 0.0 }
 0x7f3   :  { %4256 = vst [vmem:[#allocation2 + $0x8] sm:$0x3] %v4240_v30  ;;  %v4268_v57 = vld [vmem:[#allocation2] sm:$0xff] }
 0x7f4   :  { %4257 = vst [vmem:[#allocation2 + $0xa] sm:$0x3] %v4241_v32 }
 0x7f6   :  { %v4065_v35 = vpop.f32.mrb[156].mxu0 }
 0x7f7   :  { %v4066_v36 = vadd.f32 %v4065_v35, %v3692_v33  ;;  %v4067_v39 = vpop.f32.mrb[157].mxu0 }
 0x7f8   :  { %v4068_v40 = vadd.f32 %v4067_v39, %v3696_v34  ;;  %v4069_v41 = vpop.f32.mrb[158].mxu0 }
 0x7f9   :  { %v4242_v42 = vmax.f32 %v4066_v36, 0.0  ;;  %v4070_v44 = vpop.f32.mrb[159].mxu0 }
 0x7fa   :  { %v4243_v45 = vmax.f32 %v4068_v40, 0.0 }
 0x7fb   :  { %4258 = vst [vmem:[#allocation2 + $0xc] sm:$0x3] %v4242_v42 }
 0x7fc   :  { %4259 = vst [vmem:[#allocation2 + $0xe] sm:$0x3] %v4243_v45 }
 0x7fe   :  { %v4147_v43 = vpop.f32.mrb[160].mxu0 }
 0x7ff   :  { %v4148_v48 = vadd.f32 %v4147_v43, %v3708_v46  ;;  %v4149_v37 = vpop.f32.mrb[161].mxu0 }
 0x800   :  { %v4150_v49 = vadd.f32 %v4149_v37, %v3712_v47  ;;  %v4151_v52 = vpop.f32.mrb[162].mxu0 }
 0x801   :  { %v4246_v53 = vmax.f32 %v4148_v48, 0.0  ;;  %v4152_v50 = vpop.f32.mrb[163].mxu0 }
 0x802   :  { %v4247_v54 = vmax.f32 %v4150_v49, 0.0 }
 0x803   :  { %4262 = vst [vmem:[#allocation2 + $0x14] sm:$0x3] %v4246_v53  ;;  %v4269_v58 = vld [vmem:[#allocation2 + $0x8] sm:$0xff] }
 0x804   :  { %4263 = vst [vmem:[#allocation2 + $0x16] sm:$0x3] %v4247_v54  ;;  %v4282_v10 = vpack.c.bf16 %v4269_v58, %v4268_v57 }
 0x806   :  { %v4229_v61 = vpop.f32.mrb[164].mxu0  ;;  %8301 = vmatmul.mubr.msk.bf16.vlgmr.msra.gmra.mrb[156].mxu1 %vm1411_vm6, %v4282_v10  ;;  %8303 = vmatmul.mubr.msk.bf16.vlgmr.msra.gmra.mrb[168].mxu0 %vm1411_vm6, %v4282_v10 }
 0x807   :  { %v4230_v9 = vadd.f32 %v4229_v61, %v3724_v55  ;;  %v4231_v62 = vpop.f32.mrb[165].mxu0  ;;  %4378 = vmatprep.mubr.bf16.mxu1 %v10706_v22  ;;  %4431 = vmatprep.mubr.bf16.mxu0 %v10706_v22 }
 0x808   :  { %v4232_v38 = vadd.f32 %v4231_v62, %v3728_v59  ;;  %v4233_v63 = vpop.f32.mrb[166].mxu0  ;;  %4443 = vmatpush1.bf16.msra.mxu1 %v10278_v51  ;;  %4496 = vmatpush1.bf16.msra.mxu0 %v10281_v4 }
 0x809   :  { %v4250_v0 = vmax.f32 %v4230_v9, 0.0  ;;  %v4234_v1 = vpop.f32.mrb[167].mxu0  ;;  %9900 = vmatprep.subr.bf16.mxu1 %v10284_v8  ;;  %v10289_v63 = vld [vmem:[%s13582_s5 + $0x20] ss:$12 sps:$4 sm:$0xff]  }
 0x80a   :  { %v4251_v2 = vmax.f32 %v4232_v38, 0.0  ;;  %v5007_v1 = vld [vmem:[%s13583_s16 + $0x8] sm:$0xff] }
 0x80b   :  { %4266 = vst [vmem:[#allocation2 + $0x1c] sm:$0x3] %v4250_v0  ;;  %v4270_v3 = vld [vmem:[#allocation2 + $0x10] sm:$0xff]  ;;  %v10296_v0 = vld [vmem:[%s13582_s5 + $0x38] ss:$12 sps:$4 sm:$0xff]  }
 0x80c   :  { %4267 = vst [vmem:[#allocation2 + $0x1e] sm:$0x3] %v4251_v2  ;;  %v10297_v2 = vld [vmem:[%s13582_s5 + $0x50] ss:$12 sps:$4 sm:$0xff]  }
 0x813   :  { %v4271_v5 = vld [vmem:[#allocation2 + $0x18] sm:$0xff] }
 0x814   :  { %v4283_v6 = vpack.c.bf16 %v4271_v5, %v4270_v3  ;;  %v10304_v3 = vld [vmem:[%s13582_s5 + $0x68] ss:$12 sps:$4 sm:$0xff]   ;;  %v8347_v5 = vcombine.high %v5007_v1, %v5007_v1 }
 0x816   :  { %8302 = vmatmul.mubr.msk.bf16.gmra.mrb[160].mxu1 %vm1411_vm6, %v4283_v6  ;;  %8304 = vmatmul.mubr.msk.bf16.gmra.mrb[172].mxu0 %vm1411_vm6, %v4283_v6 }
 0x817   :  { %4474 = vmatprep.mubr.bf16.mxu1 %v10706_v22  ;;  %4527 = vmatprep.mubr.bf16.mxu0 %v10706_v22 }
 0x81e   :  { %8305 = vmatmul.mubr.msk.bf16.vlgmr.msra.gmra.mrb[164].mxu1 %vm1411_vm6, %v4282_v10  ;;  %8307 = vmatmul.mubr.msk.bf16.vlgmr.msra.gmra.mrb[176].mxu0 %vm1411_vm6, %v4282_v10 }
 0x81f   :  { %4484 = vmatprep.mubr.bf16.mxu1 %v10706_v22  ;;  %4537 = vmatprep.mubr.bf16.mxu0 %v10706_v22 }
 0x820   :  { %9901 = vmatpush3.bf16.msra.mxu1 %v10284_v8 }
 0x826   :  { %8306 = vmatmul.mubr.msk.bf16.gmra.mrb[168].mxu1 %vm1411_vm6, %v4283_v6  ;;  %8308 = vmatmul.mubr.msk.bf16.gmra.mrb[180].mxu0 %vm1411_vm6, %v4283_v6 }
 0x827   :  { %9902 = vmatprep.mubr.msk.bf16.mxu1 %vm1411_vm6, %v4282_v10  ;;  %4828 = vmatprep.mubr.bf16.mxu0 %v10287_v7  ;;  %v10285_v7 = vld [vmem:[%s13582_s5] ss:$12 sps:$4 sm:$0xff]  }
 0x82e   :  { %9903 = vmatmul.mubr.msk.bf16.vlgmr.msra.gmra.mrb[172].mxu1 %vm1411_vm6, %v4283_v6  ;;  %v8346_v6 = vcombine.low %v5007_v1, %v5007_v1 }
 0x82f   :  { %9910 = vmatprep.mubr.msk.bf16.mxu1 %vm3408_vm7, %v10288_v11  ;;  %v10290_v11 = vld [vmem:[%s13582_s5 + $0x1c] ss:$12 sps:$4 sm:$0xff]  }
 0x8d9   :  { %v4370_v12 = vpop.f32.mrb[156].mxu1  ;;  %v11927_v13 = vpop.f32.mrb[168].mxu0 }
 0x8da   :  { %v4372_v14 = vpop.f32.mrb[157].mxu1  ;;  %v11929_v15 = vpop.f32.mrb[169].mxu0 }
 0x8db   :  { %v4374_v16 = vpop.f32.mrb[158].mxu1  ;;  %v4427_v60 = vpop.f32.mrb[170].mxu0 }
 0x8dc   :  { %v4597_v17 = vpack.c.bf16 %v4374_v16, %v4370_v12  ;;  %v4599_v18 = vpack.c.bf16 %v4427_v60, %v11927_v13  ;;  %v4376_v56 = vpop.f32.mrb[159].mxu1  ;;  %v11932_v19 = vpop.f32.mrb[171].mxu0  ;;  %v5073_v12 = vsel %vm355_vm3, %v8346_v6, 0  ;;  %v10305_v13 = vld [vmem:[%s13582_s5 + $0x80] ss:$12 sps:$4 sm:$0xff]  }
 0x8dd   :  { %v4598_v20 = vpack.c.bf16 %v4376_v56, %v4372_v14  ;;  %v4600_v21 = vpack.c.bf16 %v11932_v19, %v11929_v15  ;;  %v10312_v14 = vld [vmem:[%s13582_s5 + $0x98] ss:$12 sps:$4 sm:$0xff]   ;;  %v10293_v16 = vld [vmem:[%s13582_s5 + $0x34] ss:$12 sps:$4 sm:$0xff]   ;;  %v10313_v60 = vld [vmem:[%s13582_s5 + $0xb0] ss:$12 sps:$4 sm:$0xff]  }
 0x8de   :  { %v10292_v15 = vld [vmem:[%s13582_s5 + $0x18] ss:$12 sps:$4 sm:$0xff]   ;;  %v10300_v56 = vld [vmem:[%s13582_s5 + $0x48] ss:$12 sps:$4 sm:$0xff]  }
 0x8df   :  { %v10301_v19 = vld [vmem:[%s13582_s5 + $0x64] ss:$12 sps:$4 sm:$0xff]  }
 0x8e9   :  { %v4380_v23 = vpop.f32.mrb[160].mxu1  ;;  %v4433_v24 = vpop.f32.mrb[172].mxu0 }
 0x8ea   :  { %v4382_v25 = vpop.f32.mrb[161].mxu1  ;;  %v11936_v26 = vpop.f32.mrb[173].mxu0 }
 0x8eb   :  { %v4384_v27 = vpop.f32.mrb[162].mxu1  ;;  %v4437_v28 = vpop.f32.mrb[174].mxu0 }
 0x8ec   :  { %v4606_v29 = vpack.c.bf16 %v4384_v27, %v4380_v23  ;;  %v4608_v30 = vpack.c.bf16 %v4437_v28, %v4433_v24  ;;  %v4386_v31 = vpop.f32.mrb[163].mxu1  ;;  %v4439_v32 = vpop.f32.mrb[175].mxu0  ;;  %v10308_v23 = vld [vmem:[%s13582_s5 + $0x78] ss:$12 sps:$4 sm:$0xff]   ;;  %v10309_v24 = vld [vmem:[%s13582_s5 + $0x94] ss:$12 sps:$4 sm:$0xff]  }
 0x8ed   :  { %v4607_v33 = vpack.c.bf16 %v4386_v31, %v4382_v25  ;;  %v4609_v34 = vpack.c.bf16 %v4439_v32, %v11936_v26  ;;  %v10311_v25 = vld [vmem:[%s13582_s5 + $0x90] ss:$12 sps:$4 sm:$0xff]   ;;  %v10314_v26 = vld [vmem:[%s13582_s5 + $0xac] ss:$12 sps:$4 sm:$0xff]   ;;  %v10316_v27 = vld [vmem:[%s13582_s5 + $0xa8] ss:$12 sps:$4 sm:$0xff]  }
 0x8ee   :  { %v5006_v28 = vld [vmem:[%s13583_s16] sm:$0xff]  ;;  %v5009_v32 = vld [vmem:[%s13583_s16 + $0x18] sm:$0xff] }
 0x8f1   :  { %v4476_v35 = vpop.f32.mrb[164].mxu1  ;;  %v4529_v36 = vpop.f32.mrb[176].mxu0 }
 0x8f2   :  { %v4478_v39 = vpop.f32.mrb[165].mxu1  ;;  %v4531_v40 = vpop.f32.mrb[177].mxu0 }
 0x8f3   :  { %v4480_v41 = vpop.f32.mrb[166].mxu1  ;;  %v4533_v42 = vpop.f32.mrb[178].mxu0 }
 0x8f4   :  { %v4601_v44 = vpack.c.bf16 %v4480_v41, %v4476_v35  ;;  %v4603_v45 = vpack.c.bf16 %v4533_v42, %v4529_v36  ;;  %v4482_v46 = vpop.f32.mrb[167].mxu1  ;;  %v4535_v47 = vpop.f32.mrb[179].mxu0 }
 0x8f5   :  { %v4602_v43 = vpack.c.bf16 %v4482_v46, %v4478_v39  ;;  %v4604_v48 = vpack.c.bf16 %v4535_v47, %v4531_v40 }
 0x8f6   :  { %9147 = vmatprep.subr.bf16.mxu0 %v4601_v44 }
 0x8f7   :  { %9148 = vmatpush3.bf16.msra.mxu0 %v4597_v17  ;;  %v10295_v17 = vld [vmem:[%s13582_s5 + $0x30] ss:$12 sps:$4 sm:$0xff]  }
 0x8f9   :  { %v4486_v37 = vpop.f32.mrb[168].mxu1  ;;  %v4539_v49 = vpop.f32.mrb[180].mxu0 }
 0x8fa   :  { %v4488_v52 = vpop.f32.mrb[169].mxu1  ;;  %v4541_v53 = vpop.f32.mrb[181].mxu0 }
 0x8fb   :  { %v4490_v50 = vpop.f32.mrb[170].mxu1  ;;  %v4543_v54 = vpop.f32.mrb[182].mxu0 }
 0x8fc   :  { %v4610_v55 = vpack.c.bf16 %v4490_v50, %v4486_v37  ;;  %v4612_v57 = vpack.c.bf16 %v4543_v54, %v4539_v49  ;;  %v4492_v58 = vpop.f32.mrb[171].mxu1  ;;  %v4545_v10 = vpop.f32.mrb[183].mxu0 }
 0x8fd   :  { %v4611_v59 = vpack.c.bf16 %v4492_v58, %v4488_v52  ;;  %v4613_v51 = vpack.c.bf16 %v4545_v10, %v4541_v53 }
 0x8fe   :  { %9149 = vmatprep.subr.bf16.mxu0 %v4610_v55 }
 0x8ff   :  { %9150 = vmatpush3.bf16.msra.mxu0 %v4606_v29  ;;  %v8345_v29 = vcombine.high %v5006_v28, %v5006_v28 }
 0x900   :  { %9151 = vmatprep.subr.bf16.mxu0 %v4602_v43 }
 0x901   :  { %v9904_v4 = vpop.f32.mrb[172].mxu1 }
 0x902   :  { %v4582_v8 = vpop.f32.mrb[173].mxu1 }
 0x903   :  { %v9905_v61 = vpop.f32.mrb[174].mxu1  ;;  %9152 = vmatpush3.bf16.msra.mxu0 %v4598_v20  ;;  %v10303_v20 = vld [vmem:[%s13582_s5 + $0x60] ss:$12 sps:$4 sm:$0xff]  }
 0x904   :  { %v4614_v9 = vpack.c.bf16 %v9905_v61, %v9904_v4  ;;  %v4585_v62 = vpop.f32.mrb[175].mxu1  ;;  %9153 = vmatprep.subr.bf16.mxu0 %v4611_v59  ;;  %v8350_v61 = vcombine.low %v5009_v32, %v5009_v32 }
 0x905   :  { %v4605_v38 = vpack.c.bf16 %v4585_v62, %v4582_v8 }
 0x906   :  { %v5085_v6 = vsel %vm355_vm3, %v8350_v61, 0 }
 0x907   :  { %9154 = vmatpush3.bf16.msra.mxu0 %v4607_v33  ;;  %9906 = vmatprep.subr.bf16.mxu1 %v4605_v38  ;;  %v5008_v33 = vld [vmem:[%s13583_s16 + $0x10] sm:$0xff] }
 0x908   :  { %9155 = vmatprep.subr.bf16.mxu0 %v4603_v45  ;;  %9907 = vmatpush3.bf16.msra.mxu1 %v4605_v38  ;;  %v8349_v35 = vcombine.high %v5008_v33, %v5008_v33 }
 0x909   :  { %9908 = vmatprep.subr.bf16.mxu1 %v4614_v9 }
 0x90b   :  { %9156 = vmatpush3.bf16.msra.mxu0 %v4599_v18  ;;  %v10298_v18 = vld [vmem:[%s13582_s5 + $0x4c] ss:$12 sps:$4 sm:$0xff]  }
 0x90c   :  { %9157 = vmatprep.subr.bf16.mxu0 %v4612_v57  ;;  %9909 = vmatpush3.bf16.msra.mxu1 %v4614_v9  ;;  %v8348_v9 = vcombine.low %v5008_v33, %v5008_v33 }
 0x90d   :  { %8353 = vmatprep.subr.msk.bf16.mxu1 %vm355_vm3, %v8345_v29 }
 0x90f   :  { %9158 = vmatpush3.bf16.msra.mxu0 %v4608_v30  ;;  %9911 = vmatmul.mubr.msk.bf16.vlgmr.msra.gmra.mrb[176].mxu1 %vm3408_vm7, %v10289_v63  ;;  %v8344_v30 = vcombine.low %v5006_v28, %v5006_v28 }
 0x910   :  { %9159 = vmatprep.subr.bf16.mxu0 %v4604_v48  ;;  %9914 = vmatprep.mubr.msk.bf16.mxu1 %vm3408_vm7, %v10296_v0  ;;  %v12042_v48 = vld [vmem:[%s13633_s23 + $0x4] ss:$0 sm:$0xff] }
 0x911   :  { %v5067_v31 = vsel %vm355_vm3, %v8344_v30, 0 }
 0x912   :  { %5094 = vmatpush1.bf16.msra.mxu1 %v5067_v31 }
 0x913   :  { %9160 = vmatpush3.bf16.msra.mxu0 %v4600_v21  ;;  %v10306_v21 = vld [vmem:[%s13582_s5 + $0x7c] ss:$12 sps:$4 sm:$0xff]   ;;  %8371 = vmatprep.subr.msk.bf16.mxu1 %vm355_vm3, %v8349_v35 }
 0x914   :  { %9161 = vmatprep.subr.bf16.mxu0 %v4613_v51 }
 0x917   :  { %9162 = vmatpush3.bf16.msra.mxu0 %v4609_v34  ;;  %9915 = vmatmul.mubr.msk.bf16.gmra.mrb[180].mxu1 %vm3408_vm7, %v10297_v2  ;;  %v8351_v34 = vcombine.high %v5009_v32, %v5009_v32 }
 0x918   :  { %9918 = vmatprep.mubr.msk.bf16.mxu1 %vm3408_vm7, %v10304_v3  ;;  %8362 = vmatprep.subr.msk.bf16.mxu0 %vm355_vm3, %v8347_v5 }
 0x91a   :  { %4829 = vmatmul.mubr.bf16.vlgmr.msra.gmra.mrb[184].mxu0 %v10285_v7  ;;  %v5079_v7 = vsel %vm355_vm3, %v8348_v9, 0 }
 0x91b   :  { %4836 = vmatprep.mubr.bf16.mxu0 %v10290_v11  ;;  %5207 = vmatpush1.bf16.msra.mxu0 %v5073_v12  ;;  %v12064_v12 = vld [vmem:[%s13583_s16 + $0x20] ss:$0 sps:$4 sm:$0xff]  }
 0x91c   :  { %8380 = vmatprep.subr.msk.bf16.mxu0 %vm355_vm3, %v8351_v34 }
 0x91f   :  { %9919 = vmatmul.mubr.msk.bf16.gmra.mrb[184].mxu1 %vm3408_vm7, %v10305_v13 }
 0x920   :  { %9922 = vmatprep.mubr.msk.bf16.mxu1 %vm3408_vm7, %v10312_v14 }
 0x922   :  { %4837 = vmatmul.mubr.bf16.gmra.mrb[188].mxu0 %v10292_v15 }
 0x923   :  { %4844 = vmatprep.mubr.bf16.mxu0 %v10293_v16 }
 0x927   :  { %9923 = vmatmul.mubr.msk.bf16.gmra.mrb[188].mxu1 %vm3408_vm7, %v10313_v60 }
 0x928   :  { %5125 = vmatprep.mubr.bf16.mxu1 %v10706_v22 }
 0x92a   :  { %4845 = vmatmul.mubr.bf16.gmra.mrb[192].mxu0 %v10295_v17 }
 0x92b   :  { %4852 = vmatprep.mubr.bf16.mxu0 %v10298_v18 }
 0x932   :  { %4853 = vmatmul.mubr.bf16.gmra.mrb[196].mxu0 %v10300_v56 }
 0x933   :  { %4860 = vmatprep.mubr.bf16.mxu0 %v10301_v19 }
 0x93a   :  { %4861 = vmatmul.mubr.bf16.gmra.mrb[200].mxu0 %v10303_v20 }
 0x93b   :  { %4868 = vmatprep.mubr.bf16.mxu0 %v10306_v21 }
 0x942   :  { %4869 = vmatmul.mubr.bf16.gmra.mrb[204].mxu0 %v10308_v23 }
 0x943   :  { %4876 = vmatprep.mubr.bf16.mxu0 %v10309_v24 }
 0x94a   :  { %4877 = vmatmul.mubr.bf16.gmra.mrb[208].mxu0 %v10311_v25 }
 0x94b   :  { %4884 = vmatprep.mubr.bf16.mxu0 %v10314_v26 }
 0x952   :  { %4885 = vmatmul.mubr.bf16.gmra.mrb[212].mxu0 %v10316_v27 }
 0x953   :  { %5238 = vmatprep.mubr.bf16.mxu0 %v10706_v22 }
 0x9e2   :  { %v9912_v36 = vpop.f32.mrb[176].mxu1 }
 0x9e3   :  { %v4927_v39 = vpop.f32.mrb[177].mxu1 }
 0x9e4   :  { %v9913_v40 = vpop.f32.mrb[178].mxu1 }
 0x9e5   :  { %v4930_v41 = vpop.f32.mrb[179].mxu1 }
 0x9ea   :  { %v12035_v42 = vpop.f32.mrb[180].mxu1 }
 0x9eb   :  { %v4943_v44 = vpop.f32.mrb[181].mxu1 }
 0x9ec   :  { %v12037_v45 = vpop.f32.mrb[182].mxu1 }
 0x9ed   :  { %v9163_v46 = vpop.f32.mrb[184].mxu0  ;;  %v4946_v47 = vpop.f32.mrb[183].mxu1 }
 0x9ee   :  { %v9164_v43 = vpop.f32.mrb[185].mxu0 }
 0x9ef   :  { %v9165_v37 = vadd.f32 %v9164_v43, %v9163_v46  ;;  %v9166_v49 = vpop.f32.mrb[186].mxu0 }
 0x9f0   :  { %v9167_v52 = vpop.f32.mrb[187].mxu0 }
 0x9f1   :  { %v4831_v53 = vadd.f32 %v9165_v37, %v12042_v48  ;;  %v9168_v50 = vadd.f32 %v9167_v52, %v9166_v49 }
 0x9f2   :  { %v12045_v54 = vpop.f32.mrb[184].mxu1 }
 0x9f3   :  { %v4928_v55 = vadd.f32 %v4927_v39, %v4831_v53  ;;  %v4834_v57 = vadd.f32 %v9168_v50, %v12042_v48  ;;  %v12048_v58 = vpop.f32.mrb[185].mxu1 }
 0x9f4   :  { %v12050_v10 = vpop.f32.mrb[186].mxu1 }
 0x9f5   :  { %v4931_v59 = vadd.f32 %v4930_v41, %v4834_v57  ;;  %v9169_v51 = vpop.f32.mrb[188].mxu0  ;;  %v12052_v4 = vpop.f32.mrb[187].mxu1  ;;  %v4990_v62 = vmax.f32 %v4928_v55, 0.0 }
 0x9f6   :  { %v9170_v8 = vpop.f32.mrb[189].mxu0 }
 0x9f7   :  { %v4991_v38 = vmax.f32 %v4931_v59, 0.0  ;;  %v9171_v63 = vadd.f32 %v9170_v8, %v9169_v51  ;;  %v9172_v0 = vpop.f32.mrb[190].mxu0 }
 0x9f8   :  { %v9173_v1 = vpop.f32.mrb[191].mxu0 }
 0x9f9   :  { %v12054_v2 = vpack.c.bf16 %v4991_v38, %v4990_v62  ;;  %v4839_v3 = vadd.f32 %v9171_v63, %v12042_v48  ;;  %v9174_v5 = vadd.f32 %v9173_v1, %v9172_v0 }
 0x9fa   :  { %v12059_v11 = vpop.f32.mrb[188].mxu1 }
 0x9fb   :  { %v4936_v13 = vadd.f32 %v9912_v36, %v4839_v3  ;;  %v4842_v14 = vadd.f32 %v9174_v5, %v12042_v48  ;;  %8354 = vmatmul.mubr.msk.bf16.vlgmr.msra.gmra.mrb[192].mxu1 %vm330_vm4, %v12054_v2  ;;  %8363 = vmatmul.mubr.msk.bf16.vlgmr.msra.gmra.mrb[216].mxu0 %vm330_vm4, %v12054_v2  ;;  %v12071_v15 = vpop.f32.mrb[189].mxu1 }
 0x9fc   :  { %5135 = vmatprep.mubr.bf16.mxu1 %v10706_v22  ;;  %5248 = vmatprep.mubr.bf16.mxu0 %v10706_v22  ;;  %v12075_v16 = vpop.f32.mrb[190].mxu1 }
 0x9fd   :  { %v4939_v60 = vadd.f32 %v9913_v40, %v4842_v14  ;;  %v9175_v17 = vpop.f32.mrb[192].mxu0  ;;  %5433 = vmatpush1.bf16.msra.mxu0 %v5085_v6  ;;  %5320 = vmatpush1.bf16.msra.mxu1 %v5079_v7  ;;  %v12077_v18 = vpop.f32.mrb[191].mxu1  ;;  %v4992_v19 = vmax.f32 %v4936_v13, 0.0 }
 0x9fe   :  { %v9176_v56 = vpop.f32.mrb[193].mxu0  ;;  %10025 = vmatprep.subr.msk.bf16.mxu1 %vm355_vm3, %v12064_v12 }
 0x9ff   :  { %v4993_v20 = vmax.f32 %v4939_v60, 0.0  ;;  %v9177_v21 = vadd.f32 %v9176_v56, %v9175_v17  ;;  %v9178_v23 = vpop.f32.mrb[194].mxu0 }
 0xa00   :  { %v9179_v24 = vpop.f32.mrb[195].mxu0 }
 0xa01   :  { %v12081_v25 = vpack.c.bf16 %v4993_v20, %v4992_v19  ;;  %v4847_v26 = vadd.f32 %v9177_v21, %v12042_v48  ;;  %v9180_v27 = vadd.f32 %v9179_v24, %v9178_v23 }
 0xa03   :  { %v4944_v28 = vadd.f32 %v4943_v44, %v4847_v26  ;;  %v4850_v29 = vadd.f32 %v9180_v27, %v12042_v48  ;;  %8355 = vmatmul.mubr.msk.bf16.gmra.mrb[196].mxu1 %vm330_vm4, %v12081_v25  ;;  %8364 = vmatmul.mubr.msk.bf16.gmra.mrb[220].mxu0 %vm330_vm4, %v12081_v25 }
 0xa04   :  { %5145 = vmatprep.mubr.bf16.mxu1 %v10706_v22  ;;  %5258 = vmatprep.mubr.bf16.mxu0 %v10706_v22 }
 0xa05   :  { %v4947_v30 = vadd.f32 %v4946_v47, %v4850_v29  ;;  %v9181_v31 = vpop.f32.mrb[196].mxu0  ;;  %v4994_v33 = vmax.f32 %v4944_v28, 0.0 }
 0xa06   :  { %v9182_v32 = vpop.f32.mrb[197].mxu0 }
 0xa07   :  { %v4995_v34 = vmax.f32 %v4947_v30, 0.0  ;;  %v9183_v35 = vadd.f32 %v9182_v32, %v9181_v31  ;;  %v9184_v36 = vpop.f32.mrb[198].mxu0 }
 0xa08   :  { %v9185_v39 = vpop.f32.mrb[199].mxu0 }
 0xa09   :  { %v12091_v40 = vpack.c.bf16 %v4995_v34, %v4994_v33  ;;  %v4855_v41 = vadd.f32 %v9183_v35, %v12042_v48  ;;  %v9186_v44 = vadd.f32 %v9185_v39, %v9184_v36 }
 0xa0b   :  { %v4952_v46 = vadd.f32 %v12035_v42, %v4855_v41  ;;  %v4858_v43 = vadd.f32 %v9186_v44, %v12042_v48  ;;  %8356 = vmatmul.mubr.msk.bf16.gmra.mrb[200].mxu1 %vm330_vm4, %v12091_v40  ;;  %8365 = vmatmul.mubr.msk.bf16.gmra.mrb[224].mxu0 %vm330_vm4, %v12091_v40 }
 0xa0c   :  { %5155 = vmatprep.mubr.bf16.mxu1 %v10706_v22  ;;  %5268 = vmatprep.mubr.bf16.mxu0 %v10706_v22 }
 0xa0d   :  { %v4955_v47 = vadd.f32 %v12037_v45, %v4858_v43  ;;  %v9187_v37 = vpop.f32.mrb[200].mxu0  ;;  %v4996_v52 = vmax.f32 %v4952_v46, 0.0 }
 0xa0e   :  { %v9188_v49 = vpop.f32.mrb[201].mxu0 }
 0xa0f   :  { %v4997_v53 = vmax.f32 %v4955_v47, 0.0  ;;  %v9189_v50 = vadd.f32 %v9188_v49, %v9187_v37  ;;  %v9190_v42 = vpop.f32.mrb[202].mxu0 }
 0xa10   :  { %v9191_v55 = vpop.f32.mrb[203].mxu0 }
 0xa11   :  { %v12103_v57 = vpack.c.bf16 %v4997_v53, %v4996_v52  ;;  %v4863_v59 = vadd.f32 %v9189_v50, %v12042_v48  ;;  %v9192_v51 = vadd.f32 %v9191_v55, %v9190_v42 }
 0xa13   :  { %v4960_v8 = vadd.f32 %v12048_v58, %v4863_v59  ;;  %v4866_v61 = vadd.f32 %v9192_v51, %v12042_v48  ;;  %8357 = vmatmul.mubr.msk.bf16.gmra.mrb[204].mxu1 %vm330_vm4, %v12103_v57  ;;  %8366 = vmatmul.mubr.msk.bf16.gmra.mrb[228].mxu0 %vm330_vm4, %v12103_v57 }
 0xa14   :  { %5165 = vmatprep.mubr.bf16.mxu1 %v10706_v22  ;;  %5278 = vmatprep.mubr.bf16.mxu0 %v10706_v22 }
 0xa15   :  { %v4963_v45 = vadd.f32 %v12052_v4, %v4866_v61  ;;  %v9193_v9 = vpop.f32.mrb[204].mxu0  ;;  %v4998_v38 = vmax.f32 %v4960_v8, 0.0 }
 0xa16   :  { %v9194_v62 = vpop.f32.mrb[205].mxu0 }
 0xa17   :  { %v4999_v63 = vmax.f32 %v4963_v45, 0.0  ;;  %v9195_v0 = vadd.f32 %v9194_v62, %v9193_v9  ;;  %v9196_v58 = vpop.f32.mrb[206].mxu0 }
 0xa18   :  { %v9197_v1 = vpop.f32.mrb[207].mxu0 }
 0xa19   :  { %v12115_v3 = vpack.c.bf16 %v4999_v63, %v4998_v38  ;;  %v4871_v5 = vadd.f32 %v9195_v0, %v12042_v48  ;;  %v9198_v6 = vadd.f32 %v9197_v1, %v9196_v58 }
 0xa1b   :  { %v4968_v7 = vadd.f32 %v12045_v54, %v4871_v5  ;;  %v4874_v13 = vadd.f32 %v9198_v6, %v12042_v48  ;;  %8358 = vmatmul.mubr.msk.bf16.gmra.mrb[208].mxu1 %vm330_vm4, %v12115_v3  ;;  %8367 = vmatmul.mubr.msk.bf16.gmra.mrb[232].mxu0 %vm330_vm4, %v12115_v3 }
 0xa1c   :  { %5175 = vmatprep.mubr.bf16.mxu1 %v10706_v22  ;;  %5288 = vmatprep.mubr.bf16.mxu0 %v10706_v22 }
 0xa1d   :  { %v4971_v4 = vadd.f32 %v12050_v10, %v4874_v13  ;;  %v9199_v14 = vpop.f32.mrb[208].mxu0  ;;  %v5000_v17 = vmax.f32 %v4968_v7, 0.0 }
 0xa1e   :  { %v9200_v60 = vpop.f32.mrb[209].mxu0 }
 0xa1f   :  { %v5001_v56 = vmax.f32 %v4971_v4, 0.0  ;;  %v9201_v19 = vadd.f32 %v9200_v60, %v9199_v14  ;;  %v9202_v54 = vpop.f32.mrb[210].mxu0 }
 0xa20   :  { %v9203_v20 = vpop.f32.mrb[211].mxu0 }
 0xa21   :  { %v12127_v21 = vpack.c.bf16 %v5001_v56, %v5000_v17  ;;  %v4879_v23 = vadd.f32 %v9201_v19, %v12042_v48  ;;  %v9204_v24 = vadd.f32 %v9203_v20, %v9202_v54 }
 0xa23   :  { %v4976_v26 = vadd.f32 %v12071_v15, %v4879_v23  ;;  %v4882_v27 = vadd.f32 %v9204_v24, %v12042_v48  ;;  %8359 = vmatmul.mubr.msk.bf16.gmra.mrb[212].mxu1 %vm330_vm4, %v12127_v21  ;;  %8368 = vmatmul.mubr.msk.bf16.gmra.mrb[236].mxu0 %vm330_vm4, %v12127_v21 }
 0xa24   :  { %5185 = vmatprep.mubr.bf16.mxu1 %v10706_v22  ;;  %5298 = vmatprep.mubr.bf16.mxu0 %v10706_v22 }
 0xa25   :  { %v4979_v10 = vadd.f32 %v12077_v18, %v4882_v27  ;;  %v9205_v28 = vpop.f32.mrb[212].mxu0  ;;  %v5002_v30 = vmax.f32 %v4976_v26, 0.0 }
 0xa26   :  { %v9206_v29 = vpop.f32.mrb[213].mxu0 }
 0xa27   :  { %v5003_v31 = vmax.f32 %v4979_v10, 0.0  ;;  %v9207_v32 = vadd.f32 %v9206_v29, %v9205_v28  ;;  %v9208_v15 = vpop.f32.mrb[214].mxu0 }
 0xa28   :  { %v9209_v33 = vpop.f32.mrb[215].mxu0 }
 0xa29   :  { %v5017_v34 = vpack.c.bf16 %v5003_v31, %v5002_v30  ;;  %v4887_v35 = vadd.f32 %v9207_v32, %v12042_v48  ;;  %v9210_v36 = vadd.f32 %v9209_v33, %v9208_v15 }
 0xa2b   :  { %v4984_v39 = vadd.f32 %v12059_v11, %v4887_v35  ;;  %v4890_v41 = vadd.f32 %v9210_v36, %v12042_v48  ;;  %8360 = vmatmul.mubr.msk.bf16.gmra.mrb[216].mxu1 %vm330_vm4, %v5017_v34  ;;  %8369 = vmatmul.mubr.msk.bf16.gmra.mrb[240].mxu0 %vm330_vm4, %v5017_v34  ;;  %v5091_v48 = vsel %vm355_vm3, %v12064_v12, 0  ;;  %v12395_v36 = vld [vmem:[%s13584_s6 + $0xc8] ss:$20 sps:$4 sm:$0xff]  }
 0xa2c   :  { %5195 = vmatprep.mubr.bf16.mxu1 %v10706_v22  ;;  %5308 = vmatprep.mubr.bf16.mxu0 %v10706_v22  ;;  %13643 = vst [vmem:[#allocation12_spill] sm:$0xff] %v12395_v36 }
 0xa2d   :  { %v4987_v18 = vadd.f32 %v12075_v16, %v4890_v41  ;;  %v5004_v44 = vmax.f32 %v4984_v39, 0.0  ;;  %v12400_v39 = vld [vmem:[%s13584_s6 + $0xf4] ss:$20 sps:$4 sm:$0xff]  }
 0xa2e   :  { %13644 = vst [vmem:[#allocation13_spill] sm:$0xff] %v12400_v39 }
 0xa2f   :  { %v5005_v46 = vmax.f32 %v4987_v18, 0.0 }
 0xa31   :  { %v5018_v43 = vpack.c.bf16 %v5005_v46, %v5004_v44 }
 0xa33   :  { %8361 = vmatmul.mubr.msk.bf16.gmra.mrb[220].mxu1 %vm330_vm4, %v5018_v43  ;;  %8370 = vmatmul.mubr.msk.bf16.gmra.mrb[244].mxu0 %vm330_vm4, %v5018_v43 }
 0xa34   :  { %5351 = vmatprep.mubr.bf16.mxu1 %v10706_v22  ;;  %5464 = vmatprep.mubr.bf16.mxu0 %v10706_v22 }
 0xa3b   :  { %8372 = vmatmul.mubr.msk.bf16.vlgmr.msra.gmra.mrb[224].mxu1 %vm330_vm4, %v12054_v2  ;;  %8381 = vmatmul.mubr.msk.bf16.vlgmr.msra.gmra.mrb[248].mxu0 %vm330_vm4, %v12054_v2 }
 0xa3c   :  { %5361 = vmatprep.mubr.bf16.mxu1 %v10706_v22  ;;  %5474 = vmatprep.mubr.bf16.mxu0 %v10706_v22 }
 0xa3d   :  { %9927 = vmatpush3.bf16.msra.mxu1 %v5091_v48 }
 0xa43   :  { %8373 = vmatmul.mubr.msk.bf16.gmra.mrb[228].mxu1 %vm330_vm4, %v12081_v25  ;;  %8382 = vmatmul.mubr.msk.bf16.gmra.mrb[252].mxu0 %vm330_vm4, %v12081_v25 }
 0xa44   :  { %5371 = vmatprep.mubr.bf16.mxu1 %v10706_v22  ;;  %5484 = vmatprep.mubr.bf16.mxu0 %v10706_v22 }
 0xa4b   :  { %8374 = vmatmul.mubr.msk.bf16.gmra.mrb[232].mxu1 %vm330_vm4, %v12091_v40  ;;  %8383 = vmatmul.mubr.msk.bf16.gmra.mrb[0].mxu0 %vm330_vm4, %v12091_v40 }
 0xa4c   :  { %5381 = vmatprep.mubr.bf16.mxu1 %v10706_v22  ;;  %5494 = vmatprep.mubr.bf16.mxu0 %v10706_v22 }
 0xa53   :  { %8375 = vmatmul.mubr.msk.bf16.gmra.mrb[236].mxu1 %vm330_vm4, %v12103_v57  ;;  %8384 = vmatmul.mubr.msk.bf16.gmra.mrb[4].mxu0 %vm330_vm4, %v12103_v57 }
 0xa54   :  { %5391 = vmatprep.mubr.bf16.mxu1 %v10706_v22  ;;  %5504 = vmatprep.mubr.bf16.mxu0 %v10706_v22 }
 0xa5b   :  { %8376 = vmatmul.mubr.msk.bf16.gmra.mrb[240].mxu1 %vm330_vm4, %v12115_v3  ;;  %8385 = vmatmul.mubr.msk.bf16.gmra.mrb[8].mxu0 %vm330_vm4, %v12115_v3 }
 0xa5c   :  { %5401 = vmatprep.mubr.bf16.mxu1 %v10706_v22  ;;  %5514 = vmatprep.mubr.bf16.mxu0 %v10706_v22 }
 0xa63   :  { %8377 = vmatmul.mubr.msk.bf16.gmra.mrb[244].mxu1 %vm330_vm4, %v12127_v21  ;;  %8386 = vmatmul.mubr.msk.bf16.gmra.mrb[12].mxu0 %vm330_vm4, %v12127_v21 }
 0xa64   :  { %5411 = vmatprep.mubr.bf16.mxu1 %v10706_v22  ;;  %5524 = vmatprep.mubr.bf16.mxu0 %v10706_v22 }
 0xa6b   :  { %8378 = vmatmul.mubr.msk.bf16.gmra.mrb[248].mxu1 %vm330_vm4, %v5017_v34  ;;  %8387 = vmatmul.mubr.msk.bf16.gmra.mrb[16].mxu0 %vm330_vm4, %v5017_v34 }
 0xa6c   :  { %5421 = vmatprep.mubr.bf16.mxu1 %v10706_v22  ;;  %5534 = vmatprep.mubr.bf16.mxu0 %v10706_v22  ;;  %v12211_v22 = vld [vmem:[%s13584_s6 + $0x4] ss:$20 sps:$4 sm:$0xff]  }
 0xa73   :  { %8379 = vmatmul.mubr.msk.bf16.gmra.mrb[252].mxu1 %vm330_vm4, %v5018_v43  ;;  %8388 = vmatmul.mubr.msk.bf16.gmra.mrb[20].mxu0 %vm330_vm4, %v5018_v43 }
 0xa74   :  { %9928 = vmatprep.mubr.msk.bf16.mxu1 %vm330_vm4, %v12054_v2  ;;  %v12218_v2 = vld [vmem:[%s13584_s6 + $0xc] ss:$20 sps:$4 sm:$0xff]  }
 0xa75   :  { %6457 = vmatprep.mubr.bf16.mxu0 %v12218_v2 }
 0xa7b   :  { %9929 = vmatmul.mubr.msk.bf16.vlgmr.msra.gmra.mrb[0].mxu1 %vm330_vm4, %v12081_v25 }
 0xa7c   :  { %9932 = vmatprep.mubr.msk.bf16.mxu1 %vm330_vm4, %v12091_v40 }
 0xa83   :  { %9933 = vmatmul.mubr.msk.bf16.gmra.mrb[4].mxu1 %vm330_vm4, %v12103_v57 }
 0xa84   :  { %9936 = vmatprep.mubr.msk.bf16.mxu1 %vm330_vm4, %v12115_v3 }
 0xa8b   :  { %9937 = vmatmul.mubr.msk.bf16.gmra.mrb[8].mxu1 %vm330_vm4, %v12127_v21 }
 0xa8c   :  { %9940 = vmatprep.mubr.msk.bf16.mxu1 %vm330_vm4, %v5017_v34 }
 0xa93   :  { %9941 = vmatmul.mubr.msk.bf16.gmra.mrb[12].mxu1 %vm330_vm4, %v5018_v43 }
 0xa94   :  { %6296 = vmatprep.mubr.bf16.mxu1 %v12211_v22 }
 0xace   :  { %v5127_v11 = vpop.f32.mrb[192].mxu1  ;;  %v5240_v12 = vpop.f32.mrb[216].mxu0 }
 0xacf   :  { %v5129_v16 = vpop.f32.mrb[193].mxu1  ;;  %v5242_v25 = vpop.f32.mrb[217].mxu0 }
 0xad0   :  { %v5131_v40 = vpop.f32.mrb[194].mxu1  ;;  %v5244_v47 = vpop.f32.mrb[218].mxu0 }
 0xad1   :  { %v5642_v37 = vpack.c.bf16 %v5131_v40, %v5127_v11  ;;  %v5644_v49 = vpack.c.bf16 %v5244_v47, %v5240_v12  ;;  %v5133_v52 = vpop.f32.mrb[195].mxu1  ;;  %v5246_v53 = vpop.f32.mrb[219].mxu0 }
 0xad2   :  { %v5643_v50 = vpack.c.bf16 %v5133_v52, %v5129_v16  ;;  %v5645_v42 = vpack.c.bf16 %v5246_v53, %v5242_v25  ;;  %v12365_v52 = vld [vmem:[%s13584_s6 + $0x78] ss:$20 sps:$4 sm:$0xff]  }
 0xad3   :  { %9230 = vmatprep.subr.bf16.mxu1 %v5644_v49  ;;  %13639 = vst [vmem:[#allocation8_spill] sm:$0xff] %v12365_v52 }
 0xad4   :  { %9231 = vmatpush3.bf16.msra.mxu1 %v5642_v37 }
 0xad6   :  { %v5137_v55 = vpop.f32.mrb[196].mxu1  ;;  %v5250_v57 = vpop.f32.mrb[220].mxu0 }
 0xad7   :  { %v5139_v59 = vpop.f32.mrb[197].mxu1  ;;  %v5252_v51 = vpop.f32.mrb[221].mxu0 }
 0xad8   :  { %v5141_v8 = vpop.f32.mrb[198].mxu1  ;;  %v5254_v61 = vpop.f32.mrb[222].mxu0 }
 0xad9   :  { %v5651_v45 = vpack.c.bf16 %v5141_v8, %v5137_v55  ;;  %v5653_v9 = vpack.c.bf16 %v5254_v61, %v5250_v57  ;;  %v5143_v62 = vpop.f32.mrb[199].mxu1  ;;  %v5256_v38 = vpop.f32.mrb[223].mxu0 }
 0xada   :  { %v5652_v63 = vpack.c.bf16 %v5143_v62, %v5139_v59  ;;  %v5654_v0 = vpack.c.bf16 %v5256_v38, %v5252_v51 }
 0xadb   :  { %9232 = vmatprep.subr.bf16.mxu1 %v5653_v9  ;;  %v12388_v9 = vld [vmem:[%s13584_s6 + $0xcc] ss:$20 sps:$4 sm:$0xff]  }
 0xadc   :  { %9233 = vmatpush3.bf16.msra.mxu1 %v5651_v45  ;;  %v12383_v45 = vld [vmem:[%s13584_s6 + $0xa0] ss:$20 sps:$4 sm:$0xff]   ;;  %13642 = vst [vmem:[#allocation11_spill] sm:$0xff] %v12388_v9 }
 0xadd   :  { %13641 = vst [vmem:[#allocation10_spill] sm:$0xff] %v12383_v45 }
 0xade   :  { %v5147_v58 = vpop.f32.mrb[200].mxu1  ;;  %v5260_v1 = vpop.f32.mrb[224].mxu0 }
 0xadf   :  { %v5149_v3 = vpop.f32.mrb[201].mxu1  ;;  %v5262_v5 = vpop.f32.mrb[225].mxu0 }
 0xae0   :  { %v5151_v6 = vpop.f32.mrb[202].mxu1  ;;  %v5264_v7 = vpop.f32.mrb[226].mxu0 }
 0xae1   :  { %v5660_v13 = vpack.c.bf16 %v5151_v6, %v5147_v58  ;;  %v5662_v4 = vpack.c.bf16 %v5264_v7, %v5260_v1  ;;  %v5153_v14 = vpop.f32.mrb[203].mxu1  ;;  %v5266_v60 = vpop.f32.mrb[227].mxu0  ;;  %v12308_v58 = vld [vmem:[%s13584_s6 + $0x28] ss:$20 sps:$4 sm:$0xff]  }
 0xae2   :  { %v5661_v17 = vpack.c.bf16 %v5153_v14, %v5149_v3  ;;  %v5663_v56 = vpack.c.bf16 %v5266_v60, %v5262_v5  ;;  %13635 = vst [vmem:[#allocation4_spill] sm:$0xff] %v12308_v58  ;;  %v12313_v1 = vld [vmem:[%s13584_s6 + $0x54] ss:$20 sps:$4 sm:$0xff]  }
 0xae3   :  { %9234 = vmatprep.subr.bf16.mxu1 %v5662_v4  ;;  %13636 = vst [vmem:[#allocation5_spill] sm:$0xff] %v12313_v1 }
 0xae4   :  { %9235 = vmatpush3.bf16.msra.mxu1 %v5660_v13 }
 0xae6   :  { %v5157_v19 = vpop.f32.mrb[204].mxu1  ;;  %v5270_v54 = vpop.f32.mrb[228].mxu0 }
 0xae7   :  { %v5159_v20 = vpop.f32.mrb[205].mxu1  ;;  %v5272_v21 = vpop.f32.mrb[229].mxu0 }
 0xae8   :  { %v5161_v23 = vpop.f32.mrb[206].mxu1  ;;  %v5274_v24 = vpop.f32.mrb[230].mxu0 }
 0xae9   :  { %v5669_v26 = vpack.c.bf16 %v5161_v23, %v5157_v19  ;;  %v5671_v27 = vpack.c.bf16 %v5274_v24, %v5270_v54  ;;  %v5163_v10 = vpop.f32.mrb[207].mxu1  ;;  %v5276_v28 = vpop.f32.mrb[231].mxu0 }
 0xaea   :  { %v5670_v29 = vpack.c.bf16 %v5163_v10, %v5159_v20  ;;  %v5672_v30 = vpack.c.bf16 %v5276_v28, %v5272_v21  ;;  %v12344_v20 = vld [vmem:[%s13584_s6 + $0x50] ss:$20 sps:$4 sm:$0xff]  }
 0xaeb   :  { %9236 = vmatprep.subr.bf16.mxu1 %v5671_v27  ;;  %13637 = vst [vmem:[#allocation6_spill] sm:$0xff] %v12344_v20  ;;  %v12349_v21 = vld [vmem:[%s13584_s6 + $0x7c] ss:$20 sps:$4 sm:$0xff]  }
 0xaec   :  { %9237 = vmatpush3.bf16.msra.mxu1 %v5669_v26  ;;  %13638 = vst [vmem:[#allocation7_spill] sm:$0xff] %v12349_v21 }
 0xaed   :  { %9238 = vmatprep.subr.bf16.mxu1 %v5645_v42  ;;  %v12277_v42 = vld [vmem:[%s13584_s6 + $0x2c] ss:$20 sps:$4 sm:$0xff]  }
 0xaee   :  { %v12221_v31 = vpop.f32.mrb[208].mxu1  ;;  %v12223_v32 = vpop.f32.mrb[232].mxu0  ;;  %13634 = vst [vmem:[#allocation3_spill] sm:$0xff] %v12277_v42 }
 0xaef   :  { %v12225_v15 = vpop.f32.mrb[209].mxu1  ;;  %v12227_v33 = vpop.f32.mrb[233].mxu0 }
 0xaf0   :  { %v12229_v34 = vpop.f32.mrb[210].mxu1  ;;  %v12231_v35 = vpop.f32.mrb[234].mxu0  ;;  %9239 = vmatpush3.bf16.msra.mxu1 %v5643_v50  ;;  %v12272_v50 = vld [vmem:[%s13584_s6] ss:$20 sps:$4 sm:$0xff]  }
 0xaf1   :  { %v12237_v41 = vpop.f32.mrb[211].mxu1  ;;  %v12239_v18 = vpop.f32.mrb[235].mxu0  ;;  %9240 = vmatprep.subr.bf16.mxu1 %v5654_v0 }
 0xaf4   :  { %9241 = vmatpush3.bf16.msra.mxu1 %v5652_v63 }
 0xaf5   :  { %9242 = vmatprep.subr.bf16.mxu1 %v5663_v56 }
 0xaf6   :  { %v12245_v43 = vpop.f32.mrb[212].mxu1  ;;  %v12247_v48 = vpop.f32.mrb[236].mxu0 }
 0xaf7   :  { %v12249_v11 = vpop.f32.mrb[213].mxu1  ;;  %v12251_v12 = vpop.f32.mrb[237].mxu0 }
 0xaf8   :  { %v12253_v16 = vpop.f32.mrb[214].mxu1  ;;  %v12255_v25 = vpop.f32.mrb[238].mxu0  ;;  %9243 = vmatpush3.bf16.msra.mxu1 %v5661_v17 }
 0xaf9   :  { %v12261_v37 = vpop.f32.mrb[215].mxu1  ;;  %v12263_v49 = vpop.f32.mrb[239].mxu0  ;;  %9244 = vmatprep.subr.bf16.mxu1 %v5672_v30 }
 0xafc   :  { %9245 = vmatpush3.bf16.msra.mxu1 %v5670_v29 }
 0xafe   :  { %v12279_v55 = vpop.f32.mrb[216].mxu1  ;;  %v12281_v57 = vpop.f32.mrb[240].mxu0 }
 0xaff   :  { %v12283_v59 = vpop.f32.mrb[217].mxu1  ;;  %v12285_v51 = vpop.f32.mrb[241].mxu0  ;;  %6297 = vmatmul.mubr.bf16.vlgmr.msra.gmra.mrb[16].mxu1 %v12272_v50 }
 0xb00   :  { %v12288_v8 = vpop.f32.mrb[218].mxu1  ;;  %v12290_v61 = vpop.f32.mrb[242].mxu0  ;;  %6304 = vmatprep.mubr.bf16.mxu1 %v12277_v42  ;;  %v13655_v42 = vpack.c.bf16 %v12255_v25, %v12247_v48  ;;  %v13658_v48 = vpack.c.bf16 %v12253_v16, %v12245_v43  ;;  %v12552_v25 = vld [vmem:[%s13584_s6 + $0x194] ss:$20 sps:$4 sm:$0xff]  }
 0xb01   :  { %v12297_v62 = vpop.f32.mrb[219].mxu1  ;;  %v12299_v38 = vpop.f32.mrb[243].mxu0 }
 0xb06   :  { %v12315_v3 = vpop.f32.mrb[220].mxu1  ;;  %v12317_v5 = vpop.f32.mrb[244].mxu0 }
 0xb07   :  { %v12319_v6 = vpop.f32.mrb[221].mxu1  ;;  %v12321_v7 = vpop.f32.mrb[245].mxu0  ;;  %6305 = vmatmul.mubr.bf16.gmra.mrb[20].mxu1 %v12308_v58 }
 0xb08   :  { %v12324_v13 = vpop.f32.mrb[222].mxu1  ;;  %v12326_v4 = vpop.f32.mrb[246].mxu0  ;;  %6312 = vmatprep.mubr.bf16.mxu1 %v12313_v1 }
 0xb09   :  { %v12333_v17 = vpop.f32.mrb[223].mxu1  ;;  %v12335_v56 = vpop.f32.mrb[247].mxu0 }
 0xb0e   :  { %v5353_v23 = vpop.f32.mrb[224].mxu1  ;;  %v5466_v24 = vpop.f32.mrb[248].mxu0 }
 0xb0f   :  { %v12351_v26 = vpop.f32.mrb[225].mxu1  ;;  %v12353_v27 = vpop.f32.mrb[249].mxu0  ;;  %6313 = vmatmul.mubr.bf16.gmra.mrb[24].mxu1 %v12344_v20 }
 0xb10   :  { %v5357_v10 = vpop.f32.mrb[226].mxu1  ;;  %v5470_v28 = vpop.f32.mrb[250].mxu0  ;;  %6320 = vmatprep.mubr.bf16.mxu1 %v12349_v21 }
 0xb11   :  { %v5646_v29 = vpack.c.bf16 %v5357_v10, %v5353_v23  ;;  %v5648_v30 = vpack.c.bf16 %v5470_v28, %v5466_v24  ;;  %v12357_v19 = vpop.f32.mrb[227].mxu1  ;;  %v5472_v54 = vpop.f32.mrb[251].mxu0  ;;  %v12370_v23 = vld [vmem:[%s13584_s6 + $0xa4] ss:$20 sps:$4 sm:$0xff]  }
 0xb12   :  { %v5649_v0 = vpack.c.bf16 %v5472_v54, %v12353_v27  ;;  %13640 = vst [vmem:[#allocation9_spill] sm:$0xff] %v12370_v23 }
 0xb13   :  { %9342 = vmatprep.subr.bf16.mxu0 %v5648_v30 }
 0xb14   :  { %9343 = vmatpush3.bf16.msra.mxu0 %v5646_v29 }
 0xb16   :  { %v5363_v24 = vpop.f32.mrb[228].mxu1  ;;  %v5476_v10 = vpop.f32.mrb[252].mxu0 }
 0xb17   :  { %v12372_v28 = vpop.f32.mrb[229].mxu1  ;;  %v12374_v53 = vpop.f32.mrb[253].mxu0  ;;  %6321 = vmatmul.mubr.bf16.gmra.mrb[28].mxu1 %v12365_v52  ;;  %v12500_v52 = vld [vmem:[%s13584_s6 + $0x34] ss:$20 sps:$4 sm:$0xff]  }
 0xb18   :  { %v5367_v54 = vpop.f32.mrb[230].mxu1  ;;  %v5480_v27 = vpop.f32.mrb[254].mxu0  ;;  %6328 = vmatprep.mubr.bf16.mxu1 %v12370_v23  ;;  %13653 = vst [vmem:[#allocation20_spill] sm:$0xff] %v12500_v52 }
 0xb19   :  { %v5655_v30 = vpack.c.bf16 %v5367_v54, %v5363_v24  ;;  %v5657_v44 = vpack.c.bf16 %v5480_v27, %v5476_v10  ;;  %v5369_v29 = vpop.f32.mrb[231].mxu1  ;;  %v5482_v46 = vpop.f32.mrb[255].mxu0 }
 0xb1a   :  { %v5656_v14 = vpack.c.bf16 %v5369_v29, %v12372_v28  ;;  %v5658_v60 = vpack.c.bf16 %v5482_v46, %v12374_v53 }
 0xb1b   :  { %9344 = vmatprep.subr.bf16.mxu0 %v5657_v44 }
 0xb1c   :  { %9345 = vmatpush3.bf16.msra.mxu0 %v5655_v30 }
 0xb1e   :  { %v5373_v24 = vpop.f32.mrb[232].mxu1  ;;  %v5486_v10 = vpop.f32.mrb[0].mxu0 }
 0xb1f   :  { %v5375_v54 = vpop.f32.mrb[233].mxu1  ;;  %v5488_v27 = vpop.f32.mrb[1].mxu0  ;;  %6329 = vmatmul.mubr.bf16.gmra.mrb[32].mxu1 %v12383_v45  ;;  %v12407_v45 = vld [vmem:[%s13584_s6 + $0xf0] ss:$20 sps:$4 sm:$0xff]  }
 0xb20   :  { %v5377_v28 = vpop.f32.mrb[234].mxu1  ;;  %v5490_v46 = vpop.f32.mrb[2].mxu0  ;;  %6336 = vmatprep.mubr.bf16.mxu1 %v12388_v9  ;;  %13645 = vst [vmem:[#allocation14_spill] sm:$0xff] %v12407_v45 }
 0xb21   :  { %v5664_v44 = vpack.c.bf16 %v5377_v28, %v5373_v24  ;;  %v5666_v53 = vpack.c.bf16 %v5490_v46, %v5486_v10  ;;  %v5379_v29 = vpop.f32.mrb[235].mxu1  ;;  %v5492_v40 = vpop.f32.mrb[3].mxu0 }
 0xb22   :  { %v5665_v30 = vpack.c.bf16 %v5379_v29, %v5375_v54  ;;  %v5667_v47 = vpack.c.bf16 %v5492_v40, %v5488_v27 }
 0xb23   :  { %9346 = vmatprep.subr.bf16.mxu0 %v5666_v53 }
 0xb24   :  { %9347 = vmatpush3.bf16.msra.mxu0 %v5664_v44 }
 0xb26   :  { %v5383_v63 = vpop.f32.mrb[236].mxu1  ;;  %v5496_v9 = vpop.f32.mrb[4].mxu0 }
 0xb27   :  { %v5385_v24 = vpop.f32.mrb[237].mxu1  ;;  %v5498_v10 = vpop.f32.mrb[5].mxu0  ;;  %6337 = vmatmul.mubr.bf16.gmra.mrb[36].mxu1 %v12395_v36  ;;  %v12412_v36 = vld [vmem:[%s13584_s6 + $0x11c] ss:$20 sps:$4 sm:$0xff]  }
 0xb28   :  { %v5387_v54 = vpop.f32.mrb[238].mxu1  ;;  %v5500_v40 = vpop.f32.mrb[6].mxu0  ;;  %6344 = vmatprep.mubr.bf16.mxu1 %v12400_v39  ;;  %13646 = vst [vmem:[#allocation15_spill] sm:$0xff] %v12412_v36 }
 0xb29   :  { %v5673_v27 = vpack.c.bf16 %v5387_v54, %v5383_v63  ;;  %v5675_v28 = vpack.c.bf16 %v5500_v40, %v5496_v9  ;;  %v5389_v46 = vpop.f32.mrb[239].mxu1  ;;  %v5502_v53 = vpop.f32.mrb[7].mxu0  ;;  %v13647_v40 = vpack.c.bf16 %v12357_v19, %v12351_v26  ;;  %v12446_v26 = vld [vmem:[%s13584_s6 + $0x118] ss:$20 sps:$4 sm:$0xff]  }
 0xb2a   :  { %v5674_v44 = vpack.c.bf16 %v5389_v46, %v5385_v24  ;;  %v5676_v29 = vpack.c.bf16 %v5502_v53, %v5498_v10  ;;  %13648 = vst [vmem:[#allocation16_spill] sm:$0xff] %v12446_v26 }
 0xb2b   :  { %9348 = vmatprep.subr.bf16.mxu0 %v5675_v28 }
 0xb2c   :  { %9349 = vmatpush3.bf16.msra.mxu0 %v5673_v27 }
 0xb2d   :  { %9350 = vmatprep.subr.bf16.mxu0 %v5649_v0 }
 0xb2e   :  { %v12414_v39 = vpop.f32.mrb[240].mxu1  ;;  %v12416_v9 = vpop.f32.mrb[8].mxu0 }
 0xb2f   :  { %v12418_v63 = vpop.f32.mrb[241].mxu1  ;;  %v12420_v24 = vpop.f32.mrb[9].mxu0  ;;  %6345 = vmatmul.mubr.bf16.gmra.mrb[40].mxu1 %v12407_v45 }
 0xb30   :  { %v12423_v10 = vpop.f32.mrb[242].mxu1  ;;  %v12425_v54 = vpop.f32.mrb[10].mxu0  ;;  %9351 = vmatpush3.bf16.msra.mxu0 %v13647_v40  ;;  %6352 = vmatprep.mubr.bf16.mxu1 %v12412_v36  ;;  %v12451_v40 = vld [vmem:[%s13584_s6 + $0x144] ss:$20 sps:$4 sm:$0xff]  }
 0xb31   :  { %v12435_v28 = vpop.f32.mrb[243].mxu1  ;;  %v12437_v46 = vpop.f32.mrb[11].mxu0  ;;  %9352 = vmatprep.subr.bf16.mxu0 %v5658_v60  ;;  %13649 = vst [vmem:[#allocation17_spill] sm:$0xff] %v12451_v40 }
 0xb34   :  { %9353 = vmatpush3.bf16.msra.mxu0 %v5656_v14 }
 0xb35   :  { %9354 = vmatprep.subr.bf16.mxu0 %v5667_v47  ;;  %v12487_v47 = vld [vmem:[%s13584_s6 + $0x8] ss:$20 sps:$4 sm:$0xff]  }
 0xb36   :  { %v12453_v0 = vpop.f32.mrb[244].mxu1  ;;  %v12455_v60 = vpop.f32.mrb[12].mxu0 }
 0xb37   :  { %v12457_v53 = vpop.f32.mrb[245].mxu1  ;;  %v12459_v27 = vpop.f32.mrb[13].mxu0  ;;  %6353 = vmatmul.mubr.bf16.gmra.mrb[44].mxu1 %v12446_v26  ;;  %v13652_v26 = vpack.c.bf16 %v12231_v35, %v12223_v32  ;;  %v13654_v35 = vpack.c.bf16 %v12229_v34, %v12221_v31  ;;  %v12560_v31 = vld [vmem:[%s13584_s6 + $0x5c] ss:$20 sps:$4 sm:$0xff]  }
 0xb38   :  { %v12462_v19 = vpop.f32.mrb[246].mxu1  ;;  %v12464_v36 = vpop.f32.mrb[14].mxu0  ;;  %9355 = vmatpush3.bf16.msra.mxu0 %v5665_v30  ;;  %6360 = vmatprep.mubr.bf16.mxu1 %v12451_v40  ;;  %v12482_v30 = vld [vmem:[%s13584_s6 + $0x140] ss:$20 sps:$4 sm:$0xff]  }
 0xb39   :  { %v12471_v45 = vpop.f32.mrb[247].mxu1  ;;  %v12473_v23 = vpop.f32.mrb[15].mxu0  ;;  %9356 = vmatprep.subr.bf16.mxu0 %v5676_v29  ;;  %13650 = vst [vmem:[#allocation18_spill] sm:$0xff] %v12482_v30  ;;  %v12492_v29 = vld [vmem:[%s13584_s6 + $0x16c] ss:$20 sps:$4 sm:$0xff]  }
 0xb3a   :  { %13651 = vst [vmem:[#allocation19_spill] sm:$0xff] %v12492_v29 }
 0xb3c   :  { %9357 = vmatpush3.bf16.msra.mxu0 %v5674_v44 }
 0xb3d   :  { %9474 = vmatprep.subr.bf16.mxu0 %v13652_v26  ;;  %v12544_v26 = vld [vmem:[%s13584_s6 + $0x30] ss:$20 sps:$4 sm:$0xff]  }
 0xb3e   :  { %v12502_v14 = vpop.f32.mrb[248].mxu1  ;;  %v12504_v40 = vpop.f32.mrb[16].mxu0  ;;  %13657 = vst [vmem:[#allocation22_spill] sm:$0xff] %v12544_v26 }
 0xb3f   :  { %v12506_v21 = vpop.f32.mrb[249].mxu1  ;;  %v12508_v44 = vpop.f32.mrb[17].mxu0  ;;  %6361 = vmatmul.mubr.bf16.gmra.mrb[48].mxu1 %v12482_v30  ;;  %6458 = vmatmul.mubr.bf16.vlgmr.msra.gmra.mrb[24].mxu0 %v12487_v47 }
 0xb40   :  { %v12512_v20 = vpop.f32.mrb[250].mxu1  ;;  %v12514_v32 = vpop.f32.mrb[18].mxu0  ;;  %9475 = vmatpush3.bf16.msra.mxu0 %v13654_v35  ;;  %6368 = vmatprep.mubr.bf16.mxu1 %v12492_v29  ;;  %v12539_v35 = vld [vmem:[%s13584_s6 + $0x168] ss:$20 sps:$4 sm:$0xff]  }
 0xb41   :  { %v12524_v58 = vpop.f32.mrb[251].mxu1  ;;  %v12526_v30 = vpop.f32.mrb[19].mxu0  ;;  %9476 = vmatprep.subr.bf16.mxu0 %v13655_v42  ;;  %6465 = vmatprep.mubr.bf16.mxu0 %v12500_v52  ;;  %13656 = vst [vmem:[#allocation21_spill] sm:$0xff] %v12539_v35  ;;  %v13659_v42 = vpack.c.bf16 %v12290_v61, %v12281_v57  ;;  %v13660_v61 = vpack.c.bf16 %v12288_v8, %v12279_v55  ;;  %v12620_v55 = vld [vmem:[%s13584_s6 + $0x84] ss:$20 sps:$4 sm:$0xff]  }
 0xb44   :  { %9477 = vmatpush3.bf16.msra.mxu0 %v13658_v48 }
 0xb45   :  { %9478 = vmatprep.subr.bf16.mxu0 %v13659_v42  ;;  %v12604_v42 = vld [vmem:[%s13584_s6 + $0x58] ss:$20 sps:$4 sm:$0xff]  }
 0xb46   :  { %v12562_v34 = vpop.f32.mrb[252].mxu1  ;;  %v12564_v1 = vpop.f32.mrb[20].mxu0 }
 0xb47   :  { %v12566_v43 = vpop.f32.mrb[253].mxu1  ;;  %v12568_v16 = vpop.f32.mrb[21].mxu0  ;;  %6369 = vmatmul.mubr.bf16.gmra.mrb[52].mxu1 %v12539_v35  ;;  %6466 = vmatmul.mubr.bf16.gmra.mrb[28].mxu0 %v12544_v26  ;;  %v13661_v26 = vpack.c.bf16 %v12326_v4, %v12317_v5  ;;  %v13663_v5 = vpack.c.bf16 %v12324_v13, %v12315_v3  ;;  %v12612_v4 = vld [vmem:[%s13584_s6 + $0x1bc] ss:$20 sps:$4 sm:$0xff]   ;;  %v13665_v13 = vpack.c.bf16 %v12237_v41, %v12225_v15  ;;  %v12640_v15 = vld [vmem:[%s13584_s6 + $0x80] ss:$20 sps:$4 sm:$0xff]  }
 0xb48   :  { %v12572_v48 = vpop.f32.mrb[254].mxu1  ;;  %v12574_v57 = vpop.f32.mrb[22].mxu0  ;;  %9479 = vmatpush3.bf16.msra.mxu0 %v13660_v61  ;;  %6376 = vmatprep.mubr.bf16.mxu1 %v12552_v25  ;;  %v12599_v61 = vld [vmem:[%s13584_s6 + $0x190] ss:$20 sps:$4 sm:$0xff]   ;;  %v13667_v41 = vpack.c.bf16 %v12261_v37, %v12249_v11  ;;  %v13669_v37 = vpack.c.bf16 %v12297_v62, %v12283_v59  ;;  %v12676_v59 = vld [vmem:[%s13584_s6 + $0xa8] ss:$20 sps:$4 sm:$0xff]   ;;  %v13671_v62 = vpack.c.bf16 %v12333_v17, %v12319_v6 }
 0xb49   :  { %v12584_v52 = vpop.f32.mrb[255].mxu1  ;;  %v12586_v35 = vpop.f32.mrb[23].mxu0  ;;  %9480 = vmatprep.subr.bf16.mxu0 %v13661_v26  ;;  %6473 = vmatprep.mubr.bf16.mxu0 %v12560_v31  ;;  %13662 = vst [vmem:[#allocation23_spill] sm:$0xff] %v12599_v61  ;;  %v13664_v26 = vpack.c.bf16 %v12239_v18, %v12227_v33 }
 0xb4c   :  { %9481 = vmatpush3.bf16.msra.mxu0 %v13663_v5  ;;  %v13666_v5 = vpack.c.bf16 %v12263_v49, %v12251_v12  ;;  %v12648_v12 = vld [vmem:[%s13584_s6 + $0x1e4] ss:$20 sps:$4 sm:$0xff]   ;;  %v13668_v49 = vpack.c.bf16 %v12299_v38, %v12285_v51 }
 0xb4d   :  { %9482 = vmatprep.subr.bf16.mxu0 %v13664_v26 }
 0xb4e   :  { %v9930_v8 = vpop.f32.mrb[0].mxu1 }
 0xb4f   :  { %v5579_v29 = vpop.f32.mrb[1].mxu1  ;;  %6377 = vmatmul.mubr.bf16.gmra.mrb[56].mxu1 %v12599_v61  ;;  %6474 = vmatmul.mubr.bf16.gmra.mrb[32].mxu0 %v12604_v42  ;;  %v12635_v61 = vld [vmem:[%s13584_s6 + $0x1b8] ss:$20 sps:$4 sm:$0xff]  }
 0xb50   :  { %v9931_v3 = vpop.f32.mrb[2].mxu1  ;;  %9483 = vmatpush3.bf16.msra.mxu0 %v13665_v13  ;;  %6384 = vmatprep.mubr.bf16.mxu1 %v12612_v4  ;;  %v13670_v13 = vpack.c.bf16 %v12335_v56, %v12321_v7  ;;  %v12684_v7 = vld [vmem:[%s13584_s6 + $0x20c] ss:$20 sps:$4 sm:$0xff]   ;;  %v12689_v56 = vld [vmem:[%s13584_s6 + $0xd4] ss:$20 sps:$4 sm:$0xff]  }
 0xb51   :  { %v5659_v33 = vpack.c.bf16 %v9931_v3, %v9930_v8  ;;  %v5582_v18 = vpop.f32.mrb[3].mxu1  ;;  %9484 = vmatprep.subr.bf16.mxu0 %v13666_v5  ;;  %6481 = vmatprep.mubr.bf16.mxu0 %v12620_v55  ;;  %v12656_v8 = vld [vmem:[%s13584_s6 + $0xac] ss:$20 sps:$4 sm:$0xff]  }
 0xb52   :  { %v5650_v26 = vpack.c.bf16 %v5582_v18, %v5579_v29  ;;  %v12671_v5 = vld [vmem:[%s13584_s6 + $0x1e0] ss:$20 sps:$4 sm:$0xff]  }
 0xb54   :  { %9944 = vmatprep.subr.bf16.mxu1 %v5650_v26  ;;  %9485 = vmatpush3.bf16.msra.mxu0 %v13667_v41 }
 0xb55   :  { %9945 = vmatpush3.bf16.msra.mxu1 %v5650_v26  ;;  %9486 = vmatprep.subr.bf16.mxu0 %v13668_v49 }
 0xb56   :  { %v9934_v29 = vpop.f32.mrb[4].mxu1  ;;  %9946 = vmatprep.subr.bf16.mxu1 %v5659_v33 }
 0xb57   :  { %v5595_v3 = vpop.f32.mrb[5].mxu1  ;;  %6385 = vmatmul.mubr.bf16.gmra.mrb[60].mxu1 %v12635_v61  ;;  %6482 = vmatmul.mubr.bf16.gmra.mrb[36].mxu0 %v12640_v15 }
 0xb58   :  { %v9935_v11 = vpop.f32.mrb[6].mxu1  ;;  %9487 = vmatpush3.bf16.msra.mxu0 %v13669_v37  ;;  %6392 = vmatprep.mubr.bf16.mxu1 %v12648_v12  ;;  %v12716_v37 = vld [vmem:[%s13584_s6 + $0x234] ss:$20 sps:$4 sm:$0xff]  }
 0xb59   :  { %v5677_v51 = vpack.c.bf16 %v9935_v11, %v9934_v29  ;;  %v5598_v38 = vpop.f32.mrb[7].mxu1  ;;  %9947 = vmatpush3.bf16.msra.mxu1 %v5659_v33  ;;  %9488 = vmatprep.subr.bf16.mxu0 %v13670_v13  ;;  %v13672_v29 = vpack.c.bf16 %v12425_v54, %v12416_v9  ;;  %v12710_v11 = vld [vmem:[%s13584_s6 + $0xd0] ss:$20 sps:$4 sm:$0xff]   ;;  %13674 = vst [vmem:[#allocation25_spill] sm:$0xff] %v12716_v37 }
 0xb5a   :  { %v5668_v18 = vpack.c.bf16 %v5598_v38, %v5595_v3  ;;  %6489 = vmatprep.mubr.bf16.mxu0 %v12656_v8  ;;  %v12705_v3 = vld [vmem:[%s13584_s6 + $0x208] ss:$20 sps:$4 sm:$0xff]  }
 0xb5b   :  { %13673 = vst [vmem:[#allocation24_spill] sm:$0xff] %v12705_v3  ;;  %v12721_v9 = vld [vmem:[%s13584_s6 + $0xfc] ss:$20 sps:$4 sm:$0xff]  }
 0xb5c   :  { %9948 = vmatprep.subr.bf16.mxu1 %v5668_v18  ;;  %9489 = vmatpush3.bf16.msra.mxu0 %v13671_v62 }
 0xb5d   :  { %9949 = vmatpush3.bf16.msra.mxu1 %v5668_v18 }
 0xb5e   :  { %v9938_v33 = vpop.f32.mrb[8].mxu1  ;;  %9950 = vmatprep.subr.bf16.mxu1 %v5677_v51 }
 0xb5f   :  { %v5611_v26 = vpop.f32.mrb[9].mxu1  ;;  %6393 = vmatmul.mubr.bf16.gmra.mrb[64].mxu1 %v12671_v5  ;;  %6490 = vmatmul.mubr.bf16.gmra.mrb[40].mxu0 %v12676_v59 }
 0xb60   :  { %v9939_v6 = vpop.f32.mrb[10].mxu1  ;;  %6400 = vmatprep.mubr.bf16.mxu1 %v12684_v7  ;;  %6497 = vmatprep.mubr.bf16.mxu0 %v12689_v56 }
 0xb61   :  { %v12695_v17 = vpack.c.bf16 %v9939_v6, %v9938_v33  ;;  %v5614_v41 = vpop.f32.mrb[11].mxu1  ;;  %9951 = vmatpush3.bf16.msra.mxu1 %v5677_v51  ;;  %v12734_v33 = vld [vmem:[%s13584_s6 + $0x230] ss:$20 sps:$4 sm:$0xff]  }
 0xb62   :  { %v12697_v49 = vpack.c.bf16 %v5614_v41, %v5611_v26  ;;  %9586 = vmatprep.subr.bf16.mxu1 %v13672_v29  ;;  %13675 = vst [vmem:[#allocation26_spill] sm:$0xff] %v12734_v33  ;;  %v12739_v26 = vld [vmem:[%s13584_s6 + $0xf8] ss:$20 sps:$4 sm:$0xff]   ;;  %v12744_v6 = vld [vmem:[%s13584_s6 + $0x25c] ss:$20 sps:$4 sm:$0xff]  }
 0xb63   :  { %13676 = vst [vmem:[#allocation27_spill] sm:$0xff] %v12744_v6  ;;  %v12749_v41 = vld [vmem:[%s13584_s6 + $0x124] ss:$20 sps:$4 sm:$0xff]  }
 0xb64   :  { %9984 = vmatprep.subr.bf16.mxu0 %v12697_v49  ;;  %v12758_v29 = vld [vmem:[%s13584_s6 + $0x258] ss:$20 sps:$4 sm:$0xff]  }
 0xb65   :  { %13677 = vst [vmem:[#allocation28_spill] sm:$0xff] %v12758_v29 }
 0xb66   :  { %v9942_v54 = vpop.f32.mrb[12].mxu1 }
 0xb67   :  { %v5627_v51 = vpop.f32.mrb[13].mxu1  ;;  %6401 = vmatmul.mubr.bf16.gmra.mrb[68].mxu1 %v12705_v3  ;;  %6498 = vmatmul.mubr.bf16.gmra.mrb[44].mxu0 %v12710_v11  ;;  %v12815_v3 = vld [vmem:[%s13584_s6 + $0x170] ss:$20 sps:$4 sm:$0xff]  }
 0xb68   :  { %v9943_v38 = vpop.f32.mrb[14].mxu1  ;;  %6408 = vmatprep.mubr.bf16.mxu1 %v12716_v37  ;;  %6505 = vmatprep.mubr.bf16.mxu0 %v12721_v9  ;;  %v13681_v37 = vpack.c.bf16 %v12464_v36, %v12455_v60  ;;  %v12828_v36 = vld [vmem:[%s13584_s6 + $0x19c] ss:$20 sps:$4 sm:$0xff]  }
 0xb69   :  { %v12727_v13 = vpack.c.bf16 %v9943_v38, %v9942_v54  ;;  %v5630_v18 = vpop.f32.mrb[15].mxu1  ;;  %v12763_v54 = vld [vmem:[%s13584_s6 + $0x120] ss:$20 sps:$4 sm:$0xff]   ;;  %v12773_v38 = vld [vmem:[%s13584_s6 + $0x10] ss:$20 sps:$4 sm:$0xff]  }
 0xb6a   :  { %v12729_v62 = vpack.c.bf16 %v5630_v18, %v5627_v51  ;;  %v12768_v51 = vld [vmem:[%s13584_s6 + $0x14c] ss:$20 sps:$4 sm:$0xff]   ;;  %13678 = vst [vmem:[#allocation29_spill] sm:$0xff] %v12773_v38  ;;  %v12783_v18 = vld [vmem:[%s13584_s6 + $0x148] ss:$20 sps:$4 sm:$0xff]  }
 0xb6b   :  { %v12836_v60 = vld [vmem:[%s13584_s6 + $0xb0] ss:$20 sps:$4 sm:$0xff]  }
 0xb6f   :  { %6409 = vmatmul.mubr.bf16.gmra.mrb[72].mxu1 %v12734_v33  ;;  %6506 = vmatmul.mubr.bf16.gmra.mrb[48].mxu0 %v12739_v26  ;;  %v12798_v33 = vld [vmem:[%s13584_s6 + $0x60] ss:$20 sps:$4 sm:$0xff]  }
 0xb70   :  { %6416 = vmatprep.mubr.bf16.mxu1 %v12744_v6  ;;  %6513 = vmatprep.mubr.bf16.mxu0 %v12749_v41  ;;  %v12788_v6 = vld [vmem:[%s13584_s6 + $0x38] ss:$20 sps:$4 sm:$0xff]  }
 0xb71   :  { %13679 = vst [vmem:[#allocation30_spill] sm:$0xff] %v12788_v6 }
 0xb77   :  { %6417 = vmatmul.mubr.bf16.gmra.mrb[76].mxu1 %v12758_v29  ;;  %6514 = vmatmul.mubr.bf16.gmra.mrb[52].mxu0 %v12763_v54  ;;  %v12793_v29 = vld [vmem:[%s13584_s6 + $0x174] ss:$20 sps:$4 sm:$0xff]  }
 0xb78   :  { %6521 = vmatprep.mubr.bf16.mxu0 %v12768_v51  ;;  %9952 = vmatprep.mubr.msk.bf16.mxu1 %vm6215_vm8, %v12773_v38  ;;  %v13680_v38 = vpack.c.bf16 %v12423_v10, %v12414_v39  ;;  %v13682_v39 = vpack.c.bf16 %v12462_v19, %v12453_v0  ;;  %v13683_v10 = vpack.c.bf16 %v12514_v32, %v12504_v40  ;;  %v12853_v40 = vld [vmem:[%s13584_s6 + $0x198] ss:$20 sps:$4 sm:$0xff]  }
 0xb79   :  { %v13684_v0 = vpack.c.bf16 %v12512_v20, %v12502_v14  ;;  %v13685_v19 = vpack.c.bf16 %v12574_v57, %v12564_v1  ;;  %v12858_v32 = vld [vmem:[%s13584_s6 + $0xd8] ss:$20 sps:$4 sm:$0xff]   ;;  %v13686_v20 = vpack.c.bf16 %v12572_v48, %v12562_v34  ;;  %v13687_v14 = vpack.c.bf16 %v12437_v46, %v12420_v24  ;;  %v12874_v57 = vld [vmem:[%s13584_s6 + $0x100] ss:$20 sps:$4 sm:$0xff]   ;;  %v12896_v48 = vld [vmem:[%s13584_s6 + $0x128] ss:$20 sps:$4 sm:$0xff]  }
 0xb7a   :  { %v12866_v1 = vld [vmem:[%s13584_s6 + $0x1c4] ss:$20 sps:$4 sm:$0xff]   ;;  %v13688_v34 = vpack.c.bf16 %v12435_v28, %v12418_v63  ;;  %v13689_v24 = vpack.c.bf16 %v12473_v23, %v12459_v27  ;;  %v12891_v46 = vld [vmem:[%s13584_s6 + $0x1c0] ss:$20 sps:$4 sm:$0xff]   ;;  %v13690_v63 = vpack.c.bf16 %v12471_v45, %v12457_v53  ;;  %v13691_v27 = vpack.c.bf16 %v12526_v30, %v12508_v44  ;;  %v12929_v30 = vld [vmem:[%s13584_s6 + $0x1e8] ss:$20 sps:$4 sm:$0xff]  }
 0xb7b   :  { %v12904_v23 = vld [vmem:[%s13584_s6 + $0x1ec] ss:$20 sps:$4 sm:$0xff]   ;;  %v12912_v28 = vld [vmem:[%s13584_s6 + $0x150] ss:$20 sps:$4 sm:$0xff]   ;;  %v13692_v45 = vpack.c.bf16 %v12524_v58, %v12506_v21  ;;  %v13693_v53 = vpack.c.bf16 %v12586_v35, %v12568_v16  ;;  %v13694_v58 = vpack.c.bf16 %v12584_v52, %v12566_v43  ;;  %v12942_v21 = vld [vmem:[%s13584_s6 + $0x214] ss:$20 sps:$4 sm:$0xff]  }
 0xb7c   :  { %v12934_v44 = vld [vmem:[%s13584_s6 + $0x178] ss:$20 sps:$4 sm:$0xff]   ;;  %v12947_v35 = vld [vmem:[%s13584_s6 + $0x1a0] ss:$20 sps:$4 sm:$0xff]   ;;  %v12958_v52 = vld [vmem:[%s13584_s6 + $0x210] ss:$20 sps:$4 sm:$0xff]  }
 0xb7d   :  { %v12963_v43 = vld [vmem:[%s13584_s6 + $0x1c8] ss:$20 sps:$4 sm:$0xff]  }
 0xb7e   :  { %v12968_v16 = vld [vmem:[%s13584_s6 + $0x23c] ss:$20 sps:$4 sm:$0xff]  }
 0xb7f   :  { %6522 = vmatmul.mubr.bf16.gmra.mrb[56].mxu0 %v12783_v18  ;;  %9953 = vmatmul.mubr.msk.bf16.vlgmr.msra.gmra.mrb[80].mxu1 %vm6215_vm8, %v12788_v6  ;;  %v12820_v6 = vld [vmem:[%s13584_s6 + $0x88] ss:$20 sps:$4 sm:$0xff]  }
 0xb80   :  { %9587 = vmatpush3.bf16.msra.mxu1 %v13680_v38  ;;  %6529 = vmatprep.mubr.bf16.mxu0 %v12793_v29  ;;  %v12984_v38 = vld [vmem:[%s13584_s6 + $0x238] ss:$20 sps:$4 sm:$0xff]  }
 0xb81   :  { %9588 = vmatprep.subr.bf16.mxu1 %v13681_v37  ;;  %9956 = vmatprep.mubr.msk.bf16.mxu1 %vm6215_vm8, %v12798_v33  ;;  %v12973_v37 = vld [vmem:[%s13584_s6 + $0x1f0] ss:$20 sps:$4 sm:$0xff]  }
 0xb84   :  { %9589 = vmatpush3.bf16.msra.mxu1 %v13682_v39  ;;  %v12989_v39 = vld [vmem:[%s13584_s6 + $0x218] ss:$20 sps:$4 sm:$0xff]  }
 0xb85   :  { %9590 = vmatprep.subr.bf16.mxu1 %v13683_v10  ;;  %v12994_v10 = vld [vmem:[%s13584_s6 + $0x264] ss:$20 sps:$4 sm:$0xff]  }
 0xb87   :  { %6530 = vmatmul.mubr.bf16.gmra.mrb[60].mxu0 %v12815_v3  ;;  %9957 = vmatmul.mubr.msk.bf16.gmra.mrb[84].mxu1 %vm6215_vm8, %v12820_v6 }
 0xb88   :  { %9591 = vmatpush3.bf16.msra.mxu1 %v13684_v0  ;;  %6537 = vmatprep.mubr.bf16.mxu0 %v12828_v36  ;;  %v12999_v0 = vld [vmem:[%s13584_s6 + $0x240] ss:$20 sps:$4 sm:$0xff]  }
 0xb89   :  { %9592 = vmatprep.subr.bf16.mxu1 %v13685_v19  ;;  %9960 = vmatprep.mubr.msk.bf16.mxu1 %vm6215_vm8, %v12836_v60  ;;  %v13010_v19 = vld [vmem:[%s13584_s6 + $0x260] ss:$20 sps:$4 sm:$0xff]  }
 0xb8c   :  { %9593 = vmatpush3.bf16.msra.mxu1 %v13686_v20  ;;  %v13015_v20 = vld [vmem:[%s13584_s6 + $0x268] ss:$20 sps:$4 sm:$0xff]  }
 0xb8d   :  { %9594 = vmatprep.subr.bf16.mxu1 %v13687_v14  ;;  %v13695_v14 = vld [vmem:[#allocation3_spill] sm:$0xff] }
 0xb8f   :  { %6538 = vmatmul.mubr.bf16.gmra.mrb[64].mxu0 %v12853_v40  ;;  %9961 = vmatmul.mubr.msk.bf16.gmra.mrb[88].mxu1 %vm6215_vm8, %v12858_v32 }
 0xb90   :  { %9595 = vmatpush3.bf16.msra.mxu1 %v13688_v34  ;;  %6545 = vmatprep.mubr.bf16.mxu0 %v12866_v1  ;;  %v13696_v34 = vld [vmem:[#allocation20_spill] sm:$0xff] }
 0xb91   :  { %9596 = vmatprep.subr.bf16.mxu1 %v13689_v24  ;;  %9964 = vmatprep.mubr.msk.bf16.mxu1 %vm6215_vm8, %v12874_v57  ;;  %v13697_v24 = vld [vmem:[#allocation4_spill] sm:$0xff] }
 0xb94   :  { %9597 = vmatpush3.bf16.msra.mxu1 %v13690_v63 }
 0xb95   :  { %9598 = vmatprep.subr.bf16.mxu1 %v13691_v27 }
 0xb97   :  { %6546 = vmatmul.mubr.bf16.gmra.mrb[68].mxu0 %v12891_v46  ;;  %9965 = vmatmul.mubr.msk.bf16.gmra.mrb[92].mxu1 %vm6215_vm8, %v12896_v48 }
 0xb98   :  { %9599 = vmatpush3.bf16.msra.mxu1 %v13692_v45  ;;  %6553 = vmatprep.mubr.bf16.mxu0 %v12904_v23 }
 0xb99   :  { %9600 = vmatprep.subr.bf16.mxu1 %v13693_v53  ;;  %9968 = vmatprep.mubr.msk.bf16.mxu1 %vm6215_vm8, %v12912_v28  ;;  %v13702_v53 = vld [vmem:[#allocation8_spill] sm:$0xff] }
 0xb9c   :  { %9601 = vmatpush3.bf16.msra.mxu1 %v13694_v58 }
 0xb9f   :  { %6554 = vmatmul.mubr.bf16.gmra.mrb[72].mxu0 %v12929_v30  ;;  %9969 = vmatmul.mubr.msk.bf16.gmra.mrb[96].mxu1 %vm6215_vm8, %v12934_v44 }
 0xba0   :  { %6561 = vmatprep.mubr.bf16.mxu0 %v12942_v21  ;;  %9972 = vmatprep.mubr.msk.bf16.mxu1 %vm6215_vm8, %v12947_v35 }
 0xba7   :  { %6562 = vmatmul.mubr.bf16.gmra.mrb[76].mxu0 %v12958_v52  ;;  %9973 = vmatmul.mubr.msk.bf16.gmra.mrb[100].mxu1 %vm6215_vm8, %v12963_v43 }
 0xba8   :  { %6569 = vmatprep.mubr.bf16.mxu0 %v12968_v16  ;;  %9976 = vmatprep.mubr.msk.bf16.mxu1 %vm6215_vm8, %v12973_v37 }
 0xbaf   :  { %6570 = vmatmul.mubr.bf16.gmra.mrb[80].mxu0 %v12984_v38  ;;  %9977 = vmatmul.mubr.msk.bf16.gmra.mrb[104].mxu1 %vm6215_vm8, %v12989_v39 }
 0xbb0   :  { %6577 = vmatprep.mubr.bf16.mxu0 %v12994_v10  ;;  %9980 = vmatprep.mubr.msk.bf16.mxu1 %vm6215_vm8, %v12999_v0 }
 0xbb7   :  { %6578 = vmatmul.mubr.bf16.gmra.mrb[84].mxu0 %v13010_v19  ;;  %9981 = vmatmul.mubr.msk.bf16.gmra.mrb[108].mxu1 %vm6215_vm8, %v13015_v20 }
 0xbb8   :  { %7131 = vmatprep.mubr.bf16.mxu0 %v12211_v22  ;;  %7292 = vmatprep.mubr.bf16.mxu1 %v12218_v2  ;;  %v13698_v22 = vld [vmem:[#allocation22_spill] sm:$0xff]  ;;  %v13699_v2 = vld [vmem:[#allocation5_spill] sm:$0xff] }
 0xbbf   :  { %7132 = vmatmul.mubr.bf16.vlgmr.msra.gmra.mrb[88].mxu0 %v12272_v50  ;;  %7293 = vmatmul.mubr.bf16.vlgmr.msra.gmra.mrb[112].mxu1 %v12487_v47  ;;  %v13700_v50 = vld [vmem:[#allocation6_spill] sm:$0xff]  ;;  %v13701_v47 = vld [vmem:[#allocation7_spill] sm:$0xff] }
 0xbc0   :  { %9985 = vmatpush3.bf16.msra.mxu0 %v12697_v49  ;;  %7139 = vmatprep.mubr.bf16.mxu0 %v13695_v14 }
 0xbc1   :  { %9986 = vmatprep.subr.bf16.mxu0 %v12695_v17  ;;  %7300 = vmatprep.mubr.bf16.mxu1 %v13696_v34 }
 0xbc4   :  { %9987 = vmatpush3.bf16.msra.mxu0 %v12695_v17 }
 0xbc5   :  { %9988 = vmatprep.subr.bf16.mxu0 %v12729_v62 }
 0xbc7   :  { %7140 = vmatmul.mubr.bf16.gmra.mrb[92].mxu0 %v13697_v24  ;;  %7301 = vmatmul.mubr.bf16.gmra.mrb[116].mxu1 %v13698_v22  ;;  %v13704_v24 = vld [vmem:[#allocation10_spill] sm:$0xff]  ;;  %v13705_v22 = vld [vmem:[#allocation11_spill] sm:$0xff] }
 0xbc8   :  { %9989 = vmatpush3.bf16.msra.mxu0 %v12729_v62  ;;  %7147 = vmatprep.mubr.bf16.mxu0 %v13699_v2 }
 0xbc9   :  { %9990 = vmatprep.subr.bf16.mxu0 %v12727_v13  ;;  %7308 = vmatprep.mubr.bf16.mxu1 %v12560_v31  ;;  %v13703_v31 = vld [vmem:[#allocation9_spill] sm:$0xff] }
 0xbcc   :  { %9991 = vmatpush3.bf16.msra.mxu0 %v12727_v13 }
 0xbcf   :  { %7148 = vmatmul.mubr.bf16.gmra.mrb[96].mxu0 %v13700_v50  ;;  %7309 = vmatmul.mubr.bf16.gmra.mrb[120].mxu1 %v12604_v42 }
 0xbd0   :  { %7155 = vmatprep.mubr.bf16.mxu0 %v13701_v47  ;;  %7316 = vmatprep.mubr.bf16.mxu1 %v12620_v55 }
 0xbd2   :  { %v9246_v17 = vpop.f32.mrb[16].mxu1 }
 0xbd3   :  { %v9247_v49 = vpop.f32.mrb[17].mxu1 }
 0xbd4   :  { %v13041_v63 = vadd.f32 %v9247_v49, %v9246_v17  ;;  %v9249_v62 = vpop.f32.mrb[18].mxu1  ;;  %v13706_v49 = vld [vmem:[#allocation12_spill] sm:$0xff] }
 0xbd5   :  { %v9250_v27 = vpop.f32.mrb[19].mxu1 }
 0xbd6   :  { %v13043_v45 = vadd.f32 %v9250_v27, %v9249_v62  ;;  %v13707_v62 = vld [vmem:[#allocation13_spill] sm:$0xff] }
 0xbd7   :  { %7156 = vmatmul.mubr.bf16.gmra.mrb[100].mxu0 %v13702_v53  ;;  %7317 = vmatmul.mubr.bf16.gmra.mrb[124].mxu1 %v12640_v15 }
 0xbd8   :  { %7163 = vmatprep.mubr.bf16.mxu0 %v13703_v31  ;;  %7324 = vmatprep.mubr.bf16.mxu1 %v12656_v8 }
 0xbda   :  { %v9252_v42 = vpop.f32.mrb[20].mxu1 }
 0xbdb   :  { %v9253_v13 = vpop.f32.mrb[21].mxu1 }
 0xbdc   :  { %v13049_v58 = vadd.f32 %v9253_v13, %v9252_v42  ;;  %v9255_v55 = vpop.f32.mrb[22].mxu1  ;;  %v13708_v13 = vld [vmem:[#allocation14_spill] sm:$0xff] }
 0xbdd   :  { %v9256_v14 = vpop.f32.mrb[23].mxu1 }
 0xbde   :  { %v13051_v34 = vadd.f32 %v9256_v14, %v9255_v55  ;;  %v13709_v55 = vld [vmem:[#allocation15_spill] sm:$0xff] }
 0xbdf   :  { %7164 = vmatmul.mubr.bf16.gmra.mrb[104].mxu0 %v13704_v24  ;;  %7325 = vmatmul.mubr.bf16.gmra.mrb[128].mxu1 %v12676_v59 }
 0xbe0   :  { %7171 = vmatprep.mubr.bf16.mxu0 %v13705_v22  ;;  %7332 = vmatprep.mubr.bf16.mxu1 %v12689_v56 }
 0xbe2   :  { %v9258_v15 = vpop.f32.mrb[24].mxu1 }
 0xbe3   :  { %v9259_v2 = vpop.f32.mrb[25].mxu1 }
 0xbe4   :  { %v13057_v50 = vadd.f32 %v9259_v2, %v9258_v15  ;;  %v9261_v8 = vpop.f32.mrb[26].mxu1  ;;  %v13710_v2 = vld [vmem:[#allocation16_spill] sm:$0xff] }
 0xbe5   :  { %v9262_v47 = vpop.f32.mrb[27].mxu1 }
 0xbe6   :  { %v13059_v17 = vadd.f32 %v9262_v47, %v9261_v8  ;;  %v13711_v8 = vld [vmem:[#allocation17_spill] sm:$0xff] }
 0xbe7   :  { %7172 = vmatmul.mubr.bf16.gmra.mrb[108].mxu0 %v13706_v49  ;;  %7333 = vmatmul.mubr.bf16.gmra.mrb[132].mxu1 %v12710_v11 }
 0xbe8   :  { %7179 = vmatprep.mubr.bf16.mxu0 %v13707_v62  ;;  %7340 = vmatprep.mubr.bf16.mxu1 %v12721_v9 }
 0xbea   :  { %v9264_v59 = vpop.f32.mrb[28].mxu1 }
 0xbeb   :  { %v9265_v27 = vpop.f32.mrb[29].mxu1 }
 0xbec   :  { %v13065_v53 = vadd.f32 %v9265_v27, %v9264_v59  ;;  %v9267_v56 = vpop.f32.mrb[30].mxu1  ;;  %v13712_v27 = vld [vmem:[#allocation18_spill] sm:$0xff] }
 0xbed   :  { %v9268_v31 = vpop.f32.mrb[31].mxu1 }
 0xbee   :  { %v13067_v42 = vadd.f32 %v9268_v31, %v9267_v56  ;;  %v13713_v56 = vld [vmem:[#allocation19_spill] sm:$0xff] }
 0xbef   :  { %7180 = vmatmul.mubr.bf16.gmra.mrb[112].mxu0 %v13708_v13  ;;  %7341 = vmatmul.mubr.bf16.gmra.mrb[136].mxu1 %v12739_v26 }
 0xbf0   :  { %7187 = vmatprep.mubr.bf16.mxu0 %v13709_v55  ;;  %7348 = vmatprep.mubr.bf16.mxu1 %v12749_v41 }
 0xbf2   :  { %v9270_v11 = vpop.f32.mrb[32].mxu1 }
 0xbf3   :  { %v9271_v14 = vpop.f32.mrb[33].mxu1 }
 0xbf4   :  { %v13073_v24 = vadd.f32 %v9271_v14, %v9270_v11  ;;  %v9273_v9 = vpop.f32.mrb[34].mxu1  ;;  %v13714_v14 = vld [vmem:[#allocation21_spill] sm:$0xff] }
 0xbf5   :  { %v9274_v22 = vpop.f32.mrb[35].mxu1 }
 0xbf6   :  { %v13075_v15 = vadd.f32 %v9274_v22, %v9273_v9 }
 0xbf7   :  { %7188 = vmatmul.mubr.bf16.gmra.mrb[116].mxu0 %v13710_v2  ;;  %7349 = vmatmul.mubr.bf16.gmra.mrb[140].mxu1 %v12763_v54 }
 0xbf8   :  { %7195 = vmatprep.mubr.bf16.mxu0 %v13711_v8  ;;  %7356 = vmatprep.mubr.bf16.mxu1 %v12768_v51 }
 0xbfa   :  { %v9276_v26 = vpop.f32.mrb[36].mxu1 }
 0xbfb   :  { %v9277_v47 = vpop.f32.mrb[37].mxu1 }
 0xbfc   :  { %v13081_v49 = vadd.f32 %v9277_v47, %v9276_v26  ;;  %v9279_v41 = vpop.f32.mrb[38].mxu1  ;;  %v13715_v26 = vld [vmem:[#allocation23_spill] sm:$0xff] }
 0xbfd   :  { %v9280_v62 = vpop.f32.mrb[39].mxu1 }
 0xbfe   :  { %v13083_v59 = vadd.f32 %v9280_v62, %v9279_v41 }
 0xbff   :  { %7196 = vmatmul.mubr.bf16.gmra.mrb[120].mxu0 %v13712_v27  ;;  %7357 = vmatmul.mubr.bf16.gmra.mrb[144].mxu1 %v12783_v18 }
 0xc00   :  { %7203 = vmatprep.mubr.bf16.mxu0 %v13713_v56  ;;  %7364 = vmatprep.mubr.bf16.mxu1 %v12793_v29 }
 0xc02   :  { %v9282_v54 = vpop.f32.mrb[40].mxu1 }
 0xc03   :  { %v9283_v31 = vpop.f32.mrb[41].mxu1 }
 0xc04   :  { %v13089_v13 = vadd.f32 %v9283_v31, %v9282_v54  ;;  %v9285_v51 = vpop.f32.mrb[42].mxu1 }
 0xc05   :  { %v9286_v55 = vpop.f32.mrb[43].mxu1 }
 0xc06   :  { %v13091_v11 = vadd.f32 %v9286_v55, %v9285_v51 }
 0xc07   :  { %7204 = vmatmul.mubr.bf16.gmra.mrb[124].mxu0 %v13714_v14  ;;  %7365 = vmatmul.mubr.bf16.gmra.mrb[148].mxu1 %v12815_v3 }
 0xc08   :  { %7211 = vmatprep.mubr.bf16.mxu0 %v12552_v25  ;;  %7372 = vmatprep.mubr.bf16.mxu1 %v12828_v36  ;;  %v13108_v25 = vld [vmem:[%s13633_s23 + $0x5] ss:$0 sm:$0xff] }
 0xc09   :  { %v6299_v62 = vadd.f32 %v13041_v63, %v13108_v25 }
 0xc0a   :  { %v9288_v18 = vpop.f32.mrb[44].mxu1 }
 0xc0b   :  { %v9289_v9 = vpop.f32.mrb[45].mxu1 }
 0xc0c   :  { %v13097_v22 = vadd.f32 %v9289_v9, %v9288_v18  ;;  %v9291_v29 = vpop.f32.mrb[46].mxu1 }
 0xc0d   :  { %v9292_v2 = vpop.f32.mrb[47].mxu1 }
 0xc0e   :  { %v13099_v8 = vadd.f32 %v9292_v2, %v9291_v29 }
 0xc0f   :  { %7212 = vmatmul.mubr.bf16.gmra.mrb[128].mxu0 %v13715_v26  ;;  %7373 = vmatmul.mubr.bf16.gmra.mrb[152].mxu1 %v12853_v40 }
 0xc10   :  { %7219 = vmatprep.mubr.bf16.mxu0 %v12612_v4  ;;  %7380 = vmatprep.mubr.bf16.mxu1 %v12866_v1  ;;  %v6302_v1 = vadd.f32 %v13043_v45, %v13108_v25  ;;  %v6307_v45 = vadd.f32 %v13049_v58, %v13108_v25 }
 0xc12   :  { %v9358_v3 = vpop.f32.mrb[24].mxu0  ;;  %v9294_v36 = vpop.f32.mrb[48].mxu1 }
 0xc13   :  { %v9359_v47 = vpop.f32.mrb[25].mxu0  ;;  %v9295_v41 = vpop.f32.mrb[49].mxu1 }
 0xc14   :  { %v9360_v27 = vadd.f32 %v9359_v47, %v9358_v3  ;;  %v9361_v56 = vpop.f32.mrb[26].mxu0  ;;  %v13112_v54 = vadd.f32 %v9295_v41, %v9294_v36  ;;  %v9297_v40 = vpop.f32.mrb[50].mxu1 }
 0xc15   :  { %v9362_v4 = vpop.f32.mrb[27].mxu0  ;;  %v9298_v31 = vpop.f32.mrb[51].mxu1 }
 0xc16   :  { %v9363_v51 = vadd.f32 %v9362_v4, %v9361_v56  ;;  %v13116_v55 = vadd.f32 %v9298_v31, %v9297_v40  ;;  %v13118_v14 = vadd.f32 %v9360_v27, %v6299_v62 }
 0xc17   :  { %7220 = vmatmul.mubr.bf16.gmra.mrb[132].mxu0 %v12635_v61  ;;  %7381 = vmatmul.mubr.bf16.gmra.mrb[156].mxu1 %v12891_v46 }
 0xc18   :  { %7227 = vmatprep.mubr.bf16.mxu0 %v12648_v12  ;;  %7388 = vmatprep.mubr.bf16.mxu1 %v12904_v23  ;;  %v13124_v63 = vadd.f32 %v9363_v51, %v6302_v1  ;;  %v6310_v12 = vadd.f32 %v13051_v34, %v13108_v25  ;;  %v6315_v34 = vadd.f32 %v13057_v50, %v13108_v25  ;;  %v13717_v50 = vld [vmem:[#allocation25_spill] sm:$0xff] }
 0xc1a   :  { %v9364_v18 = vpop.f32.mrb[28].mxu0  ;;  %v9300_v9 = vpop.f32.mrb[52].mxu1 }
 0xc1b   :  { %v9365_v29 = vpop.f32.mrb[29].mxu0  ;;  %v9301_v2 = vpop.f32.mrb[53].mxu1 }
 0xc1c   :  { %v9366_v26 = vadd.f32 %v9365_v29, %v9364_v18  ;;  %v9367_v3 = vpop.f32.mrb[30].mxu0  ;;  %v13128_v36 = vadd.f32 %v9301_v2, %v9300_v9  ;;  %v9303_v61 = vpop.f32.mrb[54].mxu1  ;;  %v13716_v2 = vld [vmem:[#allocation24_spill] sm:$0xff] }
 0xc1d   :  { %v9368_v47 = vpop.f32.mrb[31].mxu0  ;;  %v9304_v46 = vpop.f32.mrb[55].mxu1 }
 0xc1e   :  { %v9369_v23 = vadd.f32 %v9368_v47, %v9367_v3  ;;  %v13132_v41 = vadd.f32 %v9304_v46, %v9303_v61  ;;  %v13134_v62 = vadd.f32 %v9366_v26, %v6307_v45 }
 0xc1f   :  { %7228 = vmatmul.mubr.bf16.gmra.mrb[136].mxu0 %v12671_v5  ;;  %7389 = vmatmul.mubr.bf16.gmra.mrb[160].mxu1 %v12929_v30 }
 0xc20   :  { %7235 = vmatprep.mubr.bf16.mxu0 %v12684_v7  ;;  %7396 = vmatprep.mubr.bf16.mxu1 %v12942_v21  ;;  %v13140_v58 = vadd.f32 %v9369_v23, %v6310_v12  ;;  %v6318_v7 = vadd.f32 %v13059_v17, %v13108_v25  ;;  %v6323_v17 = vadd.f32 %v13065_v53, %v13108_v25  ;;  %v13719_v53 = vld [vmem:[#allocation27_spill] sm:$0xff] }
 0xc22   :  { %v9370_v27 = vpop.f32.mrb[32].mxu0  ;;  %v9306_v56 = vpop.f32.mrb[56].mxu1 }
 0xc23   :  { %v9371_v40 = vpop.f32.mrb[33].mxu0  ;;  %v9307_v4 = vpop.f32.mrb[57].mxu1 }
 0xc24   :  { %v9372_v31 = vadd.f32 %v9371_v40, %v9370_v27  ;;  %v9373_v1 = vpop.f32.mrb[34].mxu0  ;;  %v13144_v51 = vadd.f32 %v9307_v4, %v9306_v56  ;;  %v9309_v5 = vpop.f32.mrb[58].mxu1  ;;  %v6326_v40 = vadd.f32 %v13067_v42, %v13108_v25  ;;  %v6331_v42 = vadd.f32 %v13073_v24, %v13108_v25  ;;  %v13721_v24 = vld [vmem:[#allocation29_spill] sm:$0xff] }
 0xc25   :  { %v9374_v18 = vpop.f32.mrb[35].mxu0  ;;  %v9310_v30 = vpop.f32.mrb[59].mxu1 }
 0xc26   :  { %v9375_v21 = vadd.f32 %v9374_v18, %v9373_v1  ;;  %v13148_v9 = vadd.f32 %v9310_v30, %v9309_v5  ;;  %v13150_v29 = vadd.f32 %v9372_v31, %v6315_v34  ;;  %v13718_v31 = vld [vmem:[#allocation26_spill] sm:$0xff] }
 0xc27   :  { %7236 = vmatmul.mubr.bf16.gmra.mrb[140].mxu0 %v13716_v2  ;;  %7397 = vmatmul.mubr.bf16.gmra.mrb[164].mxu1 %v12958_v52 }
 0xc28   :  { %7243 = vmatprep.mubr.bf16.mxu0 %v13717_v50  ;;  %7404 = vmatprep.mubr.bf16.mxu1 %v12968_v16  ;;  %v13156_v45 = vadd.f32 %v9375_v21, %v6318_v7 }
 0xc2a   :  { %v9312_v26 = vpop.f32.mrb[60].mxu1  ;;  %v9376_v3 = vpop.f32.mrb[36].mxu0 }
 0xc2b   :  { %v9313_v61 = vpop.f32.mrb[61].mxu1  ;;  %v9377_v47 = vpop.f32.mrb[37].mxu0 }
 0xc2c   :  { %v13160_v46 = vadd.f32 %v9313_v61, %v9312_v26  ;;  %v9315_v12 = vpop.f32.mrb[62].mxu1  ;;  %v9378_v23 = vadd.f32 %v9377_v47, %v9376_v3  ;;  %v9379_v27 = vpop.f32.mrb[38].mxu0  ;;  %v6334_v61 = vadd.f32 %v13075_v15, %v13108_v25  ;;  %v6339_v15 = vadd.f32 %v13081_v49, %v13108_v25 }
 0xc2d   :  { %v9316_v56 = vpop.f32.mrb[63].mxu1  ;;  %v9380_v52 = vpop.f32.mrb[39].mxu0 }
 0xc2e   :  { %v13164_v16 = vadd.f32 %v9316_v56, %v9315_v12  ;;  %v9381_v4 = vadd.f32 %v9380_v52, %v9379_v27  ;;  %v13166_v34 = vadd.f32 %v9378_v23, %v6323_v17  ;;  %v13720_v12 = vld [vmem:[#allocation28_spill] sm:$0xff] }
 0xc2f   :  { %7244 = vmatmul.mubr.bf16.gmra.mrb[144].mxu0 %v13718_v31  ;;  %7405 = vmatmul.mubr.bf16.gmra.mrb[168].mxu1 %v12984_v38 }
 0xc30   :  { %7251 = vmatprep.mubr.bf16.mxu0 %v13719_v53  ;;  %7412 = vmatprep.mubr.bf16.mxu1 %v12994_v10  ;;  %v13172_v1 = vadd.f32 %v9381_v4, %v6326_v40 }
 0xc32   :  { %v9318_v5 = vpop.f32.mrb[64].mxu1  ;;  %v9382_v18 = vpop.f32.mrb[40].mxu0 }
 0xc33   :  { %v9319_v30 = vpop.f32.mrb[65].mxu1  ;;  %v9383_v7 = vpop.f32.mrb[41].mxu0 }
 0xc34   :  { %v13176_v21 = vadd.f32 %v9319_v30, %v9318_v5  ;;  %v9321_v2 = vpop.f32.mrb[66].mxu1  ;;  %v9384_v50 = vadd.f32 %v9383_v7, %v9382_v18  ;;  %v9385_v26 = vpop.f32.mrb[42].mxu0 }
 0xc35   :  { %v9322_v3 = vpop.f32.mrb[67].mxu1  ;;  %v9386_v38 = vpop.f32.mrb[43].mxu0 }
 0xc36   :  { %v13180_v10 = vadd.f32 %v9322_v3, %v9321_v2  ;;  %v9387_v47 = vadd.f32 %v9386_v38, %v9385_v26  ;;  %v13182_v17 = vadd.f32 %v9384_v50, %v6331_v42  ;;  %v13722_v50 = vld [vmem:[#allocation30_spill] sm:$0xff] }
 0xc37   :  { %7252 = vmatmul.mubr.bf16.gmra.mrb[148].mxu0 %v13720_v12  ;;  %7413 = vmatmul.mubr.bf16.gmra.mrb[172].mxu1 %v13010_v19  ;;  %v6342_v19 = vadd.f32 %v13083_v59, %v13108_v25  ;;  %v6347_v59 = vadd.f32 %v13089_v13, %v13108_v25 }
 0xc38   :  { %9992 = vmatprep.mubr.msk.bf16.mxu0 %vm6215_vm8, %v13721_v24  ;;  %v13188_v23 = vadd.f32 %v9387_v47, %v6334_v61 }
 0xc3a   :  { %v9324_v27 = vpop.f32.mrb[68].mxu1  ;;  %v9388_v56 = vpop.f32.mrb[44].mxu0 }
 0xc3b   :  { %v9325_v52 = vpop.f32.mrb[69].mxu1  ;;  %v9389_v40 = vpop.f32.mrb[45].mxu0 }
 0xc3c   :  { %v13192_v4 = vadd.f32 %v9325_v52, %v9324_v27  ;;  %v9327_v31 = vpop.f32.mrb[70].mxu1  ;;  %v9390_v53 = vadd.f32 %v9389_v40, %v9388_v56  ;;  %v9391_v5 = vpop.f32.mrb[46].mxu0  ;;  %v6350_v40 = vadd.f32 %v13091_v11, %v13108_v25  ;;  %v6355_v11 = vadd.f32 %v13097_v22, %v13108_v25 }
 0xc3d   :  { %v9328_v18 = vpop.f32.mrb[71].mxu1  ;;  %v9392_v30 = vpop.f32.mrb[47].mxu0 }
 0xc3e   :  { %v13196_v7 = vadd.f32 %v9328_v18, %v9327_v31  ;;  %v9393_v42 = vadd.f32 %v9392_v30, %v9391_v5  ;;  %v13198_v2 = vadd.f32 %v9390_v53, %v6339_v15 }
 0xc3f   :  { %9993 = vmatmul.mubr.msk.bf16.vlgmr.msra.gmra.mrb[152].mxu0 %vm6215_vm8, %v13722_v50 }
 0xc40   :  { %9996 = vmatprep.mubr.msk.bf16.mxu0 %vm6215_vm8, %v12798_v33  ;;  %v13204_v49 = vadd.f32 %v9393_v42, %v6342_v19 }
 0xc42   :  { %v9330_v26 = vpop.f32.mrb[72].mxu1  ;;  %v9394_v3 = vpop.f32.mrb[48].mxu0 }
 0xc43   :  { %v9331_v38 = vpop.f32.mrb[73].mxu1  ;;  %v9395_v61 = vpop.f32.mrb[49].mxu0 }
 0xc44   :  { %v13208_v47 = vadd.f32 %v9331_v38, %v9330_v26  ;;  %v9333_v12 = vpop.f32.mrb[74].mxu1  ;;  %v9396_v24 = vadd.f32 %v9395_v61, %v9394_v3  ;;  %v9397_v27 = vpop.f32.mrb[50].mxu0 }
 0xc45   :  { %v9334_v56 = vpop.f32.mrb[75].mxu1  ;;  %v9398_v52 = vpop.f32.mrb[51].mxu0 }
 0xc46   :  { %v13212_v33 = vadd.f32 %v9334_v56, %v9333_v12  ;;  %v9399_v15 = vadd.f32 %v9398_v52, %v9397_v27  ;;  %v13214_v31 = vadd.f32 %v9396_v24, %v6347_v59 }
 0xc47   :  { %9997 = vmatmul.mubr.msk.bf16.gmra.mrb[156].mxu0 %vm6215_vm8, %v12820_v6  ;;  %v6358_v6 = vadd.f32 %v13099_v8, %v13108_v25  ;;  %v6363_v8 = vadd.f32 %v13112_v54, %v13108_v25 }
 0xc48   :  { %10000 = vmatprep.mubr.msk.bf16.mxu0 %vm6215_vm8, %v12836_v60  ;;  %v13220_v13 = vadd.f32 %v9399_v15, %v6350_v40 }
 0xc4a   :  { %v9336_v53 = vpop.f32.mrb[76].mxu1  ;;  %v9400_v5 = vpop.f32.mrb[52].mxu0 }
 0xc4b   :  { %v9337_v18 = vpop.f32.mrb[77].mxu1  ;;  %v9401_v30 = vpop.f32.mrb[53].mxu0 }
 0xc4c   :  { %v13224_v19 = vadd.f32 %v9337_v18, %v9336_v53  ;;  %v9339_v42 = vpop.f32.mrb[78].mxu1  ;;  %v9402_v50 = vadd.f32 %v9401_v30, %v9400_v5  ;;  %v9403_v26 = vpop.f32.mrb[54].mxu0 }
 0xc4d   :  { %v9340_v3 = vpop.f32.mrb[79].mxu1  ;;  %v9404_v38 = vpop.f32.mrb[55].mxu0 }
 0xc4e   :  { %v13228_v60 = vadd.f32 %v9340_v3, %v9339_v42  ;;  %v9405_v61 = vadd.f32 %v9404_v38, %v9403_v26  ;;  %v13230_v59 = vadd.f32 %v9402_v50, %v6355_v11 }
 0xc4f   :  { %10001 = vmatmul.mubr.msk.bf16.gmra.mrb[160].mxu0 %vm6215_vm8, %v12858_v32  ;;  %v6366_v32 = vadd.f32 %v13116_v55, %v13108_v25 }
 0xc50   :  { %10004 = vmatprep.mubr.msk.bf16.mxu0 %vm6215_vm8, %v12874_v57  ;;  %v13236_v22 = vadd.f32 %v9405_v61, %v6358_v6  ;;  %v6371_v61 = vadd.f32 %v13128_v36, %v13108_v25 }
 0xc52   :  { %v9954_v12 = vpop.f32.mrb[80].mxu1  ;;  %v9406_v24 = vpop.f32.mrb[56].mxu0 }
 0xc53   :  { %v6629_v27 = vadd.f32 %v9954_v12, %v13134_v62  ;;  %v6620_v56 = vpop.f32.mrb[81].mxu1  ;;  %v9407_v52 = vpop.f32.mrb[57].mxu0 }
 0xc54   :  { %v6621_v40 = vadd.f32 %v6620_v56, %v13118_v14  ;;  %v9955_v15 = vpop.f32.mrb[82].mxu1  ;;  %v9408_v53 = vadd.f32 %v9407_v52, %v9406_v24  ;;  %v9409_v5 = vpop.f32.mrb[58].mxu0 }
 0xc55   :  { %v8496_v57 = vmul.f32 -1.442695, %v6629_v27  ;;  %v6632_v18 = vadd.f32 %v9955_v15, %v13140_v58  ;;  %v6623_v30 = vpop.f32.mrb[83].mxu1  ;;  %v9410_v11 = vpop.f32.mrb[59].mxu0 }
 0xc56   :  { %v8494_v42 = vmul.f32 -1.442695, %v6621_v40  ;;  %v6624_v62 = vadd.f32 %v6623_v30, %v13124_v63  ;;  %v9411_v50 = vadd.f32 %v9410_v11, %v9409_v5  ;;  %v13246_v26 = vadd.f32 %v9408_v53, %v6363_v8 }
 0xc57   :  { %10448 = vpow2.f32 %v8496_v57  ;;  %v8497_v54 = vmul.f32 -1.442695, %v6632_v18  ;;  %10005 = vmatmul.mubr.msk.bf16.gmra.mrb[164].mxu0 %vm6215_vm8, %v12896_v48  ;;  %v6379_v11 = vadd.f32 %v13144_v51, %v13108_v25 }
 0xc58   :  { %10450 = vpow2.f32 %v8494_v42  ;;  %v8495_v14 = vmul.f32 -1.442695, %v6624_v62  ;;  %10008 = vmatprep.mubr.msk.bf16.mxu0 %vm6215_vm8, %v12912_v28  ;;  %v13252_v55 = vadd.f32 %v9411_v50, %v6366_v32  ;;  %v6374_v28 = vadd.f32 %v13132_v41, %v13108_v25 }
 0xc59   :  { %10452 = vpow2.f32 %v8497_v54 }
 0xc5a   :  { %10454 = vpow2.f32 %v8495_v14  ;;  %v9958_v58 = vpop.f32.mrb[84].mxu1  ;;  %v9412_v3 = vpop.f32.mrb[60].mxu0 }
 0xc5b   :  { %v6645_v63 = vadd.f32 %v9958_v58, %v13166_v34  ;;  %v6636_v38 = vpop.f32.mrb[85].mxu1  ;;  %v9413_v6 = vpop.f32.mrb[61].mxu0 }
 0xc5c   :  { %v6637_v48 = vadd.f32 %v6636_v38, %v13150_v29  ;;  %v9959_v12 = vpop.f32.mrb[86].mxu1  ;;  %v9414_v24 = vadd.f32 %v9413_v6, %v9412_v3  ;;  %v9415_v27 = vpop.f32.mrb[62].mxu0 }
 0xc5d   :  { %v8500_v56 = vmul.f32 -1.442695, %v6645_v63  ;;  %v6648_v52 = vadd.f32 %v9959_v12, %v13172_v1  ;;  %v6639_v8 = vpop.f32.mrb[87].mxu1  ;;  %v9416_v40 = vpop.f32.mrb[63].mxu0 }
 0xc5e   :  { %v8498_v15 = vmul.f32 -1.442695, %v6637_v48  ;;  %v6640_v34 = vadd.f32 %v6639_v8, %v13156_v45  ;;  %v9417_v53 = vadd.f32 %v9416_v40, %v9415_v27  ;;  %v13262_v5 = vadd.f32 %v9414_v24, %v6371_v61 }
 0xc5f   :  { %10456 = vpow2.f32 %v8500_v56  ;;  %v8501_v36 = vmul.f32 -1.442695, %v6648_v52  ;;  %10009 = vmatmul.mubr.msk.bf16.gmra.mrb[168].mxu0 %vm6215_vm8, %v12934_v44  ;;  %v6382_v44 = vadd.f32 %v13148_v9, %v13108_v25 }
 0xc60   :  { %10458 = vpow2.f32 %v8498_v15  ;;  %v8499_v29 = vmul.f32 -1.442695, %v6640_v34  ;;  %10012 = vmatprep.mubr.msk.bf16.mxu0 %vm6215_vm8, %v12947_v35  ;;  %v13268_v41 = vadd.f32 %v9417_v53, %v6374_v28 }
 0xc61   :  { %v10449_v1 = vpop.eup %10448  ;;  %10460 = vpow2.f32 %v8501_v36 }
 0xc62   :  { %v10451_v32 = vpop.eup %10450  ;;  %v6845_v57 = vadd.f32 1.0, %v10449_v1  ;;  %10462 = vpow2.f32 %v8499_v29  ;;  %v9962_v45 = vpop.f32.mrb[88].mxu1 }
 0xc63   :  { %v9418_v18 = vpop.f32.mrb[64].mxu0  ;;  %v10453_v30 = vpop.eup %10452  ;;  %v6843_v42 = vadd.f32 1.0, %v10451_v32  ;;  %v6661_v62 = vadd.f32 %v9962_v45, %v13198_v2 }
 0xc64   :  { %v6652_v35 = vpop.f32.mrb[89].mxu1  ;;  %v9419_v50 = vpop.f32.mrb[65].mxu0  ;;  %10464 = vrcp.f32 %v6845_v57  ;;  %v6846_v14 = vadd.f32 1.0, %v10453_v30 }
 0xc65   :  { %v10455_v54 = vpop.eup %10454  ;;  %v6653_v58 = vadd.f32 %v6652_v35, %v13182_v17  ;;  %v9963_v3 = vpop.f32.mrb[90].mxu1  ;;  %v9420_v63 = vadd.f32 %v9419_v50, %v9418_v18  ;;  %10466 = vrcp.f32 %v6843_v42  ;;  %v8504_v61 = vmul.f32 -1.442695, %v6661_v62 }
 0xc66   :  { %v9421_v38 = vpop.f32.mrb[66].mxu0  ;;  %v6844_v6 = vadd.f32 1.0, %v10455_v54  ;;  %v6664_v51 = vadd.f32 %v9963_v3, %v13204_v49  ;;  %v6655_v48 = vpop.f32.mrb[91].mxu1  ;;  %10468 = vrcp.f32 %v6846_v14 }
 0xc67   :  { %v9422_v9 = vpop.f32.mrb[67].mxu0  ;;  %v8502_v12 = vmul.f32 -1.442695, %v6653_v58  ;;  %v6656_v2 = vadd.f32 %v6655_v48, %v13188_v23  ;;  %10013 = vmatmul.mubr.msk.bf16.gmra.mrb[172].mxu0 %vm6215_vm8, %v12963_v43  ;;  %v13280_v17 = vadd.f32 %v9420_v63, %v6379_v11  ;;  %v6387_v43 = vadd.f32 %v13160_v46, %v13108_v25 }
 0xc68   :  { %v9423_v24 = vadd.f32 %v9422_v9, %v9421_v38  ;;  %10470 = vrcp.f32 %v6844_v6  ;;  %v8505_v27 = vmul.f32 -1.442695, %v6664_v51  ;;  %10016 = vmatprep.mubr.msk.bf16.mxu0 %vm6215_vm8, %v12973_v37 }
 0xc69   :  { %10472 = vpow2.f32 %v8504_v61  ;;  %v8503_v28 = vmul.f32 -1.442695, %v6656_v2  ;;  %v10457_v56 = vpop.eup %10456 }
 0xc6a   :  { %v13284_v49 = vadd.f32 %v9423_v24, %v6382_v44  ;;  %10474 = vpow2.f32 %v8502_v12  ;;  %v10459_v52 = vpop.eup %10458  ;;  %v6849_v8 = vadd.f32 1.0, %v10457_v56  ;;  %v9966_v23 = vpop.f32.mrb[92].mxu1 }
 0xc6b   :  { %10476 = vpow2.f32 %v8505_v27  ;;  %v9424_v40 = vpop.f32.mrb[68].mxu0  ;;  %v10461_v15 = vpop.eup %10460  ;;  %v6847_v34 = vadd.f32 1.0, %v10459_v52  ;;  %v6677_v53 = vadd.f32 %v9966_v23, %v13230_v59  ;;  %v6398_v27 = vadd.f32 %v13180_v10, %v13108_v25 }
 0xc6c   :  { %10478 = vpow2.f32 %v8503_v28  ;;  %v6668_v36 = vpop.f32.mrb[93].mxu1  ;;  %v9425_v29 = vpop.f32.mrb[69].mxu0  ;;  %v6850_v1 = vadd.f32 1.0, %v10461_v15 }
 0xc6d   :  { %v10463_v37 = vpop.eup %10462  ;;  %10480 = vrcp.f32 %v6849_v8  ;;  %v6669_v32 = vadd.f32 %v6668_v36, %v13214_v31  ;;  %v9967_v57 = vpop.f32.mrb[94].mxu1  ;;  %v9426_v45 = vadd.f32 %v9425_v29, %v9424_v40  ;;  %v8508_v11 = vmul.f32 -1.442695, %v6677_v53 }
 0xc6e   :  { %v9427_v18 = vpop.f32.mrb[70].mxu0  ;;  %10482 = vrcp.f32 %v6847_v34  ;;  %v6848_v30 = vadd.f32 1.0, %v10463_v37  ;;  %v6680_v44 = vadd.f32 %v9967_v57, %v13236_v22  ;;  %v6671_v46 = vpop.f32.mrb[95].mxu1  ;;  %v6390_v31 = vadd.f32 %v13164_v16, %v13108_v25 }
 0xc6f   :  { %v9428_v42 = vpop.f32.mrb[71].mxu0  ;;  %v10465_v62 = vpop.eup %10464  ;;  %10484 = vrcp.f32 %v6850_v1  ;;  %v8506_v59 = vmul.f32 -1.442695, %v6669_v32  ;;  %v6672_v35 = vadd.f32 %v6671_v46, %v13220_v13  ;;  %v13292_v50 = vadd.f32 %v9426_v45, %v6387_v43  ;;  %10017 = vmatmul.mubr.msk.bf16.gmra.mrb[176].mxu0 %vm6215_vm8, %v12989_v39 }
 0xc70   :  { %v10467_v54 = vpop.eup %10466  ;;  %10486 = vrcp.f32 %v6848_v30  ;;  %v8509_v14 = vmul.f32 -1.442695, %v6680_v44  ;;  %v9429_v58 = vadd.f32 %v9428_v42, %v9427_v18  ;;  %10020 = vmatprep.mubr.msk.bf16.mxu0 %vm6215_vm8, %v12999_v0  ;;  %v6395_v39 = vadd.f32 %v13176_v21, %v13108_v25 }
 0xc71   :  { %v10469_v22 = vpop.eup %10468  ;;  %10488 = vpow2.f32 %v8508_v11  ;;  %v8507_v3 = vmul.f32 -1.442695, %v6672_v35 }
 0xc72   :  { %v10471_v63 = vpop.eup %10470  ;;  %v8710_v13 = vpack.c.bf16 %v10469_v22, %v10465_v62  ;;  %10490 = vpow2.f32 %v8506_v59  ;;  %v13300_v38 = vadd.f32 %v9429_v58, %v6390_v31  ;;  %v9970_v16 = vpop.f32.mrb[96].mxu1 }
 0xc73   :  { %v10473_v6 = vpop.eup %10472  ;;  %v8705_v61 = vpack.c.bf16 %v10471_v63, %v10467_v54  ;;  %10492 = vpow2.f32 %v8509_v14  ;;  %v9430_v51 = vpop.f32.mrb[72].mxu0  ;;  %v6693_v0 = vadd.f32 %v9970_v16, %v13262_v5 }
 0xc74   :  { %v10475_v48 = vpop.eup %10474  ;;  %8862 = vst [vmem:[%s13585_s22 + $0x8] sm:$0xff] %v8710_v13   ;;  %v6853_v9 = vadd.f32 1.0, %v10473_v6  ;;  %10494 = vpow2.f32 %v8507_v3  ;;  %v6684_v12 = vpop.f32.mrb[97].mxu1  ;;  %v6406_v13 = vadd.f32 %v13196_v7, %v13108_v25 }
 0xc75   :  { %v9431_v2 = vpop.f32.mrb[73].mxu0  ;;  %v10477_v24 = vpop.eup %10476  ;;  %8706 = vst [vmem:[%s13585_s22] sm:$0xff] %v8705_v61   ;;  %v6851_v28 = vadd.f32 1.0, %v10475_v48  ;;  %v6685_v21 = vadd.f32 %v6684_v12, %v13246_v26  ;;  %v8512_v5 = vmul.f32 -1.442695, %v6693_v0 }
 0xc76   :  { %v9971_v56 = vpop.f32.mrb[98].mxu1  ;;  %v9432_v52 = vadd.f32 %v9431_v2, %v9430_v51  ;;  %v9433_v8 = vpop.f32.mrb[74].mxu0  ;;  %10496 = vrcp.f32 %v6853_v9  ;;  %v6854_v40 = vadd.f32 1.0, %v10477_v24 }
 0xc77   :  { %v10479_v23 = vpop.eup %10478  ;;  %v6696_v15 = vadd.f32 %v9971_v56, %v13268_v41  ;;  %v6687_v43 = vpop.f32.mrb[99].mxu1  ;;  %10498 = vrcp.f32 %v6851_v28  ;;  %v8510_v36 = vmul.f32 -1.442695, %v6685_v21  ;;  %10021 = vmatmul.mubr.msk.bf16.gmra.mrb[180].mxu0 %vm6215_vm8, %v13015_v20  ;;  %v6403_v20 = vadd.f32 %v13192_v4, %v13108_v25 }
 0xc78   :  { %v9434_v34 = vpop.f32.mrb[75].mxu0  ;;  %v10481_v53 = vpop.eup %10480  ;;  %v6852_v10 = vadd.f32 1.0, %v10479_v23  ;;  %v6688_v29 = vadd.f32 %v6687_v43, %v13252_v55  ;;  %10500 = vrcp.f32 %v6854_v40  ;;  %v13318_v32 = vadd.f32 %v9432_v52, %v6395_v39 }
 0xc79   :  { %v10483_v37 = vpop.eup %10482  ;;  %v8513_v26 = vmul.f32 -1.442695, %v6696_v15  ;;  %v9435_v1 = vadd.f32 %v9434_v34, %v9433_v8 }
 0xc7a   :  { %v10485_v57 = vpop.eup %10484  ;;  %10502 = vrcp.f32 %v6852_v10  ;;  %v8511_v41 = vmul.f32 -1.442695, %v6688_v29  ;;  %v9974_v55 = vpop.f32.mrb[100].mxu1 }
 0xc7b   :  { %v10487_v45 = vpop.eup %10486  ;;  %v8720_v18 = vpack.c.bf16 %v10485_v57, %v10481_v53  ;;  %10504 = vpow2.f32 %v8512_v5  ;;  %v13320_v30 = vadd.f32 %v9435_v1, %v6398_v27  ;;  %v9436_v46 = vpop.f32.mrb[76].mxu0  ;;  %v6709_v35 = vadd.f32 %v9974_v55, %v13292_v50 }
 0xc7c   :  { %v10489_v11 = vpop.eup %10488  ;;  %v8715_v44 = vpack.c.bf16 %v10487_v45, %v10483_v37  ;;  %10506 = vpow2.f32 %v8510_v36  ;;  %v6700_v59 = vpop.f32.mrb[101].mxu1  ;;  %v6411_v37 = vadd.f32 %v13208_v47, %v13108_v25  ;;  %v6414_v55 = vadd.f32 %v13212_v33, %v13108_v25 }
 0xc7d   :  { %v10491_v42 = vpop.eup %10490  ;;  %8864 = vst [vmem:[%s13585_s22 + $0x18] sm:$0xff] %v8720_v18   ;;  %v6857_v62 = vadd.f32 1.0, %v10489_v11  ;;  %10508 = vpow2.f32 %v8513_v26  ;;  %v9437_v54 = vpop.f32.mrb[77].mxu0  ;;  %v6701_v58 = vadd.f32 %v6700_v59, %v13280_v17  ;;  %v8516_v17 = vmul.f32 -1.442695, %v6709_v35 }
 0xc7e   :  { %v10493_v31 = vpop.eup %10492  ;;  %8863 = vst [vmem:[%s13585_s22 + $0x10] sm:$0xff] %v8715_v44   ;;  %v6855_v14 = vadd.f32 1.0, %v10491_v42  ;;  %10510 = vpow2.f32 %v8511_v41  ;;  %v9975_v4 = vpop.f32.mrb[102].mxu1  ;;  %v9438_v22 = vadd.f32 %v9437_v54, %v9436_v46 }
 0xc7f   :  { %v9439_v3 = vpop.f32.mrb[78].mxu0  ;;  %v10495_v63 = vpop.eup %10494  ;;  %10512 = vrcp.f32 %v6857_v62  ;;  %v6858_v6 = vadd.f32 1.0, %v10493_v31  ;;  %v6712_v61 = vadd.f32 %v9975_v4, %v13300_v38  ;;  %v8514_v48 = vmul.f32 -1.442695, %v6701_v58 }
 0xc80   :  { %v6703_v50 = vpop.f32.mrb[103].mxu1  ;;  %v9440_v16 = vpop.f32.mrb[79].mxu0  ;;  %10514 = vrcp.f32 %v6855_v14  ;;  %v6856_v51 = vadd.f32 1.0, %v10495_v63  ;;  %v6564_v0 = vadd.f32 %v9438_v22, %v6403_v20 }
 0xc81   :  { %v6704_v39 = vadd.f32 %v6703_v50, %v13284_v49  ;;  %v10497_v9 = vpop.eup %10496  ;;  %10516 = vrcp.f32 %v6858_v6  ;;  %v9441_v12 = vadd.f32 %v9440_v16, %v9439_v3  ;;  %v8517_v7 = vmul.f32 -1.442695, %v6712_v61 }
 0xc82   :  { %v10499_v2 = vpop.eup %10498  ;;  %10518 = vrcp.f32 %v6856_v51  ;;  %v9978_v56 = vpop.f32.mrb[104].mxu1 }
 0xc83   :  { %v8515_v24 = vmul.f32 -1.442695, %v6704_v39  ;;  %v10501_v27 = vpop.eup %10500  ;;  %10520 = vpow2.f32 %v8514_v48  ;;  %v6567_v28 = vadd.f32 %v9441_v12, %v6406_v13  ;;  %v9442_v52 = vpop.f32.mrb[80].mxu0  ;;  %v6725_v40 = vadd.f32 %v9978_v56, %v6564_v0 }
 0xc84   :  { %v10503_v21 = vpop.eup %10502  ;;  %v8730_v38 = vpack.c.bf16 %v10501_v27, %v10497_v9  ;;  %v6716_v49 = vpop.f32.mrb[105].mxu1  ;;  %v6419_v39 = vadd.f32 %v13224_v19, %v13108_v25  ;;  %v6422_v9 = vadd.f32 %v13228_v60, %v13108_v25 }
 0xc85   :  { %10522 = vpow2.f32 %v8515_v24  ;;  %v10505_v8 = vpop.eup %10504  ;;  %v8725_v23 = vpack.c.bf16 %v10503_v21, %v10499_v2  ;;  %v9443_v5 = vpop.f32.mrb[81].mxu0  ;;  %v6717_v34 = vadd.f32 %v6716_v49, %v13318_v32  ;;  %v8520_v62 = vmul.f32 -1.442695, %v6725_v40 }
 0xc86   :  { %10524 = vpow2.f32 %v8516_v17  ;;  %v10507_v15 = vpop.eup %10506  ;;  %8866 = vst [vmem:[%s13585_s22 + $0x28] sm:$0xff] %v8730_v38   ;;  %v6861_v43 = vadd.f32 1.0, %v10505_v8  ;;  %v9979_v53 = vpop.f32.mrb[106].mxu1  ;;  %v9444_v10 = vadd.f32 %v9443_v5, %v9442_v52 }
 0xc87   :  { %10526 = vpow2.f32 %v8517_v7  ;;  %v9445_v36 = vpop.f32.mrb[82].mxu0  ;;  %v10509_v29 = vpop.eup %10508  ;;  %8865 = vst [vmem:[%s13585_s22 + $0x20] sm:$0xff] %v8725_v23   ;;  %v6859_v26 = vadd.f32 1.0, %v10507_v15  ;;  %v6728_v57 = vadd.f32 %v9979_v53, %v6567_v28  ;;  %v8518_v11 = vmul.f32 -1.442695, %v6717_v34 }
 0xc88   :  { %v6719_v1 = vpop.f32.mrb[107].mxu1  ;;  %v9446_v41 = vpop.f32.mrb[83].mxu0  ;;  %10528 = vrcp.f32 %v6861_v43  ;;  %v6862_v18 = vadd.f32 1.0, %v10509_v29  ;;  %v6572_v59 = vadd.f32 %v9444_v10, %v6411_v37 }
 0xc89   :  { %v10511_v45 = vpop.eup %10510  ;;  %v6720_v32 = vadd.f32 %v6719_v1, %v13320_v30  ;;  %10530 = vrcp.f32 %v6859_v26  ;;  %v9447_v46 = vadd.f32 %v9446_v41, %v9445_v36  ;;  %v8521_v54 = vmul.f32 -1.442695, %v6728_v57 }
 0xc8a   :  { %v10513_v44 = vpop.eup %10512  ;;  %v6860_v47 = vadd.f32 1.0, %v10511_v45  ;;  %10532 = vrcp.f32 %v6862_v18  ;;  %v9982_v30 = vpop.f32.mrb[108].mxu1 }
 0xc8b   :  { %v10515_v42 = vpop.eup %10514  ;;  %v8519_v20 = vmul.f32 -1.442695, %v6720_v32  ;;  %v6575_v31 = vadd.f32 %v9447_v46, %v6414_v55  ;;  %v9448_v4 = vpop.f32.mrb[84].mxu0 }
 0xc8c   :  { %v10517_v35 = vpop.eup %10516  ;;  %10534 = vrcp.f32 %v6860_v47  ;;  %v6732_v33 = vpop.f32.mrb[109].mxu1 }
 0xc8d   :  { %v10519_v14 = vpop.eup %10518  ;;  %v8740_v58 = vpack.c.bf16 %v10517_v35, %v10513_v44  ;;  %10536 = vpow2.f32 %v8518_v11  ;;  %v9449_v63 = vpop.f32.mrb[85].mxu0  ;;  %v6733_v50 = vadd.f32 %v6732_v33, %v6572_v59 }
 0xc8e   :  { %v10521_v22 = vpop.eup %10520  ;;  %v8735_v3 = vpack.c.bf16 %v10519_v14, %v10515_v42  ;;  %10538 = vpow2.f32 %v8519_v20  ;;  %v9983_v61 = vpop.f32.mrb[110].mxu1  ;;  %v9450_v16 = vadd.f32 %v9449_v63, %v9448_v4 }
 0xc8f   :  { %v10523_v13 = vpop.eup %10522  ;;  %8868 = vst [vmem:[%s13585_s22 + $0x38] sm:$0xff] %v8740_v58   ;;  %v6863_v6 = vadd.f32 1.0, %v10521_v22  ;;  %10540 = vpow2.f32 %v8520_v62  ;;  %v9451_v51 = vpop.f32.mrb[86].mxu0  ;;  %v8522_v7 = vmul.f32 -1.442695, %v6733_v50 }
 0xc90   :  { %v10525_v48 = vpop.eup %10524  ;;  %8867 = vst [vmem:[%s13585_s22 + $0x30] sm:$0xff] %v8735_v3   ;;  %v6864_v17 = vadd.f32 1.0, %v10523_v13  ;;  %10542 = vpow2.f32 %v8521_v54  ;;  %v6735_v0 = vpop.f32.mrb[111].mxu1  ;;  %v6580_v21 = vadd.f32 %v9450_v16, %v6419_v39 }
 0xc91   :  { %v9452_v12 = vpop.f32.mrb[87].mxu0  ;;  %v10527_v2 = vpop.eup %10526  ;;  %10544 = vrcp.f32 %v6863_v6  ;;  %v6865_v24 = vadd.f32 1.0, %v10525_v48  ;;  %v6736_v27 = vadd.f32 %v6735_v0, %v6575_v31 }
 0xc92   :  { %10546 = vrcp.f32 %v6864_v17  ;;  %v6866_v28 = vadd.f32 1.0, %v10527_v2  ;;  %v9453_v19 = vadd.f32 %v9452_v12, %v9451_v51  ;;  %v10529_v38 = vpop.eup %10528  ;;  %v6741_v52 = vadd.f32 %v9982_v30, %v6580_v21  ;;  %v9490_v49 = vpop.f32.mrb[88].mxu0  ;;  %v13379_v12 = vld [vmem:[%s13633_s23 + $0x5] ss:$0 sm:$0xff] }
 0xc93   :  { %10548 = vrcp.f32 %v6865_v24  ;;  %v8523_v60 = vmul.f32 -1.442695, %v6736_v27  ;;  %v10531_v56 = vpop.eup %10530  ;;  %v9602_v40 = vpop.f32.mrb[112].mxu1 }
 0xc94   :  { %10550 = vrcp.f32 %v6866_v28  ;;  %v6583_v8 = vadd.f32 %v9453_v19, %v6422_v9  ;;  %v10533_v23 = vpop.eup %10532  ;;  %v8524_v43 = vmul.f32 -1.442695, %v6741_v52  ;;  %v9491_v53 = vpop.f32.mrb[89].mxu0 }
 0xc95   :  { %10552 = vpow2.f32 %v8522_v7  ;;  %v8750_v15 = vpack.c.bf16 %v10533_v23, %v10529_v38  ;;  %v9603_v10 = vpop.f32.mrb[113].mxu1  ;;  %v9492_v37 = vadd.f32 %v9491_v53, %v9490_v49  ;;  %v9493_v26 = vpop.f32.mrb[90].mxu0 }
 0xc96   :  { %v10535_v5 = vpop.eup %10534  ;;  %10554 = vpow2.f32 %v8523_v60  ;;  %v6744_v34 = vadd.f32 %v9983_v61, %v6583_v8  ;;  %v9604_v1 = vadd.f32 %v9603_v10, %v9602_v40  ;;  %v9605_v57 = vpop.f32.mrb[114].mxu1 }
 0xc97   :  { %v10537_v36 = vpop.eup %10536  ;;  %v8745_v29 = vpack.c.bf16 %v10535_v5, %v10531_v56  ;;  %8870 = vst [vmem:[%s13585_s22 + $0x48] sm:$0xff] %v8750_v15   ;;  %10556 = vpow2.f32 %v8524_v43  ;;  %v9494_v18 = vpop.f32.mrb[91].mxu0  ;;  %v7134_v55 = vadd.f32 %v9492_v37, %v13108_v25 }
 0xc98   :  { %v10539_v41 = vpop.eup %10538  ;;  %v6867_v45 = vadd.f32 1.0, %v10537_v36  ;;  %v9606_v11 = vpop.f32.mrb[115].mxu1  ;;  %v9495_v47 = vadd.f32 %v9494_v18, %v9493_v26  ;;  %v8525_v62 = vmul.f32 -1.442695, %v6744_v34 }
 0xc99   :  { %v10541_v32 = vpop.eup %10540  ;;  %8869 = vst [vmem:[%s13585_s22 + $0x40] sm:$0xff] %v8745_v29   ;;  %v6868_v44 = vadd.f32 1.0, %v10539_v41  ;;  %v9607_v46 = vadd.f32 %v9606_v11, %v9605_v57  ;;  %v13366_v31 = vadd.f32 %v9604_v1, %v7134_v55 }
 0xc9a   :  { %v10543_v42 = vpop.eup %10542  ;;  %10558 = vrcp.f32 %v6867_v45  ;;  %v6869_v20 = vadd.f32 1.0, %v10541_v32  ;;  %v7137_v54 = vadd.f32 %v9495_v47, %v13108_v25  ;;  %v9496_v4 = vpop.f32.mrb[92].mxu0 }
 0xc9b   :  { %v10545_v59 = vpop.eup %10544  ;;  %10560 = vrcp.f32 %v6868_v44  ;;  %v6870_v35 = vadd.f32 1.0, %v10543_v42  ;;  %v9608_v22 = vpop.f32.mrb[116].mxu1 }
 0xc9c   :  { %v10547_v14 = vpop.eup %10546  ;;  %10562 = vrcp.f32 %v6869_v20  ;;  %v13368_v3 = vadd.f32 %v9607_v46, %v7137_v54  ;;  %v9497_v63 = vpop.f32.mrb[93].mxu0 }
 0xc9d   :  { %v10549_v58 = vpop.eup %10548  ;;  %v8755_v30 = vpack.c.bf16 %v10547_v14, %v10545_v59  ;;  %10564 = vrcp.f32 %v6870_v35  ;;  %v9609_v13 = vpop.f32.mrb[117].mxu1  ;;  %v9498_v50 = vadd.f32 %v9497_v63, %v9496_v4 }
 0xc9e   :  { %v10551_v33 = vpop.eup %10550  ;;  %10566 = vpow2.f32 %v8525_v62  ;;  %v9499_v61 = vpop.f32.mrb[94].mxu0  ;;  %v9610_v16 = vadd.f32 %v9609_v13, %v9608_v22 }
 0xc9f   :  { %v10553_v6 = vpop.eup %10552  ;;  %8871 = vst [vmem:[%s13585_s22 + $0x50] sm:$0xff] %v8755_v30   ;;  %v8760_v25 = vpack.c.bf16 %v10551_v33, %v10549_v58  ;;  %v9611_v51 = vpop.f32.mrb[118].mxu1  ;;  %v7142_v2 = vadd.f32 %v13379_v12, %v9498_v50 }
 0xca0   :  { %v10555_v48 = vpop.eup %10554  ;;  %v6871_v39 = vadd.f32 1.0, %v10553_v6  ;;  %v9500_v9 = vpop.f32.mrb[95].mxu0 }
 0xca1   :  { %v9612_v17 = vpop.f32.mrb[119].mxu1  ;;  %8872 = vst [vmem:[%s13585_s22 + $0x58] sm:$0xff] %v8760_v25   ;;  %v6872_v0 = vadd.f32 1.0, %v10555_v48  ;;  %v9501_v24 = vadd.f32 %v9500_v9, %v9499_v61  ;;  %v10557_v27 = vpop.eup %10556  ;;  %v13383_v21 = vadd.f32 %v9610_v16, %v7142_v2 }
 0xca2   :  { %v9613_v7 = vadd.f32 %v9612_v17, %v9611_v51  ;;  %10568 = vrcp.f32 %v6871_v39  ;;  %v9502_v60 = vpop.f32.mrb[96].mxu0  ;;  %v9614_v56 = vpop.f32.mrb[120].mxu1  ;;  %v6873_v49 = vadd.f32 1.0, %v10557_v27 }
 0xca3   :  { %10570 = vrcp.f32 %v6872_v0  ;;  %v7145_v28 = vadd.f32 %v13379_v12, %v9501_v24  ;;  %v9503_v40 = vpop.f32.mrb[97].mxu0  ;;  %v9615_v5 = vpop.f32.mrb[121].mxu1 }
 0xca4   :  { %v10559_v19 = vpop.eup %10558  ;;  %v9504_v43 = vadd.f32 %v9503_v40, %v9502_v60  ;;  %v9505_v34 = vpop.f32.mrb[98].mxu0  ;;  %v9616_v53 = vadd.f32 %v9615_v5, %v9614_v56  ;;  %10572 = vrcp.f32 %v6873_v49 }
 0xca5   :  { %v10561_v38 = vpop.eup %10560  ;;  %v13385_v52 = vadd.f32 %v9613_v7, %v7145_v28  ;;  %v9617_v10 = vpop.f32.mrb[122].mxu1 }
 0xca6   :  { %v10563_v8 = vpop.eup %10562  ;;  %v8765_v23 = vpack.c.bf16 %v10561_v38, %v10559_v19  ;;  %v9506_v37 = vpop.f32.mrb[99].mxu0  ;;  %v7150_v57 = vadd.f32 %v13379_v12, %v9504_v43 }
 0xca7   :  { %v10565_v15 = vpop.eup %10564  ;;  %v9618_v26 = vpop.f32.mrb[123].mxu1  ;;  %v9507_v41 = vadd.f32 %v9506_v37, %v9505_v34 }
 0xca8   :  { %v10567_v36 = vpop.eup %10566  ;;  %8873 = vst [vmem:[%s13585_s22 + $0x60] sm:$0xff] %v8765_v23   ;;  %v8770_v29 = vpack.c.bf16 %v10565_v15, %v10563_v8  ;;  %v9619_v45 = vadd.f32 %v9618_v26, %v9617_v10  ;;  %v13395_v11 = vadd.f32 %v9616_v53, %v7150_v57 }
 0xca9   :  { %v6874_v1 = vadd.f32 1.0, %v10567_v36  ;;  %v7153_v18 = vadd.f32 %v13379_v12, %v9507_v41 }
 0xcaa   :  { %8874 = vst [vmem:[%s13585_s22 + $0x68] sm:$0xff] %v8770_v29   ;;  %v9508_v55 = vpop.f32.mrb[100].mxu0  ;;  %v9620_v47 = vpop.f32.mrb[124].mxu1 }
 0xcab   :  { %10574 = vrcp.f32 %v6874_v1  ;;  %v13397_v46 = vadd.f32 %v9619_v45, %v7153_v18  ;;  %v9509_v20 = vpop.f32.mrb[101].mxu0  ;;  %v9621_v62 = vpop.f32.mrb[125].mxu1 }
 0xcac   :  { %v10569_v32 = vpop.eup %10568  ;;  %v9510_v59 = vadd.f32 %v9509_v20, %v9508_v55  ;;  %v9511_v35 = vpop.f32.mrb[102].mxu0  ;;  %v9622_v54 = vadd.f32 %v9621_v62, %v9620_v47 }
 0xcad   :  { %v10571_v44 = vpop.eup %10570  ;;  %v9623_v14 = vpop.f32.mrb[126].mxu1 }
 0xcae   :  { %v8775_v42 = vpack.c.bf16 %v10571_v44, %v10569_v32  ;;  %v9512_v58 = vpop.f32.mrb[103].mxu0  ;;  %v9624_v30 = vpop.f32.mrb[127].mxu1  ;;  %v7158_v4 = vadd.f32 %v13379_v12, %v9510_v59 }
 0xcaf   :  { %v9513_v22 = vadd.f32 %v9512_v58, %v9511_v35  ;;  %v9625_v33 = vadd.f32 %v9624_v30, %v9623_v14  ;;  %v10573_v6 = vpop.eup %10572 }
 0xcb0   :  { %8875 = vst [vmem:[%s13585_s22 + $0x70] sm:$0xff] %v8775_v42   ;;  %v13404_v13 = vadd.f32 %v9622_v54, %v7158_v4 }
 0xcb1   :  { %v7161_v63 = vadd.f32 %v13379_v12, %v9513_v22 }
 0xcb2   :  { %v9514_v50 = vpop.f32.mrb[104].mxu0  ;;  %v9626_v61 = vpop.f32.mrb[128].mxu1 }
 0xcb3   :  { %v13406_v16 = vadd.f32 %v9625_v33, %v7161_v63  ;;  %v9515_v48 = vpop.f32.mrb[105].mxu0  ;;  %v9627_v39 = vpop.f32.mrb[129].mxu1 }
 0xcb4   :  { %v9516_v9 = vadd.f32 %v9515_v48, %v9514_v50  ;;  %v9517_v17 = vpop.f32.mrb[106].mxu0  ;;  %v9628_v0 = vadd.f32 %v9627_v39, %v9626_v61  ;;  %v9629_v2 = vpop.f32.mrb[130].mxu1 }
 0xcb5   :  { %v10575_v25 = vpop.eup %10574  ;;  %v9518_v24 = vpop.f32.mrb[107].mxu0 }
 0xcb6   :  { %v8780_v51 = vpack.c.bf16 %v10575_v25, %v10573_v6  ;;  %v9630_v7 = vpop.f32.mrb[131].mxu1  ;;  %v7166_v27 = vadd.f32 %v13379_v12, %v9516_v9  ;;  %v9519_v28 = vadd.f32 %v9518_v24, %v9517_v17 }
 0xcb7   :  { %v9631_v19 = vadd.f32 %v9630_v7, %v9629_v2 }
 0xcb8   :  { %8876 = vst [vmem:[%s13585_s22 + $0x78] sm:$0xff] %v8780_v51   ;;  %v7169_v38 = vadd.f32 %v13379_v12, %v9519_v28  ;;  %v13413_v60 = vadd.f32 %v9628_v0, %v7166_v27 }
 0xcba   :  { %v9520_v56 = vpop.f32.mrb[108].mxu0  ;;  %v9632_v8 = vpop.f32.mrb[132].mxu1  ;;  %v13415_v23 = vadd.f32 %v9631_v19, %v7169_v38 }
 0xcbb   :  { %v9521_v49 = vpop.f32.mrb[109].mxu0  ;;  %v9633_v40 = vpop.f32.mrb[133].mxu1 }
 0xcbc   :  { %v9522_v5 = vadd.f32 %v9521_v49, %v9520_v56  ;;  %v9523_v15 = vpop.f32.mrb[110].mxu0  ;;  %v9634_v43 = vadd.f32 %v9633_v40, %v9632_v8  ;;  %v9635_v34 = vpop.f32.mrb[134].mxu1 }
 0xcbd   :  { %v9524_v53 = vpop.f32.mrb[111].mxu0  ;;  %v9636_v10 = vpop.f32.mrb[135].mxu1 }
 0xcbe   :  { %v7174_v36 = vadd.f32 %v13379_v12, %v9522_v5  ;;  %v9525_v29 = vadd.f32 %v9524_v53, %v9523_v15  ;;  %v9637_v37 = vadd.f32 %v9636_v10, %v9635_v34 }
 0xcc0   :  { %v7177_v26 = vadd.f32 %v13379_v12, %v9525_v29  ;;  %v13419_v1 = vadd.f32 %v9634_v43, %v7174_v36 }
 0xcc2   :  { %v9526_v57 = vpop.f32.mrb[112].mxu0  ;;  %v9638_v41 = vpop.f32.mrb[136].mxu1  ;;  %v13421_v45 = vadd.f32 %v9637_v37, %v7177_v26 }
 0xcc3   :  { %v9527_v18 = vpop.f32.mrb[113].mxu0  ;;  %v9639_v32 = vpop.f32.mrb[137].mxu1 }
 0xcc4   :  { %v9528_v44 = vadd.f32 %v9527_v18, %v9526_v57  ;;  %v9529_v55 = vpop.f32.mrb[114].mxu0  ;;  %v9640_v47 = vadd.f32 %v9639_v32, %v9638_v41  ;;  %v9641_v42 = vpop.f32.mrb[138].mxu1 }
 0xcc5   :  { %v9530_v20 = vpop.f32.mrb[115].mxu0  ;;  %v9642_v62 = vpop.f32.mrb[139].mxu1 }
 0xcc6   :  { %v7182_v59 = vadd.f32 %v13379_v12, %v9528_v44  ;;  %v9531_v35 = vadd.f32 %v9530_v20, %v9529_v55  ;;  %v9643_v54 = vadd.f32 %v9642_v62, %v9641_v42 }
 0xcc8   :  { %v7185_v14 = vadd.f32 %v13379_v12, %v9531_v35  ;;  %v13425_v58 = vadd.f32 %v9640_v47, %v7182_v59 }
 0xcca   :  { %v9532_v30 = vpop.f32.mrb[116].mxu0  ;;  %v9644_v4 = vpop.f32.mrb[140].mxu1  ;;  %v13427_v22 = vadd.f32 %v9643_v54, %v7185_v14 }
 0xccb   :  { %v9533_v33 = vpop.f32.mrb[117].mxu0  ;;  %v9645_v63 = vpop.f32.mrb[141].mxu1 }
 0xccc   :  { %v9534_v6 = vadd.f32 %v9533_v33, %v9532_v30  ;;  %v9535_v25 = vpop.f32.mrb[118].mxu0  ;;  %v9646_v50 = vadd.f32 %v9645_v63, %v9644_v4  ;;  %v9647_v61 = vpop.f32.mrb[142].mxu1 }
 0xccd   :  { %v9536_v51 = vpop.f32.mrb[119].mxu0  ;;  %v9648_v48 = vpop.f32.mrb[143].mxu1 }
 0xcce   :  { %v7190_v39 = vadd.f32 %v13379_v12, %v9534_v6  ;;  %v9537_v9 = vadd.f32 %v9536_v51, %v9535_v25  ;;  %v9649_v17 = vadd.f32 %v9648_v48, %v9647_v61 }
 0xcd0   :  { %v7193_v0 = vadd.f32 %v13379_v12, %v9537_v9  ;;  %v13431_v2 = vadd.f32 %v9646_v50, %v7190_v39 }
 0xcd2   :  { %v9538_v24 = vpop.f32.mrb[120].mxu0  ;;  %v9650_v7 = vpop.f32.mrb[144].mxu1  ;;  %v13433_v27 = vadd.f32 %v9649_v17, %v7193_v0 }
 0xcd3   :  { %v9539_v28 = vpop.f32.mrb[121].mxu0  ;;  %v9651_v19 = vpop.f32.mrb[145].mxu1 }
 0xcd4   :  { %v9540_v38 = vadd.f32 %v9539_v28, %v9538_v24  ;;  %v9541_v56 = vpop.f32.mrb[122].mxu0  ;;  %v9652_v8 = vadd.f32 %v9651_v19, %v9650_v7  ;;  %v9653_v49 = vpop.f32.mrb[146].mxu1 }
 0xcd5   :  { %v9542_v40 = vpop.f32.mrb[123].mxu0  ;;  %v9654_v5 = vpop.f32.mrb[147].mxu1 }
 0xcd6   :  { %v7198_v15 = vadd.f32 %v13379_v12, %v9540_v38  ;;  %v9543_v43 = vadd.f32 %v9542_v40, %v9541_v56  ;;  %v9655_v34 = vadd.f32 %v9654_v5, %v9653_v49 }
 0xcd8   :  { %v7201_v53 = vadd.f32 %v13379_v12, %v9543_v43  ;;  %v13437_v10 = vadd.f32 %v9652_v8, %v7198_v15 }
 0xcda   :  { %v9544_v36 = vpop.f32.mrb[124].mxu0  ;;  %v9656_v29 = vpop.f32.mrb[148].mxu1  ;;  %v13439_v37 = vadd.f32 %v9655_v34, %v7201_v53 }
 0xcdb   :  { %v9545_v26 = vpop.f32.mrb[125].mxu0  ;;  %v9657_v57 = vpop.f32.mrb[149].mxu1 }
 0xcdc   :  { %v9546_v41 = vadd.f32 %v9545_v26, %v9544_v36  ;;  %v9547_v18 = vpop.f32.mrb[126].mxu0  ;;  %v9658_v32 = vadd.f32 %v9657_v57, %v9656_v29  ;;  %v9659_v44 = vpop.f32.mrb[150].mxu1 }
 0xcdd   :  { %v9548_v55 = vpop.f32.mrb[127].mxu0  ;;  %v9660_v47 = vpop.f32.mrb[151].mxu1 }
 0xcde   :  { %v7206_v42 = vadd.f32 %v13379_v12, %v9546_v41  ;;  %v9549_v20 = vadd.f32 %v9548_v55, %v9547_v18  ;;  %v9661_v62 = vadd.f32 %v9660_v47, %v9659_v44 }
 0xce0   :  { %v7209_v59 = vadd.f32 %v13379_v12, %v9549_v20  ;;  %v13443_v35 = vadd.f32 %v9658_v32, %v7206_v42 }
 0xce2   :  { %v9550_v54 = vpop.f32.mrb[128].mxu0  ;;  %v9662_v14 = vpop.f32.mrb[152].mxu1  ;;  %v13445_v30 = vadd.f32 %v9661_v62, %v7209_v59 }
 0xce3   :  { %v9551_v4 = vpop.f32.mrb[129].mxu0  ;;  %v9663_v33 = vpop.f32.mrb[153].mxu1 }
 0xce4   :  { %v9552_v63 = vadd.f32 %v9551_v4, %v9550_v54  ;;  %v9553_v6 = vpop.f32.mrb[130].mxu0  ;;  %v9664_v25 = vadd.f32 %v9663_v33, %v9662_v14  ;;  %v9665_v50 = vpop.f32.mrb[154].mxu1 }
 0xce5   :  { %v9554_v61 = vpop.f32.mrb[131].mxu0  ;;  %v9666_v51 = vpop.f32.mrb[155].mxu1 }
 0xce6   :  { %v7214_v48 = vadd.f32 %v13379_v12, %v9552_v63  ;;  %v9555_v39 = vadd.f32 %v9554_v61, %v9553_v6  ;;  %v9667_v9 = vadd.f32 %v9666_v51, %v9665_v50 }
 0xce8   :  { %v7217_v17 = vadd.f32 %v13379_v12, %v9555_v39  ;;  %v13449_v0 = vadd.f32 %v9664_v25, %v7214_v48 }
 0xcea   :  { %v9556_v24 = vpop.f32.mrb[132].mxu0  ;;  %v9668_v7 = vpop.f32.mrb[156].mxu1  ;;  %v13451_v28 = vadd.f32 %v9667_v9, %v7217_v17 }
 0xceb   :  { %v9557_v19 = vpop.f32.mrb[133].mxu0  ;;  %v9669_v38 = vpop.f32.mrb[157].mxu1 }
 0xcec   :  { %v9558_v56 = vadd.f32 %v9557_v19, %v9556_v24  ;;  %v9559_v8 = vpop.f32.mrb[134].mxu0  ;;  %v9670_v49 = vadd.f32 %v9669_v38, %v9668_v7  ;;  %v9671_v40 = vpop.f32.mrb[158].mxu1 }
 0xced   :  { %v9560_v5 = vpop.f32.mrb[135].mxu0  ;;  %v9672_v15 = vpop.f32.mrb[159].mxu1 }
 0xcee   :  { %v7222_v43 = vadd.f32 %v13379_v12, %v9558_v56  ;;  %v9561_v34 = vadd.f32 %v9560_v5, %v9559_v8  ;;  %v9673_v53 = vadd.f32 %v9672_v15, %v9671_v40 }
 0xcf0   :  { %v7225_v36 = vadd.f32 %v13379_v12, %v9561_v34  ;;  %v13455_v29 = vadd.f32 %v9670_v49, %v7222_v43 }
 0xcf2   :  { %v9562_v26 = vpop.f32.mrb[136].mxu0  ;;  %v9674_v57 = vpop.f32.mrb[160].mxu1  ;;  %v13457_v41 = vadd.f32 %v9673_v53, %v7225_v36 }
 0xcf3   :  { %v9563_v18 = vpop.f32.mrb[137].mxu0  ;;  %v9675_v32 = vpop.f32.mrb[161].mxu1 }
 0xcf4   :  { %v9564_v44 = vadd.f32 %v9563_v18, %v9562_v26  ;;  %v9565_v55 = vpop.f32.mrb[138].mxu0  ;;  %v9676_v47 = vadd.f32 %v9675_v32, %v9674_v57  ;;  %v9677_v42 = vpop.f32.mrb[162].mxu1 }
 0xcf5   :  { %v9566_v20 = vpop.f32.mrb[139].mxu0  ;;  %v9678_v62 = vpop.f32.mrb[163].mxu1 }
 0xcf6   :  { %v7230_v59 = vadd.f32 %v13379_v12, %v9564_v44  ;;  %v9567_v54 = vadd.f32 %v9566_v20, %v9565_v55  ;;  %v9679_v14 = vadd.f32 %v9678_v62, %v9677_v42 }
 0xcf8   :  { %v7233_v4 = vadd.f32 %v13379_v12, %v9567_v54  ;;  %v13461_v33 = vadd.f32 %v9676_v47, %v7230_v59 }
 0xcfa   :  { %v9568_v63 = vpop.f32.mrb[140].mxu0  ;;  %v9680_v6 = vpop.f32.mrb[164].mxu1  ;;  %v13463_v25 = vadd.f32 %v9679_v14, %v7233_v4 }
 0xcfb   :  { %v9569_v50 = vpop.f32.mrb[141].mxu0  ;;  %v9681_v61 = vpop.f32.mrb[165].mxu1 }
 0xcfc   :  { %v9570_v51 = vadd.f32 %v9569_v50, %v9568_v63  ;;  %v9571_v48 = vpop.f32.mrb[142].mxu0  ;;  %v9682_v39 = vadd.f32 %v9681_v61, %v9680_v6  ;;  %v9683_v9 = vpop.f32.mrb[166].mxu1 }
 0xcfd   :  { %v9572_v17 = vpop.f32.mrb[143].mxu0  ;;  %v9684_v24 = vpop.f32.mrb[167].mxu1 }
 0xcfe   :  { %v7238_v7 = vadd.f32 %v13379_v12, %v9570_v51  ;;  %v9573_v19 = vadd.f32 %v9572_v17, %v9571_v48  ;;  %v9685_v38 = vadd.f32 %v9684_v24, %v9683_v9 }
 0xd00   :  { %v7241_v56 = vadd.f32 %v13379_v12, %v9573_v19  ;;  %v13467_v8 = vadd.f32 %v9682_v39, %v7238_v7 }
 0xd02   :  { %v9574_v49 = vpop.f32.mrb[144].mxu0  ;;  %v9686_v40 = vpop.f32.mrb[168].mxu1  ;;  %v13469_v5 = vadd.f32 %v9685_v38, %v7241_v56 }
 0xd03   :  { %v9575_v15 = vpop.f32.mrb[145].mxu0  ;;  %v9687_v43 = vpop.f32.mrb[169].mxu1 }
 0xd04   :  { %v9576_v34 = vadd.f32 %v9575_v15, %v9574_v49  ;;  %v9577_v53 = vpop.f32.mrb[146].mxu0  ;;  %v9688_v36 = vadd.f32 %v9687_v43, %v9686_v40  ;;  %v9689_v26 = vpop.f32.mrb[170].mxu1 }
 0xd05   :  { %v9578_v57 = vpop.f32.mrb[147].mxu0  ;;  %v9690_v18 = vpop.f32.mrb[171].mxu1 }
 0xd06   :  { %v7246_v32 = vadd.f32 %v13379_v12, %v9576_v34  ;;  %v9579_v44 = vadd.f32 %v9578_v57, %v9577_v53  ;;  %v9691_v55 = vadd.f32 %v9690_v18, %v9689_v26 }
 0xd08   :  { %v7249_v47 = vadd.f32 %v13379_v12, %v9579_v44  ;;  %v13473_v42 = vadd.f32 %v9688_v36, %v7246_v32 }
 0xd0a   :  { %v9580_v20 = vpop.f32.mrb[148].mxu0  ;;  %v9692_v62 = vpop.f32.mrb[172].mxu1  ;;  %v13475_v59 = vadd.f32 %v9691_v55, %v7249_v47 }
 0xd0b   :  { %v9581_v54 = vpop.f32.mrb[149].mxu0  ;;  %v9693_v14 = vpop.f32.mrb[173].mxu1 }
 0xd0c   :  { %v9582_v4 = vadd.f32 %v9581_v54, %v9580_v20  ;;  %v9583_v63 = vpop.f32.mrb[150].mxu0  ;;  %v9694_v6 = vadd.f32 %v9693_v14, %v9692_v62  ;;  %v9695_v50 = vpop.f32.mrb[174].mxu1 }
 0xd0d   :  { %v9584_v61 = vpop.f32.mrb[151].mxu0  ;;  %v9696_v51 = vpop.f32.mrb[175].mxu1 }
 0xd0e   :  { %v7254_v48 = vadd.f32 %v13379_v12, %v9582_v4  ;;  %v9585_v39 = vadd.f32 %v9584_v61, %v9583_v63  ;;  %v9697_v9 = vadd.f32 %v9696_v51, %v9695_v50 }
 0xd10   :  { %v7257_v17 = vadd.f32 %v13379_v12, %v9585_v39  ;;  %v13479_v24 = vadd.f32 %v9694_v6, %v7254_v48 }
 0xd12   :  { %v9994_v7 = vpop.f32.mrb[152].mxu0  ;;  %v13481_v19 = vadd.f32 %v9697_v9, %v7257_v17 }
 0xd13   :  { %v7464_v38 = vadd.f32 %v9994_v7, %v13383_v21  ;;  %v7455_v56 = vpop.f32.mrb[153].mxu0 }
 0xd14   :  { %v7456_v49 = vadd.f32 %v7455_v56, %v13366_v31  ;;  %v9995_v40 = vpop.f32.mrb[154].mxu0 }
 0xd15   :  { %v8576_v15 = vmul.f32 -1.442695, %v7464_v38  ;;  %v7467_v43 = vadd.f32 %v9995_v40, %v13385_v52  ;;  %v7458_v34 = vpop.f32.mrb[155].mxu0 }
 0xd16   :  { %v8574_v53 = vmul.f32 -1.442695, %v7456_v49  ;;  %v7459_v36 = vadd.f32 %v7458_v34, %v13368_v3 }
 0xd17   :  { %10576 = vpow2.f32 %v8576_v15  ;;  %v8577_v12 = vmul.f32 -1.442695, %v7467_v43 }
 0xd18   :  { %10578 = vpow2.f32 %v8574_v53  ;;  %v8575_v26 = vmul.f32 -1.442695, %v7459_v36 }
 0xd19   :  { %10580 = vpow2.f32 %v8577_v12 }
 0xd1a   :  { %10582 = vpow2.f32 %v8575_v26  ;;  %v9998_v57 = vpop.f32.mrb[156].mxu0 }
 0xd1b   :  { %v7480_v21 = vadd.f32 %v9998_v57, %v13404_v13  ;;  %v7471_v18 = vpop.f32.mrb[157].mxu0 }
 0xd1c   :  { %v7472_v31 = vadd.f32 %v7471_v18, %v13395_v11  ;;  %v9999_v32 = vpop.f32.mrb[158].mxu0 }
 0xd1d   :  { %v8580_v44 = vmul.f32 -1.442695, %v7480_v21  ;;  %v7483_v52 = vadd.f32 %v9999_v32, %v13406_v16  ;;  %v7474_v55 = vpop.f32.mrb[159].mxu0 }
 0xd1e   :  { %v8578_v47 = vmul.f32 -1.442695, %v7472_v31  ;;  %v7475_v3 = vadd.f32 %v7474_v55, %v13397_v46 }
 0xd1f   :  { %10584 = vpow2.f32 %v8580_v44  ;;  %v8581_v20 = vmul.f32 -1.442695, %v7483_v52 }
 0xd20   :  { %10586 = vpow2.f32 %v8578_v47  ;;  %v8579_v62 = vmul.f32 -1.442695, %v7475_v3 }
 0xd21   :  { %v10577_v54 = vpop.eup %10576  ;;  %10588 = vpow2.f32 %v8581_v20 }
 0xd22   :  { %v10579_v14 = vpop.eup %10578  ;;  %v7680_v4 = vadd.f32 1.0, %v10577_v54  ;;  %10590 = vpow2.f32 %v8579_v62  ;;  %v10002_v13 = vpop.f32.mrb[160].mxu0 }
 0xd23   :  { %v10581_v63 = vpop.eup %10580  ;;  %v7678_v11 = vadd.f32 1.0, %v10579_v14  ;;  %v7496_v6 = vadd.f32 %v10002_v13, %v13419_v1  ;;  %v7487_v50 = vpop.f32.mrb[161].mxu0 }
 0xd24   :  { %v10583_v16 = vpop.eup %10582  ;;  %10592 = vrcp.f32 %v7680_v4  ;;  %v7681_v61 = vadd.f32 1.0, %v10581_v63  ;;  %v7488_v46 = vadd.f32 %v7487_v50, %v13413_v60  ;;  %v10003_v51 = vpop.f32.mrb[162].mxu0 }
 0xd25   :  { %10594 = vrcp.f32 %v7678_v11  ;;  %v7679_v48 = vadd.f32 1.0, %v10583_v16  ;;  %v8584_v39 = vmul.f32 -1.442695, %v7496_v6  ;;  %v7499_v9 = vadd.f32 %v10003_v51, %v13421_v45  ;;  %v7490_v17 = vpop.f32.mrb[163].mxu0 }
 0xd26   :  { %10596 = vrcp.f32 %v7681_v61  ;;  %v8582_v7 = vmul.f32 -1.442695, %v7488_v46  ;;  %v7491_v38 = vadd.f32 %v7490_v17, %v13415_v23 }
 0xd27   :  { %10598 = vrcp.f32 %v7679_v48  ;;  %v8585_v56 = vmul.f32 -1.442695, %v7499_v9 }
 0xd28   :  { %10600 = vpow2.f32 %v8584_v39  ;;  %v8583_v1 = vmul.f32 -1.442695, %v7491_v38 }
 0xd29   :  { %v10585_v49 = vpop.eup %10584  ;;  %10602 = vpow2.f32 %v8582_v7 }
 0xd2a   :  { %v10587_v40 = vpop.eup %10586  ;;  %v7684_v15 = vadd.f32 1.0, %v10585_v49  ;;  %10604 = vpow2.f32 %v8585_v56  ;;  %v10006_v60 = vpop.f32.mrb[164].mxu0 }
 0xd2b   :  { %v10589_v43 = vpop.eup %10588  ;;  %v7682_v34 = vadd.f32 1.0, %v10587_v40  ;;  %10606 = vpow2.f32 %v8583_v1  ;;  %v7512_v45 = vadd.f32 %v10006_v60, %v13431_v2  ;;  %v7503_v53 = vpop.f32.mrb[165].mxu0 }
 0xd2c   :  { %v10591_v36 = vpop.eup %10590  ;;  %10608 = vrcp.f32 %v7684_v15  ;;  %v7685_v12 = vadd.f32 1.0, %v10589_v43  ;;  %v7504_v23 = vadd.f32 %v7503_v53, %v13425_v58  ;;  %v10007_v26 = vpop.f32.mrb[166].mxu0 }
 0xd2d   :  { %10610 = vrcp.f32 %v7682_v34  ;;  %v7683_v57 = vadd.f32 1.0, %v10591_v36  ;;  %v8588_v21 = vmul.f32 -1.442695, %v7512_v45  ;;  %v7515_v18 = vadd.f32 %v10007_v26, %v13433_v27  ;;  %v7506_v31 = vpop.f32.mrb[167].mxu0 }
 0xd2e   :  { %v10593_v32 = vpop.eup %10592  ;;  %10612 = vrcp.f32 %v7685_v12  ;;  %v8586_v44 = vmul.f32 -1.442695, %v7504_v23  ;;  %v7507_v52 = vadd.f32 %v7506_v31, %v13427_v22 }
 0xd2f   :  { %v10595_v55 = vpop.eup %10594  ;;  %10614 = vrcp.f32 %v7683_v57  ;;  %v8589_v2 = vmul.f32 -1.442695, %v7515_v18 }
 0xd30   :  { %v10597_v47 = vpop.eup %10596  ;;  %10616 = vpow2.f32 %v8588_v21  ;;  %v8587_v3 = vmul.f32 -1.442695, %v7507_v52 }
 0xd31   :  { %v10599_v20 = vpop.eup %10598  ;;  %v8790_v58 = vpack.c.bf16 %v10597_v47, %v10593_v32  ;;  %10618 = vpow2.f32 %v8586_v44 }
 0xd32   :  { %v10601_v62 = vpop.eup %10600  ;;  %v8785_v54 = vpack.c.bf16 %v10599_v20, %v10595_v55  ;;  %10620 = vpow2.f32 %v8589_v2  ;;  %v10010_v14 = vpop.f32.mrb[168].mxu0 }
 0xd33   :  { %v10603_v27 = vpop.eup %10602  ;;  %8878 = vst [vmem:[%s13585_s22 + $0x88] sm:$0xff] %v8790_v58   ;;  %v7688_v4 = vadd.f32 1.0, %v10601_v62  ;;  %10622 = vpow2.f32 %v8587_v3  ;;  %v7528_v22 = vadd.f32 %v10010_v14, %v13443_v35  ;;  %v7519_v13 = vpop.f32.mrb[169].mxu0 }
 0xd34   :  { %v10605_v63 = vpop.eup %10604  ;;  %8877 = vst [vmem:[%s13585_s22 + $0x80] sm:$0xff] %v8785_v54   ;;  %v7686_v11 = vadd.f32 1.0, %v10603_v27  ;;  %v7520_v6 = vadd.f32 %v7519_v13, %v13437_v10  ;;  %v10011_v50 = vpop.f32.mrb[170].mxu0 }
 0xd35   :  { %v10607_v16 = vpop.eup %10606  ;;  %10624 = vrcp.f32 %v7688_v4  ;;  %v7689_v61 = vadd.f32 1.0, %v10605_v63  ;;  %v8592_v46 = vmul.f32 -1.442695, %v7528_v22  ;;  %v7531_v51 = vadd.f32 %v10011_v50, %v13445_v30  ;;  %v7522_v48 = vpop.f32.mrb[171].mxu0 }
 0xd36   :  { %v10609_v39 = vpop.eup %10608  ;;  %10626 = vrcp.f32 %v7686_v11  ;;  %v7687_v35 = vadd.f32 1.0, %v10607_v16  ;;  %v8590_v9 = vmul.f32 -1.442695, %v7520_v6  ;;  %v7523_v17 = vadd.f32 %v7522_v48, %v13439_v37 }
 0xd37   :  { %v10611_v7 = vpop.eup %10610  ;;  %10628 = vrcp.f32 %v7689_v61  ;;  %v8593_v38 = vmul.f32 -1.442695, %v7531_v51 }
 0xd38   :  { %v10613_v56 = vpop.eup %10612  ;;  %10630 = vrcp.f32 %v7687_v35  ;;  %v8591_v10 = vmul.f32 -1.442695, %v7523_v17 }
 0xd39   :  { %v10615_v1 = vpop.eup %10614  ;;  %v8800_v49 = vpack.c.bf16 %v10613_v56, %v10609_v39  ;;  %10632 = vpow2.f32 %v8592_v46 }
 0xd3a   :  { %v10617_v40 = vpop.eup %10616  ;;  %v8795_v15 = vpack.c.bf16 %v10615_v1, %v10611_v7  ;;  %10634 = vpow2.f32 %v8590_v9  ;;  %v10014_v30 = vpop.f32.mrb[172].mxu0 }
 0xd3b   :  { %v10619_v60 = vpop.eup %10618  ;;  %8880 = vst [vmem:[%s13585_s22 + $0x98] sm:$0xff] %v8800_v49   ;;  %v7692_v43 = vadd.f32 1.0, %v10617_v40  ;;  %10636 = vpow2.f32 %v8593_v38  ;;  %v7544_v37 = vadd.f32 %v10014_v30, %v13455_v29  ;;  %v7535_v34 = vpop.f32.mrb[173].mxu0 }
 0xd3c   :  { %v10621_v45 = vpop.eup %10620  ;;  %8879 = vst [vmem:[%s13585_s22 + $0x90] sm:$0xff] %v8795_v15   ;;  %v7690_v53 = vadd.f32 1.0, %v10619_v60  ;;  %10638 = vpow2.f32 %v8591_v10  ;;  %v7536_v36 = vadd.f32 %v7535_v34, %v13449_v0  ;;  %v10015_v12 = vpop.f32.mrb[174].mxu0 }
 0xd3d   :  { %v10623_v23 = vpop.eup %10622  ;;  %10640 = vrcp.f32 %v7692_v43  ;;  %v7693_v26 = vadd.f32 1.0, %v10621_v45  ;;  %v8596_v57 = vmul.f32 -1.442695, %v7544_v37  ;;  %v7547_v21 = vadd.f32 %v10015_v12, %v13457_v41  ;;  %v7538_v18 = vpop.f32.mrb[175].mxu0 }
 0xd3e   :  { %10642 = vrcp.f32 %v7690_v53  ;;  %v7691_v29 = vadd.f32 1.0, %v10623_v23  ;;  %v8594_v31 = vmul.f32 -1.442695, %v7536_v36  ;;  %v7539_v32 = vadd.f32 %v7538_v18, %v13451_v28 }
 0xd3f   :  { %v10625_v44 = vpop.eup %10624  ;;  %10644 = vrcp.f32 %v7693_v26  ;;  %v8597_v52 = vmul.f32 -1.442695, %v7547_v21 }
 0xd40   :  { %v10627_v55 = vpop.eup %10626  ;;  %10646 = vrcp.f32 %v7691_v29  ;;  %v8595_v2 = vmul.f32 -1.442695, %v7539_v32 }
 0xd41   :  { %v10629_v0 = vpop.eup %10628  ;;  %10648 = vpow2.f32 %v8596_v57 }
 0xd42   :  { %v10631_v47 = vpop.eup %10630  ;;  %v8810_v3 = vpack.c.bf16 %v10629_v0, %v10625_v44  ;;  %10650 = vpow2.f32 %v8594_v31  ;;  %v10018_v20 = vpop.f32.mrb[176].mxu0 }
 0xd43   :  { %v10633_v58 = vpop.eup %10632  ;;  %v8805_v41 = vpack.c.bf16 %v10631_v47, %v10627_v55  ;;  %10652 = vpow2.f32 %v8597_v52  ;;  %v7560_v62 = vadd.f32 %v10018_v20, %v13467_v8  ;;  %v7551_v54 = vpop.f32.mrb[177].mxu0 }
 0xd44   :  { %v10635_v14 = vpop.eup %10634  ;;  %8882 = vst [vmem:[%s13585_s22 + $0xa8] sm:$0xff] %v8810_v3   ;;  %v7696_v28 = vadd.f32 1.0, %v10633_v58  ;;  %10654 = vpow2.f32 %v8595_v2  ;;  %v7552_v27 = vadd.f32 %v7551_v54, %v13461_v33  ;;  %v10019_v4 = vpop.f32.mrb[178].mxu0 }
 0xd45   :  { %v10637_v22 = vpop.eup %10636  ;;  %8881 = vst [vmem:[%s13585_s22 + $0xa0] sm:$0xff] %v8805_v41   ;;  %v7694_v13 = vadd.f32 1.0, %v10635_v14  ;;  %v7563_v63 = vadd.f32 %v10019_v4, %v13469_v5  ;;  %v7554_v8 = vpop.f32.mrb[179].mxu0  ;;  %v8600_v50 = vmul.f32 -1.442695, %v7560_v62 }
 0xd46   :  { %v10639_v11 = vpop.eup %10638  ;;  %10656 = vrcp.f32 %v7696_v28  ;;  %v7697_v6 = vadd.f32 1.0, %v10637_v22  ;;  %v7555_v16 = vadd.f32 %v7554_v8, %v13463_v25  ;;  %v8598_v33 = vmul.f32 -1.442695, %v7552_v27 }
 0xd47   :  { %v10641_v61 = vpop.eup %10640  ;;  %10658 = vrcp.f32 %v7694_v13  ;;  %v7695_v46 = vadd.f32 1.0, %v10639_v11  ;;  %v8601_v48 = vmul.f32 -1.442695, %v7563_v63 }
 0xd48   :  { %v10643_v51 = vpop.eup %10642  ;;  %10660 = vrcp.f32 %v7697_v6  ;;  %v8599_v35 = vmul.f32 -1.442695, %v7555_v16 }
 0xd49   :  { %v10645_v39 = vpop.eup %10644  ;;  %10662 = vrcp.f32 %v7695_v46 }
 0xd4a   :  { %v10647_v9 = vpop.eup %10646  ;;  %v8820_v17 = vpack.c.bf16 %v10645_v39, %v10641_v61  ;;  %10664 = vpow2.f32 %v8600_v50  ;;  %v10022_v5 = vpop.f32.mrb[180].mxu0 }
 0xd4b   :  { %v10649_v7 = vpop.eup %10648  ;;  %v8815_v38 = vpack.c.bf16 %v10647_v9, %v10643_v51  ;;  %10666 = vpow2.f32 %v8598_v33  ;;  %v7576_v56 = vadd.f32 %v10022_v5, %v13479_v24  ;;  %v7567_v25 = vpop.f32.mrb[181].mxu0 }
 0xd4c   :  { %v10651_v10 = vpop.eup %10650  ;;  %8884 = vst [vmem:[%s13585_s22 + $0xb8] sm:$0xff] %v8820_v17   ;;  %v7700_v1 = vadd.f32 1.0, %v10649_v7  ;;  %10668 = vpow2.f32 %v8601_v48  ;;  %v7568_v49 = vadd.f32 %v7567_v25, %v13473_v42  ;;  %v10023_v40 = vpop.f32.mrb[182].mxu0 }
 0xd4d   :  { %v10653_v15 = vpop.eup %10652  ;;  %8883 = vst [vmem:[%s13585_s22 + $0xb0] sm:$0xff] %v8815_v38   ;;  %v7698_v30 = vadd.f32 1.0, %v10651_v10  ;;  %10670 = vpow2.f32 %v8599_v35  ;;  %v7579_v24 = vadd.f32 %v10023_v40, %v13481_v19  ;;  %v7570_v60 = vpop.f32.mrb[183].mxu0  ;;  %v8604_v34 = vmul.f32 -1.442695, %v7576_v56 }
 0xd4e   :  { %v10655_v43 = vpop.eup %10654  ;;  %10672 = vrcp.f32 %v7700_v1  ;;  %v7701_v37 = vadd.f32 1.0, %v10653_v15  ;;  %v7571_v45 = vadd.f32 %v7570_v60, %v13475_v59  ;;  %v8602_v42 = vmul.f32 -1.442695, %v7568_v49 }
 0xd4f   :  { %10674 = vrcp.f32 %v7698_v30  ;;  %v7699_v53 = vadd.f32 1.0, %v10655_v43  ;;  %v8605_v12 = vmul.f32 -1.442695, %v7579_v24 }
 0xd50   :  { %v10657_v36 = vpop.eup %10656  ;;  %10676 = vrcp.f32 %v7701_v37  ;;  %v8603_v26 = vmul.f32 -1.442695, %v7571_v45 }
 0xd51   :  { %v10659_v23 = vpop.eup %10658  ;;  %10678 = vrcp.f32 %v7699_v53 }
 0xd52   :  { %v10661_v57 = vpop.eup %10660  ;;  %10680 = vpow2.f32 %v8604_v34 }
 0xd53   :  { %v10663_v21 = vpop.eup %10662  ;;  %v8830_v19 = vpack.c.bf16 %v10661_v57, %v10657_v36  ;;  %10682 = vpow2.f32 %v8602_v42 }
 0xd54   :  { %v10665_v18 = vpop.eup %10664  ;;  %v8825_v29 = vpack.c.bf16 %v10663_v21, %v10659_v23  ;;  %10684 = vpow2.f32 %v8605_v12 }
 0xd55   :  { %v10667_v31 = vpop.eup %10666  ;;  %8886 = vst [vmem:[%s13585_s22 + $0xc8] sm:$0xff] %v8830_v19   ;;  %v7704_v59 = vadd.f32 1.0, %v10665_v18  ;;  %10686 = vpow2.f32 %v8603_v26 }
 0xd56   :  { %v10669_v32 = vpop.eup %10668  ;;  %8885 = vst [vmem:[%s13585_s22 + $0xc0] sm:$0xff] %v8825_v29   ;;  %v7702_v44 = vadd.f32 1.0, %v10667_v31 }
 0xd57   :  { %v10671_v52 = vpop.eup %10670  ;;  %10688 = vrcp.f32 %v7704_v59  ;;  %v7705_v55 = vadd.f32 1.0, %v10669_v32 }
 0xd58   :  { %v10673_v2 = vpop.eup %10672  ;;  %10690 = vrcp.f32 %v7702_v44  ;;  %v7703_v0 = vadd.f32 1.0, %v10671_v52 }
 0xd59   :  { %v10675_v47 = vpop.eup %10674  ;;  %10692 = vrcp.f32 %v7705_v55 }
 0xd5a   :  { %v10677_v3 = vpop.eup %10676  ;;  %10694 = vrcp.f32 %v7703_v0 }
 0xd5b   :  { %v10679_v20 = vpop.eup %10678  ;;  %v8840_v58 = vpack.c.bf16 %v10677_v3, %v10673_v2 }
 0xd5c   :  { %v10681_v41 = vpop.eup %10680  ;;  %v8835_v62 = vpack.c.bf16 %v10679_v20, %v10675_v47 }
 0xd5d   :  { %v10683_v54 = vpop.eup %10682  ;;  %8888 = vst [vmem:[%s13585_s22 + $0xd8] sm:$0xff] %v8840_v58   ;;  %v7708_v14 = vadd.f32 1.0, %v10681_v41 }
 0xd5e   :  { %v10685_v28 = vpop.eup %10684  ;;  %8887 = vst [vmem:[%s13585_s22 + $0xd0] sm:$0xff] %v8835_v62   ;;  %v7706_v27 = vadd.f32 1.0, %v10683_v54 }
 0xd5f   :  { %v10687_v4 = vpop.eup %10686  ;;  %10696 = vrcp.f32 %v7708_v14  ;;  %v7709_v22 = vadd.f32 1.0, %v10685_v28 }
 0xd60   :  { %10698 = vrcp.f32 %v7706_v27  ;;  %v7707_v13 = vadd.f32 1.0, %v10687_v4 }
 0xd61   :  { %v10689_v63 = vpop.eup %10688  ;;  %10700 = vrcp.f32 %v7709_v22 }
 0xd62   :  { %v10691_v8 = vpop.eup %10690  ;;  %10702 = vrcp.f32 %v7707_v13 }
 0xd63   :  { %v10693_v11 = vpop.eup %10692 }
 0xd64   :  { %v10695_v6 = vpop.eup %10694  ;;  %v8850_v50 = vpack.c.bf16 %v10693_v11, %v10689_v63 }
 0xd65   :  { %v8845_v16 = vpack.c.bf16 %v10695_v6, %v10691_v8 }
 0xd66   :  { %8890 = vst [vmem:[%s13585_s22 + $0xe8] sm:$0xff] %v8850_v50  }
 0xd67   :  { %8889 = vst [vmem:[%s13585_s22 + $0xe0] sm:$0xff] %v8845_v16  }
 0xd69   :  { %v10697_v61 = vpop.eup %10696 }
 0xd6a   :  { %v10699_v46 = vpop.eup %10698 }
 0xd6b   :  { %v10701_v33 = vpop.eup %10700 }
 0xd6c   :  { %v10703_v51 = vpop.eup %10702  ;;  %v8860_v48 = vpack.c.bf16 %v10701_v33, %v10697_v61 }
 0xd6d   :  { %v8855_v39 = vpack.c.bf16 %v10703_v51, %v10699_v46 }
 0xd6e   :  { %8892 = vst [vmem:[%s13585_s22 + $0xf8] sm:$0xff] %v8860_v48  }
 0xd6f   :  { %8891 = vst [vmem:[%s13585_s22 + $0xf0] sm:$0xff] %v8855_v39  }

</bundles_post_ra>
